<compile_context>
chip_gen: v7x
topology: tpu7x:2x2x1
jax: 0.10.0
libtpu: 0.0.40
codegen_flags: <defaults>
</compile_context>

<pallas_src>
import functools

import jax
import jax.numpy as jnp
import numpy as np
from jax.experimental import pallas as pl
from jax.experimental.pallas import tpu as pltpu


# ---------------------------------------------------------------------------
# Helpers (wrapper side, XLA / numpy — weights and constant matrices only)
# ---------------------------------------------------------------------------
def _upsample_matrix(B, H, W):
    """0/1 matrix U so that U @ x2d is nearest-neighbour 2x upsampling.

    x2d rows are (b, h, w) row-major over (B, H, W); output rows are (b, i, j)
    row-major over (B, 2H, 2W).  Returned in bf16 (0/1 are exact).
    """
    rows, cols = B * 4 * H * W, B * H * W
    r = np.arange(rows)
    b = r // (4 * H * W)
    rem = r % (4 * H * W)
    i = rem // (2 * W)
    j = rem % (2 * W)
    src = b * H * W + (i // 2) * W + (j // 2)
    U = np.zeros((rows, cols), np.float32)
    U[r, src] = 1.0
    return jnp.asarray(U, dtype=jnp.bfloat16)


# ---------------------------------------------------------------------------
# The fused Pallas kernel
# ---------------------------------------------------------------------------
def _generator_kernel(
    z_ref, w1_ref, b1_ref, g1_ref, be1_ref,
    u1_ref, w1c_ref, b1c_ref, g2_ref, be2_ref,
    u2_ref, w2c_ref, b2c_ref, g3_ref, be3_ref,
    w3c_ref, b3c_ref,
    o_ref,
    x0_ref, p1_ref, p2_ref, p3_ref,
    *, B, s):
    f32 = jnp.float32
    bf16 = jnp.bfloat16
    s2 = s * s
    H1 = W1 = 2 * s
    H2 = W2 = 4 * s

    def bn(x2d, g_ref, be_ref, eps, slope=None):
        # Training-mode BatchNorm2d: biased per-channel stats over all rows
        # (rows = B*H*W), optionally fused with LeakyReLU.  All f32.
        n = x2d.shape[0]
        mean = jnp.sum(x2d, axis=0, keepdims=True) * (1.0 / n)
        cen = x2d - mean
        var = jnp.sum(cen * cen, axis=0, keepdims=True) * (1.0 / n)
        y = cen * jax.lax.rsqrt(var + eps) * g_ref[...] + be_ref[...]
        if slope is not None:
            y = jnp.where(y >= 0.0, y, slope * y)
        return y

    def conv3x3(x2d, H, W, Cin, p_ref, w_ref, bias_ref):
        # x2d: (B*H*W, Cin) f32, rows in (b, h, w) order.
        # Build P[b, h', w, dx*Cin + ci] = xpad[b, h', w+dx, ci] (xpad = zero
        # padded by 1) in a VMEM scratch, then the 3x3 conv is 3 matmuls with
        # K = 3*Cin (one per dy), accumulated in f32.
        x4 = x2d.reshape(B, H, W, Cin)
        p_ref[...] = jnp.zeros(p_ref.shape, f32)
        # dx = 0  (source column w-1): valid only for w >= 1
        p_ref[:, 1:H + 1, 1:W, 0:Cin] = x4[:, :, 0:W - 1, :]
        # dx = 1  (source column w): always valid
        p_ref[:, 1:H + 1, :, Cin:2 * Cin] = x4
        # dx = 2  (source column w+1): valid only for w <= W-2
        p_ref[:, 1:H + 1, 0:W - 1, 2 * Cin:3 * Cin] = x4[:, :, 1:W, :]
        pv = p_ref[...]
        Cout = w_ref.shape[-1]
        acc = jnp.zeros((B * H * W, Cout), f32)
        for dy in range(3):           # 3 fat matmuls instead of 9 thin taps
            slab = pv[:, dy:dy + H, :, :].reshape(B * H * W, 3 * Cin)
            acc = acc + jnp.dot(slab.astype(bf16), w_ref[dy],
                                preferred_element_type=f32)
        return acc + bias_ref[...]

    # ---- l1: Linear(latent -> 128*s*s); weights pre-permuted channel-last ----
    h0 = jnp.dot(z_ref[...].astype(bf16), w1_ref[...],
                 preferred_element_type=f32) + b1_ref[...]
    # Un-flatten (B, s*s*128) -> (B, s*s, 128) via 128-lane-aligned copies.
    for pos in range(s2):
        x0_ref[:, pos, :] = h0[:, pos * 128:(pos + 1) * 128]
    x = x0_ref[...].reshape(B * s2, 128)

    # ---- BatchNorm2d(128), eps = 1e-5 ----
    x = bn(x, g1_ref, be1_ref, 1e-5)

    # ---- Upsample(x2) + Conv(128->128) + BN(eps=0.8) + LeakyReLU(0.2) ----
    x = jnp.dot(u1_ref[...], x.astype(bf16), preferred_element_type=f32)
    x = conv3x3(x, H1, W1, 128, p1_ref, w1c_ref, b1c_ref)
    x = bn(x, g2_ref, be2_ref, 0.8, slope=0.2)

    # ---- Upsample(x2) + Conv(128->64) + BN(eps=0.8) + LeakyReLU(0.2) ----
    x = jnp.dot(u2_ref[...], x.astype(bf16), preferred_element_type=f32)
    x = conv3x3(x, H2, W2, 128, p2_ref, w2c_ref, b2c_ref)
    x = bn(x, g3_ref, be3_ref, 0.8, slope=0.2)

    # ---- Conv(64 -> channels, Cout lane-padded to 128) + Tanh ----
    x = conv3x3(x, H2, W2, 64, p3_ref, w3c_ref, b3c_ref)
    x = jnp.tanh(x)

    # Lane-dense (128-wide) store; the wrapper slices the real channels.
    o_ref[...] = x.reshape(B, H2, W2, 128)


# ---------------------------------------------------------------------------
# Generator forward (Pallas path)
# ---------------------------------------------------------------------------
def generator_forward(z, params, *, img_size, channels):
    assert img_size % 4 == 0 and 1 <= channels <= 128
    s = img_size // 4
    B = z.shape[0]
    H1 = W1 = 2 * s
    H2 = W2 = 4 * s
    f32, bf16 = jnp.float32, jnp.bfloat16

    # --- layout plumbing on the (small) weights only, outside the kernel ---
    # Linear weights permuted so the kernel's linear output is channel-last.
    w1p = (params["l1_w"].reshape(-1, 128, s, s).transpose(0, 2, 3, 1)
           .reshape(-1, s * s * 128).astype(bf16))
    b1p = (params["l1_b"].reshape(128, s, s).transpose(1, 2, 0)
           .reshape(1, s * s * 128).astype(f32))
    # Conv weights reshaped for the im2col matmuls: (3, 3*Cin, Cout), HWIO.
    w1c = params["c1_w"].reshape(3, 3 * 128, 128).astype(bf16)
    w2c = params["c2_w"].reshape(3, 3 * 128, 64).astype(bf16)
    # Final conv: zero-pad Cout up to 128 so the output store is lane-dense.
    w3c = (jnp.zeros((3, 3, 64, 128), f32)
           .at[:, :, :, :channels].set(params["c3_w"])
           .reshape(3, 3 * 64, 128).astype(bf16))
    b3p = jnp.zeros((1, 128), f32).at[0, :channels].set(params["c3_b"])
    # Nearest 2x upsampling as 0/1 matmuls (stays in VMEM, uses the idle MXU).
    u1 = _upsample_matrix(B, s, s)
    u2 = _upsample_matrix(B, 2 * s, 2 * s)

    two_d = lambda v: v.reshape(1, -1).astype(f32)

    out = pl.pallas_call(
        functools.partial(_generator_kernel, B=B, s=s),
        out_shape=jax.ShapeDtypeStruct((B, H2, W2, 128), f32),
        scratch_shapes=[
            pltpu.VMEM((B, s * s, 128), f32),            # linear out, channel-last
            pltpu.VMEM((B, H1 + 2, W1, 3 * 128), f32),   # im2col buffer, conv1
            pltpu.VMEM((B, H2 + 2, W2, 3 * 128), f32),   # im2col buffer, conv2
            pltpu.VMEM((B, H2 + 2, W2, 3 * 64), f32),    # im2col buffer, conv3
        ],
    )(z.astype(f32), w1p, b1p,
      two_d(params["bn1_g"]), two_d(params["bn1_b"]),
      u1, w1c, two_d(params["c1_b"]),
      two_d(params["bn2_g"]), two_d(params["bn2_b"]),
      u2, w2c, two_d(params["c2_b"]),
      two_d(params["bn3_g"]), two_d(params["bn3_b"]),
      w3c, b3p)

    # Slice the real channels and go NHWC -> NCHW (tiny tensor; XLA glue).
    return out[..., :channels].transpose(0, 3, 1, 2)


# ---------------------------------------------------------------------------
# Pure-JAX reference (same math & same bf16 weight casts) for validation
# ---------------------------------------------------------------------------
def reference_forward(z, params, *, img_size, channels):
    s = img_size // 4
    B = z.shape[0]
    f32, bf16 = jnp.float32, jnp.bfloat16

    def bn(x, g, b, eps):
        m = jnp.mean(x, axis=(0, 1, 2), keepdims=True)
        v = jnp.mean((x - m) ** 2, axis=(0, 1, 2), keepdims=True)
        return (x - m) * jax.lax.rsqrt(v + eps) * g + b

    def lrelu(x):
        return jnp.where(x >= 0.0, x, 0.2 * x)

    def up(x):
        return jnp.repeat(jnp.repeat(x, 2, axis=1), 2, axis=2)

    def conv(x, w, b):
        y = jax.lax.conv_general_dilated(
            x.astype(bf16), w.astype(bf16), (1, 1), "SAME",
            dimension_numbers=("NHWC", "HWIO", "NHWC"),
            preferred_element_type=f32)
        return y + b

    out = jnp.dot(z.astype(bf16), params["l1_w"].astype(bf16),
                  preferred_element_type=f32) + params["l1_b"]
    x = out.reshape(B, 128, s, s).transpose(0, 2, 3, 1)
    x = bn(x, params["bn1_g"], params["bn1_b"], 1e-5)
    x = up(x)
    x = lrelu(bn(conv(x, params["c1_w"], params["c1_b"]),
                 params["bn2_g"], params["bn2_b"], 0.8))
    x = up(x)
    x = lrelu(bn(conv(x, params["c2_w"], params["c2_b"]),
                 params["bn3_g"], params["bn3_b"], 0.8))
    x = jnp.tanh(conv(x, params["c3_w"], params["c3_b"]))
    return x.transpose(0, 3, 1, 2)


# ---------------------------------------------------------------------------
# Deterministic parameter init (shapes follow the PyTorch module __init__)
# ---------------------------------------------------------------------------
def init_params(key, latent_dim, img_size, channels):
    s = img_size // 4
    ks = jax.random.split(key, 8)

    def w(k, shape, scale=0.05):
        return (scale * jax.random.normal(k, shape)).astype(jnp.float32)

    return {
        "l1_w": w(ks[0], (latent_dim, 128 * s * s)),
        "l1_b": w(ks[1], (128 * s * s,)),
        "bn1_g": jnp.ones((128,), jnp.float32),
        "bn1_b": jnp.zeros((128,), jnp.float32),
        "c1_w": w(ks[2], (3, 3, 128, 128)),      # HWIO
        "c1_b": w(ks[3], (128,)),
        "bn2_g": jnp.ones((128,), jnp.float32),
        "bn2_b": jnp.zeros((128,), jnp.float32),
        "c2_w": w(ks[4], (3, 3, 128, 64)),       # HWIO
        "c2_b": w(ks[5], (64,)),
        "bn3_g": jnp.ones((64,), jnp.float32),
        "bn3_b": jnp.zeros((64,), jnp.float32),
        "c3_w": w(ks[6], (3, 3, 64, channels)),  # HWIO
        "c3_b": w(ks[7], (channels,)),
    }


if __name__ == "__main__":
    LATENT = 32
    IMG = 16      # init_size = 4
    CH = 3
    B = 2

    root = jax.random.PRNGKey(0)
    k_param, k_z = jax.random.split(root)
    params = init_params(k_param, LATENT, IMG, CH)
    z = jax.random.normal(k_z, (B, LATENT), dtype=jnp.float32)

    img = generator_forward(z, params, img_size=IMG, channels=CH)
    img = jax.block_until_ready(img)
    assert img.shape == (B, CH, IMG, IMG), img.shape
    assert bool(jnp.all(jnp.isfinite(img)))

    ref = jax.block_until_ready(
        reference_forward(z, params, img_size=IMG, channels=CH))
    err = float(np.max(np.abs(np.asarray(img) - np.asarray(ref))))
    if not np.allclose(np.asarray(img), np.asarray(ref), atol=5e-3, rtol=0.0):
        raise AssertionError(
            f"Pallas generator mismatch vs reference, max abs err = {err:.3e}")

    print("KERNEL_OK")
</pallas_src>

<mosaic_0001>
module attributes {stable_mosaic.version = 11 : i64} {
  func.func @_generator_kernel(%arg0: memref<2x32xf32, #tpu.memory_space<vmem>>, %arg1: memref<32x2048xbf16, #tpu.memory_space<vmem>>, %arg2: memref<1x2048xf32, #tpu.memory_space<vmem>>, %arg3: memref<1x128xf32, #tpu.memory_space<vmem>>, %arg4: memref<1x128xf32, #tpu.memory_space<vmem>>, %arg5: memref<128x32xbf16, #tpu.memory_space<vmem>>, %arg6: memref<3x384x128xbf16, #tpu.memory_space<vmem>>, %arg7: memref<1x128xf32, #tpu.memory_space<vmem>>, %arg8: memref<1x128xf32, #tpu.memory_space<vmem>>, %arg9: memref<1x128xf32, #tpu.memory_space<vmem>>, %arg10: memref<512x128xbf16, #tpu.memory_space<vmem>>, %arg11: memref<3x384x64xbf16, #tpu.memory_space<vmem>>, %arg12: memref<1x64xf32, #tpu.memory_space<vmem>>, %arg13: memref<1x64xf32, #tpu.memory_space<vmem>>, %arg14: memref<1x64xf32, #tpu.memory_space<vmem>>, %arg15: memref<3x192x128xbf16, #tpu.memory_space<vmem>>, %arg16: memref<1x128xf32, #tpu.memory_space<vmem>>, %arg17: memref<2x16x16x128xf32, #tpu.memory_space<vmem>>, %arg18: memref<2x16x128xf32, #tpu.memory_space<vmem>>, %arg19: memref<2x10x8x384xf32, #tpu.memory_space<vmem>>, %arg20: memref<2x18x16x384xf32, #tpu.memory_space<vmem>>, %arg21: memref<2x18x16x192xf32, #tpu.memory_space<vmem>>) attributes {dimension_semantics = [], scalar_prefetch = 0 : i64, scratch_operands = 4 : i64, tpu.core_type = #tpu.core_type<tc>} {
    %c0 = arith.constant 0 : index
    %c0_0 = arith.constant 0 : index
    %0 = vector.load %arg0[%c0, %c0_0] : memref<2x32xf32, #tpu.memory_space<vmem>>, vector<2x32xf32>
    %1 = arith.truncf %0 : vector<2x32xf32> to vector<2x32xbf16>
    %c0_1 = arith.constant 0 : index
    %c0_2 = arith.constant 0 : index
    %2 = vector.load %arg1[%c0_1, %c0_2] : memref<32x2048xbf16, #tpu.memory_space<vmem>>, vector<32x2048xbf16>
    %cst = arith.constant dense<0.000000e+00> : vector<2x2048xf32>
    %3 = tpu.matmul %1, %2, %cst {dimension_numbers = #tpu.dot_dimension_numbers<[1], [0], [0], [1], [0, 0, 1, 1], [], []>} : vector<2x32xbf16>, vector<32x2048xbf16>, vector<2x2048xf32> -> vector<2x2048xf32>
    %c0_3 = arith.constant 0 : index
    %c0_4 = arith.constant 0 : index
    %4 = vector.load %arg2[%c0_3, %c0_4] : memref<1x2048xf32, #tpu.memory_space<vmem>>, vector<1x2048xf32>
    %5 = vector.broadcast %4 : vector<1x2048xf32> to vector<2x2048xf32>
    %6 = arith.addf %3, %5 : vector<2x2048xf32>
    %7 = vector.extract_strided_slice %6 {offsets = [0, 0], sizes = [2, 128], strides = [1, 1]} : vector<2x2048xf32> to vector<2x128xf32>
    %c0_5 = arith.constant 0 : index
    %c0_6 = arith.constant 0 : index
    %c0_7 = arith.constant 0 : index
    %8 = vector.load %arg18[%c0_5, %c0_6, %c0_7] : memref<2x16x128xf32, #tpu.memory_space<vmem>>, vector<2x1x128xf32>
    %9 = vector.shape_cast %8 : vector<2x1x128xf32> to vector<2x128xf32>
    %10 = vector.shape_cast %7 : vector<2x128xf32> to vector<2x1x128xf32>
    tpu.vector_store %arg18[%c0_5, %c0_6, %c0_7], %10 {strides = array<i32>} : memref<2x16x128xf32, #tpu.memory_space<vmem>>, vector<2x1x128xf32>,
    %11 = vector.extract_strided_slice %6 {offsets = [0, 128], sizes = [2, 128], strides = [1, 1]} : vector<2x2048xf32> to vector<2x128xf32>
    %c0_8 = arith.constant 0 : index
    %c1 = arith.constant 1 : index
    %c0_9 = arith.constant 0 : index
    %12 = vector.load %arg18[%c0_8, %c1, %c0_9] : memref<2x16x128xf32, #tpu.memory_space<vmem>>, vector<2x1x128xf32>
    %13 = vector.shape_cast %12 : vector<2x1x128xf32> to vector<2x128xf32>
    %14 = vector.shape_cast %11 : vector<2x128xf32> to vector<2x1x128xf32>
    tpu.vector_store %arg18[%c0_8, %c1, %c0_9], %14 {strides = array<i32>} : memref<2x16x128xf32, #tpu.memory_space<vmem>>, vector<2x1x128xf32>,
    %15 = vector.extract_strided_slice %6 {offsets = [0, 256], sizes = [2, 128], strides = [1, 1]} : vector<2x2048xf32> to vector<2x128xf32>
    %c0_10 = arith.constant 0 : index
    %c2 = arith.constant 2 : index
    %c0_11 = arith.constant 0 : index
    %16 = vector.load %arg18[%c0_10, %c2, %c0_11] : memref<2x16x128xf32, #tpu.memory_space<vmem>>, vector<2x1x128xf32>
    %17 = vector.shape_cast %16 : vector<2x1x128xf32> to vector<2x128xf32>
    %18 = vector.shape_cast %15 : vector<2x128xf32> to vector<2x1x128xf32>
    tpu.vector_store %arg18[%c0_10, %c2, %c0_11], %18 {strides = array<i32>} : memref<2x16x128xf32, #tpu.memory_space<vmem>>, vector<2x1x128xf32>,
    %19 = vector.extract_strided_slice %6 {offsets = [0, 384], sizes = [2, 128], strides = [1, 1]} : vector<2x2048xf32> to vector<2x128xf32>
    %c0_12 = arith.constant 0 : index
    %c3 = arith.constant 3 : index
    %c0_13 = arith.constant 0 : index
    %20 = vector.load %arg18[%c0_12, %c3, %c0_13] : memref<2x16x128xf32, #tpu.memory_space<vmem>>, vector<2x1x128xf32>
    %21 = vector.shape_cast %20 : vector<2x1x128xf32> to vector<2x128xf32>
    %22 = vector.shape_cast %19 : vector<2x128xf32> to vector<2x1x128xf32>
    tpu.vector_store %arg18[%c0_12, %c3, %c0_13], %22 {strides = array<i32>} : memref<2x16x128xf32, #tpu.memory_space<vmem>>, vector<2x1x128xf32>,
    %23 = vector.extract_strided_slice %6 {offsets = [0, 512], sizes = [2, 128], strides = [1, 1]} : vector<2x2048xf32> to vector<2x128xf32>
    %c0_14 = arith.constant 0 : index
    %c4 = arith.constant 4 : index
    %c0_15 = arith.constant 0 : index
    %24 = vector.load %arg18[%c0_14, %c4, %c0_15] : memref<2x16x128xf32, #tpu.memory_space<vmem>>, vector<2x1x128xf32>
    %25 = vector.shape_cast %24 : vector<2x1x128xf32> to vector<2x128xf32>
    %26 = vector.shape_cast %23 : vector<2x128xf32> to vector<2x1x128xf32>
    tpu.vector_store %arg18[%c0_14, %c4, %c0_15], %26 {strides = array<i32>} : memref<2x16x128xf32, #tpu.memory_space<vmem>>, vector<2x1x128xf32>,
    %27 = vector.extract_strided_slice %6 {offsets = [0, 640], sizes = [2, 128], strides = [1, 1]} : vector<2x2048xf32> to vector<2x128xf32>
    %c0_16 = arith.constant 0 : index
    %c5 = arith.constant 5 : index
    %c0_17 = arith.constant 0 : index
    %28 = vector.load %arg18[%c0_16, %c5, %c0_17] : memref<2x16x128xf32, #tpu.memory_space<vmem>>, vector<2x1x128xf32>
    %29 = vector.shape_cast %28 : vector<2x1x128xf32> to vector<2x128xf32>
    %30 = vector.shape_cast %27 : vector<2x128xf32> to vector<2x1x128xf32>
    tpu.vector_store %arg18[%c0_16, %c5, %c0_17], %30 {strides = array<i32>} : memref<2x16x128xf32, #tpu.memory_space<vmem>>, vector<2x1x128xf32>,
    %31 = vector.extract_strided_slice %6 {offsets = [0, 768], sizes = [2, 128], strides = [1, 1]} : vector<2x2048xf32> to vector<2x128xf32>
    %c0_18 = arith.constant 0 : index
    %c6 = arith.constant 6 : index
    %c0_19 = arith.constant 0 : index
    %32 = vector.load %arg18[%c0_18, %c6, %c0_19] : memref<2x16x128xf32, #tpu.memory_space<vmem>>, vector<2x1x128xf32>
    %33 = vector.shape_cast %32 : vector<2x1x128xf32> to vector<2x128xf32>
    %34 = vector.shape_cast %31 : vector<2x128xf32> to vector<2x1x128xf32>
    tpu.vector_store %arg18[%c0_18, %c6, %c0_19], %34 {strides = array<i32>} : memref<2x16x128xf32, #tpu.memory_space<vmem>>, vector<2x1x128xf32>,
    %35 = vector.extract_strided_slice %6 {offsets = [0, 896], sizes = [2, 128], strides = [1, 1]} : vector<2x2048xf32> to vector<2x128xf32>
    %c0_20 = arith.constant 0 : index
    %c7 = arith.constant 7 : index
    %c0_21 = arith.constant 0 : index
    %36 = vector.load %arg18[%c0_20, %c7, %c0_21] : memref<2x16x128xf32, #tpu.memory_space<vmem>>, vector<2x1x128xf32>
    %37 = vector.shape_cast %36 : vector<2x1x128xf32> to vector<2x128xf32>
    %38 = vector.shape_cast %35 : vector<2x128xf32> to vector<2x1x128xf32>
    tpu.vector_store %arg18[%c0_20, %c7, %c0_21], %38 {strides = array<i32>} : memref<2x16x128xf32, #tpu.memory_space<vmem>>, vector<2x1x128xf32>,
    %39 = vector.extract_strided_slice %6 {offsets = [0, 1024], sizes = [2, 128], strides = [1, 1]} : vector<2x2048xf32> to vector<2x128xf32>
    %c0_22 = arith.constant 0 : index
    %c8 = arith.constant 8 : index
    %c0_23 = arith.constant 0 : index
    %40 = vector.load %arg18[%c0_22, %c8, %c0_23] : memref<2x16x128xf32, #tpu.memory_space<vmem>>, vector<2x1x128xf32>
    %41 = vector.shape_cast %40 : vector<2x1x128xf32> to vector<2x128xf32>
    %42 = vector.shape_cast %39 : vector<2x128xf32> to vector<2x1x128xf32>
    tpu.vector_store %arg18[%c0_22, %c8, %c0_23], %42 {strides = array<i32>} : memref<2x16x128xf32, #tpu.memory_space<vmem>>, vector<2x1x128xf32>,
    %43 = vector.extract_strided_slice %6 {offsets = [0, 1152], sizes = [2, 128], strides = [1, 1]} : vector<2x2048xf32> to vector<2x128xf32>
    %c0_24 = arith.constant 0 : index
    %c9 = arith.constant 9 : index
    %c0_25 = arith.constant 0 : index
    %44 = vector.load %arg18[%c0_24, %c9, %c0_25] : memref<2x16x128xf32, #tpu.memory_space<vmem>>, vector<2x1x128xf32>
    %45 = vector.shape_cast %44 : vector<2x1x128xf32> to vector<2x128xf32>
    %46 = vector.shape_cast %43 : vector<2x128xf32> to vector<2x1x128xf32>
    tpu.vector_store %arg18[%c0_24, %c9, %c0_25], %46 {strides = array<i32>} : memref<2x16x128xf32, #tpu.memory_space<vmem>>, vector<2x1x128xf32>,
    %47 = vector.extract_strided_slice %6 {offsets = [0, 1280], sizes = [2, 128], strides = [1, 1]} : vector<2x2048xf32> to vector<2x128xf32>
    %c0_26 = arith.constant 0 : index
    %c10 = arith.constant 10 : index
    %c0_27 = arith.constant 0 : index
    %48 = vector.load %arg18[%c0_26, %c10, %c0_27] : memref<2x16x128xf32, #tpu.memory_space<vmem>>, vector<2x1x128xf32>
    %49 = vector.shape_cast %48 : vector<2x1x128xf32> to vector<2x128xf32>
    %50 = vector.shape_cast %47 : vector<2x128xf32> to vector<2x1x128xf32>
    tpu.vector_store %arg18[%c0_26, %c10, %c0_27], %50 {strides = array<i32>} : memref<2x16x128xf32, #tpu.memory_space<vmem>>, vector<2x1x128xf32>,
    %51 = vector.extract_strided_slice %6 {offsets = [0, 1408], sizes = [2, 128], strides = [1, 1]} : vector<2x2048xf32> to vector<2x128xf32>
    %c0_28 = arith.constant 0 : index
    %c11 = arith.constant 11 : index
    %c0_29 = arith.constant 0 : index
    %52 = vector.load %arg18[%c0_28, %c11, %c0_29] : memref<2x16x128xf32, #tpu.memory_space<vmem>>, vector<2x1x128xf32>
    %53 = vector.shape_cast %52 : vector<2x1x128xf32> to vector<2x128xf32>
    %54 = vector.shape_cast %51 : vector<2x128xf32> to vector<2x1x128xf32>
    tpu.vector_store %arg18[%c0_28, %c11, %c0_29], %54 {strides = array<i32>} : memref<2x16x128xf32, #tpu.memory_space<vmem>>, vector<2x1x128xf32>,
    %55 = vector.extract_strided_slice %6 {offsets = [0, 1536], sizes = [2, 128], strides = [1, 1]} : vector<2x2048xf32> to vector<2x128xf32>
    %c0_30 = arith.constant 0 : index
    %c12 = arith.constant 12 : index
    %c0_31 = arith.constant 0 : index
    %56 = vector.load %arg18[%c0_30, %c12, %c0_31] : memref<2x16x128xf32, #tpu.memory_space<vmem>>, vector<2x1x128xf32>
    %57 = vector.shape_cast %56 : vector<2x1x128xf32> to vector<2x128xf32>
    %58 = vector.shape_cast %55 : vector<2x128xf32> to vector<2x1x128xf32>
    tpu.vector_store %arg18[%c0_30, %c12, %c0_31], %58 {strides = array<i32>} : memref<2x16x128xf32, #tpu.memory_space<vmem>>, vector<2x1x128xf32>,
    %59 = vector.extract_strided_slice %6 {offsets = [0, 1664], sizes = [2, 128], strides = [1, 1]} : vector<2x2048xf32> to vector<2x128xf32>
    %c0_32 = arith.constant 0 : index
    %c13 = arith.constant 13 : index
    %c0_33 = arith.constant 0 : index
    %60 = vector.load %arg18[%c0_32, %c13, %c0_33] : memref<2x16x128xf32, #tpu.memory_space<vmem>>, vector<2x1x128xf32>
    %61 = vector.shape_cast %60 : vector<2x1x128xf32> to vector<2x128xf32>
    %62 = vector.shape_cast %59 : vector<2x128xf32> to vector<2x1x128xf32>
    tpu.vector_store %arg18[%c0_32, %c13, %c0_33], %62 {strides = array<i32>} : memref<2x16x128xf32, #tpu.memory_space<vmem>>, vector<2x1x128xf32>,
    %63 = vector.extract_strided_slice %6 {offsets = [0, 1792], sizes = [2, 128], strides = [1, 1]} : vector<2x2048xf32> to vector<2x128xf32>
    %c0_34 = arith.constant 0 : index
    %c14 = arith.constant 14 : index
    %c0_35 = arith.constant 0 : index
    %64 = vector.load %arg18[%c0_34, %c14, %c0_35] : memref<2x16x128xf32, #tpu.memory_space<vmem>>, vector<2x1x128xf32>
    %65 = vector.shape_cast %64 : vector<2x1x128xf32> to vector<2x128xf32>
    %66 = vector.shape_cast %63 : vector<2x128xf32> to vector<2x1x128xf32>
    tpu.vector_store %arg18[%c0_34, %c14, %c0_35], %66 {strides = array<i32>} : memref<2x16x128xf32, #tpu.memory_space<vmem>>, vector<2x1x128xf32>,
    %67 = vector.extract_strided_slice %6 {offsets = [0, 1920], sizes = [2, 128], strides = [1, 1]} : vector<2x2048xf32> to vector<2x128xf32>
    %c0_36 = arith.constant 0 : index
    %c15 = arith.constant 15 : index
    %c0_37 = arith.constant 0 : index
    %68 = vector.load %arg18[%c0_36, %c15, %c0_37] : memref<2x16x128xf32, #tpu.memory_space<vmem>>, vector<2x1x128xf32>
    %69 = vector.shape_cast %68 : vector<2x1x128xf32> to vector<2x128xf32>
    %70 = vector.shape_cast %67 : vector<2x128xf32> to vector<2x1x128xf32>
    tpu.vector_store %arg18[%c0_36, %c15, %c0_37], %70 {strides = array<i32>} : memref<2x16x128xf32, #tpu.memory_space<vmem>>, vector<2x1x128xf32>,
    %c0_38 = arith.constant 0 : index
    %c0_39 = arith.constant 0 : index
    %c0_40 = arith.constant 0 : index
    %71 = vector.load %arg18[%c0_38, %c0_39, %c0_40] : memref<2x16x128xf32, #tpu.memory_space<vmem>>, vector<2x16x128xf32>
    %72 = vector.shape_cast %71 : vector<2x16x128xf32> to vector<32x128xf32>
    %cst_41 = arith.constant dense<0.000000e+00> : vector<128xf32>
    %73 = vector.multi_reduction <add>, %72, %cst_41 [0] : vector<32x128xf32> to vector<128xf32>
    %74 = vector.shape_cast %73 : vector<128xf32> to vector<1x128xf32>
    %cst_42 = arith.constant 3.125000e-02 : f32
    %75 = vector.broadcast %cst_42 : f32 to vector<1x128xf32>
    %76 = arith.mulf %74, %75 : vector<1x128xf32>
    %77 = vector.broadcast %76 : vector<1x128xf32> to vector<32x128xf32>
    %78 = arith.subf %72, %77 : vector<32x128xf32>
    %79 = arith.mulf %78, %78 : vector<32x128xf32>
    %cst_43 = arith.constant dense<0.000000e+00> : vector<128xf32>
    %80 = vector.multi_reduction <add>, %79, %cst_43 [0] : vector<32x128xf32> to vector<128xf32>
    %81 = vector.shape_cast %80 : vector<128xf32> to vector<1x128xf32>
    %cst_44 = arith.constant 3.125000e-02 : f32
    %82 = vector.broadcast %cst_44 : f32 to vector<1x128xf32>
    %83 = arith.mulf %81, %82 : vector<1x128xf32>
    %cst_45 = arith.constant 9.99999974E-6 : f32
    %84 = vector.broadcast %cst_45 : f32 to vector<1x128xf32>
    %85 = arith.addf %83, %84 : vector<1x128xf32>
    %86 = math.rsqrt %85 : vector<1x128xf32>
    %87 = vector.broadcast %86 : vector<1x128xf32> to vector<32x128xf32>
    %88 = arith.mulf %78, %87 : vector<32x128xf32>
    %c0_46 = arith.constant 0 : index
    %c0_47 = arith.constant 0 : index
    %89 = vector.load %arg3[%c0_46, %c0_47] : memref<1x128xf32, #tpu.memory_space<vmem>>, vector<1x128xf32>
    %90 = vector.broadcast %89 : vector<1x128xf32> to vector<32x128xf32>
    %91 = arith.mulf %88, %90 : vector<32x128xf32>
    %c0_48 = arith.constant 0 : index
    %c0_49 = arith.constant 0 : index
    %92 = vector.load %arg4[%c0_48, %c0_49] : memref<1x128xf32, #tpu.memory_space<vmem>>, vector<1x128xf32>
    %93 = vector.broadcast %92 : vector<1x128xf32> to vector<32x128xf32>
    %94 = arith.addf %91, %93 : vector<32x128xf32>
    %c0_50 = arith.constant 0 : index
    %c0_51 = arith.constant 0 : index
    %95 = vector.load %arg5[%c0_50, %c0_51] : memref<128x32xbf16, #tpu.memory_space<vmem>>, vector<128x32xbf16>
    %96 = arith.truncf %94 : vector<32x128xf32> to vector<32x128xbf16>
    %cst_52 = arith.constant dense<0.000000e+00> : vector<128x128xf32>
    %97 = tpu.matmul %95, %96, %cst_52 {dimension_numbers = #tpu.dot_dimension_numbers<[1], [0], [0], [1], [0, 0, 1, 1], [], []>} : vector<128x32xbf16>, vector<32x128xbf16>, vector<128x128xf32> -> vector<128x128xf32>
    %98 = vector.shape_cast %97 : vector<128x128xf32> to vector<2x8x8x128xf32>
    %cst_53 = arith.constant 0.000000e+00 : f32
    %99 = vector.broadcast %cst_53 : f32 to vector<2x10x8x384xf32>
    %c0_54 = arith.constant 0 : index
    %c0_55 = arith.constant 0 : index
    %c0_56 = arith.constant 0 : index
    %c0_57 = arith.constant 0 : index
    %100 = vector.load %arg19[%c0_54, %c0_55, %c0_56, %c0_57] : memref<2x10x8x384xf32, #tpu.memory_space<vmem>>, vector<2x10x8x384xf32>
    tpu.vector_store %arg19[%c0_54, %c0_55, %c0_56, %c0_57], %99 {strides = array<i32>} : memref<2x10x8x384xf32, #tpu.memory_space<vmem>>, vector<2x10x8x384xf32>,
    %101 = vector.extract_strided_slice %98 {offsets = [0, 0, 0, 0], sizes = [2, 8, 7, 128], strides = [1, 1, 1, 1]} : vector<2x8x8x128xf32> to vector<2x8x7x128xf32>
    %c0_58 = arith.constant 0 : index
    %c1_59 = arith.constant 1 : index
    %c1_60 = arith.constant 1 : index
    %c0_61 = arith.constant 0 : index
    %102 = vector.load %arg19[%c0_58, %c1_59, %c1_60, %c0_61] : memref<2x10x8x384xf32, #tpu.memory_space<vmem>>, vector<2x8x7x128xf32>
    tpu.vector_store %arg19[%c0_58, %c1_59, %c1_60, %c0_61], %101 {strides = array<i32>} : memref<2x10x8x384xf32, #tpu.memory_space<vmem>>, vector<2x8x7x128xf32>,
    %c0_62 = arith.constant 0 : index
    %c1_63 = arith.constant 1 : index
    %c0_64 = arith.constant 0 : index
    %c128 = arith.constant 128 : index
    %103 = vector.load %arg19[%c0_62, %c1_63, %c0_64, %c128] : memref<2x10x8x384xf32, #tpu.memory_space<vmem>>, vector<2x8x8x128xf32>
    tpu.vector_store %arg19[%c0_62, %c1_63, %c0_64, %c128], %98 {strides = array<i32>} : memref<2x10x8x384xf32, #tpu.memory_space<vmem>>, vector<2x8x8x128xf32>,
    %104 = vector.extract_strided_slice %98 {offsets = [0, 0, 1, 0], sizes = [2, 8, 7, 128], strides = [1, 1, 1, 1]} : vector<2x8x8x128xf32> to vector<2x8x7x128xf32>
    %c0_65 = arith.constant 0 : index
    %c1_66 = arith.constant 1 : index
    %c0_67 = arith.constant 0 : index
    %c256 = arith.constant 256 : index
    %105 = vector.load %arg19[%c0_65, %c1_66, %c0_67, %c256] : memref<2x10x8x384xf32, #tpu.memory_space<vmem>>, vector<2x8x7x128xf32>
    tpu.vector_store %arg19[%c0_65, %c1_66, %c0_67, %c256], %104 {strides = array<i32>} : memref<2x10x8x384xf32, #tpu.memory_space<vmem>>, vector<2x8x7x128xf32>,
    %c0_68 = arith.constant 0 : index
    %c0_69 = arith.constant 0 : index
    %c0_70 = arith.constant 0 : index
    %c0_71 = arith.constant 0 : index
    %106 = vector.load %arg19[%c0_68, %c0_69, %c0_70, %c0_71] : memref<2x10x8x384xf32, #tpu.memory_space<vmem>>, vector<2x10x8x384xf32>
    %cst_72 = arith.constant 0.000000e+00 : f32
    %107 = vector.broadcast %cst_72 : f32 to vector<128x128xf32>
    %108 = vector.extract_strided_slice %106 {offsets = [0, 0, 0, 0], sizes = [2, 8, 8, 384], strides = [1, 1, 1, 1]} : vector<2x10x8x384xf32> to vector<2x8x8x384xf32>
    %109 = vector.shape_cast %108 : vector<2x8x8x384xf32> to vector<128x384xf32>
    %110 = arith.truncf %109 : vector<128x384xf32> to vector<128x384xbf16>
    %c0_73 = arith.constant 0 : index
    %c0_74 = arith.constant 0 : index
    %c0_75 = arith.constant 0 : index
    %111 = vector.load %arg6[%c0_73, %c0_74, %c0_75] : memref<3x384x128xbf16, #tpu.memory_space<vmem>>, vector<1x384x128xbf16>
    %112 = vector.shape_cast %111 : vector<1x384x128xbf16> to vector<384x128xbf16>
    %cst_76 = arith.constant dense<0.000000e+00> : vector<128x128xf32>
    %113 = tpu.matmul %110, %112, %cst_76 {dimension_numbers = #tpu.dot_dimension_numbers<[1], [0], [0], [1], [0, 0, 1, 1], [], []>} : vector<128x384xbf16>, vector<384x128xbf16>, vector<128x128xf32> -> vector<128x128xf32>
    %114 = arith.addf %107, %113 : vector<128x128xf32>
    %115 = vector.extract_strided_slice %106 {offsets = [0, 1, 0, 0], sizes = [2, 8, 8, 384], strides = [1, 1, 1, 1]} : vector<2x10x8x384xf32> to vector<2x8x8x384xf32>
    %116 = vector.shape_cast %115 : vector<2x8x8x384xf32> to vector<128x384xf32>
    %117 = arith.truncf %116 : vector<128x384xf32> to vector<128x384xbf16>
    %c1_77 = arith.constant 1 : index
    %c0_78 = arith.constant 0 : index
    %c0_79 = arith.constant 0 : index
    %118 = vector.load %arg6[%c1_77, %c0_78, %c0_79] : memref<3x384x128xbf16, #tpu.memory_space<vmem>>, vector<1x384x128xbf16>
    %119 = vector.shape_cast %118 : vector<1x384x128xbf16> to vector<384x128xbf16>
    %cst_80 = arith.constant dense<0.000000e+00> : vector<128x128xf32>
    %120 = tpu.matmul %117, %119, %cst_80 {dimension_numbers = #tpu.dot_dimension_numbers<[1], [0], [0], [1], [0, 0, 1, 1], [], []>} : vector<128x384xbf16>, vector<384x128xbf16>, vector<128x128xf32> -> vector<128x128xf32>
    %121 = arith.addf %114, %120 : vector<128x128xf32>
    %122 = vector.extract_strided_slice %106 {offsets = [0, 2, 0, 0], sizes = [2, 8, 8, 384], strides = [1, 1, 1, 1]} : vector<2x10x8x384xf32> to vector<2x8x8x384xf32>
    %123 = vector.shape_cast %122 : vector<2x8x8x384xf32> to vector<128x384xf32>
    %124 = arith.truncf %123 : vector<128x384xf32> to vector<128x384xbf16>
    %c2_81 = arith.constant 2 : index
    %c0_82 = arith.constant 0 : index
    %c0_83 = arith.constant 0 : index
    %125 = vector.load %arg6[%c2_81, %c0_82, %c0_83] : memref<3x384x128xbf16, #tpu.memory_space<vmem>>, vector<1x384x128xbf16>
    %126 = vector.shape_cast %125 : vector<1x384x128xbf16> to vector<384x128xbf16>
    %cst_84 = arith.constant dense<0.000000e+00> : vector<128x128xf32>
    %127 = tpu.matmul %124, %126, %cst_84 {dimension_numbers = #tpu.dot_dimension_numbers<[1], [0], [0], [1], [0, 0, 1, 1], [], []>} : vector<128x384xbf16>, vector<384x128xbf16>, vector<128x128xf32> -> vector<128x128xf32>
    %128 = arith.addf %121, %127 : vector<128x128xf32>
    %c0_85 = arith.constant 0 : index
    %c0_86 = arith.constant 0 : index
    %129 = vector.load %arg7[%c0_85, %c0_86] : memref<1x128xf32, #tpu.memory_space<vmem>>, vector<1x128xf32>
    %130 = vector.broadcast %129 : vector<1x128xf32> to vector<128x128xf32>
    %131 = arith.addf %128, %130 : vector<128x128xf32>
    %cst_87 = arith.constant dense<0.000000e+00> : vector<128xf32>
    %132 = vector.multi_reduction <add>, %131, %cst_87 [0] : vector<128x128xf32> to vector<128xf32>
    %133 = vector.shape_cast %132 : vector<128xf32> to vector<1x128xf32>
    %cst_88 = arith.constant 7.812500e-03 : f32
    %134 = vector.broadcast %cst_88 : f32 to vector<1x128xf32>
    %135 = arith.mulf %133, %134 : vector<1x128xf32>
    %136 = vector.broadcast %135 : vector<1x128xf32> to vector<128x128xf32>
    %137 = arith.subf %131, %136 : vector<128x128xf32>
    %138 = arith.mulf %137, %137 : vector<128x128xf32>
    %cst_89 = arith.constant dense<0.000000e+00> : vector<128xf32>
    %139 = vector.multi_reduction <add>, %138, %cst_89 [0] : vector<128x128xf32> to vector<128xf32>
    %140 = vector.shape_cast %139 : vector<128xf32> to vector<1x128xf32>
    %cst_90 = arith.constant 7.812500e-03 : f32
    %141 = vector.broadcast %cst_90 : f32 to vector<1x128xf32>
    %142 = arith.mulf %140, %141 : vector<1x128xf32>
    %cst_91 = arith.constant 8.000000e-01 : f32
    %143 = vector.broadcast %cst_91 : f32 to vector<1x128xf32>
    %144 = arith.addf %142, %143 : vector<1x128xf32>
    %145 = math.rsqrt %144 : vector<1x128xf32>
    %146 = vector.broadcast %145 : vector<1x128xf32> to vector<128x128xf32>
    %147 = arith.mulf %137, %146 : vector<128x128xf32>
    %c0_92 = arith.constant 0 : index
    %c0_93 = arith.constant 0 : index
    %148 = vector.load %arg8[%c0_92, %c0_93] : memref<1x128xf32, #tpu.memory_space<vmem>>, vector<1x128xf32>
    %149 = vector.broadcast %148 : vector<1x128xf32> to vector<128x128xf32>
    %150 = arith.mulf %147, %149 : vector<128x128xf32>
    %c0_94 = arith.constant 0 : index
    %c0_95 = arith.constant 0 : index
    %151 = vector.load %arg9[%c0_94, %c0_95] : memref<1x128xf32, #tpu.memory_space<vmem>>, vector<1x128xf32>
    %152 = vector.broadcast %151 : vector<1x128xf32> to vector<128x128xf32>
    %153 = arith.addf %150, %152 : vector<128x128xf32>
    %cst_96 = arith.constant 0.000000e+00 : f32
    %154 = vector.broadcast %cst_96 : f32 to vector<128x128xf32>
    %155 = arith.cmpf oge, %153, %154 : vector<128x128xf32>
    %cst_97 = arith.constant 2.000000e-01 : f32
    %156 = vector.broadcast %cst_97 : f32 to vector<128x128xf32>
    %157 = arith.mulf %156, %153 : vector<128x128xf32>
    %158 = arith.select %155, %153, %157 : vector<128x128xi1>, vector<128x128xf32>
    %c0_98 = arith.constant 0 : index
    %c0_99 = arith.constant 0 : index
    %159 = vector.load %arg10[%c0_98, %c0_99] : memref<512x128xbf16, #tpu.memory_space<vmem>>, vector<512x128xbf16>
    %160 = arith.truncf %158 : vector<128x128xf32> to vector<128x128xbf16>
    %cst_100 = arith.constant dense<0.000000e+00> : vector<512x128xf32>
    %161 = tpu.matmul %159, %160, %cst_100 {dimension_numbers = #tpu.dot_dimension_numbers<[1], [0], [0], [1], [0, 0, 1, 1], [], []>} : vector<512x128xbf16>, vector<128x128xbf16>, vector<512x128xf32> -> vector<512x128xf32>
    %162 = vector.shape_cast %161 : vector<512x128xf32> to vector<2x16x16x128xf32>
    %cst_101 = arith.constant 0.000000e+00 : f32
    %163 = vector.broadcast %cst_101 : f32 to vector<2x18x16x384xf32>
    %c0_102 = arith.constant 0 : index
    %c0_103 = arith.constant 0 : index
    %c0_104 = arith.constant 0 : index
    %c0_105 = arith.constant 0 : index
    %164 = vector.load %arg20[%c0_102, %c0_103, %c0_104, %c0_105] : memref<2x18x16x384xf32, #tpu.memory_space<vmem>>, vector<2x18x16x384xf32>
    tpu.vector_store %arg20[%c0_102, %c0_103, %c0_104, %c0_105], %163 {strides = array<i32>} : memref<2x18x16x384xf32, #tpu.memory_space<vmem>>, vector<2x18x16x384xf32>,
    %165 = vector.extract_strided_slice %162 {offsets = [0, 0, 0, 0], sizes = [2, 16, 15, 128], strides = [1, 1, 1, 1]} : vector<2x16x16x128xf32> to vector<2x16x15x128xf32>
    %c0_106 = arith.constant 0 : index
    %c1_107 = arith.constant 1 : index
    %c1_108 = arith.constant 1 : index
    %c0_109 = arith.constant 0 : index
    %166 = vector.load %arg20[%c0_106, %c1_107, %c1_108, %c0_109] : memref<2x18x16x384xf32, #tpu.memory_space<vmem>>, vector<2x16x15x128xf32>
    tpu.vector_store %arg20[%c0_106, %c1_107, %c1_108, %c0_109], %165 {strides = array<i32>} : memref<2x18x16x384xf32, #tpu.memory_space<vmem>>, vector<2x16x15x128xf32>,
    %c0_110 = arith.constant 0 : index
    %c1_111 = arith.constant 1 : index
    %c0_112 = arith.constant 0 : index
    %c128_113 = arith.constant 128 : index
    %167 = vector.load %arg20[%c0_110, %c1_111, %c0_112, %c128_113] : memref<2x18x16x384xf32, #tpu.memory_space<vmem>>, vector<2x16x16x128xf32>
    tpu.vector_store %arg20[%c0_110, %c1_111, %c0_112, %c128_113], %162 {strides = array<i32>} : memref<2x18x16x384xf32, #tpu.memory_space<vmem>>, vector<2x16x16x128xf32>,
    %168 = vector.extract_strided_slice %162 {offsets = [0, 0, 1, 0], sizes = [2, 16, 15, 128], strides = [1, 1, 1, 1]} : vector<2x16x16x128xf32> to vector<2x16x15x128xf32>
    %c0_114 = arith.constant 0 : index
    %c1_115 = arith.constant 1 : index
    %c0_116 = arith.constant 0 : index
    %c256_117 = arith.constant 256 : index
    %169 = vector.load %arg20[%c0_114, %c1_115, %c0_116, %c256_117] : memref<2x18x16x384xf32, #tpu.memory_space<vmem>>, vector<2x16x15x128xf32>
    tpu.vector_store %arg20[%c0_114, %c1_115, %c0_116, %c256_117], %168 {strides = array<i32>} : memref<2x18x16x384xf32, #tpu.memory_space<vmem>>, vector<2x16x15x128xf32>,
    %c0_118 = arith.constant 0 : index
    %c0_119 = arith.constant 0 : index
    %c0_120 = arith.constant 0 : index
    %c0_121 = arith.constant 0 : index
    %170 = vector.load %arg20[%c0_118, %c0_119, %c0_120, %c0_121] : memref<2x18x16x384xf32, #tpu.memory_space<vmem>>, vector<2x18x16x384xf32>
    %cst_122 = arith.constant 0.000000e+00 : f32
    %171 = vector.broadcast %cst_122 : f32 to vector<512x64xf32>
    %172 = vector.extract_strided_slice %170 {offsets = [0, 0, 0, 0], sizes = [2, 16, 16, 384], strides = [1, 1, 1, 1]} : vector<2x18x16x384xf32> to vector<2x16x16x384xf32>
    %173 = vector.shape_cast %172 : vector<2x16x16x384xf32> to vector<512x384xf32>
    %174 = arith.truncf %173 : vector<512x384xf32> to vector<512x384xbf16>
    %c0_123 = arith.constant 0 : index
    %c0_124 = arith.constant 0 : index
    %c0_125 = arith.constant 0 : index
    %175 = vector.load %arg11[%c0_123, %c0_124, %c0_125] : memref<3x384x64xbf16, #tpu.memory_space<vmem>>, vector<1x384x64xbf16>
    %176 = vector.shape_cast %175 : vector<1x384x64xbf16> to vector<384x64xbf16>
    %cst_126 = arith.constant dense<0.000000e+00> : vector<512x64xf32>
    %177 = tpu.matmul %174, %176, %cst_126 {dimension_numbers = #tpu.dot_dimension_numbers<[1], [0], [0], [1], [0, 0, 1, 1], [], []>} : vector<512x384xbf16>, vector<384x64xbf16>, vector<512x64xf32> -> vector<512x64xf32>
    %178 = arith.addf %171, %177 : vector<512x64xf32>
    %179 = vector.extract_strided_slice %170 {offsets = [0, 1, 0, 0], sizes = [2, 16, 16, 384], strides = [1, 1, 1, 1]} : vector<2x18x16x384xf32> to vector<2x16x16x384xf32>
    %180 = vector.shape_cast %179 : vector<2x16x16x384xf32> to vector<512x384xf32>
    %181 = arith.truncf %180 : vector<512x384xf32> to vector<512x384xbf16>
    %c1_127 = arith.constant 1 : index
    %c0_128 = arith.constant 0 : index
    %c0_129 = arith.constant 0 : index
    %182 = vector.load %arg11[%c1_127, %c0_128, %c0_129] : memref<3x384x64xbf16, #tpu.memory_space<vmem>>, vector<1x384x64xbf16>
    %183 = vector.shape_cast %182 : vector<1x384x64xbf16> to vector<384x64xbf16>
    %cst_130 = arith.constant dense<0.000000e+00> : vector<512x64xf32>
    %184 = tpu.matmul %181, %183, %cst_130 {dimension_numbers = #tpu.dot_dimension_numbers<[1], [0], [0], [1], [0, 0, 1, 1], [], []>} : vector<512x384xbf16>, vector<384x64xbf16>, vector<512x64xf32> -> vector<512x64xf32>
    %185 = arith.addf %178, %184 : vector<512x64xf32>
    %186 = vector.extract_strided_slice %170 {offsets = [0, 2, 0, 0], sizes = [2, 16, 16, 384], strides = [1, 1, 1, 1]} : vector<2x18x16x384xf32> to vector<2x16x16x384xf32>
    %187 = vector.shape_cast %186 : vector<2x16x16x384xf32> to vector<512x384xf32>
    %188 = arith.truncf %187 : vector<512x384xf32> to vector<512x384xbf16>
    %c2_131 = arith.constant 2 : index
    %c0_132 = arith.constant 0 : index
    %c0_133 = arith.constant 0 : index
    %189 = vector.load %arg11[%c2_131, %c0_132, %c0_133] : memref<3x384x64xbf16, #tpu.memory_space<vmem>>, vector<1x384x64xbf16>
    %190 = vector.shape_cast %189 : vector<1x384x64xbf16> to vector<384x64xbf16>
    %cst_134 = arith.constant dense<0.000000e+00> : vector<512x64xf32>
    %191 = tpu.matmul %188, %190, %cst_134 {dimension_numbers = #tpu.dot_dimension_numbers<[1], [0], [0], [1], [0, 0, 1, 1], [], []>} : vector<512x384xbf16>, vector<384x64xbf16>, vector<512x64xf32> -> vector<512x64xf32>
    %192 = arith.addf %185, %191 : vector<512x64xf32>
    %c0_135 = arith.constant 0 : index
    %c0_136 = arith.constant 0 : index
    %193 = vector.load %arg12[%c0_135, %c0_136] : memref<1x64xf32, #tpu.memory_space<vmem>>, vector<1x64xf32>
    %194 = vector.broadcast %193 : vector<1x64xf32> to vector<512x64xf32>
    %195 = arith.addf %192, %194 : vector<512x64xf32>
    %cst_137 = arith.constant dense<0.000000e+00> : vector<64xf32>
    %196 = vector.multi_reduction <add>, %195, %cst_137 [0] : vector<512x64xf32> to vector<64xf32>
    %197 = vector.shape_cast %196 : vector<64xf32> to vector<1x64xf32>
    %cst_138 = arith.constant 0.001953125 : f32
    %198 = vector.broadcast %cst_138 : f32 to vector<1x64xf32>
    %199 = arith.mulf %197, %198 : vector<1x64xf32>
    %200 = vector.broadcast %199 : vector<1x64xf32> to vector<512x64xf32>
    %201 = arith.subf %195, %200 : vector<512x64xf32>
    %202 = arith.mulf %201, %201 : vector<512x64xf32>
    %cst_139 = arith.constant dense<0.000000e+00> : vector<64xf32>
    %203 = vector.multi_reduction <add>, %202, %cst_139 [0] : vector<512x64xf32> to vector<64xf32>
    %204 = vector.shape_cast %203 : vector<64xf32> to vector<1x64xf32>
    %cst_140 = arith.constant 0.001953125 : f32
    %205 = vector.broadcast %cst_140 : f32 to vector<1x64xf32>
    %206 = arith.mulf %204, %205 : vector<1x64xf32>
    %cst_141 = arith.constant 8.000000e-01 : f32
    %207 = vector.broadcast %cst_141 : f32 to vector<1x64xf32>
    %208 = arith.addf %206, %207 : vector<1x64xf32>
    %209 = math.rsqrt %208 : vector<1x64xf32>
    %210 = vector.broadcast %209 : vector<1x64xf32> to vector<512x64xf32>
    %211 = arith.mulf %201, %210 : vector<512x64xf32>
    %c0_142 = arith.constant 0 : index
    %c0_143 = arith.constant 0 : index
    %212 = vector.load %arg13[%c0_142, %c0_143] : memref<1x64xf32, #tpu.memory_space<vmem>>, vector<1x64xf32>
    %213 = vector.broadcast %212 : vector<1x64xf32> to vector<512x64xf32>
    %214 = arith.mulf %211, %213 : vector<512x64xf32>
    %c0_144 = arith.constant 0 : index
    %c0_145 = arith.constant 0 : index
    %215 = vector.load %arg14[%c0_144, %c0_145] : memref<1x64xf32, #tpu.memory_space<vmem>>, vector<1x64xf32>
    %216 = vector.broadcast %215 : vector<1x64xf32> to vector<512x64xf32>
    %217 = arith.addf %214, %216 : vector<512x64xf32>
    %cst_146 = arith.constant 0.000000e+00 : f32
    %218 = vector.broadcast %cst_146 : f32 to vector<512x64xf32>
    %219 = arith.cmpf oge, %217, %218 : vector<512x64xf32>
    %cst_147 = arith.constant 2.000000e-01 : f32
    %220 = vector.broadcast %cst_147 : f32 to vector<512x64xf32>
    %221 = arith.mulf %220, %217 : vector<512x64xf32>
    %222 = arith.select %219, %217, %221 : vector<512x64xi1>, vector<512x64xf32>
    %223 = vector.shape_cast %222 : vector<512x64xf32> to vector<2x16x16x64xf32>
    %cst_148 = arith.constant 0.000000e+00 : f32
    %224 = vector.broadcast %cst_148 : f32 to vector<2x18x16x192xf32>
    %c0_149 = arith.constant 0 : index
    %c0_150 = arith.constant 0 : index
    %c0_151 = arith.constant 0 : index
    %c0_152 = arith.constant 0 : index
    %225 = vector.load %arg21[%c0_149, %c0_150, %c0_151, %c0_152] : memref<2x18x16x192xf32, #tpu.memory_space<vmem>>, vector<2x18x16x192xf32>
    tpu.vector_store %arg21[%c0_149, %c0_150, %c0_151, %c0_152], %224 {strides = array<i32>} : memref<2x18x16x192xf32, #tpu.memory_space<vmem>>, vector<2x18x16x192xf32>,
    %226 = vector.extract_strided_slice %223 {offsets = [0, 0, 0, 0], sizes = [2, 16, 15, 64], strides = [1, 1, 1, 1]} : vector<2x16x16x64xf32> to vector<2x16x15x64xf32>
    %c0_153 = arith.constant 0 : index
    %c1_154 = arith.constant 1 : index
    %c1_155 = arith.constant 1 : index
    %c0_156 = arith.constant 0 : index
    %227 = vector.load %arg21[%c0_153, %c1_154, %c1_155, %c0_156] : memref<2x18x16x192xf32, #tpu.memory_space<vmem>>, vector<2x16x15x64xf32>
    tpu.vector_store %arg21[%c0_153, %c1_154, %c1_155, %c0_156], %226 {strides = array<i32>} : memref<2x18x16x192xf32, #tpu.memory_space<vmem>>, vector<2x16x15x64xf32>,
    %c0_157 = arith.constant 0 : index
    %c1_158 = arith.constant 1 : index
    %c0_159 = arith.constant 0 : index
    %c64 = arith.constant 64 : index
    %228 = vector.load %arg21[%c0_157, %c1_158, %c0_159, %c64] : memref<2x18x16x192xf32, #tpu.memory_space<vmem>>, vector<2x16x16x64xf32>
    tpu.vector_store %arg21[%c0_157, %c1_158, %c0_159, %c64], %223 {strides = array<i32>} : memref<2x18x16x192xf32, #tpu.memory_space<vmem>>, vector<2x16x16x64xf32>,
    %229 = vector.extract_strided_slice %223 {offsets = [0, 0, 1, 0], sizes = [2, 16, 15, 64], strides = [1, 1, 1, 1]} : vector<2x16x16x64xf32> to vector<2x16x15x64xf32>
    %c0_160 = arith.constant 0 : index
    %c1_161 = arith.constant 1 : index
    %c0_162 = arith.constant 0 : index
    %c128_163 = arith.constant 128 : index
    %230 = vector.load %arg21[%c0_160, %c1_161, %c0_162, %c128_163] : memref<2x18x16x192xf32, #tpu.memory_space<vmem>>, vector<2x16x15x64xf32>
    tpu.vector_store %arg21[%c0_160, %c1_161, %c0_162, %c128_163], %229 {strides = array<i32>} : memref<2x18x16x192xf32, #tpu.memory_space<vmem>>, vector<2x16x15x64xf32>,
    %c0_164 = arith.constant 0 : index
    %c0_165 = arith.constant 0 : index
    %c0_166 = arith.constant 0 : index
    %c0_167 = arith.constant 0 : index
    %231 = vector.load %arg21[%c0_164, %c0_165, %c0_166, %c0_167] : memref<2x18x16x192xf32, #tpu.memory_space<vmem>>, vector<2x18x16x192xf32>
    %cst_168 = arith.constant 0.000000e+00 : f32
    %232 = vector.broadcast %cst_168 : f32 to vector<512x128xf32>
    %233 = vector.extract_strided_slice %231 {offsets = [0, 0, 0, 0], sizes = [2, 16, 16, 192], strides = [1, 1, 1, 1]} : vector<2x18x16x192xf32> to vector<2x16x16x192xf32>
    %234 = vector.shape_cast %233 : vector<2x16x16x192xf32> to vector<512x192xf32>
    %235 = arith.truncf %234 : vector<512x192xf32> to vector<512x192xbf16>
    %c0_169 = arith.constant 0 : index
    %c0_170 = arith.constant 0 : index
    %c0_171 = arith.constant 0 : index
    %236 = vector.load %arg15[%c0_169, %c0_170, %c0_171] : memref<3x192x128xbf16, #tpu.memory_space<vmem>>, vector<1x192x128xbf16>
    %237 = vector.shape_cast %236 : vector<1x192x128xbf16> to vector<192x128xbf16>
    %cst_172 = arith.constant dense<0.000000e+00> : vector<512x128xf32>
    %238 = tpu.matmul %235, %237, %cst_172 {dimension_numbers = #tpu.dot_dimension_numbers<[1], [0], [0], [1], [0, 0, 1, 1], [], []>} : vector<512x192xbf16>, vector<192x128xbf16>, vector<512x128xf32> -> vector<512x128xf32>
    %239 = arith.addf %232, %238 : vector<512x128xf32>
    %240 = vector.extract_strided_slice %231 {offsets = [0, 1, 0, 0], sizes = [2, 16, 16, 192], strides = [1, 1, 1, 1]} : vector<2x18x16x192xf32> to vector<2x16x16x192xf32>
    %241 = vector.shape_cast %240 : vector<2x16x16x192xf32> to vector<512x192xf32>
    %242 = arith.truncf %241 : vector<512x192xf32> to vector<512x192xbf16>
    %c1_173 = arith.constant 1 : index
    %c0_174 = arith.constant 0 : index
    %c0_175 = arith.constant 0 : index
    %243 = vector.load %arg15[%c1_173, %c0_174, %c0_175] : memref<3x192x128xbf16, #tpu.memory_space<vmem>>, vector<1x192x128xbf16>
    %244 = vector.shape_cast %243 : vector<1x192x128xbf16> to vector<192x128xbf16>
    %cst_176 = arith.constant dense<0.000000e+00> : vector<512x128xf32>
    %245 = tpu.matmul %242, %244, %cst_176 {dimension_numbers = #tpu.dot_dimension_numbers<[1], [0], [0], [1], [0, 0, 1, 1], [], []>} : vector<512x192xbf16>, vector<192x128xbf16>, vector<512x128xf32> -> vector<512x128xf32>
    %246 = arith.addf %239, %245 : vector<512x128xf32>
    %247 = vector.extract_strided_slice %231 {offsets = [0, 2, 0, 0], sizes = [2, 16, 16, 192], strides = [1, 1, 1, 1]} : vector<2x18x16x192xf32> to vector<2x16x16x192xf32>
    %248 = vector.shape_cast %247 : vector<2x16x16x192xf32> to vector<512x192xf32>
    %249 = arith.truncf %248 : vector<512x192xf32> to vector<512x192xbf16>
    %c2_177 = arith.constant 2 : index
    %c0_178 = arith.constant 0 : index
    %c0_179 = arith.constant 0 : index
    %250 = vector.load %arg15[%c2_177, %c0_178, %c0_179] : memref<3x192x128xbf16, #tpu.memory_space<vmem>>, vector<1x192x128xbf16>
    %251 = vector.shape_cast %250 : vector<1x192x128xbf16> to vector<192x128xbf16>
    %cst_180 = arith.constant dense<0.000000e+00> : vector<512x128xf32>
    %252 = tpu.matmul %249, %251, %cst_180 {dimension_numbers = #tpu.dot_dimension_numbers<[1], [0], [0], [1], [0, 0, 1, 1], [], []>} : vector<512x192xbf16>, vector<192x128xbf16>, vector<512x128xf32> -> vector<512x128xf32>
    %253 = arith.addf %246, %252 : vector<512x128xf32>
    %c0_181 = arith.constant 0 : index
    %c0_182 = arith.constant 0 : index
    %254 = vector.load %arg16[%c0_181, %c0_182] : memref<1x128xf32, #tpu.memory_space<vmem>>, vector<1x128xf32>
    %255 = vector.broadcast %254 : vector<1x128xf32> to vector<512x128xf32>
    %256 = arith.addf %253, %255 : vector<512x128xf32>
    %257 = math.tanh %256 : vector<512x128xf32>
    %258 = vector.shape_cast %257 : vector<512x128xf32> to vector<2x16x16x128xf32>
    %c0_183 = arith.constant 0 : index
    %c0_184 = arith.constant 0 : index
    %c0_185 = arith.constant 0 : index
    %c0_186 = arith.constant 0 : index
    %259 = vector.load %arg17[%c0_183, %c0_184, %c0_185, %c0_186] : memref<2x16x16x128xf32, #tpu.memory_space<vmem>>, vector<2x16x16x128xf32>
    tpu.vector_store %arg17[%c0_183, %c0_184, %c0_185, %c0_186], %258 {strides = array<i32>} : memref<2x16x16x128xf32, #tpu.memory_space<vmem>>, vector<2x16x16x128xf32>,
    return
  }
}

</mosaic_0001>

<bundles_post_ra>
// kernel: tpu_custom_call.1
= control target key start
LH: loop header
LB: loop body
LE: loop exit
PB: predicated region body
PF: predicated region fallthrough
CT: control target
= control target key end

     0   :  { %s18346_s0 = inlined_call_operand.vmem [shape: f32[2,32], index: 0, kind: input, shape index: {}]   ;;  %s18347_s1 = inlined_call_operand.hbm [shape: bf16[32,2048], index: 1, kind: input, shape index: {}]   ;;  %s18348_s2 = inlined_call_operand.vmem [shape: f32[1,2048], index: 2, kind: input, shape index: {}]   ;;  %s18349_s3 = inlined_call_operand.vmem [shape: f32[1,128], index: 3, kind: input, shape index: {}]   ;;  %s18350_s4 = inlined_call_operand.vmem [shape: f32[1,128], index: 4, kind: input, shape index: {}]   ;;  %s18351_s5 = inlined_call_operand.vmem [shape: bf16[128,32], index: 5, kind: input, shape index: {}]   ;;  %s18352_s6 = inlined_call_operand.vmem [shape: bf16[3,384,128], index: 6, kind: input, shape index: {}]   ;;  %s18353_s7 = inlined_call_operand.vmem [shape: f32[1,128], index: 7, kind: input, shape index: {}]   ;;  %s18354_s8 = inlined_call_operand.vmem [shape: f32[1,128], index: 8, kind: input, shape index: {}]   ;;  %s18355_s9 = inlined_call_operand.vmem [shape: f32[1,128], index: 9, kind: input, shape index: {}]   ;;  %s18356_s10 = inlined_call_operand.hbm [shape: bf16[512,128], index: 10, kind: input, shape index: {}]   ;;  %s18357_s11 = inlined_call_operand.vmem [shape: bf16[3,384,64], index: 11, kind: input, shape index: {}]   ;;  %s18358_s12 = inlined_call_operand.vmem [shape: f32[1,64], index: 12, kind: input, shape index: {}]   ;;  %s18359_s13 = inlined_call_operand.vmem [shape: f32[1,64], index: 13, kind: input, shape index: {}]   ;;  %s18360_s14 = inlined_call_operand.vmem [shape: f32[1,64], index: 14, kind: input, shape index: {}]   ;;  %s18361_s15 = inlined_call_operand.vmem [shape: bf16[3,192,128], index: 15, kind: input, shape index: {}]   ;;  %s18362_s16 = inlined_call_operand.vmem [shape: f32[1,128], index: 16, kind: input, shape index: {}]   ;;  %s18363_s17 = inlined_call_operand.hbm [shape: f32[2,16,16,128], index: 17, kind: output, shape index: {}]  }
   0x1   :  { %18560 = sst [smem:[#allocation123_spill]] %s18346_s0 }
   0x2   :  { %18561 = sst [smem:[#allocation124_spill]] %s18347_s1 }
   0x3   :  { %18562 = sst [smem:[#allocation125_spill]] %s18363_s17 }
   0x4   :  { %22 = vsyncpa [#allocation7], 0 }
   0x5   :  { %23 = vsyncpa [#allocation10], 0 }
   0x6   :  { %24 = vsyncpa [#allocation8], 0  ;;  %s12704_s24 = smov [#allocation6]   ;;  %s18563_s28 = sld [smem:[#allocation124_spill]] }
   0x7   :  { %s32_s25 = sshll.u32 %s12704_s24, 4  ;;  %s33_s25 = int_to_ptr.vmem [resolvable:$true] %s32_s25 }
   0xc   :  { %s12632_s29 = scalar_lea.hbm %s18563_s28, 4096 }
   0xd   :  { %p12633_p0 = scmp.ne.s32.totalorder %s18563_s28, %s12632_s29  ;;  %p12636_p1 = scmp.lt.u32.totalorder %s12632_s29, %s18563_s28 }
   0xf   :  { %p12638_p2 = pnand %p12636_p1, %p12633_p0 }
  0x11   :  { %12641 = shalt.err (!%p12638_p2)
}
  0x12   :  { %s12642_s1 = scalar_lea.vmem %s33_s25, 4096  ;;  %p12647_p4 = scmp.lt.s32.totalorder %s33_s25, %s33_s25 }
  0x13   :  { %p12643_p3 = scmp.ne.s32.totalorder %s33_s25, %s12642_s1  ;;  %p12648_p5 = scmp.lt.s32.totalorder %s12642_s1, %s12642_s1 }
  0x15   :  { %p12649_p6 = por %p12648_p5, %p12647_p4 }
  0x17   :  { %p12650_p7 = pnand %p12649_p6, %p12643_p3 }
  0x19   :  { %12653 = shalt.err (!%p12650_p7)
}
  0x1a   :  { %s12705_s20 = smov 1024   ;;  %s12706_s21 = smov 64  }
  0x1b   :  { %38 = dma.hbm_to_vmem [thread:$0]  %s18563_s28, 4096, %s33_s25, [#allocation7], %s12705_s20, %s12705_s20, %s12706_s21  }
  0x1c   :  { %s12707_s24 = smov [#allocation9]   ;;  %s12654_s0 = scalar_lea.hbm %s18356_s10, 4096 }
  0x1d   :  { %s60_s26 = sshll.u32 %s12707_s24, 4  ;;  %p12655_p8 = scmp.ne.s32.totalorder %s18356_s10, %s12654_s0  ;;  %s61_s26 = int_to_ptr.vmem [resolvable:$true] %s60_s26 }
  0x1e   :  { %p12658_p9 = scmp.lt.u32.totalorder %s12654_s0, %s18356_s10 }
  0x20   :  { %p12660_p10 = pnand %p12658_p9, %p12655_p8 }
  0x22   :  { %12663 = shalt.err (!%p12660_p10)
}
  0x23   :  { %s12664_s17 = scalar_lea.vmem %s61_s26, 4096  ;;  %p12669_p12 = scmp.lt.s32.totalorder %s61_s26, %s61_s26 }
  0x24   :  { %p12665_p11 = scmp.ne.s32.totalorder %s61_s26, %s12664_s17  ;;  %p12670_p13 = scmp.lt.s32.totalorder %s12664_s17, %s12664_s17 }
  0x26   :  { %p12671_p0 = por %p12670_p13, %p12669_p12 }
  0x28   :  { %p12672_p1 = pnand %p12671_p0, %p12665_p11 }
  0x2a   :  { %12675 = shalt.err (!%p12672_p1)
}
  0x2b   :  { %s12708_s25 = smov 4  }
  0x2c   :  { %66 = dma.hbm_to_vmem [thread:$0]  %s18356_s10, 4096, %s61_s26, [#allocation10], %s12706_s21, %s12706_s21, %s12708_s25  }
  0x2d   :  { %12698 = dma.done.wait [#allocation7], 4096  }
  0x2e   :  { %12699 = vsyncadd [#allocation7], 4294963200 }
  0x2f   :  { %12700 = dma.done.wait [#allocation10], 4096  }
  0x30   :  { %12701 = vsyncadd [#allocation10], 4294963200  ;;  %v18376_v0 = vmov 0   ;;  %v88_v1 = vld [vmem:[#allocation6] sm:$0xff]  ;;  %v89_v8 = vld [vmem:[#allocation6 + $0x8] sm:$0xff]  ;;  %s18564_s22 = sld [smem:[#allocation123_spill]] }
  0x31   :  { %400 = vmatprep.mubr.bf16.mxu0 %v18376_v0  ;;  %523 = vmatprep.mubr.bf16.mxu1 %v18376_v0  ;;  %v96_v2 = vld [vmem:[#allocation6 + $0x40] sm:$0xff]  ;;  %v97_v9 = vld [vmem:[#allocation6 + $0x48] sm:$0xff]  ;;  %v91_v10 = vld [vmem:[#allocation6 + $0x18] sm:$0xff]  ;;  %vm364_vm0 = vcmask 261120  }
  0x32   :  { %v104_v3 = vld [vmem:[#allocation6 + $0x80] sm:$0xff]  ;;  %v10652_v4 = vcombine.high %v88_v1, %v96_v2  ;;  %v10651_v5 = vcombine.low %v88_v1, %v96_v2  ;;  %v99_v11 = vld [vmem:[#allocation6 + $0x58] sm:$0xff]  ;;  %v10654_v18 = vcombine.high %v89_v8, %v97_v9  ;;  %v105_v19 = vld [vmem:[#allocation6 + $0x88] sm:$0xff]  ;;  %v10653_v26 = vcombine.low %v89_v8, %v97_v9 }
  0x33   :  { %v112_v6 = vld [vmem:[#allocation6 + $0xc0] sm:$0xff]  ;;  %v10658_v14 = vcombine.high %v91_v10, %v99_v11  ;;  %v10657_v15 = vcombine.low %v91_v10, %v99_v11  ;;  %v107_v16 = vld [vmem:[#allocation6 + $0x98] sm:$0xff]  ;;  %v113_v21 = vld [vmem:[#allocation6 + $0xc8] sm:$0xff] }
  0x34   :  { %v10668_v7 = vcombine.high %v104_v3, %v112_v6  ;;  %368 = vmatprep.subr.bf16.mxu0 %v10652_v4  ;;  %v10667_v12 = vcombine.low %v104_v3, %v112_v6  ;;  %v115_v17 = vld [vmem:[#allocation6 + $0xd8] sm:$0xff]  ;;  %v93_v22 = vld [vmem:[#allocation6 + $0x28] sm:$0xff]  ;;  %v10670_v27 = vcombine.high %v105_v19, %v113_v21  ;;  %v90_v31 = vld [vmem:[#allocation6 + $0x10] sm:$0xff]  ;;  %v10669_v34 = vcombine.low %v105_v19, %v113_v21 }
  0x35   :  { %369 = vmatpush1.bf16.msra.mxu0 %v10651_v5  ;;  %v10674_v20 = vcombine.high %v107_v16, %v115_v17  ;;  %491 = vmatprep.subr.bf16.mxu1 %v10658_v14  ;;  %v101_v23 = vld [vmem:[#allocation6 + $0x68] sm:$0xff]  ;;  %v10673_v25 = vcombine.low %v107_v16, %v115_v17  ;;  %v98_v32 = vld [vmem:[#allocation6 + $0x50] sm:$0xff]  ;;  %v95_v38 = vld [vmem:[#allocation6 + $0x38] sm:$0xff]  ;;  %v124_v4 = vlaneseq }
  0x36   :  { %v86_v13 = vld [vmem:[%s18564_s22] sm:$0x3]  ;;  %370 = vmatprep.subr.bf16.mxu0 %v10668_v7  ;;  %492 = vmatpush1.bf16.msra.mxu1 %v10657_v15  ;;  %v10662_v28 = vcombine.high %v93_v22, %v101_v23  ;;  %v109_v29 = vld [vmem:[#allocation6 + $0xa8] sm:$0xff]  ;;  %v10661_v33 = vcombine.low %v93_v22, %v101_v23  ;;  %v106_v35 = vld [vmem:[#allocation6 + $0x90] sm:$0xff]  ;;  %v10656_v40 = vcombine.high %v90_v31, %v98_v32  ;;  %v12710_v7 = vmov 1966171168  }
  0x37   :  { %v12837_v24 = vpack.c.bf16 %v86_v13, %v86_v13  ;;  %493 = vmatprep.subr.bf16.mxu1 %v10674_v20  ;;  %v117_v30 = vld [vmem:[#allocation6 + $0xe8] sm:$0xff]  ;;  %v114_v36 = vld [vmem:[#allocation6 + $0xd0] sm:$0xff]  ;;  %v103_v39 = vld [vmem:[#allocation6 + $0x78] sm:$0xff]  ;;  %v10655_v44 = vcombine.low %v90_v31, %v98_v32  ;;  %v12864_v6 = vshrl.u32 %v124_v4, 7  ;;  %v698_v8 = vunpack.c.l.s4 %v12710_v7 }
  0x38   :  { %v10678_v37 = vcombine.high %v109_v29, %v117_v30  ;;  %v10677_v41 = vcombine.low %v109_v29, %v117_v30  ;;  %v111_v42 = vld [vmem:[#allocation6 + $0xb8] sm:$0xff]  ;;  %v92_v45 = vld [vmem:[#allocation6 + $0x20] sm:$0xff]  ;;  %v10672_v47 = vcombine.high %v106_v35, %v114_v36  ;;  %v10666_v48 = vcombine.high %v95_v38, %v103_v39  ;;  %v94_v57 = vld [vmem:[#allocation6 + $0x30] sm:$0xff] }
  0x39   :  { %371 = vmatpush1.bf16.msra.mxu0 %v10667_v12  ;;  %v119_v43 = vld [vmem:[#allocation6 + $0xf8] sm:$0xff]  ;;  %v100_v46 = vld [vmem:[#allocation6 + $0x60] sm:$0xff]  ;;  %v10665_v49 = vcombine.low %v95_v38, %v103_v39  ;;  %v10671_v50 = vcombine.low %v106_v35, %v114_v36  ;;  %v102_v58 = vld [vmem:[#allocation6 + $0x70] sm:$0xff]  ;;  %v126_v9 = vsub.s32 0, %v12864_v6  ;;  %v130_v11 = vsub.s32 1, %v12864_v6 }
  0x3a   :  { %409 = vmatprep.subr.bf16.mxu0 %v10654_v18  ;;  %494 = vmatpush1.bf16.msra.mxu1 %v10673_v25  ;;  %v108_v51 = vld [vmem:[#allocation6 + $0xa0] sm:$0xff]  ;;  %v10682_v53 = vcombine.high %v111_v42, %v119_v43  ;;  %v10660_v54 = vcombine.high %v92_v45, %v100_v46  ;;  %v10681_v55 = vcombine.low %v111_v42, %v119_v43  ;;  %v110_v61 = vld [vmem:[#allocation6 + $0xb0] sm:$0xff]  ;;  %v699_v12 = vunpack.c.0.s8 %v698_v8 }
  0x3b   :  { %573 = vmatprep.subr.bf16.mxu1 %v10662_v28  ;;  %v116_v52 = vld [vmem:[#allocation6 + $0xe0] sm:$0xff]  ;;  %v10659_v56 = vcombine.low %v92_v45, %v100_v46  ;;  %v118_v62 = vld [vmem:[#allocation6 + $0xf0] sm:$0xff]  ;;  %v10664_v63 = vcombine.high %v94_v57, %v102_v58  ;;  %v10663_v1 = vcombine.low %v94_v57, %v102_v58  ;;  %v150_v13 = vsub.s32 6, %v12864_v6 }
  0x3c   :  { %10683 = vmatmul.mubr.msk.bf16.vlgmr.msra.gmra.mrb[0].mxu0 %vm364_vm0, %v12837_v24  ;;  %v10676_v59 = vcombine.high %v108_v51, %v116_v52  ;;  %v10675_v60 = vcombine.low %v108_v51, %v116_v52  ;;  %v10680_v2 = vcombine.high %v110_v61, %v118_v62  ;;  %v10679_v3 = vcombine.low %v110_v61, %v118_v62  ;;  %v12249_v5 = vld [vmem:[%s18351_s5] sm:$0xff]  }
  0x3d   :  { %410 = vmatpush1.bf16.msra.mxu0 %v10653_v26  ;;  %441 = vmatprep.mubr.bf16.mxu0 %v18376_v0  ;;  %v12871_v10 = vld [vmem:[%s18348_s2] sm:$0xff]  ;;  %v154_v15 = vsub.s32 7, %v12864_v6  ;;  %v12883_v17 = vsub.s32 %v699_v12, %v12864_v6  ;;  %v134_v22 = vsub.s32 2, %v12864_v6  ;;  %v138_v26 = vsub.s32 3, %v12864_v6 }
  0x3e   :  { %411 = vmatprep.subr.bf16.mxu0 %v10670_v27  ;;  %10686 = vmatmul.mubr.msk.bf16.vlgmr.msra.gmra.mrb[0].mxu1 %vm364_vm0, %v12837_v24  ;;  %v127_v14 = vrot.slane %v12871_v10, %v126_v9  ;;  %v131_v16 = vrot.slane %v12871_v10, %v130_v11  ;;  %v151_v19 = vrot.slane %v12871_v10, %v150_v13  ;;  %v12257_v7 = vld [vmem:[%s18352_s6 + $0x100] sm:$0xff]  }
  0x3f   :  { %574 = vmatpush1.bf16.msra.mxu1 %v10661_v33  ;;  %605 = vmatprep.mubr.bf16.mxu1 %v18376_v0  ;;  %v155_v23 = vrot.slane %v12871_v10, %v154_v15  ;;  %v139_v39 = vrot.slane %v12871_v10, %v138_v26  ;;  %v12258_v8 = vld [vmem:[%s18352_s6 + $0xc0] sm:$0xff]  }
  0x40   :  { %575 = vmatprep.subr.bf16.mxu1 %v10678_v37  ;;  %v12899_v37 = vld [vmem:[%s18348_s2 + $0x8] sm:$0xff] }
  0x41   :  { %412 = vmatpush1.bf16.msra.mxu0 %v10669_v34  ;;  %v135_v34 = vrot.slane %v12871_v10, %v134_v22  ;;  %v167_v45 = vrot.slane %v12899_v37, %v134_v22 }
  0x42   :  { %450 = vmatprep.subr.bf16.mxu0 %v10656_v40 }
  0x43   :  { %576 = vmatpush1.bf16.msra.mxu1 %v10677_v41 }
  0x44   :  { %10684 = vmatmul.mubr.msk.bf16.vlgmr.msra.gmra.mrb[4].mxu0 %vm364_vm0, %v12837_v24  ;;  %655 = vmatprep.subr.bf16.mxu1 %v10666_v48 }
  0x45   :  { %451 = vmatpush1.bf16.msra.mxu0 %v10655_v44  ;;  %482 = vmatprep.mubr.bf16.mxu0 %v18376_v0 }
  0x46   :  { %452 = vmatprep.subr.bf16.mxu0 %v10672_v47  ;;  %10688 = vmatmul.mubr.msk.bf16.vlgmr.msra.gmra.mrb[4].mxu1 %vm364_vm0, %v12837_v24 }
  0x47   :  { %656 = vmatpush1.bf16.msra.mxu1 %v10665_v49  ;;  %687 = vmatprep.mubr.bf16.mxu1 %v18376_v0  ;;  %v142_v49 = vsub.s32 4, %v12864_v6 }
  0x48   :  { %657 = vmatprep.subr.bf16.mxu1 %v10682_v53  ;;  %v146_v53 = vsub.s32 5, %v12864_v6 }
  0x49   :  { %453 = vmatpush1.bf16.msra.mxu0 %v10671_v50  ;;  %v171_v50 = vrot.slane %v12899_v37, %v138_v26  ;;  %v143_v61 = vrot.slane %v12871_v10, %v142_v49 }
  0x4a   :  { %532 = vmatprep.subr.bf16.mxu0 %v10660_v54 }
  0x4b   :  { %658 = vmatpush1.bf16.msra.mxu1 %v10681_v55 }
  0x4c   :  { %10685 = vmatmul.mubr.msk.bf16.vlgmr.msra.gmra.mrb[8].mxu0 %vm364_vm0, %v12837_v24  ;;  %11306 = vmatprep.subr.bf16.mxu1 %v12257_v7 }
  0x4d   :  { %533 = vmatpush1.bf16.msra.mxu0 %v10659_v56  ;;  %564 = vmatprep.mubr.bf16.mxu0 %v18376_v0 }
  0x4e   :  { %534 = vmatprep.subr.bf16.mxu0 %v10676_v59  ;;  %10690 = vmatmul.mubr.msk.bf16.vlgmr.msra.gmra.mrb[8].mxu1 %vm364_vm0, %v12837_v24 }
  0x4f   :  { %11307 = vmatpush3.bf16.msra.mxu1 %v12258_v8 }
  0x51   :  { %535 = vmatpush1.bf16.msra.mxu0 %v10675_v60 }
  0x52   :  { %614 = vmatprep.subr.bf16.mxu0 %v10664_v63 }
  0x54   :  { %10687 = vmatmul.mubr.msk.bf16.vlgmr.msra.gmra.mrb[12].mxu0 %vm364_vm0, %v12837_v24 }
  0x55   :  { %615 = vmatpush1.bf16.msra.mxu0 %v10663_v1  ;;  %646 = vmatprep.mubr.bf16.mxu0 %v18376_v0 }
  0x56   :  { %616 = vmatprep.subr.bf16.mxu0 %v10680_v2  ;;  %v147_v2 = vrot.slane %v12871_v10, %v146_v53  ;;  %v183_v10 = vrot.slane %v12899_v37, %v150_v13  ;;  %v12261_v13 = vld [vmem:[%s18352_s6 + $0xc8] sm:$0xff]  }
  0x59   :  { %617 = vmatpush1.bf16.msra.mxu0 %v10679_v3 }
  0x5c   :  { %10689 = vmatmul.mubr.msk.bf16.vlgmr.msra.gmra.mrb[16].mxu0 %vm364_vm0, %v12837_v24 }
  0x5d   :  { %11710 = vmatprep.mubr.msk.bf16.mxu0 %vm364_vm0, %v12249_v5 }
 0x10f   :  { %v402_v18 = vpop.f32.mrb[0].mxu0 }
 0x110   :  { %v403_v20 = vadd.f32 %v402_v18, %v127_v14  ;;  %v404_v21 = vpop.f32.mrb[1].mxu0 }
 0x111   :  { %v405_v24 = vadd.f32 %v404_v21, %v131_v16  ;;  %v406_v25 = vpop.f32.mrb[2].mxu0  ;;  %v525_v29 = vpop.f32.mrb[0].mxu1  ;;  %v12260_v16 = vld [vmem:[%s18352_s6 + $0x108] sm:$0xff]   ;;  %v187_v21 = vrot.slane %v12899_v37, %v154_v15 }
 0x112   :  { %v703_v27 = vrot.slane %v403_v20, %v12883_v17  ;;  %v407_v28 = vpop.f32.mrb[3].mxu0  ;;  %v526_v31 = vadd.f32 %v525_v29, %v151_v19  ;;  %v527_v32 = vpop.f32.mrb[1].mxu1  ;;  %11308 = vmatprep.subr.bf16.mxu1 %v12260_v16 }
 0x113   :  { %v730_v30 = vrot.slane %v405_v24, %v12883_v17  ;;  %v528_v35 = vadd.f32 %v527_v32, %v155_v23  ;;  %v529_v36 = vpop.f32.mrb[2].mxu1  ;;  %11309 = vmatpush3.bf16.msra.mxu1 %v12261_v13 }
 0x114   :  { %v704_v33 = vcombine.high %v703_v27, %v703_v27  ;;  %10691 = vst.sshfl [vmem:[#allocation2] sm:$0x1 pattern:$0x73625140] %v703_v27  ;;  %v865_v40 = vrot.slane %v526_v31, %v12883_v17  ;;  %v530_v41 = vpop.f32.mrb[3].mxu1  ;;  %v12263_v27 = vld [vmem:[%s18352_s6 + $0x110] sm:$0xff]   ;;  %v159_v31 = vrot.slane %v12899_v37, %v126_v9 }
 0x115   :  { %v731_v38 = vcombine.high %v730_v30, %v730_v30  ;;  %10693 = vst.sshfl [vmem:[#allocation2 + $0x1] sm:$0x1 pattern:$0x73625140] %v730_v30  ;;  %v892_v42 = vrot.slane %v528_v35, %v12883_v17  ;;  %v163_v35 = vrot.slane %v12899_v37, %v130_v11  ;;  %11310 = vmatprep.subr.bf16.mxu1 %v12263_v27  ;;  %v12266_v9 = vld [vmem:[%s18352_s6 + $0x118] sm:$0xff]  }
 0x116   :  { %10692 = vst.sshfl [vmem:[#allocation2 + $0x10] sm:$0x1 pattern:$0x73625140] %v704_v33  ;;  %v866_v44 = vcombine.high %v865_v40, %v865_v40 }
 0x117   :  { %10694 = vst.sshfl [vmem:[#allocation2 + $0x11] sm:$0x1 pattern:$0x73625140] %v731_v38  ;;  %v443_v43 = vpop.f32.mrb[4].mxu0  ;;  %v893_v48 = vcombine.high %v892_v42, %v892_v42 }
 0x118   :  { %10703 = vst.sshfl [vmem:[#allocation2 + $0x6] sm:$0x1 pattern:$0x73625140] %v865_v40  ;;  %v444_v46 = vadd.f32 %v443_v43, %v135_v34  ;;  %v445_v47 = vpop.f32.mrb[5].mxu0 }
 0x119   :  { %10705 = vst.sshfl [vmem:[#allocation2 + $0x7] sm:$0x1 pattern:$0x73625140] %v892_v42  ;;  %v446_v51 = vadd.f32 %v445_v47, %v139_v39  ;;  %v447_v52 = vpop.f32.mrb[6].mxu0  ;;  %v607_v56 = vpop.f32.mrb[4].mxu1 }
 0x11a   :  { %10704 = vst.sshfl [vmem:[#allocation2 + $0x16] sm:$0x1 pattern:$0x73625140] %v866_v44  ;;  %v757_v54 = vrot.slane %v444_v46, %v12883_v17  ;;  %v448_v55 = vpop.f32.mrb[7].mxu0  ;;  %v608_v58 = vadd.f32 %v607_v56, %v167_v45  ;;  %v609_v59 = vpop.f32.mrb[5].mxu1  ;;  %v179_v56 = vrot.slane %v12899_v37, %v146_v53 }
 0x11b   :  { %10706 = vst.sshfl [vmem:[#allocation2 + $0x17] sm:$0x1 pattern:$0x73625140] %v893_v48  ;;  %v784_v57 = vrot.slane %v446_v51, %v12883_v17  ;;  %v610_v62 = vadd.f32 %v609_v59, %v171_v50  ;;  %v611_v63 = vpop.f32.mrb[6].mxu1  ;;  %v12264_v39 = vld [vmem:[%s18352_s6 + $0xd0] sm:$0xff]  }
 0x11c   :  { %v758_v60 = vcombine.high %v757_v54, %v757_v54  ;;  %10695 = vst.sshfl [vmem:[#allocation2 + $0x2] sm:$0x1 pattern:$0x73625140] %v757_v54  ;;  %v973_v3 = vrot.slane %v608_v58, %v12883_v17  ;;  %v612_v4 = vpop.f32.mrb[7].mxu1  ;;  %11311 = vmatpush3.bf16.msra.mxu1 %v12264_v39  ;;  %v12267_v47 = vld [vmem:[%s18352_s6 + $0xd8] sm:$0xff]   ;;  %v175_v54 = vrot.slane %v12899_v37, %v142_v49 }
 0x11d   :  { %v785_v1 = vcombine.high %v784_v57, %v784_v57  ;;  %10697 = vst.sshfl [vmem:[#allocation2 + $0x3] sm:$0x1 pattern:$0x73625140] %v784_v57  ;;  %v1000_v5 = vrot.slane %v610_v62, %v12883_v17  ;;  %11312 = vmatprep.subr.bf16.mxu1 %v12266_v9 }
 0x11e   :  { %10696 = vst.sshfl [vmem:[#allocation2 + $0x12] sm:$0x1 pattern:$0x73625140] %v758_v60  ;;  %v974_v14 = vcombine.high %v973_v3, %v973_v3 }
 0x11f   :  { %10698 = vst.sshfl [vmem:[#allocation2 + $0x13] sm:$0x1 pattern:$0x73625140] %v785_v1  ;;  %v484_v12 = vpop.f32.mrb[8].mxu0  ;;  %v1001_v20 = vcombine.high %v1000_v5, %v1000_v5 }
 0x120   :  { %10711 = vst.sshfl [vmem:[#allocation2 + $0xa] sm:$0x1 pattern:$0x73625140] %v973_v3  ;;  %v485_v18 = vadd.f32 %v484_v12, %v143_v61  ;;  %v486_v19 = vpop.f32.mrb[9].mxu0  ;;  %11313 = vmatpush3.bf16.msra.mxu1 %v12267_v47 }
 0x121   :  { %10713 = vst.sshfl [vmem:[#allocation2 + $0xb] sm:$0x1 pattern:$0x73625140] %v1000_v5  ;;  %v487_v22 = vadd.f32 %v486_v19, %v147_v2  ;;  %v488_v23 = vpop.f32.mrb[10].mxu0  ;;  %v689_v26 = vpop.f32.mrb[8].mxu1 }
 0x122   :  { %10712 = vst.sshfl [vmem:[#allocation2 + $0x1a] sm:$0x1 pattern:$0x73625140] %v974_v14  ;;  %v811_v24 = vrot.slane %v485_v18, %v12883_v17  ;;  %v489_v25 = vpop.f32.mrb[11].mxu0  ;;  %v690_v28 = vadd.f32 %v689_v26, %v183_v10  ;;  %v691_v29 = vpop.f32.mrb[9].mxu1 }
 0x123   :  { %10714 = vst.sshfl [vmem:[#allocation2 + $0x1b] sm:$0x1 pattern:$0x73625140] %v1001_v20  ;;  %v838_v15 = vrot.slane %v487_v22, %v12883_v17  ;;  %v692_v32 = vadd.f32 %v691_v29, %v187_v21  ;;  %v693_v33 = vpop.f32.mrb[10].mxu1 }
 0x124   :  { %v812_v30 = vcombine.high %v811_v24, %v811_v24  ;;  %10699 = vst.sshfl [vmem:[#allocation2 + $0x4] sm:$0x1 pattern:$0x73625140] %v811_v24  ;;  %v1081_v36 = vrot.slane %v690_v28, %v12883_v17  ;;  %v694_v38 = vpop.f32.mrb[11].mxu1 }
 0x125   :  { %v839_v34 = vcombine.high %v838_v15, %v838_v15  ;;  %10701 = vst.sshfl [vmem:[#allocation2 + $0x5] sm:$0x1 pattern:$0x73625140] %v838_v15  ;;  %v1108_v40 = vrot.slane %v692_v32, %v12883_v17  ;;  %v10723_v38 = vld [vmem:[%s18349_s3] ss:$0 sm:$0xff] }
 0x126   :  { %10700 = vst.sshfl [vmem:[#allocation2 + $0x14] sm:$0x1 pattern:$0x73625140] %v812_v30  ;;  %v1082_v42 = vcombine.high %v1081_v36, %v1081_v36 }
 0x127   :  { %10702 = vst.sshfl [vmem:[#allocation2 + $0x15] sm:$0x1 pattern:$0x73625140] %v839_v34  ;;  %v566_v41 = vpop.f32.mrb[12].mxu0  ;;  %v1109_v44 = vcombine.high %v1108_v40, %v1108_v40 }
 0x128   :  { %10719 = vst.sshfl [vmem:[#allocation2 + $0xe] sm:$0x1 pattern:$0x73625140] %v1081_v36  ;;  %v567_v11 = vadd.f32 %v566_v41, %v159_v31  ;;  %v568_v43 = vpop.f32.mrb[13].mxu0 }
 0x129   :  { %10721 = vst.sshfl [vmem:[#allocation2 + $0xf] sm:$0x1 pattern:$0x73625140] %v1108_v40  ;;  %v569_v45 = vadd.f32 %v568_v43, %v163_v35  ;;  %v570_v46 = vpop.f32.mrb[14].mxu0 }
 0x12a   :  { %10720 = vst.sshfl [vmem:[#allocation2 + $0x1e] sm:$0x1 pattern:$0x73625140] %v1082_v42  ;;  %v919_v48 = vrot.slane %v567_v11, %v12883_v17  ;;  %v571_v50 = vpop.f32.mrb[15].mxu0 }
 0x12b   :  { %10722 = vst.sshfl [vmem:[#allocation2 + $0x1f] sm:$0x1 pattern:$0x73625140] %v1109_v44  ;;  %v946_v51 = vrot.slane %v569_v45, %v12883_v17  ;;  %v10724_v42 = vld [vmem:[%s18350_s4] ss:$0 sm:$0xff] }
 0x12c   :  { %v920_v52 = vcombine.high %v919_v48, %v919_v48  ;;  %10707 = vst.sshfl [vmem:[#allocation2 + $0x8] sm:$0x1 pattern:$0x73625140] %v919_v48  ;;  %v1128_v6 = vld [vmem:[#allocation2] sm:$0xff] }
 0x12d   :  { %v947_v55 = vcombine.high %v946_v51, %v946_v51  ;;  %10709 = vst.sshfl [vmem:[#allocation2 + $0x9] sm:$0x1 pattern:$0x73625140] %v946_v51 }
 0x12e   :  { %10708 = vst.sshfl [vmem:[#allocation2 + $0x18] sm:$0x1 pattern:$0x73625140] %v920_v52  ;;  %v1130_v3 = vld [vmem:[#allocation2 + $0x10] sm:$0xff] }
 0x12f   :  { %10710 = vst.sshfl [vmem:[#allocation2 + $0x19] sm:$0x1 pattern:$0x73625140] %v947_v55  ;;  %v648_v57 = vpop.f32.mrb[16].mxu0  ;;  %v12250_v55 = vld [vmem:[%s18351_s5 + $0x8] sm:$0xff]  }
 0x130   :  { %v649_v58 = vadd.f32 %v648_v57, %v175_v54  ;;  %v650_v59 = vpop.f32.mrb[17].mxu0  ;;  %v12259_v54 = vld [vmem:[%s18352_s6 + $0x140] sm:$0xff]   ;;  %v12262_v57 = vld [vmem:[%s18352_s6 + $0x148] sm:$0xff]  }
 0x131   :  { %v651_v60 = vadd.f32 %v650_v59, %v179_v56  ;;  %v652_v61 = vpop.f32.mrb[18].mxu0  ;;  %v12251_v56 = vld [vmem:[%s18351_s5 + $0x10] sm:$0xff]   ;;  %v12252_v59 = vld [vmem:[%s18351_s5 + $0x18] sm:$0xff]  }
 0x132   :  { %v1027_v62 = vrot.slane %v649_v58, %v12883_v17  ;;  %v653_v63 = vpop.f32.mrb[19].mxu0  ;;  %v12265_v58 = vld [vmem:[%s18352_s6 + $0x150] sm:$0xff]   ;;  %v12268_v61 = vld [vmem:[%s18352_s6 + $0x158] sm:$0xff]  }
 0x133   :  { %v1054_v1 = vrot.slane %v651_v60, %v12883_v17  ;;  %v12253_v60 = vld [vmem:[%s18351_s5 + $0x20] sm:$0xff]   ;;  %v12255_v63 = vld [vmem:[%s18351_s5 + $0x30] sm:$0xff]  }
 0x134   :  { %v1028_v49 = vcombine.high %v1027_v62, %v1027_v62  ;;  %10715 = vst.sshfl [vmem:[#allocation2 + $0xc] sm:$0x1 pattern:$0x73625140] %v1027_v62  ;;  %v12254_v62 = vld [vmem:[%s18351_s5 + $0x28] sm:$0xff]  }
 0x135   :  { %v1055_v2 = vcombine.high %v1054_v1, %v1054_v1  ;;  %10717 = vst.sshfl [vmem:[#allocation2 + $0xd] sm:$0x1 pattern:$0x73625140] %v1054_v1  ;;  %v12256_v1 = vld [vmem:[%s18351_s5 + $0x38] sm:$0xff]  }
 0x136   :  { %10716 = vst.sshfl [vmem:[#allocation2 + $0x1c] sm:$0x1 pattern:$0x73625140] %v1028_v49  ;;  %v12269_v49 = vld [vmem:[%s18352_s6 + $0x120] sm:$0xff]  }
 0x137   :  { %10718 = vst.sshfl [vmem:[#allocation2 + $0x1d] sm:$0x1 pattern:$0x73625140] %v1055_v2  ;;  %v13020_v2 = vld [vmem:[%s18352_s6 + $0xe0] sm:$0xff]   ;;  %11314 = vmatprep.subr.bf16.mxu1 %v12269_v49 }
 0x138   :  { %11315 = vmatpush3.bf16.msra.mxu1 %v13020_v2 }
 0x13c   :  { %v1129_v37 = vld [vmem:[#allocation2 + $0x8] sm:$0xff] }
 0x13d   :  { %v1132_v53 = vadd.f32 %v1129_v37, %v1128_v6 }
 0x13e   :  { %v1131_v5 = vld [vmem:[#allocation2 + $0x18] sm:$0xff] }
 0x13f   :  { %v1133_v4 = vadd.f32 %v1132_v53, %v1130_v3  ;;  %v12272_v53 = vld [vmem:[%s18352_s6 + $0x128] sm:$0xff]  }
 0x140   :  { %11316 = vmatprep.subr.bf16.mxu1 %v12272_v53 }
 0x141   :  { %v1134_v7 = vadd.f32 %v1133_v4, %v1131_v5  ;;  %v12274_v4 = vld [vmem:[%s18352_s6 + $0x168] sm:$0xff]  }
 0x143   :  { %v1135_v8 = vrot.slane %v1134_v7, 4 }
 0x145   :  { %v1136_v12 = vadd.f32 %v1135_v8, %v1134_v7  ;;  %v12276_v7 = vld [vmem:[%s18352_s6 + $0xf0] sm:$0xff]  }
 0x146   :  { %v12277_v8 = vld [vmem:[%s18352_s6 + $0x170] sm:$0xff]  }
 0x147   :  { %v1137_v14 = vrot.slane %v1136_v12, 2 }
 0x149   :  { %v1138_v10 = vadd.f32 %v1137_v14, %v1136_v12  ;;  %v12278_v12 = vld [vmem:[%s18352_s6 + $0x138] sm:$0xff]  }
 0x14a   :  { %v12279_v14 = vld [vmem:[%s18352_s6 + $0xf8] sm:$0xff]  }
 0x14b   :  { %v1139_v16 = vrot.slane %v1138_v10, 1 }
 0x14d   :  { %v1140_v18 = vadd.f32 %v1139_v16, %v1138_v10  ;;  %v12280_v10 = vld [vmem:[%s18352_s6 + $0x178] sm:$0xff]   ;;  %v12281_v16 = vld [vmem:[%s18352_s6 + $0x40] sm:$0xff]  }
 0x14f   :  { %v1141_v17 = vmul.f32 0.03125, %v1140_v18  ;;  %v12297_v18 = vld [vmem:[%s18352_s6 + $0x1c0] sm:$0xff]  }
 0x151   :  { %v1142_v19 = vsub.f32 %v1128_v6, %v1141_v17  ;;  %v1143_v20 = vsub.f32 %v1129_v37, %v1141_v17  ;;  %v1144_v21 = vsub.f32 %v1130_v3, %v1141_v17  ;;  %v1145_v22 = vsub.f32 %v1131_v5, %v1141_v17  ;;  %v13025_v6 = vld [vmem:[%s18352_s6 + $0x160] sm:$0xff]   ;;  %v12273_v3 = vld [vmem:[%s18352_s6 + $0xe8] sm:$0xff]   ;;  %v12275_v5 = vld [vmem:[%s18352_s6 + $0x130] sm:$0xff]  }
 0x152   :  { %v12711_v37 = vmov 0.0   ;;  %11317 = vmatpush3.bf16.msra.mxu1 %v12273_v3  ;;  %v12284_v3 = vld [vmem:[%s18352_s6 + $0x8] sm:$0xff]  }
 0x153   :  { %v1146_v23 = vmul.f32 %v1142_v19, %v1142_v19  ;;  %v1147_v13 = vmul.f32 %v1143_v20, %v1143_v20  ;;  %v1148_v24 = vmul.f32 %v1144_v21, %v1144_v21  ;;  %v1149_v26 = vmul.f32 %v1145_v22, %v1145_v22  ;;  %1376 = vst [vmem:[#allocation3 + $0x48] sm:$0xff] %v12711_v37 }
 0x154   :  { %1378 = vst [vmem:[#allocation3 + $0x58] sm:$0xff] %v12711_v37  ;;  %1367 = vst [vmem:[#allocation3] sm:$0xff] %v12711_v37  ;;  %11318 = vmatprep.subr.bf16.mxu1 %v12275_v5 }
 0x155   :  { %v1150_v25 = vadd.f32 %v1147_v13, %v1146_v23  ;;  %1370 = vst [vmem:[#allocation3 + $0x18] sm:$0xff] %v12711_v37  ;;  %1372 = vst [vmem:[#allocation3 + $0x28] sm:$0xff] %v12711_v37 }
 0x156   :  { %1373 = vst [vmem:[#allocation3 + $0x30] sm:$0xff] %v12711_v37  ;;  %1375 = vst [vmem:[#allocation3 + $0x40] sm:$0xff] %v12711_v37  ;;  %11319 = vmatpush3.bf16.msra.mxu1 %v12276_v7 }
 0x157   :  { %v1151_v27 = vadd.f32 %v1150_v25, %v1148_v24  ;;  %1379 = vst [vmem:[#allocation3 + $0x60] sm:$0xff] %v12711_v37  ;;  %1381 = vst [vmem:[#allocation3 + $0x70] sm:$0xff] %v12711_v37  ;;  %11320 = vmatprep.subr.bf16.mxu1 %v12278_v12 }
 0x158   :  { %1382 = vst [vmem:[#allocation3 + $0x78] sm:$0xff] %v12711_v37  ;;  %1384 = vst [vmem:[#allocation3 + $0x88] sm:$0xff] %v12711_v37 }
 0x159   :  { %v1152_v15 = vadd.f32 %v1151_v27, %v1149_v26  ;;  %1385 = vst [vmem:[#allocation3 + $0x90] sm:$0xff] %v12711_v37  ;;  %1387 = vst [vmem:[#allocation3 + $0xa0] sm:$0xff] %v12711_v37 }
 0x15a   :  { %1388 = vst [vmem:[#allocation3 + $0xa8] sm:$0xff] %v12711_v37  ;;  %1390 = vst [vmem:[#allocation3 + $0xb8] sm:$0xff] %v12711_v37  ;;  %11321 = vmatpush3.bf16.msra.mxu1 %v12279_v14  ;;  %v12285_v14 = vld [vmem:[%s18352_s6 + $0x50] sm:$0xff]  }
 0x15b   :  { %v1153_v28 = vrot.slane %v1152_v15, 4  ;;  %1391 = vst [vmem:[#allocation3 + $0xc0] sm:$0xff] %v12711_v37  ;;  %1393 = vst [vmem:[#allocation3 + $0xd0] sm:$0xff] %v12711_v37  ;;  %11466 = vmatprep.subr.bf16.mxu1 %v12297_v18 }
 0x15c   :  { %1400 = vst [vmem:[#allocation3 + $0x108] sm:$0xff] %v12711_v37  ;;  %1402 = vst [vmem:[#allocation3 + $0x118] sm:$0xff] %v12711_v37 }
 0x15d   :  { %v1154_v29 = vadd.f32 %v1153_v28, %v1152_v15  ;;  %1403 = vst [vmem:[#allocation3 + $0x120] sm:$0xff] %v12711_v37  ;;  %1405 = vst [vmem:[#allocation3 + $0x130] sm:$0xff] %v12711_v37 }
 0x15e   :  { %1406 = vst [vmem:[#allocation3 + $0x138] sm:$0xff] %v12711_v37  ;;  %1408 = vst [vmem:[#allocation3 + $0x148] sm:$0xff] %v12711_v37 }
 0x15f   :  { %v1155_v30 = vrot.slane %v1154_v29, 2  ;;  %1409 = vst [vmem:[#allocation3 + $0x150] sm:$0xff] %v12711_v37  ;;  %1411 = vst [vmem:[#allocation3 + $0x160] sm:$0xff] %v12711_v37 }
 0x160   :  { %1412 = vst [vmem:[#allocation3 + $0x168] sm:$0xff] %v12711_v37  ;;  %1414 = vst [vmem:[#allocation3 + $0x178] sm:$0xff] %v12711_v37 }
 0x161   :  { %v1156_v31 = vadd.f32 %v1155_v30, %v1154_v29  ;;  %1415 = vst [vmem:[#allocation3 + $0x180] sm:$0xff] %v12711_v37  ;;  %1417 = vst [vmem:[#allocation3 + $0x190] sm:$0xff] %v12711_v37 }
 0x162   :  { %1418 = vst [vmem:[#allocation3 + $0x198] sm:$0xff] %v12711_v37  ;;  %1420 = vst [vmem:[#allocation3 + $0x1a8] sm:$0xff] %v12711_v37 }
 0x163   :  { %v1157_v32 = vrot.slane %v1156_v31, 1  ;;  %1421 = vst [vmem:[#allocation3 + $0x1b0] sm:$0xff] %v12711_v37  ;;  %1423 = vst [vmem:[#allocation3 + $0x1c0] sm:$0xff] %v12711_v37 }
 0x164   :  { %3616 = vst [vmem:[#allocation4 + $0x30] sm:$0xff] %v12711_v37  ;;  %3621 = vst [vmem:[#allocation4 + $0x58] sm:$0xff] %v12711_v37 }
 0x165   :  { %v1158_v33 = vadd.f32 %v1157_v32, %v1156_v31  ;;  %3622 = vst [vmem:[#allocation4 + $0x60] sm:$0xff] %v12711_v37  ;;  %3627 = vst [vmem:[#allocation4 + $0x88] sm:$0xff] %v12711_v37 }
 0x166   :  { %3628 = vst [vmem:[#allocation4 + $0x90] sm:$0xff] %v12711_v37  ;;  %3633 = vst [vmem:[#allocation4 + $0xb8] sm:$0xff] %v12711_v37 }
 0x167   :  { %v1159_v34 = vmul.f32 0.03125, %v1158_v33  ;;  %3634 = vst [vmem:[#allocation4 + $0xc0] sm:$0xff] %v12711_v37  ;;  %3639 = vst [vmem:[#allocation4 + $0xe8] sm:$0xff] %v12711_v37 }
 0x168   :  { %3640 = vst [vmem:[#allocation4 + $0xf0] sm:$0xff] %v12711_v37  ;;  %3645 = vst [vmem:[#allocation4 + $0x118] sm:$0xff] %v12711_v37 }
 0x169   :  { %v1160_v35 = vadd.f32 1e-05, %v1159_v34  ;;  %3646 = vst [vmem:[#allocation4 + $0x120] sm:$0xff] %v12711_v37  ;;  %3651 = vst [vmem:[#allocation4 + $0x148] sm:$0xff] %v12711_v37 }
 0x16a   :  { %3652 = vst [vmem:[#allocation4 + $0x150] sm:$0xff] %v12711_v37  ;;  %3657 = vst [vmem:[#allocation4 + $0x178] sm:$0xff] %v12711_v37 }
 0x16b   :  { %12469 = vrsqrt.f32 %v1160_v35  ;;  %3658 = vst [vmem:[#allocation4 + $0x180] sm:$0xff] %v12711_v37  ;;  %3663 = vst [vmem:[#allocation4 + $0x1a8] sm:$0xff] %v12711_v37 }
 0x16c   :  { %3664 = vst [vmem:[#allocation4 + $0x1b0] sm:$0xff] %v12711_v37  ;;  %3669 = vst [vmem:[#allocation4 + $0x1d8] sm:$0xff] %v12711_v37 }
 0x16d   :  { %3670 = vst [vmem:[#allocation4 + $0x1e0] sm:$0xff] %v12711_v37  ;;  %3675 = vst [vmem:[#allocation4 + $0x208] sm:$0xff] %v12711_v37 }
 0x16e   :  { %3676 = vst [vmem:[#allocation4 + $0x210] sm:$0xff] %v12711_v37  ;;  %3681 = vst [vmem:[#allocation4 + $0x238] sm:$0xff] %v12711_v37 }
 0x16f   :  { %3682 = vst [vmem:[#allocation4 + $0x240] sm:$0xff] %v12711_v37  ;;  %3687 = vst [vmem:[#allocation4 + $0x268] sm:$0xff] %v12711_v37 }
 0x170   :  { %3688 = vst [vmem:[#allocation4 + $0x270] sm:$0xff] %v12711_v37  ;;  %3693 = vst [vmem:[#allocation4 + $0x298] sm:$0xff] %v12711_v37 }
 0x171   :  { %3694 = vst [vmem:[#allocation4 + $0x2a0] sm:$0xff] %v12711_v37  ;;  %3699 = vst [vmem:[#allocation4 + $0x2c8] sm:$0xff] %v12711_v37 }
 0x172   :  { %3700 = vst [vmem:[#allocation4 + $0x2d0] sm:$0xff] %v12711_v37  ;;  %3705 = vst [vmem:[#allocation4 + $0x2f8] sm:$0xff] %v12711_v37 }
 0x173   :  { %3706 = vst [vmem:[#allocation4 + $0x300] sm:$0xff] %v12711_v37  ;;  %3711 = vst [vmem:[#allocation4 + $0x328] sm:$0xff] %v12711_v37 }
 0x174   :  { %3724 = vst [vmem:[#allocation4 + $0x390] sm:$0xff] %v12711_v37  ;;  %3729 = vst [vmem:[#allocation4 + $0x3b8] sm:$0xff] %v12711_v37 }
 0x175   :  { %v12470_v36 = vpop.eup %12469  ;;  %3730 = vst [vmem:[#allocation4 + $0x3c0] sm:$0xff] %v12711_v37  ;;  %3735 = vst [vmem:[#allocation4 + $0x3e8] sm:$0xff] %v12711_v37 }
 0x176   :  { %v1162_v39 = vmul.f32 %v12470_v36, %v1142_v19  ;;  %v1163_v40 = vmul.f32 %v12470_v36, %v1143_v20  ;;  %v1164_v9 = vmul.f32 %v12470_v36, %v1144_v21  ;;  %v1165_v41 = vmul.f32 %v12470_v36, %v1145_v22  ;;  %3736 = vst [vmem:[#allocation4 + $0x3f0] sm:$0xff] %v12711_v37 }
 0x177   :  { %3741 = vst [vmem:[#allocation4 + $0x418] sm:$0xff] %v12711_v37  ;;  %3742 = vst [vmem:[#allocation4 + $0x420] sm:$0xff] %v12711_v37 }
 0x178   :  { %v1173_v11 = vmul.f32 %v10723_v38, %v1162_v39  ;;  %v1174_v43 = vmul.f32 %v10723_v38, %v1163_v40  ;;  %v1175_v44 = vmul.f32 %v10723_v38, %v1164_v9  ;;  %v1176_v45 = vmul.f32 %v10723_v38, %v1165_v41  ;;  %3747 = vst [vmem:[#allocation4 + $0x448] sm:$0xff] %v12711_v37 }
 0x179   :  { %3748 = vst [vmem:[#allocation4 + $0x450] sm:$0xff] %v12711_v37  ;;  %3753 = vst [vmem:[#allocation4 + $0x478] sm:$0xff] %v12711_v37 }
 0x17a   :  { %v1184_v46 = vadd.f32 %v10724_v42, %v1173_v11  ;;  %v1185_v47 = vadd.f32 %v10724_v42, %v1174_v43  ;;  %v1186_v48 = vadd.f32 %v10724_v42, %v1175_v44  ;;  %v1187_v50 = vadd.f32 %v10724_v42, %v1176_v45  ;;  %3754 = vst [vmem:[#allocation4 + $0x480] sm:$0xff] %v12711_v37 }
 0x17b   :  { %3759 = vst [vmem:[#allocation4 + $0x4a8] sm:$0xff] %v12711_v37  ;;  %3760 = vst [vmem:[#allocation4 + $0x4b0] sm:$0xff] %v12711_v37 }
 0x17c   :  { %v1204_v51 = vpack.c.bf16 %v1185_v47, %v1184_v46  ;;  %v1205_v52 = vpack.c.bf16 %v1187_v50, %v1186_v48  ;;  %3765 = vst [vmem:[#allocation4 + $0x4d8] sm:$0xff] %v12711_v37  ;;  %3766 = vst [vmem:[#allocation4 + $0x4e0] sm:$0xff] %v12711_v37 }
 0x17d   :  { %3771 = vst [vmem:[#allocation4 + $0x508] sm:$0xff] %v12711_v37  ;;  %3772 = vst [vmem:[#allocation4 + $0x510] sm:$0xff] %v12711_v37 }
 0x17e   :  { %11706 = vmatprep.subr.bf16.mxu0 %v1204_v51  ;;  %3777 = vst [vmem:[#allocation4 + $0x538] sm:$0xff] %v12711_v37  ;;  %3778 = vst [vmem:[#allocation4 + $0x540] sm:$0xff] %v12711_v37 }
 0x17f   :  { %11707 = vmatpush3.bf16.msra.mxu0 %v1204_v51  ;;  %3783 = vst [vmem:[#allocation4 + $0x568] sm:$0xff] %v12711_v37  ;;  %3784 = vst [vmem:[#allocation4 + $0x570] sm:$0xff] %v12711_v37 }
 0x180   :  { %11708 = vmatprep.subr.bf16.mxu0 %v1205_v52  ;;  %3789 = vst [vmem:[#allocation4 + $0x598] sm:$0xff] %v12711_v37  ;;  %3790 = vst [vmem:[#allocation4 + $0x5a0] sm:$0xff] %v12711_v37 }
 0x181   :  { %3795 = vst [vmem:[#allocation4 + $0x5c8] sm:$0xff] %v12711_v37  ;;  %3796 = vst [vmem:[#allocation4 + $0x5d0] sm:$0xff] %v12711_v37 }
 0x182   :  { %3801 = vst [vmem:[#allocation4 + $0x5f8] sm:$0xff] %v12711_v37  ;;  %3802 = vst [vmem:[#allocation4 + $0x600] sm:$0xff] %v12711_v37 }
 0x183   :  { %11709 = vmatpush3.bf16.msra.mxu0 %v1205_v52  ;;  %3807 = vst [vmem:[#allocation4 + $0x628] sm:$0xff] %v12711_v37  ;;  %3808 = vst [vmem:[#allocation4 + $0x630] sm:$0xff] %v12711_v37 }
 0x184   :  { %11726 = vmatprep.subr.bf16.mxu0 %v12259_v54  ;;  %3813 = vst [vmem:[#allocation4 + $0x658] sm:$0xff] %v12711_v37  ;;  %3814 = vst [vmem:[#allocation4 + $0x660] sm:$0xff] %v12711_v37 }
 0x185   :  { %3819 = vst [vmem:[#allocation4 + $0x688] sm:$0xff] %v12711_v37  ;;  %7977 = vst [vmem:[#allocation5 + $0x20] sm:$0xff] %v12711_v37 }
 0x186   :  { %11711 = vmatmul.mubr.msk.bf16.vlgmr.msra.gmra.mrb[20].mxu0 %vm364_vm0, %v12250_v55  ;;  %7979 = vst [vmem:[#allocation5 + $0x30] sm:$0xff] %v12711_v37  ;;  %7981 = vst [vmem:[#allocation5 + $0x40] sm:$0xff] %v12711_v37 }
 0x187   :  { %11714 = vmatprep.mubr.msk.bf16.mxu0 %vm364_vm0, %v12251_v56  ;;  %11727 = vmatpush3.bf16.msra.mxu0 %v12259_v54  ;;  %7983 = vst [vmem:[#allocation5 + $0x50] sm:$0xff] %v12711_v37  ;;  %7985 = vst [vmem:[#allocation5 + $0x60] sm:$0xff] %v12711_v37 }
 0x188   :  { %11728 = vmatprep.subr.bf16.mxu0 %v12262_v57  ;;  %7987 = vst [vmem:[#allocation5 + $0x70] sm:$0xff] %v12711_v37  ;;  %7989 = vst [vmem:[#allocation5 + $0x80] sm:$0xff] %v12711_v37 }
 0x189   :  { %7991 = vst [vmem:[#allocation5 + $0x90] sm:$0xff] %v12711_v37  ;;  %7993 = vst [vmem:[#allocation5 + $0xa0] sm:$0xff] %v12711_v37 }
 0x18a   :  { %7995 = vst [vmem:[#allocation5 + $0xb0] sm:$0xff] %v12711_v37  ;;  %7997 = vst [vmem:[#allocation5 + $0xc0] sm:$0xff] %v12711_v37 }
 0x18b   :  { %11729 = vmatpush3.bf16.msra.mxu0 %v12262_v57  ;;  %7999 = vst [vmem:[#allocation5 + $0xd0] sm:$0xff] %v12711_v37  ;;  %8001 = vst [vmem:[#allocation5 + $0xe0] sm:$0xff] %v12711_v37  ;;  %v12282_v57 = vld [vmem:[%s18352_s6] sm:$0xff]  }
 0x18c   :  { %11730 = vmatprep.subr.bf16.mxu0 %v12265_v58  ;;  %8003 = vst [vmem:[#allocation5 + $0xf0] sm:$0xff] %v12711_v37  ;;  %8005 = vst [vmem:[#allocation5 + $0x100] sm:$0xff] %v12711_v37 }
 0x18d   :  { %8007 = vst [vmem:[#allocation5 + $0x110] sm:$0xff] %v12711_v37  ;;  %8009 = vst [vmem:[#allocation5 + $0x120] sm:$0xff] %v12711_v37 }
 0x18e   :  { %11715 = vmatmul.mubr.msk.bf16.gmra.mrb[24].mxu0 %vm364_vm0, %v12252_v59  ;;  %8011 = vst [vmem:[#allocation5 + $0x130] sm:$0xff] %v12711_v37  ;;  %8013 = vst [vmem:[#allocation5 + $0x140] sm:$0xff] %v12711_v37 }
 0x18f   :  { %11718 = vmatprep.mubr.msk.bf16.mxu0 %vm364_vm0, %v12253_v60  ;;  %11731 = vmatpush3.bf16.msra.mxu0 %v12265_v58  ;;  %8015 = vst [vmem:[#allocation5 + $0x150] sm:$0xff] %v12711_v37  ;;  %8017 = vst [vmem:[#allocation5 + $0x160] sm:$0xff] %v12711_v37  ;;  %v12299_v58 = vld [vmem:[%s18352_s6 + $0x180] sm:$0xff]   ;;  %v12283_v60 = vld [vmem:[%s18352_s6 + $0x48] sm:$0xff]  }
 0x190   :  { %11732 = vmatprep.subr.bf16.mxu0 %v12268_v61  ;;  %8019 = vst [vmem:[#allocation5 + $0x170] sm:$0xff] %v12711_v37  ;;  %8021 = vst [vmem:[#allocation5 + $0x180] sm:$0xff] %v12711_v37 }
 0x191   :  { %8023 = vst [vmem:[#allocation5 + $0x190] sm:$0xff] %v12711_v37  ;;  %8025 = vst [vmem:[#allocation5 + $0x1a0] sm:$0xff] %v12711_v37 }
 0x192   :  { %8027 = vst [vmem:[#allocation5 + $0x1b0] sm:$0xff] %v12711_v37  ;;  %8029 = vst [vmem:[#allocation5 + $0x1c0] sm:$0xff] %v12711_v37 }
 0x193   :  { %11733 = vmatpush3.bf16.msra.mxu0 %v12268_v61  ;;  %8031 = vst [vmem:[#allocation5 + $0x1d0] sm:$0xff] %v12711_v37  ;;  %8033 = vst [vmem:[#allocation5 + $0x1e0] sm:$0xff] %v12711_v37  ;;  %v12300_v61 = vld [vmem:[%s18352_s6 + $0x1c8] sm:$0xff]  }
 0x194   :  { %8035 = vst [vmem:[#allocation5 + $0x1f0] sm:$0xff] %v12711_v37  ;;  %8037 = vst [vmem:[#allocation5 + $0x200] sm:$0xff] %v12711_v37  ;;  %11734 = vmatprep.subr.bf16.mxu0 %v13025_v6 }
 0x195   :  { %8039 = vst [vmem:[#allocation5 + $0x210] sm:$0xff] %v12711_v37  ;;  %8049 = vst [vmem:[#allocation5 + $0x260] sm:$0xff] %v12711_v37 }
 0x196   :  { %11719 = vmatmul.mubr.msk.bf16.gmra.mrb[28].mxu0 %vm364_vm0, %v12254_v62  ;;  %8051 = vst [vmem:[#allocation5 + $0x270] sm:$0xff] %v12711_v37  ;;  %8053 = vst [vmem:[#allocation5 + $0x280] sm:$0xff] %v12711_v37 }
 0x197   :  { %11722 = vmatprep.mubr.msk.bf16.mxu0 %vm364_vm0, %v12255_v63  ;;  %8055 = vst [vmem:[#allocation5 + $0x290] sm:$0xff] %v12711_v37  ;;  %8057 = vst [vmem:[#allocation5 + $0x2a0] sm:$0xff] %v12711_v37  ;;  %11735 = vmatpush3.bf16.msra.mxu0 %v13025_v6 }
 0x198   :  { %8059 = vst [vmem:[#allocation5 + $0x2b0] sm:$0xff] %v12711_v37  ;;  %8061 = vst [vmem:[#allocation5 + $0x2c0] sm:$0xff] %v12711_v37  ;;  %11736 = vmatprep.subr.bf16.mxu0 %v12274_v4 }
 0x199   :  { %8063 = vst [vmem:[#allocation5 + $0x2d0] sm:$0xff] %v12711_v37  ;;  %8065 = vst [vmem:[#allocation5 + $0x2e0] sm:$0xff] %v12711_v37 }
 0x19a   :  { %8067 = vst [vmem:[#allocation5 + $0x2f0] sm:$0xff] %v12711_v37  ;;  %8069 = vst [vmem:[#allocation5 + $0x300] sm:$0xff] %v12711_v37 }
 0x19b   :  { %8071 = vst [vmem:[#allocation5 + $0x310] sm:$0xff] %v12711_v37  ;;  %8073 = vst [vmem:[#allocation5 + $0x320] sm:$0xff] %v12711_v37  ;;  %11737 = vmatpush3.bf16.msra.mxu0 %v12274_v4  ;;  %v12301_v4 = vld [vmem:[%s18352_s6 + $0x188] sm:$0xff]  }
 0x19c   :  { %8075 = vst [vmem:[#allocation5 + $0x330] sm:$0xff] %v12711_v37  ;;  %8077 = vst [vmem:[#allocation5 + $0x340] sm:$0xff] %v12711_v37  ;;  %11738 = vmatprep.subr.bf16.mxu0 %v12277_v8 }
 0x19d   :  { %8079 = vst [vmem:[#allocation5 + $0x350] sm:$0xff] %v12711_v37  ;;  %8081 = vst [vmem:[#allocation5 + $0x360] sm:$0xff] %v12711_v37 }
 0x19e   :  { %11723 = vmatmul.mubr.msk.bf16.gmra.mrb[32].mxu0 %vm364_vm0, %v12256_v1  ;;  %8083 = vst [vmem:[#allocation5 + $0x370] sm:$0xff] %v12711_v37  ;;  %8085 = vst [vmem:[#allocation5 + $0x380] sm:$0xff] %v12711_v37 }
 0x19f   :  { %8087 = vst [vmem:[#allocation5 + $0x390] sm:$0xff] %v12711_v37  ;;  %8089 = vst [vmem:[#allocation5 + $0x3a0] sm:$0xff] %v12711_v37  ;;  %11739 = vmatpush3.bf16.msra.mxu0 %v12277_v8 }
 0x1a0   :  { %8091 = vst [vmem:[#allocation5 + $0x3b0] sm:$0xff] %v12711_v37  ;;  %8093 = vst [vmem:[#allocation5 + $0x3c0] sm:$0xff] %v12711_v37  ;;  %11740 = vmatprep.subr.bf16.mxu0 %v12280_v10 }
 0x1a1   :  { %8095 = vst [vmem:[#allocation5 + $0x3d0] sm:$0xff] %v12711_v37  ;;  %8097 = vst [vmem:[#allocation5 + $0x3e0] sm:$0xff] %v12711_v37 }
 0x1a2   :  { %8099 = vst [vmem:[#allocation5 + $0x3f0] sm:$0xff] %v12711_v37  ;;  %8101 = vst [vmem:[#allocation5 + $0x400] sm:$0xff] %v12711_v37 }
 0x1a3   :  { %8103 = vst [vmem:[#allocation5 + $0x410] sm:$0xff] %v12711_v37  ;;  %8105 = vst [vmem:[#allocation5 + $0x420] sm:$0xff] %v12711_v37  ;;  %11741 = vmatpush3.bf16.msra.mxu0 %v12280_v10 }
 0x1a4   :  { %8107 = vst [vmem:[#allocation5 + $0x430] sm:$0xff] %v12711_v37  ;;  %8109 = vst [vmem:[#allocation5 + $0x440] sm:$0xff] %v12711_v37  ;;  %11386 = vmatprep.subr.bf16.mxu0 %v12281_v16  ;;  %v12302_v16 = vld [vmem:[%s18352_s6 + $0x1d0] sm:$0xff]  }
 0x1a5   :  { %8111 = vst [vmem:[#allocation5 + $0x450] sm:$0xff] %v12711_v37 }
 0x259   :  { %v13224_v17 = vpop.f32.mrb[20].mxu0 }
 0x25a   :  { %v1445_v19 = vrot.slane %v13224_v17, 7  ;;  %v1510_v20 = vrot.slane %v13224_v17, 1  ;;  %v13228_v21 = vpop.f32.mrb[21].mxu0 }
 0x25b   :  { %v1443_v22 = vrot.slane %v13228_v21, 7  ;;  %v1508_v23 = vrot.slane %v13228_v21, 1  ;;  %v11713_v13 = vpop.f32.mrb[22].mxu0 }
 0x25c   :  { %1478 = vst [vmem:[#allocation3 + $0x48] sm:$0xfe] %v1445_v19  ;;  %1542 = vst [vmem:[#allocation3 + $0x58] sm:$0x7f] %v1510_v20  ;;  %v1446_v24 = vrot.slane %v11713_v13, 7  ;;  %v1511_v25 = vrot.slane %v11713_v13, 1  ;;  %v1692_v27 = vpack.c.bf16 %v11713_v13, %v13224_v17 }
 0x25d   :  { %v1307_v26 = vpop.f32.mrb[23].mxu0  ;;  %1476 = vst [vmem:[#allocation3 + $0x18] sm:$0xfe] %v1443_v22  ;;  %1540 = vst [vmem:[#allocation3 + $0x28] sm:$0x7f] %v1508_v23 }
 0x25e   :  { %v1444_v15 = vrot.slane %v1307_v26, 7  ;;  %v1509_v28 = vrot.slane %v1307_v26, 1  ;;  %v1689_v29 = vpack.c.bf16 %v1307_v26, %v13228_v21  ;;  %v13235_v30 = vpack.c.bf16 %v13224_v17, %v1307_v26  ;;  %1479 = vst [vmem:[#allocation3 + $0x60] sm:$0xfe] %v1446_v24  ;;  %1543 = vst [vmem:[#allocation3 + $0x70] sm:$0x7f] %v1511_v25 }
 0x260   :  { %1477 = vst [vmem:[#allocation3 + $0x30] sm:$0xfe] %v1444_v15  ;;  %1541 = vst [vmem:[#allocation3 + $0x40] sm:$0x7f] %v1509_v28  ;;  %1937 = vmatprep.mubr.bf16.mxu1 %v1689_v29  ;;  %v12286_v15 = vld [vmem:[%s18352_s6 + $0x10] sm:$0xff]  }
 0x261   :  { %v13237_v31 = vpop.f32.mrb[24].mxu0  ;;  %v12304_v28 = vld [vmem:[%s18352_s6 + $0x190] sm:$0xff]  }
 0x262   :  { %v1449_v32 = vrot.slane %v13237_v31, 7  ;;  %v1514_v33 = vrot.slane %v13237_v31, 1  ;;  %v13241_v34 = vpop.f32.mrb[25].mxu0 }
 0x263   :  { %v1447_v35 = vrot.slane %v13241_v34, 7  ;;  %v1512_v36 = vrot.slane %v13241_v34, 1  ;;  %v13245_v38 = vpop.f32.mrb[26].mxu0  ;;  %v13248_v39 = vpack.c.bf16 %v13241_v34, %v11713_v13  ;;  %v1567_v45 = vld [vmem:[#allocation3 + $0x58] sm:$0xff]  ;;  %v13326_v23 = vld [vmem:[#allocation3 + $0x48] sm:$0xff] }
 0x264   :  { %1482 = vst [vmem:[#allocation3 + $0xa8] sm:$0xfe] %v1449_v32  ;;  %1546 = vst [vmem:[#allocation3 + $0xb8] sm:$0x7f] %v1514_v33  ;;  %v1450_v40 = vrot.slane %v13245_v38, 7  ;;  %v1515_v9 = vrot.slane %v13245_v38, 1  ;;  %v1698_v42 = vpack.c.bf16 %v13245_v38, %v13237_v31 }
 0x265   :  { %v13252_v41 = vpop.f32.mrb[27].mxu0  ;;  %1480 = vst [vmem:[#allocation3 + $0x78] sm:$0xfe] %v1447_v35  ;;  %1544 = vst [vmem:[#allocation3 + $0x88] sm:$0x7f] %v1512_v36  ;;  %v13258_v44 = vld [vmem:[#allocation3 + $0x18] sm:$0xff] }
 0x266   :  { %v1448_v11 = vrot.slane %v13252_v41, 7  ;;  %v1513_v43 = vrot.slane %v13252_v41, 1  ;;  %v13260_v46 = vld [vmem:[#allocation3 + $0x70] sm:$0xff]  ;;  %v1695_v47 = vpack.c.bf16 %v13252_v41, %v13241_v34  ;;  %1483 = vst [vmem:[#allocation3 + $0xc0] sm:$0xfe] %v1450_v40  ;;  %v13266_v50 = vld [vmem:[#allocation3 + $0x28] sm:$0xff]  ;;  %v13270_v52 = vpack.c.bf16 %v13237_v31, %v13252_v41 }
 0x267   :  { %1547 = vst [vmem:[#allocation3 + $0xd0] sm:$0x7f] %v1515_v9  ;;  %v13264_v48 = vld [vmem:[#allocation3 + $0x30] sm:$0xff]  ;;  %v1564_v51 = vld [vmem:[#allocation3 + $0x40] sm:$0xff]  ;;  %v1693_v59 = vpack.c.bf16 %v13260_v46, %v1567_v45  ;;  %v12287_v32 = vld [vmem:[%s18352_s6 + $0x58] sm:$0xff]  }
 0x268   :  { %1481 = vst [vmem:[#allocation3 + $0x90] sm:$0xfe] %v1448_v11  ;;  %1545 = vst [vmem:[#allocation3 + $0xa0] sm:$0x7f] %v1513_v43  ;;  %v1688_v54 = vpack.c.bf16 %v13264_v48, %v13258_v44  ;;  %v13274_v55 = vpack.c.bf16 %v1567_v45, %v1564_v51  ;;  %v1690_v56 = vpack.c.bf16 %v1564_v51, %v13266_v50  ;;  %v13310_v12 = vld [vmem:[#allocation3 + $0x60] sm:$0xff]  ;;  %v12305_v33 = vld [vmem:[%s18352_s6 + $0x1d8] sm:$0xff]  }
 0x269   :  { %v13290_v62 = vpop.f32.mrb[28].mxu0  ;;  %v1691_v25 = vpack.c.bf16 %v13310_v12, %v13326_v23 }
 0x26a   :  { %1938 = vmatmul.mubr.bf16.vlgmr.msra.gmra.mrb[12].mxu1 %v1688_v54  ;;  %11742 = vmatprep.mubr.bf16.mxu0 %v1690_v56  ;;  %v1453_v63 = vrot.slane %v13290_v62, 7  ;;  %v1518_v1 = vrot.slane %v13290_v62, 1  ;;  %v13294_v49 = vpop.f32.mrb[29].mxu0  ;;  %v12288_v54 = vld [vmem:[%s18352_s6 + $0x18] sm:$0xff]  }
 0x26b   :  { %1945 = vmatprep.mubr.bf16.mxu1 %v1692_v27  ;;  %11743 = vmatmul.mubr.bf16.vlgmr.msra.gmra.mrb[36].mxu0 %v1693_v59  ;;  %v1451_v2 = vrot.slane %v13294_v49, 7  ;;  %v1516_v6 = vrot.slane %v13294_v49, 1  ;;  %v13298_v53 = vpop.f32.mrb[30].mxu0  ;;  %v1579_v27 = vld [vmem:[#allocation3 + $0xb8] sm:$0xff]  ;;  %v12289_v59 = vld [vmem:[%s18352_s6 + $0x60] sm:$0xff]  }
 0x26c   :  { %11387 = vmatpush3.bf16.msra.mxu0 %v12282_v57  ;;  %11467 = vmatpush3.bf16.msra.mxu1 %v12299_v58  ;;  %1486 = vst [vmem:[#allocation3 + $0x138] sm:$0xfe] %v1453_v63  ;;  %1550 = vst [vmem:[#allocation3 + $0x148] sm:$0x7f] %v1518_v1  ;;  %v1454_v5 = vrot.slane %v13298_v53, 7  ;;  %v1519_v7 = vrot.slane %v13298_v53, 1  ;;  %v1704_v10 = vpack.c.bf16 %v13298_v53, %v13290_v62 }
 0x26d   :  { %v13308_v8 = vpop.f32.mrb[31].mxu0  ;;  %11388 = vmatprep.subr.bf16.mxu0 %v12283_v60  ;;  %11468 = vmatprep.subr.bf16.mxu1 %v12300_v61  ;;  %1484 = vst [vmem:[#allocation3 + $0x108] sm:$0xfe] %v1451_v2  ;;  %1548 = vst [vmem:[#allocation3 + $0x118] sm:$0x7f] %v1516_v6  ;;  %v1573_v19 = vld [vmem:[#allocation3 + $0x88] sm:$0xff] }
 0x26e   :  { %v1452_v18 = vrot.slane %v13308_v8, 7  ;;  %v1517_v17 = vrot.slane %v13308_v8, 1  ;;  %v13322_v20 = vld [vmem:[#allocation3 + $0xd0] sm:$0xff]  ;;  %v1701_v22 = vpack.c.bf16 %v13308_v8, %v13294_v49  ;;  %1487 = vst [vmem:[#allocation3 + $0x150] sm:$0xfe] %v1454_v5  ;;  %v13330_v24 = vpack.c.bf16 %v13290_v62, %v13308_v8  ;;  %v12306_v56 = vld [vmem:[%s18352_s6 + $0x198] sm:$0xff]  }
 0x26f   :  { %1551 = vst [vmem:[#allocation3 + $0x160] sm:$0x7f] %v1519_v7  ;;  %v1576_v13 = vld [vmem:[#allocation3 + $0xa0] sm:$0xff]  ;;  %v1699_v29 = vpack.c.bf16 %v13322_v20, %v1579_v27  ;;  %v13348_v35 = vpack.c.bf16 %v1573_v19, %v13260_v46  ;;  %v13379_v58 = vld [vmem:[#allocation3 + $0x90] sm:$0xff]  ;;  %v12316_v8 = vld [vmem:[%s18352_s6 + $0x1b8] sm:$0xff]  }
 0x270   :  { %1485 = vst [vmem:[#allocation3 + $0x120] sm:$0xfe] %v1452_v18  ;;  %1549 = vst [vmem:[#allocation3 + $0x130] sm:$0x7f] %v1517_v17  ;;  %11389 = vmatpush3.bf16.msra.mxu0 %v12284_v3  ;;  %v1696_v26 = vpack.c.bf16 %v1576_v13, %v1573_v19  ;;  %11469 = vmatpush3.bf16.msra.mxu1 %v12301_v4  ;;  %v13350_v36 = vpack.c.bf16 %v1579_v27, %v1576_v13  ;;  %v12307_v60 = vld [vmem:[%s18352_s6 + $0x1e0] sm:$0xff]   ;;  %v13393_v3 = vld [vmem:[#allocation3 + $0x78] sm:$0xff] }
 0x271   :  { %11390 = vmatprep.subr.bf16.mxu0 %v12285_v14  ;;  %11470 = vmatprep.subr.bf16.mxu1 %v12302_v16  ;;  %v13352_v40 = vpop.f32.mrb[32].mxu0  ;;  %v1694_v14 = vpack.c.bf16 %v13379_v58, %v13393_v3  ;;  %v12290_v17 = vld [vmem:[%s18352_s6 + $0x20] sm:$0xff]   ;;  %v12313_v62 = vld [vmem:[%s18352_s6 + $0x98] sm:$0xff]  }
 0x272   :  { %1946 = vmatmul.mubr.bf16.gmra.mrb[16].mxu1 %v1691_v25  ;;  %11746 = vmatprep.mubr.bf16.mxu0 %v1696_v26  ;;  %v1457_v9 = vrot.slane %v13352_v40, 7  ;;  %v1522_v11 = vrot.slane %v13352_v40, 1  ;;  %v13356_v43 = vpop.f32.mrb[33].mxu0  ;;  %v12309_v19 = vld [vmem:[%s18352_s6 + $0x1a0] sm:$0xff]   ;;  %v12291_v25 = vld [vmem:[%s18352_s6 + $0x68] sm:$0xff]  }
 0x273   :  { %1953 = vmatprep.mubr.bf16.mxu1 %v1695_v47  ;;  %11747 = vmatmul.mubr.bf16.gmra.mrb[40].mxu0 %v1699_v29  ;;  %v1455_v45 = vrot.slane %v13356_v43, 7  ;;  %v1520_v46 = vrot.slane %v13356_v43, 1  ;;  %v13363_v51 = vpop.f32.mrb[34].mxu0  ;;  %v13373_v34 = vpack.c.bf16 %v13356_v43, %v13298_v53  ;;  %v1597_v18 = vld [vmem:[#allocation3 + $0x148] sm:$0xff] }
 0x274   :  { %11391 = vmatpush3.bf16.msra.mxu0 %v12286_v15  ;;  %11471 = vmatpush3.bf16.msra.mxu1 %v12304_v28  ;;  %1490 = vst [vmem:[#allocation3 + $0x198] sm:$0xfe] %v1457_v9  ;;  %1554 = vst [vmem:[#allocation3 + $0x1a8] sm:$0x7f] %v1522_v11  ;;  %v1458_v41 = vrot.slane %v13363_v51, 7  ;;  %v1523_v47 = vrot.slane %v13363_v51, 1  ;;  %v1710_v61 = vpack.c.bf16 %v13363_v51, %v13352_v40 }
 0x275   :  { %v13377_v57 = vpop.f32.mrb[35].mxu0  ;;  %11392 = vmatprep.subr.bf16.mxu0 %v12287_v32  ;;  %11472 = vmatprep.subr.bf16.mxu1 %v12305_v33  ;;  %1488 = vst [vmem:[#allocation3 + $0x168] sm:$0xfe] %v1455_v45  ;;  %1552 = vst [vmem:[#allocation3 + $0x178] sm:$0x7f] %v1520_v46  ;;  %v13395_v4 = vld [vmem:[#allocation3 + $0x118] sm:$0xff] }
 0x276   :  { %v1456_v63 = vrot.slane %v13377_v57, 7  ;;  %v1521_v1 = vrot.slane %v13377_v57, 1  ;;  %v1600_v2 = vld [vmem:[#allocation3 + $0x160] sm:$0xff]  ;;  %v1707_v6 = vpack.c.bf16 %v13377_v57, %v13356_v43  ;;  %1491 = vst [vmem:[#allocation3 + $0x1b0] sm:$0xfe] %v1458_v41  ;;  %v13399_v7 = vpack.c.bf16 %v13352_v40, %v13377_v57  ;;  %v12310_v26 = vld [vmem:[%s18352_s6 + $0x1e8] sm:$0xff]  }
 0x277   :  { %1555 = vst [vmem:[#allocation3 + $0x1c0] sm:$0x7f] %v1523_v47  ;;  %v1594_v5 = vld [vmem:[#allocation3 + $0x130] sm:$0xff]  ;;  %v1705_v13 = vpack.c.bf16 %v1600_v2, %v1597_v18  ;;  %v12292_v15 = vld [vmem:[%s18352_s6 + $0x28] sm:$0xff]   ;;  %v13430_v32 = vld [vmem:[#allocation3 + $0xc0] sm:$0xff] }
 0x278   :  { %1489 = vst [vmem:[#allocation3 + $0x180] sm:$0xfe] %v1456_v63  ;;  %1553 = vst [vmem:[#allocation3 + $0x190] sm:$0x7f] %v1521_v1  ;;  %11393 = vmatpush3.bf16.msra.mxu0 %v12288_v54  ;;  %v1702_v16 = vpack.c.bf16 %v1594_v5, %v13395_v4  ;;  %11473 = vmatpush3.bf16.msra.mxu1 %v12306_v56  ;;  %v13416_v27 = vpack.c.bf16 %v1597_v18, %v1594_v5  ;;  %v12293_v28 = vld [vmem:[%s18352_s6 + $0x70] sm:$0xff]   ;;  %v12311_v29 = vld [vmem:[%s18352_s6 + $0x1a8] sm:$0xff]  }
 0x279   :  { %11394 = vmatprep.subr.bf16.mxu0 %v12289_v59  ;;  %11474 = vmatprep.subr.bf16.mxu1 %v12307_v60  ;;  %v13439_v11 = vld [vmem:[#allocation3 + $0xa8] sm:$0xff]  ;;  %v12294_v41 = vld [vmem:[%s18352_s6 + $0x30] sm:$0xff]   ;;  %v12295_v59 = vld [vmem:[%s18352_s6 + $0x78] sm:$0xff]   ;;  %v1617_v1 = vpack.c.bf16 %v13228_v21, %v12711_v37  ;;  %v1616_v18 = vpack.c.bf16 %v13258_v44, %v12711_v37 }
 0x27a   :  { %1954 = vmatmul.mubr.bf16.gmra.mrb[20].mxu1 %v1694_v14  ;;  %11750 = vmatprep.mubr.bf16.mxu0 %v1702_v16  ;;  %v1697_v46 = vpack.c.bf16 %v13430_v32, %v13439_v11  ;;  %v12314_v60 = vld [vmem:[%s18352_s6 + $0x1b0] sm:$0xff]   ;;  %v12296_v5 = vld [vmem:[%s18352_s6 + $0x38] sm:$0xff]   ;;  %v13466_v14 = vld [vmem:[#allocation3 + $0x120] sm:$0xff] }
 0x27b   :  { %1961 = vmatprep.mubr.bf16.mxu1 %v1698_v42  ;;  %11751 = vmatmul.mubr.bf16.gmra.mrb[44].mxu0 %v1705_v13  ;;  %v12312_v42 = vld [vmem:[%s18352_s6 + $0x1f0] sm:$0xff]   ;;  %v1609_v56 = vld [vmem:[#allocation3 + $0x1a8] sm:$0xff]  ;;  %v12298_v21 = vld [vmem:[%s18352_s6 + $0x80] sm:$0xff]  }
 0x27c   :  { %11395 = vmatpush3.bf16.msra.mxu0 %v12290_v17  ;;  %11475 = vmatpush3.bf16.msra.mxu1 %v12309_v19  ;;  %v1603_v31 = vld [vmem:[#allocation3 + $0x178] sm:$0xff]  ;;  %v12303_v17 = vld [vmem:[%s18352_s6 + $0x88] sm:$0xff]   ;;  %v1598_v19 = vld [vmem:[#allocation3 + $0x150] sm:$0xff] }
 0x27d   :  { %11396 = vmatprep.subr.bf16.mxu0 %v12291_v25  ;;  %11476 = vmatprep.subr.bf16.mxu1 %v12310_v26  ;;  %v13437_v9 = vpack.c.bf16 %v1603_v31, %v1600_v2  ;;  %v12315_v2 = vld [vmem:[%s18352_s6 + $0x1f8] sm:$0xff]   ;;  %v12308_v44 = vld [vmem:[%s18352_s6 + $0x90] sm:$0xff]   ;;  %v1619_v26 = vpack.c.bf16 %v13326_v23, %v13264_v48  ;;  %v12317_v48 = vld [vmem:[%s18352_s6 + $0xa0] sm:$0xff]  }
 0x27e   :  { %v13435_v33 = vld [vmem:[#allocation3 + $0x1c0] sm:$0xff]  ;;  %v1595_v13 = vld [vmem:[#allocation3 + $0x138] sm:$0xff]  ;;  %v12318_v43 = vld [vmem:[%s18352_s6 + $0xa8] sm:$0xff]  }
 0x27f   :  { %v1606_v45 = vld [vmem:[#allocation3 + $0x190] sm:$0xff]  ;;  %v1711_v47 = vpack.c.bf16 %v13435_v33, %v1609_v56  ;;  %v1703_v25 = vpack.c.bf16 %v1598_v19, %v1595_v13  ;;  %v1604_v53 = vld [vmem:[#allocation3 + $0x180] sm:$0xff]  ;;  %v12320_v40 = vld [vmem:[%s18352_s6 + $0xb8] sm:$0xff]  }
 0x280   :  { %11397 = vmatpush3.bf16.msra.mxu0 %v12292_v15  ;;  %v1708_v54 = vpack.c.bf16 %v1606_v45, %v1603_v31  ;;  %11477 = vmatpush3.bf16.msra.mxu1 %v12311_v29  ;;  %v13453_v63 = vpack.c.bf16 %v1609_v56, %v1606_v45  ;;  %v1622_v15 = vpack.c.bf16 %v13393_v3, %v13310_v12  ;;  %v13508_v57 = vld [vmem:[#allocation3 + $0x1b0] sm:$0xff]  ;;  %v12321_v29 = vld [vmem:[%s18352_s6 + $0x200] sm:$0xff]   ;;  %v12328_v45 = vld [vmem:[%s18352_s6 + $0x238] sm:$0xff]  }
 0x281   :  { %11398 = vmatprep.subr.bf16.mxu0 %v12293_v28  ;;  %11478 = vmatprep.subr.bf16.mxu1 %v12312_v42  ;;  %v12319_v12 = vld [vmem:[%s18352_s6 + $0xb0] sm:$0xff]   ;;  %v1625_v28 = vpack.c.bf16 %v13439_v11, %v13379_v58  ;;  %v13525_v58 = vld [vmem:[#allocation3] sm:$0xff] }
 0x282   :  { %1962 = vmatmul.mubr.bf16.gmra.mrb[24].mxu1 %v1697_v46  ;;  %11754 = vmatprep.mubr.bf16.mxu0 %v1708_v54  ;;  %v1618_v11 = vpack.c.bf16 %v13266_v50, %v13525_v58  ;;  %v12323_v50 = vld [vmem:[%s18352_s6 + $0x210] sm:$0xff]   ;;  %v2439_v46 = vpack.c.bf16 %v13525_v58, %v13322_v20  ;;  %v2442_v54 = vpack.c.bf16 %v13525_v58, %v13435_v33 }
 0x283   :  { %1969 = vmatprep.mubr.bf16.mxu1 %v1701_v22  ;;  %11755 = vmatmul.mubr.bf16.gmra.mrb[48].mxu0 %v1711_v47  ;;  %v1589_v22 = vld [vmem:[#allocation3 + $0x108] sm:$0xff] }
 0x284   :  { %11399 = vmatpush3.bf16.msra.mxu0 %v12294_v41  ;;  %2275 = vmatprep.mubr.bf16.mxu0 %v1617_v1  ;;  %v1700_v16 = vpack.c.bf16 %v13466_v14, %v1589_v22  ;;  %v1628_v31 = vpack.c.bf16 %v1589_v22, %v13525_v58 }
 0x285   :  { %11400 = vmatprep.subr.bf16.mxu0 %v12295_v59  ;;  %11479 = vmatpush3.bf16.msra.mxu1 %v12314_v60 }
 0x286   :  { %11480 = vmatprep.subr.bf16.mxu1 %v12315_v2 }
 0x288   :  { %11401 = vmatpush3.bf16.msra.mxu0 %v12296_v5 }
 0x289   :  { %11758 = vmatprep.subr.bf16.mxu0 %v12298_v21  ;;  %11481 = vmatpush3.bf16.msra.mxu1 %v12316_v8 }
 0x28a   :  { %1970 = vmatmul.mubr.bf16.gmra.mrb[28].mxu1 %v1700_v16 }
 0x28b   :  { %1977 = vmatprep.mubr.bf16.mxu1 %v1704_v10  ;;  %2276 = vmatmul.mubr.bf16.vlgmr.msra.gmra.mrb[52].mxu0 %v1616_v18  ;;  %v1601_v10 = vld [vmem:[#allocation3 + $0x168] sm:$0xff] }
 0x28c   :  { %2283 = vmatprep.mubr.bf16.mxu0 %v13235_v30  ;;  %11759 = vmatpush3.bf16.msra.mxu0 %v12298_v21  ;;  %v1706_v23 = vpack.c.bf16 %v1604_v53, %v1601_v10 }
 0x28d   :  { %11760 = vmatprep.subr.bf16.mxu0 %v12303_v17 }
 0x290   :  { %11761 = vmatpush3.bf16.msra.mxu0 %v12303_v17 }
 0x291   :  { %11762 = vmatprep.subr.bf16.mxu0 %v12308_v44 }
 0x292   :  { %1978 = vmatmul.mubr.bf16.gmra.mrb[32].mxu1 %v1703_v25 }
 0x293   :  { %1985 = vmatprep.mubr.bf16.mxu1 %v1707_v6  ;;  %2284 = vmatmul.mubr.bf16.gmra.mrb[56].mxu0 %v1619_v26  ;;  %v1607_v6 = vld [vmem:[#allocation3 + $0x198] sm:$0xff] }
 0x294   :  { %2291 = vmatprep.mubr.bf16.mxu0 %v13248_v39  ;;  %11763 = vmatpush3.bf16.msra.mxu0 %v12308_v44  ;;  %v1709_v3 = vpack.c.bf16 %v13508_v57, %v1607_v6  ;;  %v1637_v42 = vpack.c.bf16 %v1607_v6, %v1604_v53 }
 0x295   :  { %11764 = vmatprep.subr.bf16.mxu0 %v12313_v62 }
 0x298   :  { %11765 = vmatpush3.bf16.msra.mxu0 %v12313_v62 }
 0x299   :  { %11766 = vmatprep.subr.bf16.mxu0 %v12317_v48 }
 0x29a   :  { %1986 = vmatmul.mubr.bf16.gmra.mrb[36].mxu1 %v1706_v23 }
 0x29b   :  { %1993 = vmatprep.mubr.bf16.mxu1 %v1710_v61  ;;  %2292 = vmatmul.mubr.bf16.gmra.mrb[60].mxu0 %v1622_v15  ;;  %v1629_v61 = vpack.c.bf16 %v13294_v49, %v12711_v37  ;;  %v1631_v37 = vpack.c.bf16 %v1595_v13, %v13466_v14  ;;  %v2438_v49 = vpack.c.bf16 %v13525_v58, %v13245_v38  ;;  %v12322_v38 = vld [vmem:[%s18352_s6 + $0x208] sm:$0xff]  }
 0x29c   :  { %2299 = vmatprep.mubr.bf16.mxu0 %v13270_v52  ;;  %11767 = vmatpush3.bf16.msra.mxu0 %v12317_v48 }
 0x29d   :  { %11768 = vmatprep.subr.bf16.mxu0 %v12318_v43 }
 0x2a0   :  { %11769 = vmatpush3.bf16.msra.mxu0 %v12318_v43 }
 0x2a1   :  { %11770 = vmatprep.subr.bf16.mxu0 %v12319_v12 }
 0x2a2   :  { %1994 = vmatmul.mubr.bf16.gmra.mrb[40].mxu1 %v1709_v3 }
 0x2a3   :  { %2300 = vmatmul.mubr.bf16.gmra.mrb[64].mxu0 %v1625_v28  ;;  %2668 = vmatprep.mubr.bf16.mxu1 %v13235_v30  ;;  %v1634_v30 = vpack.c.bf16 %v1601_v10, %v1598_v19 }
 0x2a4   :  { %2307 = vmatprep.mubr.bf16.mxu0 %v1629_v61  ;;  %11771 = vmatpush3.bf16.msra.mxu0 %v12319_v12 }
 0x2a5   :  { %11772 = vmatprep.subr.bf16.mxu0 %v12320_v40 }
 0x2a8   :  { %11773 = vmatpush3.bf16.msra.mxu0 %v12320_v40 }
 0x2a9   :  { %11790 = vmatprep.subr.bf16.mxu0 %v12321_v29 }
 0x2aa   :  { %2669 = vmatmul.mubr.bf16.vlgmr.msra.gmra.mrb[44].mxu1 %v1619_v26 }
 0x2ab   :  { %2308 = vmatmul.mubr.bf16.gmra.mrb[68].mxu0 %v1628_v31  ;;  %2676 = vmatprep.mubr.bf16.mxu1 %v13248_v39  ;;  %v2437_v39 = vpack.c.bf16 %v13525_v58, %v13430_v32  ;;  %v2441_v32 = vpack.c.bf16 %v13525_v58, %v13363_v51  ;;  %v2440_v51 = vpack.c.bf16 %v13525_v58, %v13508_v57 }
 0x2ac   :  { %2315 = vmatprep.mubr.bf16.mxu0 %v13330_v24 }
 0x2b2   :  { %2677 = vmatmul.mubr.bf16.gmra.mrb[48].mxu1 %v1622_v15 }
 0x2b3   :  { %2316 = vmatmul.mubr.bf16.gmra.mrb[72].mxu0 %v1631_v37  ;;  %2684 = vmatprep.mubr.bf16.mxu1 %v13270_v52  ;;  %v12324_v52 = vld [vmem:[%s18352_s6 + $0x218] sm:$0xff]  }
 0x2b4   :  { %2323 = vmatprep.mubr.bf16.mxu0 %v13373_v34 }
 0x2ba   :  { %2685 = vmatmul.mubr.bf16.gmra.mrb[52].mxu1 %v1625_v28 }
 0x2bb   :  { %2324 = vmatmul.mubr.bf16.gmra.mrb[76].mxu0 %v1634_v30  ;;  %2692 = vmatprep.mubr.bf16.mxu1 %v2438_v49 }
 0x2bc   :  { %2331 = vmatprep.mubr.bf16.mxu0 %v13399_v7 }
 0x2c2   :  { %2693 = vmatmul.mubr.bf16.gmra.mrb[56].mxu1 %v2437_v39 }
 0x2c3   :  { %2332 = vmatmul.mubr.bf16.gmra.mrb[80].mxu0 %v1637_v42  ;;  %2700 = vmatprep.mubr.bf16.mxu1 %v13330_v24  ;;  %v1630_v24 = vpack.c.bf16 %v13395_v4, %v13525_v58  ;;  %v12326_v4 = vld [vmem:[%s18352_s6 + $0x228] sm:$0xff]  }
 0x2c4   :  { %11774 = vmatprep.mubr.bf16.mxu0 %v1618_v11 }
 0x2ca   :  { %2701 = vmatmul.mubr.bf16.gmra.mrb[60].mxu1 %v1631_v37 }
 0x2cb   :  { %11775 = vmatmul.mubr.bf16.vlgmr.msra.gmra.mrb[36].mxu0 %v13274_v55  ;;  %2708 = vmatprep.mubr.bf16.mxu1 %v13373_v34  ;;  %v12325_v34 = vld [vmem:[%s18352_s6 + $0x220] sm:$0xff]  }
 0x2cc   :  { %11778 = vmatprep.mubr.bf16.mxu0 %v13348_v35  ;;  %11791 = vmatpush3.bf16.msra.mxu0 %v12321_v29 }
 0x2cd   :  { %11792 = vmatprep.subr.bf16.mxu0 %v12322_v38 }
 0x2d0   :  { %11793 = vmatpush3.bf16.msra.mxu0 %v12322_v38 }
 0x2d1   :  { %11794 = vmatprep.subr.bf16.mxu0 %v12323_v50 }
 0x2d2   :  { %2709 = vmatmul.mubr.bf16.gmra.mrb[64].mxu1 %v1634_v30 }
 0x2d3   :  { %11779 = vmatmul.mubr.bf16.gmra.mrb[40].mxu0 %v13350_v36  ;;  %2716 = vmatprep.mubr.bf16.mxu1 %v13399_v7  ;;  %v12327_v7 = vld [vmem:[%s18352_s6 + $0x230] sm:$0xff]  }
 0x2d4   :  { %11782 = vmatprep.mubr.bf16.mxu0 %v1630_v24  ;;  %11795 = vmatpush3.bf16.msra.mxu0 %v12323_v50 }
 0x2d5   :  { %11796 = vmatprep.subr.bf16.mxu0 %v12324_v52 }
 0x2d8   :  { %11797 = vmatpush3.bf16.msra.mxu0 %v12324_v52 }
 0x2d9   :  { %11798 = vmatprep.subr.bf16.mxu0 %v12325_v34 }
 0x2da   :  { %2717 = vmatmul.mubr.bf16.gmra.mrb[68].mxu1 %v1637_v42 }
 0x2db   :  { %11783 = vmatmul.mubr.bf16.gmra.mrb[44].mxu0 %v13416_v27  ;;  %2724 = vmatprep.mubr.bf16.mxu1 %v2441_v32 }
 0x2dc   :  { %11786 = vmatprep.mubr.bf16.mxu0 %v13437_v9  ;;  %11799 = vmatpush3.bf16.msra.mxu0 %v12325_v34 }
 0x2dd   :  { %11800 = vmatprep.subr.bf16.mxu0 %v12326_v4 }
 0x2e0   :  { %11801 = vmatpush3.bf16.msra.mxu0 %v12326_v4 }
 0x2e1   :  { %11802 = vmatprep.subr.bf16.mxu0 %v12327_v7 }
 0x2e2   :  { %2725 = vmatmul.mubr.bf16.gmra.mrb[72].mxu1 %v2440_v51 }
 0x2e3   :  { %11787 = vmatmul.mubr.bf16.gmra.mrb[48].mxu0 %v13453_v63 }
 0x2e4   :  { %11803 = vmatpush3.bf16.msra.mxu0 %v12327_v7  ;;  %11806 = vmatprep.mubr.bf16.mxu0 %v13274_v55 }
 0x2e5   :  { %11804 = vmatprep.subr.bf16.mxu0 %v12328_v45 }
 0x2e8   :  { %11805 = vmatpush3.bf16.msra.mxu0 %v12328_v45 }
 0x2eb   :  { %11807 = vmatmul.mubr.bf16.vlgmr.msra.gmra.mrb[36].mxu0 %v13348_v35 }
 0x2ec   :  { %11810 = vmatprep.mubr.bf16.mxu0 %v13350_v36 }
 0x2f3   :  { %11811 = vmatmul.mubr.bf16.gmra.mrb[40].mxu0 %v2439_v46 }
 0x2f4   :  { %11814 = vmatprep.mubr.bf16.mxu0 %v13416_v27 }
 0x2fb   :  { %11815 = vmatmul.mubr.bf16.gmra.mrb[44].mxu0 %v13437_v9 }
 0x2fc   :  { %11818 = vmatprep.mubr.bf16.mxu0 %v13453_v63 }
 0x303   :  { %11819 = vmatmul.mubr.bf16.gmra.mrb[48].mxu0 %v2442_v54 }
 0x33d   :  { %v11322_v55 = vpop.f32.mrb[12].mxu1 }
 0x33e   :  { %v11323_v56 = vpop.f32.mrb[13].mxu1 }
 0x33f   :  { %v11324_v41 = vadd.f32 %v11323_v56, %v11322_v55  ;;  %v11325_v35 = vpop.f32.mrb[14].mxu1 }
 0x340   :  { %v11326_v47 = vpop.f32.mrb[15].mxu1 }
 0x341   :  { %v11327_v36 = vadd.f32 %v11326_v47, %v11325_v35 }
 0x345   :  { %v11328_v59 = vpop.f32.mrb[16].mxu1 }
 0x346   :  { %v11329_v60 = vpop.f32.mrb[17].mxu1 }
 0x347   :  { %v11330_v20 = vadd.f32 %v11329_v60, %v11328_v59  ;;  %v11331_v1 = vpop.f32.mrb[18].mxu1 }
 0x348   :  { %v11332_v2 = vpop.f32.mrb[19].mxu1 }
 0x349   :  { %v11333_v27 = vadd.f32 %v11332_v2, %v11331_v1 }
 0x34d   :  { %v11334_v5 = vpop.f32.mrb[20].mxu1 }
 0x34e   :  { %v11335_v9 = vpop.f32.mrb[21].mxu1 }
 0x34f   :  { %v11336_v14 = vadd.f32 %v11335_v9, %v11334_v5  ;;  %v11337_v63 = vpop.f32.mrb[22].mxu1 }
 0x350   :  { %v11338_v21 = vpop.f32.mrb[23].mxu1 }
 0x351   :  { %v11339_v8 = vadd.f32 %v11338_v21, %v11337_v63 }
 0x355   :  { %v11340_v33 = vpop.f32.mrb[24].mxu1 }
 0x356   :  { %v11341_v22 = vpop.f32.mrb[25].mxu1 }
 0x357   :  { %v11342_v16 = vadd.f32 %v11341_v22, %v11340_v33  ;;  %v11343_v18 = vpop.f32.mrb[26].mxu1 }
 0x358   :  { %v11344_v17 = vpop.f32.mrb[27].mxu1 }
 0x359   :  { %v11345_v19 = vadd.f32 %v11344_v17, %v11343_v18 }
 0x35d   :  { %v11346_v44 = vpop.f32.mrb[28].mxu1 }
 0x35e   :  { %v11347_v13 = vpop.f32.mrb[29].mxu1  ;;  %v11402_v25 = vpop.f32.mrb[52].mxu0 }
 0x35f   :  { %v13586_v26 = vadd.f32 %v11347_v13, %v11346_v44  ;;  %v11349_v62 = vpop.f32.mrb[30].mxu1  ;;  %v11403_v53 = vpop.f32.mrb[53].mxu0 }
 0x360   :  { %v11404_v48 = vadd.f32 %v11403_v53, %v11402_v25  ;;  %v11350_v10 = vpop.f32.mrb[31].mxu1  ;;  %v11405_v23 = vpop.f32.mrb[54].mxu0 }
 0x361   :  { %v11351_v15 = vadd.f32 %v11350_v10, %v11349_v62  ;;  %v11406_v43 = vpop.f32.mrb[55].mxu0 }
 0x362   :  { %v12161_v57 = vadd.f32 %v11404_v48, %v11324_v41  ;;  %v11407_v12 = vadd.f32 %v11406_v43, %v11405_v23 }
 0x364   :  { %v12167_v6 = vadd.f32 %v11407_v12, %v11327_v36 }
 0x365   :  { %v11352_v3 = vpop.f32.mrb[32].mxu1 }
 0x366   :  { %v11353_v28 = vpop.f32.mrb[33].mxu1  ;;  %v11408_v40 = vpop.f32.mrb[56].mxu0 }
 0x367   :  { %v13588_v61 = vadd.f32 %v11353_v28, %v11352_v3  ;;  %v11355_v29 = vpop.f32.mrb[34].mxu1  ;;  %v11409_v58 = vpop.f32.mrb[57].mxu0 }
 0x368   :  { %v11410_v31 = vadd.f32 %v11409_v58, %v11408_v40  ;;  %v11356_v37 = vpop.f32.mrb[35].mxu1  ;;  %v11411_v30 = vpop.f32.mrb[58].mxu0 }
 0x369   :  { %v13590_v49 = vadd.f32 %v11356_v37, %v11355_v29  ;;  %v11412_v39 = vpop.f32.mrb[59].mxu0 }
 0x36a   :  { %v12158_v42 = vadd.f32 %v11410_v31, %v11330_v20  ;;  %v11413_v11 = vadd.f32 %v11412_v39, %v11411_v30 }
 0x36c   :  { %v12164_v38 = vadd.f32 %v11413_v11, %v11333_v27 }
 0x36d   :  { %v11358_v50 = vpop.f32.mrb[36].mxu1 }
 0x36e   :  { %v11359_v52 = vpop.f32.mrb[37].mxu1  ;;  %v11414_v24 = vpop.f32.mrb[60].mxu0 }
 0x36f   :  { %v13592_v34 = vadd.f32 %v11359_v52, %v11358_v50  ;;  %v11361_v32 = vpop.f32.mrb[38].mxu1  ;;  %v11415_v4 = vpop.f32.mrb[61].mxu0 }
 0x370   :  { %v11416_v7 = vadd.f32 %v11415_v4, %v11414_v24  ;;  %v11362_v51 = vpop.f32.mrb[39].mxu1  ;;  %v11417_v45 = vpop.f32.mrb[62].mxu0 }
 0x371   :  { %v13594_v46 = vadd.f32 %v11362_v51, %v11361_v32  ;;  %v11418_v54 = vpop.f32.mrb[63].mxu0 }
 0x372   :  { %v12173_v55 = vadd.f32 %v11416_v7, %v11336_v14  ;;  %v11419_v56 = vadd.f32 %v11418_v54, %v11417_v45 }
 0x374   :  { %v12179_v41 = vadd.f32 %v11419_v56, %v11339_v8 }
 0x375   :  { %v11364_v35 = vpop.f32.mrb[40].mxu1 }
 0x376   :  { %v11365_v47 = vpop.f32.mrb[41].mxu1  ;;  %v11420_v36 = vpop.f32.mrb[64].mxu0 }
 0x377   :  { %v13596_v59 = vadd.f32 %v11365_v47, %v11364_v35  ;;  %v11367_v60 = vpop.f32.mrb[42].mxu1  ;;  %v11421_v20 = vpop.f32.mrb[65].mxu0 }
 0x378   :  { %v11422_v1 = vadd.f32 %v11421_v20, %v11420_v36  ;;  %v11368_v2 = vpop.f32.mrb[43].mxu1  ;;  %v11423_v27 = vpop.f32.mrb[66].mxu0 }
 0x379   :  { %v13598_v5 = vadd.f32 %v11368_v2, %v11367_v60  ;;  %v11424_v9 = vpop.f32.mrb[67].mxu0 }
 0x37a   :  { %v12170_v63 = vadd.f32 %v11422_v1, %v11342_v16  ;;  %v11425_v21 = vadd.f32 %v11424_v9, %v11423_v27 }
 0x37c   :  { %v13600_v33 = vadd.f32 %v11425_v21, %v11345_v19 }
 0x37d   :  { %v11482_v14 = vpop.f32.mrb[44].mxu1 }
 0x37e   :  { %v11426_v22 = vpop.f32.mrb[68].mxu0  ;;  %v11483_v8 = vpop.f32.mrb[45].mxu1 }
 0x37f   :  { %v11484_v18 = vadd.f32 %v11483_v8, %v11482_v14  ;;  %v11427_v17 = vpop.f32.mrb[69].mxu0  ;;  %v11485_v44 = vpop.f32.mrb[46].mxu1 }
 0x380   :  { %v11428_v13 = vadd.f32 %v11427_v17, %v11426_v22  ;;  %v11429_v25 = vpop.f32.mrb[70].mxu0  ;;  %v11486_v62 = vpop.f32.mrb[47].mxu1 }
 0x381   :  { %v11487_v53 = vadd.f32 %v11486_v62, %v11485_v44  ;;  %v11430_v48 = vpop.f32.mrb[71].mxu0  ;;  %v13602_v10 = vadd.f32 %v12161_v57, %v11484_v18 }
 0x382   :  { %v12185_v23 = vadd.f32 %v11428_v13, %v13586_v26  ;;  %v11431_v43 = vadd.f32 %v11430_v48, %v11429_v25 }
 0x383   :  { %v13605_v16 = vadd.f32 %v12167_v6, %v11487_v53 }
 0x384   :  { %v12191_v19 = vadd.f32 %v11431_v43, %v11351_v15 }
 0x385   :  { %v11488_v12 = vpop.f32.mrb[48].mxu1 }
 0x386   :  { %v11432_v3 = vpop.f32.mrb[72].mxu0  ;;  %v11489_v28 = vpop.f32.mrb[49].mxu1 }
 0x387   :  { %v11490_v40 = vadd.f32 %v11489_v28, %v11488_v12  ;;  %v11433_v29 = vpop.f32.mrb[73].mxu0  ;;  %v11491_v58 = vpop.f32.mrb[50].mxu1 }
 0x388   :  { %v11434_v31 = vadd.f32 %v11433_v29, %v11432_v3  ;;  %v11435_v37 = vpop.f32.mrb[74].mxu0  ;;  %v11492_v30 = vpop.f32.mrb[51].mxu1 }
 0x389   :  { %v11493_v39 = vadd.f32 %v11492_v30, %v11491_v58  ;;  %v11436_v11 = vpop.f32.mrb[75].mxu0  ;;  %v13607_v50 = vadd.f32 %v12158_v42, %v11490_v40 }
 0x38a   :  { %v12182_v57 = vadd.f32 %v11434_v31, %v13588_v61  ;;  %v11437_v26 = vadd.f32 %v11436_v11, %v11435_v37 }
 0x38b   :  { %v13610_v52 = vadd.f32 %v12164_v38, %v11493_v39 }
 0x38c   :  { %v12188_v15 = vadd.f32 %v11437_v26, %v13590_v49 }
 0x38d   :  { %v11494_v6 = vpop.f32.mrb[52].mxu1 }
 0x38e   :  { %v11438_v24 = vpop.f32.mrb[76].mxu0  ;;  %v11495_v32 = vpop.f32.mrb[53].mxu1 }
 0x38f   :  { %v11496_v4 = vadd.f32 %v11495_v32, %v11494_v6  ;;  %v11439_v7 = vpop.f32.mrb[77].mxu0  ;;  %v11497_v51 = vpop.f32.mrb[54].mxu1 }
 0x390   :  { %v11440_v45 = vadd.f32 %v11439_v7, %v11438_v24  ;;  %v11441_v54 = vpop.f32.mrb[78].mxu0  ;;  %v11498_v56 = vpop.f32.mrb[55].mxu1 }
 0x391   :  { %v11499_v35 = vadd.f32 %v11498_v56, %v11497_v51  ;;  %v11442_v47 = vpop.f32.mrb[79].mxu0  ;;  %v13613_v42 = vadd.f32 %v12173_v55, %v11496_v4 }
 0x392   :  { %v12197_v61 = vadd.f32 %v11440_v45, %v13592_v34  ;;  %v11443_v36 = vadd.f32 %v11442_v47, %v11441_v54  ;;  %v10909_v47 = vld [vmem:[%s18353_s7] ss:$0 sm:$0xff] }
 0x393   :  { %v13616_v38 = vadd.f32 %v12179_v41, %v11499_v35 }
 0x394   :  { %v12203_v49 = vadd.f32 %v11443_v36, %v13594_v46 }
 0x395   :  { %v11500_v60 = vpop.f32.mrb[56].mxu1 }
 0x396   :  { %v11444_v20 = vpop.f32.mrb[80].mxu0  ;;  %v11501_v1 = vpop.f32.mrb[57].mxu1 }
 0x397   :  { %v11502_v2 = vadd.f32 %v11501_v1, %v11500_v60  ;;  %v11445_v27 = vpop.f32.mrb[81].mxu0  ;;  %v11503_v9 = vpop.f32.mrb[58].mxu1 }
 0x398   :  { %v11446_v21 = vadd.f32 %v11445_v27, %v11444_v20  ;;  %v11447_v14 = vpop.f32.mrb[82].mxu0  ;;  %v11504_v22 = vpop.f32.mrb[59].mxu1 }
 0x399   :  { %v11505_v8 = vadd.f32 %v11504_v22, %v11503_v9  ;;  %v11448_v18 = vpop.f32.mrb[83].mxu0  ;;  %v12171_v55 = vadd.f32 %v12170_v63, %v11502_v2 }
 0x39a   :  { %v12194_v17 = vadd.f32 %v11446_v21, %v13596_v59  ;;  %v11449_v34 = vadd.f32 %v11448_v18, %v11447_v14 }
 0x39b   :  { %v12177_v41 = vadd.f32 %v13600_v33, %v11505_v8 }
 0x39c   :  { %v12200_v44 = vadd.f32 %v11449_v34, %v13598_v5 }
 0x39d   :  { %v11506_v46 = vpop.f32.mrb[60].mxu1 }
 0x39e   :  { %v11507_v13 = vpop.f32.mrb[61].mxu1 }
 0x39f   :  { %v11508_v25 = vadd.f32 %v11507_v13, %v11506_v46  ;;  %v11509_v62 = vpop.f32.mrb[62].mxu1 }
 0x3a0   :  { %v11510_v53 = vpop.f32.mrb[63].mxu1 }
 0x3a1   :  { %v11511_v48 = vadd.f32 %v11510_v53, %v11509_v62  ;;  %v12186_v43 = vadd.f32 %v12185_v23, %v11508_v25 }
 0x3a3   :  { %v13622_v12 = vadd.f32 %v12191_v19, %v11511_v48 }
 0x3a5   :  { %v11512_v3 = vpop.f32.mrb[64].mxu1 }
 0x3a6   :  { %v11513_v28 = vpop.f32.mrb[65].mxu1 }
 0x3a7   :  { %v11514_v40 = vadd.f32 %v11513_v28, %v11512_v3  ;;  %v11515_v63 = vpop.f32.mrb[66].mxu1 }
 0x3a8   :  { %v11516_v29 = vpop.f32.mrb[67].mxu1 }
 0x3a9   :  { %v11517_v59 = vadd.f32 %v11516_v29, %v11515_v63  ;;  %v12183_v58 = vadd.f32 %v12182_v57, %v11514_v40 }
 0x3ab   :  { %v12189_v31 = vadd.f32 %v12188_v15, %v11517_v59 }
 0x3ad   :  { %v11518_v33 = vpop.f32.mrb[68].mxu1 }
 0x3ae   :  { %v11519_v37 = vpop.f32.mrb[69].mxu1 }
 0x3af   :  { %v11520_v5 = vadd.f32 %v11519_v37, %v11518_v33  ;;  %v11521_v30 = vpop.f32.mrb[70].mxu1 }
 0x3b0   :  { %v11522_v39 = vpop.f32.mrb[71].mxu1 }
 0x3b1   :  { %v11523_v11 = vadd.f32 %v11522_v39, %v11521_v30  ;;  %v12198_v26 = vadd.f32 %v12197_v61, %v11520_v5 }
 0x3b3   :  { %v13624_v6 = vadd.f32 %v12203_v49, %v11523_v11 }
 0x3b5   :  { %v11524_v23 = vpop.f32.mrb[72].mxu1 }
 0x3b6   :  { %v11525_v19 = vpop.f32.mrb[73].mxu1 }
 0x3b7   :  { %v11526_v24 = vadd.f32 %v11525_v19, %v11524_v23  ;;  %v11527_v32 = vpop.f32.mrb[74].mxu1 }
 0x3b8   :  { %v11528_v4 = vpop.f32.mrb[75].mxu1 }
 0x3b9   :  { %v11529_v7 = vadd.f32 %v11528_v4, %v11527_v32  ;;  %v12195_v51 = vadd.f32 %v12194_v17, %v11526_v24 }
 0x3bb   :  { %v12201_v45 = vadd.f32 %v12200_v44, %v11529_v7  ;;  %v12329_v7 = vld [vmem:[#allocation9] sm:$0xff]  }
 0x3bc   :  { %11838 = vmatprep.mubr.bf16.mxu0 %v12329_v7 }
 0x3be   :  { %v11808_v54 = vpop.f32.mrb[36].mxu0 }
 0x3bf   :  { %v12160_v57 = vadd.f32 %v13607_v50, %v11808_v54  ;;  %v2767_v15 = vpop.f32.mrb[37].mxu0 }
 0x3c0   :  { %v12163_v56 = vadd.f32 %v13602_v10, %v2767_v15  ;;  %v11809_v35 = vpop.f32.mrb[38].mxu0 }
 0x3c1   :  { %v12166_v61 = vadd.f32 %v13610_v52, %v11809_v35  ;;  %v2770_v36 = vpop.f32.mrb[39].mxu0  ;;  %v13637_v1 = vadd.f32 %v12160_v57, %v10909_v47 }
 0x3c2   :  { %v12169_v49 = vadd.f32 %v13605_v16, %v2770_v36  ;;  %v13633_v60 = vadd.f32 %v12163_v56, %v10909_v47 }
 0x3c3   :  { %v2856_v9 = vadd.f32 %v12166_v61, %v10909_v47 }
 0x3c4   :  { %v13635_v20 = vadd.f32 %v12169_v49, %v10909_v47 }
 0x3c6   :  { %v2869_v50 = vadd.f32 %v13635_v20, %v13633_v60  ;;  %v11812_v10 = vpop.f32.mrb[40].mxu0 }
 0x3c7   :  { %v12172_v2 = vadd.f32 %v12171_v55, %v11812_v10  ;;  %v2783_v27 = vpop.f32.mrb[41].mxu0 }
 0x3c8   :  { %v2870_v21 = vadd.f32 %v2869_v50, %v13637_v1  ;;  %v12175_v52 = vadd.f32 %v13613_v42, %v2783_v27  ;;  %v11813_v14 = vpop.f32.mrb[42].mxu0 }
 0x3c9   :  { %v12178_v22 = vadd.f32 %v12177_v41, %v11813_v14  ;;  %v2786_v16 = vpop.f32.mrb[43].mxu0  ;;  %v2859_v46 = vadd.f32 %v12172_v2, %v10909_v47 }
 0x3ca   :  { %v2857_v8 = vadd.f32 %v12175_v52, %v10909_v47  ;;  %v2871_v18 = vadd.f32 %v2870_v21, %v2856_v9  ;;  %v12181_v17 = vadd.f32 %v13616_v38, %v2786_v16 }
 0x3cb   :  { %v2860_v53 = vadd.f32 %v12178_v22, %v10909_v47 }
 0x3cc   :  { %v2872_v34 = vadd.f32 %v2871_v18, %v2857_v8  ;;  %v2858_v44 = vadd.f32 %v12181_v17, %v10909_v47 }
 0x3ce   :  { %v2873_v13 = vadd.f32 %v2872_v34, %v2858_v44  ;;  %v11816_v25 = vpop.f32.mrb[44].mxu0 }
 0x3cf   :  { %v12184_v62 = vadd.f32 %v12183_v58, %v11816_v25  ;;  %v2799_v55 = vpop.f32.mrb[45].mxu0 }
 0x3d0   :  { %v2874_v48 = vadd.f32 %v2873_v13, %v2859_v46  ;;  %v12187_v3 = vadd.f32 %v12186_v43, %v2799_v55  ;;  %v11817_v28 = vpop.f32.mrb[46].mxu0 }
 0x3d1   :  { %v12190_v40 = vadd.f32 %v12189_v31, %v11817_v28  ;;  %v2802_v42 = vpop.f32.mrb[47].mxu0  ;;  %v2863_v38 = vadd.f32 %v12184_v62, %v10909_v47 }
 0x3d2   :  { %v2861_v63 = vadd.f32 %v12187_v3, %v10909_v47  ;;  %v2875_v41 = vadd.f32 %v2874_v48, %v2860_v53  ;;  %v12193_v29 = vadd.f32 %v13622_v12, %v2802_v42 }
 0x3d3   :  { %v2864_v11 = vadd.f32 %v12190_v40, %v10909_v47 }
 0x3d4   :  { %v2876_v59 = vadd.f32 %v2875_v41, %v2861_v63  ;;  %v2862_v33 = vadd.f32 %v12193_v29, %v10909_v47 }
 0x3d6   :  { %v2877_v37 = vadd.f32 %v2876_v59, %v2862_v33  ;;  %v11820_v5 = vpop.f32.mrb[48].mxu0 }
 0x3d7   :  { %v12196_v30 = vadd.f32 %v12195_v51, %v11820_v5  ;;  %v2815_v39 = vpop.f32.mrb[49].mxu0 }
 0x3d8   :  { %v2878_v58 = vadd.f32 %v2877_v37, %v2863_v38  ;;  %v12199_v23 = vadd.f32 %v12198_v26, %v2815_v39  ;;  %v11821_v19 = vpop.f32.mrb[50].mxu0 }
 0x3d9   :  { %v12202_v24 = vadd.f32 %v12201_v45, %v11821_v19  ;;  %v2818_v43 = vpop.f32.mrb[51].mxu0  ;;  %v2867_v57 = vadd.f32 %v12196_v30, %v10909_v47 }
 0x3da   :  { %v2865_v32 = vadd.f32 %v12199_v23, %v10909_v47  ;;  %v2879_v31 = vadd.f32 %v2878_v58, %v2864_v11  ;;  %v12205_v4 = vadd.f32 %v13624_v6, %v2818_v43 }
 0x3db   :  { %v2868_v56 = vadd.f32 %v12202_v24, %v10909_v47 }
 0x3dc   :  { %v2880_v54 = vadd.f32 %v2879_v31, %v2865_v32  ;;  %v2866_v12 = vadd.f32 %v12205_v4, %v10909_v47 }
 0x3de   :  { %v2881_v15 = vadd.f32 %v2880_v54, %v2866_v12 }
 0x3e0   :  { %v2882_v35 = vadd.f32 %v2881_v15, %v2867_v57 }
 0x3e2   :  { %v2883_v51 = vadd.f32 %v2882_v35, %v2868_v56 }
 0x3e4   :  { %v2884_v61 = vrot.slane %v2883_v51, 4 }
 0x3e6   :  { %v2885_v36 = vadd.f32 %v2884_v61, %v2883_v51  ;;  %v13686_v61 = vld [vmem:[%s18354_s8] ss:$0 sm:$0xff] }
 0x3e8   :  { %v2886_v49 = vrot.slane %v2885_v36, 2 }
 0x3ea   :  { %v2887_v26 = vadd.f32 %v2886_v49, %v2885_v36 }
 0x3ec   :  { %v2888_v50 = vrot.slane %v2887_v26, 1 }
 0x3ee   :  { %v2889_v45 = vadd.f32 %v2888_v50, %v2887_v26 }
 0x3f0   :  { %v2890_v10 = vmul.f32 0.0078125, %v2889_v45  ;;  %v13695_v45 = vld [vmem:[%s18355_s9] ss:$0 sm:$0xff] }
 0x3f2   :  { %v2891_v2 = vsub.f32 %v13633_v60, %v2890_v10  ;;  %v2892_v6 = vsub.f32 %v13635_v20, %v2890_v10  ;;  %v2893_v27 = vsub.f32 %v13637_v1, %v2890_v10  ;;  %v2894_v21 = vsub.f32 %v2856_v9, %v2890_v10 }
 0x3f3   :  { %v2895_v52 = vsub.f32 %v2857_v8, %v2890_v10  ;;  %v2896_v14 = vsub.f32 %v2858_v44, %v2890_v10  ;;  %v2897_v22 = vsub.f32 %v2859_v46, %v2890_v10  ;;  %v13649_v47 = vsub.f32 %v2860_v53, %v2890_v10 }
 0x3f4   :  { %v13651_v16 = vsub.f32 %v2861_v63, %v2890_v10  ;;  %v13653_v18 = vsub.f32 %v2862_v33, %v2890_v10  ;;  %v13655_v17 = vsub.f32 %v2863_v38, %v2890_v10  ;;  %v13657_v34 = vsub.f32 %v2864_v11, %v2890_v10 }
 0x3f5   :  { %v13659_v13 = vsub.f32 %v2865_v32, %v2890_v10  ;;  %v2904_v60 = vsub.f32 %v2866_v12, %v2890_v10  ;;  %v13661_v20 = vsub.f32 %v2867_v57, %v2890_v10  ;;  %v13663_v1 = vsub.f32 %v2868_v56, %v2890_v10 }
 0x3f6   :  { %v2907_v9 = vmul.f32 %v2891_v2, %v2891_v2  ;;  %v2908_v8 = vmul.f32 %v2892_v6, %v2892_v6  ;;  %v2909_v44 = vmul.f32 %v2893_v27, %v2893_v27  ;;  %v2910_v25 = vmul.f32 %v2894_v21, %v2894_v21 }
 0x3f7   :  { %v2911_v55 = vmul.f32 %v2895_v52, %v2895_v52  ;;  %v2912_v48 = vmul.f32 %v2896_v14, %v2896_v14  ;;  %v2913_v28 = vmul.f32 %v2897_v22, %v2897_v22  ;;  %v2914_v42 = vmul.f32 %v13649_v47, %v13649_v47 }
 0x3f8   :  { %v2923_v46 = vadd.f32 %v2908_v8, %v2907_v9  ;;  %v2915_v41 = vmul.f32 %v13651_v16, %v13651_v16  ;;  %v2916_v59 = vmul.f32 %v13653_v18, %v13653_v18  ;;  %v2917_v38 = vmul.f32 %v13655_v17, %v13655_v17 }
 0x3f9   :  { %v2918_v5 = vmul.f32 %v13657_v34, %v13657_v34  ;;  %v2919_v39 = vmul.f32 %v13659_v13, %v13659_v13  ;;  %v2920_v58 = vmul.f32 %v2904_v60, %v2904_v60  ;;  %v2921_v19 = vmul.f32 %v13661_v20, %v13661_v20 }
 0x3fa   :  { %v2924_v62 = vadd.f32 %v2923_v46, %v2909_v44  ;;  %v2922_v43 = vmul.f32 %v13663_v1, %v13663_v1 }
 0x3fc   :  { %v2925_v53 = vadd.f32 %v2924_v62, %v2910_v25 }
 0x3fe   :  { %v2926_v3 = vadd.f32 %v2925_v53, %v2911_v55 }
 0x400   :  { %v2927_v40 = vadd.f32 %v2926_v3, %v2912_v48 }
 0x402   :  { %v2928_v63 = vadd.f32 %v2927_v40, %v2913_v28 }
 0x404   :  { %v2929_v29 = vadd.f32 %v2928_v63, %v2914_v42 }
 0x406   :  { %v2930_v33 = vadd.f32 %v2929_v29, %v2915_v41 }
 0x408   :  { %v2931_v37 = vadd.f32 %v2930_v33, %v2916_v59 }
 0x40a   :  { %v2932_v30 = vadd.f32 %v2931_v37, %v2917_v38 }
 0x40c   :  { %v2933_v11 = vadd.f32 %v2932_v30, %v2918_v5 }
 0x40e   :  { %v2934_v23 = vadd.f32 %v2933_v11, %v2919_v39 }
 0x410   :  { %v2935_v24 = vadd.f32 %v2934_v23, %v2920_v58 }
 0x412   :  { %v2936_v32 = vadd.f32 %v2935_v24, %v2921_v19 }
 0x414   :  { %v2937_v31 = vadd.f32 %v2936_v32, %v2922_v43 }
 0x416   :  { %v2938_v4 = vrot.slane %v2937_v31, 4 }
 0x418   :  { %v2939_v7 = vadd.f32 %v2938_v4, %v2937_v31 }
 0x41a   :  { %v2940_v54 = vrot.slane %v2939_v7, 2 }
 0x41c   :  { %v2941_v12 = vadd.f32 %v2940_v54, %v2939_v7 }
 0x41e   :  { %v2942_v57 = vrot.slane %v2941_v12, 1 }
 0x420   :  { %v2943_v15 = vadd.f32 %v2942_v57, %v2941_v12 }
 0x422   :  { %v2944_v56 = vmul.f32 0.0078125, %v2943_v15 }
 0x424   :  { %v2945_v35 = vadd.f32 0.8, %v2944_v56 }
 0x426   :  { %12471 = vrsqrt.f32 %v2945_v35 }
 0x430   :  { %v13681_v51 = vpop.eup %12471 }
 0x431   :  { %v2960_v36 = vmul.f32 %v13681_v51, %v2904_v60  ;;  %v2947_v49 = vmul.f32 %v13681_v51, %v2891_v2  ;;  %v2948_v26 = vmul.f32 %v13681_v51, %v2892_v6  ;;  %v2949_v50 = vmul.f32 %v13681_v51, %v2893_v27 }
 0x432   :  { %v2950_v10 = vmul.f32 %v13681_v51, %v2894_v21  ;;  %v2951_v9 = vmul.f32 %v13681_v51, %v2895_v52  ;;  %v2952_v8 = vmul.f32 %v13681_v51, %v2896_v14  ;;  %v2953_v44 = vmul.f32 %v13681_v51, %v2897_v22  ;;  %v12353_v14 = vld [vmem:[#allocation9 + $0xc0] sm:$0xff]  }
 0x433   :  { %v2983_v60 = vmul.f32 %v13686_v61, %v2960_v36  ;;  %v2970_v2 = vmul.f32 %v13686_v61, %v2947_v49  ;;  %v2971_v6 = vmul.f32 %v13686_v61, %v2948_v26  ;;  %v2972_v27 = vmul.f32 %v13686_v61, %v2949_v50  ;;  %11886 = vmatprep.mubr.bf16.mxu1 %v12353_v14 }
 0x434   :  { %v2973_v46 = vmul.f32 %v13686_v61, %v2950_v10  ;;  %v2974_v25 = vmul.f32 %v13686_v61, %v2951_v9  ;;  %v2975_v21 = vmul.f32 %v13686_v61, %v2952_v8  ;;  %v2954_v52 = vmul.f32 %v13681_v51, %v13649_v47 }
 0x435   :  { %v2993_v22 = vadd.f32 %v13695_v45, %v2970_v2  ;;  %v2994_v62 = vadd.f32 %v13695_v45, %v2971_v6  ;;  %v2995_v55 = vadd.f32 %v13695_v45, %v2972_v27  ;;  %v2976_v53 = vmul.f32 %v13686_v61, %v2953_v44 }
 0x436   :  { %v2996_v48 = vadd.f32 %v13695_v45, %v2973_v46  ;;  %v2997_v3 = vadd.f32 %v13695_v45, %v2974_v25  ;;  %v2998_v28 = vadd.f32 %v13695_v45, %v2975_v21  ;;  %v2977_v40 = vmul.f32 %v13686_v61, %v2954_v52 }
 0x437   :  { %vm3009_vm1 = vcmp.ge.f32.partialorder %v2993_v22, 0.0  ;;  %vm3010_vm2 = vcmp.ge.f32.partialorder %v2994_v62, 0.0  ;;  %v3025_v47 = vmul.f32 0.2, %v2993_v22  ;;  %v3026_v42 = vmul.f32 0.2, %v2994_v62 }
 0x438   :  { %vm3011_vm3 = vcmp.ge.f32.partialorder %v2995_v55, 0.0  ;;  %vm3012_vm4 = vcmp.ge.f32.partialorder %v2996_v48, 0.0  ;;  %v3027_v63 = vmul.f32 0.2, %v2995_v55  ;;  %v3028_v41 = vmul.f32 0.2, %v2996_v48 }
 0x439   :  { %v3041_v29 = vsel %vm3009_vm1, %v2993_v22, %v3025_v47  ;;  %v3042_v59 = vsel %vm3010_vm2, %v2994_v62, %v3026_v42  ;;  %vm3013_vm5 = vcmp.ge.f32.partialorder %v2997_v3, 0.0  ;;  %vm3014_vm6 = vcmp.ge.f32.partialorder %v2998_v28, 0.0 }
 0x43a   :  { %v3121_v33 = vpack.c.bf16 %v3042_v59, %v3041_v29  ;;  %v3043_v38 = vsel %vm3011_vm3, %v2995_v55, %v3027_v63  ;;  %v3044_v37 = vsel %vm3012_vm4, %v2996_v48, %v3028_v41  ;;  %v3029_v5 = vmul.f32 0.2, %v2997_v3  ;;  %v12330_v63 = vld [vmem:[#allocation9 + $0x8] sm:$0xff]   ;;  %v12331_v29 = vld [vmem:[#allocation9 + $0x10] sm:$0xff]  }
 0x43b   :  { %v3122_v30 = vpack.c.bf16 %v3044_v37, %v3043_v38  ;;  %v3030_v39 = vmul.f32 0.2, %v2998_v28  ;;  %v2999_v11 = vadd.f32 %v13695_v45, %v2976_v53  ;;  %v3000_v58 = vadd.f32 %v13695_v45, %v2977_v40  ;;  %v12354_v41 = vld [vmem:[#allocation9 + $0xc8] sm:$0xff]   ;;  %v12355_v59 = vld [vmem:[#allocation9 + $0xd0] sm:$0xff]  }
 0x43c   :  { %11822 = vmatprep.subr.bf16.mxu0 %v3121_v33  ;;  %12142 = vmatprep.subr.bf16.mxu1 %v3121_v33  ;;  %v3045_v23 = vsel %vm3013_vm5, %v2997_v3, %v3029_v5  ;;  %v2955_v19 = vmul.f32 %v13681_v51, %v13651_v16  ;;  %v2956_v24 = vmul.f32 %v13681_v51, %v13653_v18  ;;  %v12374_v38 = vld [vmem:[%s18357_s11 + $0x148] sm:$0xff]   ;;  %v12376_v5 = vld [vmem:[%s18357_s11 + $0x150] sm:$0xff]   ;;  %vm3890_vm1 = vcmask 1040384  }
 0x43d   :  { %11823 = vmatpush3.bf16.msra.mxu0 %v3121_v33  ;;  %12150 = vmatpush3.bf16.msra.mxu1 %v3121_v33  ;;  %v3046_v43 = vsel %vm3014_vm6, %v2998_v28, %v3030_v39  ;;  %vm3015_vm7 = vcmp.ge.f32.partialorder %v2999_v11, 0.0  ;;  %vm3016_vm8 = vcmp.ge.f32.partialorder %v3000_v58, 0.0  ;;  %v3031_v32 = vmul.f32 0.2, %v2999_v11  ;;  %v12361_v33 = vld [vmem:[%s18357_s11 + $0xc0] sm:$0xff]   ;;  %v12362_v37 = vld [vmem:[%s18357_s11 + $0xc8] sm:$0xff]  }
 0x43e   :  { %11824 = vmatprep.subr.bf16.mxu0 %v3122_v30  ;;  %12143 = vmatprep.subr.bf16.mxu1 %v3122_v30  ;;  %v3123_v31 = vpack.c.bf16 %v3046_v43, %v3045_v23  ;;  %v3032_v4 = vmul.f32 0.2, %v3000_v58  ;;  %v2978_v7 = vmul.f32 %v13686_v61, %v2955_v19  ;;  %v2979_v54 = vmul.f32 %v13686_v61, %v2956_v24  ;;  %v12356_v39 = vld [vmem:[#allocation9 + $0xd8] sm:$0xff]   ;;  %v12363_v23 = vld [vmem:[%s18357_s11 + $0xd0] sm:$0xff]   ;;  %v12334_v43 = vld [vmem:[#allocation9 + $0x28] sm:$0xff]  }
 0x43f   :  { %v3047_v12 = vsel %vm3015_vm7, %v2999_v11, %v3031_v32  ;;  %v2957_v16 = vmul.f32 %v13681_v51, %v13655_v17  ;;  %v2958_v18 = vmul.f32 %v13681_v51, %v13657_v34  ;;  %v2959_v57 = vmul.f32 %v13681_v51, %v13659_v13  ;;  %v12333_v11 = vld [vmem:[#allocation9 + $0x20] sm:$0xff]   ;;  %v12377_v19 = vld [vmem:[%s18357_s11 + $0x158] sm:$0xff]   ;;  %v12358_v32 = vld [vmem:[#allocation9 + $0xe8] sm:$0xff]  }
 0x440   :  { %v3048_v15 = vsel %vm3016_vm8, %v3000_v58, %v3032_v4  ;;  %v3001_v56 = vadd.f32 %v13695_v45, %v2978_v7  ;;  %v3002_v35 = vadd.f32 %v13695_v45, %v2979_v54  ;;  %v3006_v36 = vadd.f32 %v13695_v45, %v2983_v60  ;;  %v12357_v58 = vld [vmem:[#allocation9 + $0xe0] sm:$0xff]   ;;  %v12364_v24 = vld [vmem:[%s18357_s11 + $0xd8] sm:$0xff]   ;;  %v12359_v4 = vld [vmem:[#allocation9 + $0xf0] sm:$0xff]  }
 0x441   :  { %11825 = vmatpush3.bf16.msra.mxu0 %v3122_v30  ;;  %12151 = vmatpush3.bf16.msra.mxu1 %v3122_v30  ;;  %v3124_v49 = vpack.c.bf16 %v3048_v15, %v3047_v12  ;;  %v2980_v26 = vmul.f32 %v13686_v61, %v2957_v16  ;;  %v2981_v17 = vmul.f32 %v13686_v61, %v2958_v18  ;;  %v12332_v30 = vld [vmem:[#allocation9 + $0x18] sm:$0xff]   ;;  %v12365_v7 = vld [vmem:[%s18357_s11 + $0xe0] sm:$0xff]   ;;  %v12366_v54 = vld [vmem:[%s18357_s11 + $0xe8] sm:$0xff]   ;;  %vm4180_vm2 = vcmask 1046528  }
 0x442   :  { %11826 = vmatprep.subr.bf16.mxu0 %v3123_v31  ;;  %12144 = vmatprep.subr.bf16.mxu1 %v3123_v31  ;;  %vm3017_vm9 = vcmp.ge.f32.partialorder %v3001_v56, 0.0  ;;  %vm3018_vm10 = vcmp.ge.f32.partialorder %v3002_v35, 0.0  ;;  %v3033_v34 = vmul.f32 0.2, %v3001_v56  ;;  %v3034_v13 = vmul.f32 0.2, %v3002_v35 }
 0x443   :  { %v3003_v50 = vadd.f32 %v13695_v45, %v2980_v26  ;;  %v3004_v10 = vadd.f32 %v13695_v45, %v2981_v17  ;;  %v2982_v9 = vmul.f32 %v13686_v61, %v2959_v57  ;;  %vm3022_vm11 = vcmp.ge.f32.partialorder %v3006_v36, 0.0  ;;  %v12336_v12 = vld [vmem:[#allocation9 + $0x38] sm:$0xff]   ;;  %v12337_v18 = vld [vmem:[#allocation9 + $0x40] sm:$0xff]   ;;  %v12367_v57 = vld [vmem:[%s18357_s11 + $0xf0] sm:$0xff]  }
 0x444   :  { %v3049_v8 = vsel %vm3017_vm9, %v3001_v56, %v3033_v34  ;;  %v3050_v44 = vsel %vm3018_vm10, %v3002_v35, %v3034_v13  ;;  %v3038_v60 = vmul.f32 0.2, %v3006_v36  ;;  %v2961_v2 = vmul.f32 %v13681_v51, %v13661_v20  ;;  %v12360_v16 = vld [vmem:[#allocation9 + $0xf8] sm:$0xff]   ;;  %v12338_v56 = vld [vmem:[#allocation9 + $0x48] sm:$0xff]   ;;  %v12339_v35 = vld [vmem:[#allocation9 + $0x50] sm:$0xff]  }
 0x445   :  { %11827 = vmatpush3.bf16.msra.mxu0 %v3123_v31  ;;  %12152 = vmatpush3.bf16.msra.mxu1 %v3123_v31  ;;  %v3125_v6 = vpack.c.bf16 %v3050_v44, %v3049_v8  ;;  %vm3019_vm12 = vcmp.ge.f32.partialorder %v3003_v50, 0.0  ;;  %vm3020_vm13 = vcmp.ge.f32.partialorder %v3004_v10, 0.0  ;;  %v3035_v27 = vmul.f32 0.2, %v3003_v50  ;;  %v12335_v31 = vld [vmem:[#allocation9 + $0x30] sm:$0xff]   ;;  %v12368_v15 = vld [vmem:[%s18357_s11 + $0xf8] sm:$0xff]  }
 0x446   :  { %11828 = vmatprep.subr.bf16.mxu0 %v3124_v49  ;;  %12145 = vmatprep.subr.bf16.mxu1 %v3124_v49  ;;  %v3036_v46 = vmul.f32 0.2, %v3004_v10  ;;  %v3005_v25 = vadd.f32 %v13695_v45, %v2982_v9  ;;  %v2962_v21 = vmul.f32 %v13681_v51, %v13663_v1  ;;  %v3054_v14 = vsel %vm3022_vm11, %v3006_v36, %v3038_v60  ;;  %v12369_v36 = vld [vmem:[%s18357_s11 + $0x100] sm:$0xff]   ;;  %v12340_v26 = vld [vmem:[#allocation9 + $0x58] sm:$0xff]   ;;  %v12371_v34 = vld [vmem:[%s18357_s11 + $0x110] sm:$0xff]  }
 0x447   :  { %v3051_v52 = vsel %vm3019_vm12, %v3003_v50, %v3035_v27  ;;  %v2984_v22 = vmul.f32 %v13686_v61, %v2961_v2  ;;  %v12341_v17 = vld [vmem:[#allocation9 + $0x60] sm:$0xff]   ;;  %v12373_v13 = vld [vmem:[%s18357_s11 + $0x118] sm:$0xff]   ;;  %v12342_v50 = vld [vmem:[#allocation9 + $0x68] sm:$0xff]   ;;  %vm7176_vm3 = vcmask 523264   ;;  %vm8825_vm4 = vcmask 522240  }
 0x448   :  { %v3052_v20 = vsel %vm3020_vm13, %v3004_v10, %v3036_v46  ;;  %vm3021_vm14 = vcmp.ge.f32.partialorder %v3005_v25, 0.0  ;;  %v3037_v62 = vmul.f32 0.2, %v3005_v25  ;;  %v2985_v55 = vmul.f32 %v13686_v61, %v2962_v21  ;;  %v12343_v10 = vld [vmem:[#allocation9 + $0x70] sm:$0xff]   ;;  %v12375_v9 = vld [vmem:[%s18357_s11 + $0x120] sm:$0xff]   ;;  %v12344_v8 = vld [vmem:[#allocation9 + $0x78] sm:$0xff]  }
 0x449   :  { %11829 = vmatpush3.bf16.msra.mxu0 %v3124_v49  ;;  %12153 = vmatpush3.bf16.msra.mxu1 %v3124_v49  ;;  %v3126_v53 = vpack.c.bf16 %v3052_v20, %v3051_v52  ;;  %v3007_v48 = vadd.f32 %v13695_v45, %v2984_v22  ;;  %v12370_v49 = vld [vmem:[%s18357_s11 + $0x108] sm:$0xff]   ;;  %v12345_v44 = vld [vmem:[#allocation9 + $0x80] sm:$0xff]   ;;  %v12347_v2 = vld [vmem:[#allocation9 + $0x90] sm:$0xff]  }
 0x44a   :  { %11830 = vmatprep.subr.bf16.mxu0 %v3125_v6  ;;  %12146 = vmatprep.subr.bf16.mxu1 %v3125_v6  ;;  %v3053_v3 = vsel %vm3021_vm14, %v3005_v25, %v3037_v62  ;;  %v3008_v1 = vadd.f32 %v13695_v45, %v2985_v55  ;;  %v12372_v45 = vld [vmem:[%s18357_s11 + $0x140] sm:$0xff]   ;;  %v12346_v60 = vld [vmem:[#allocation9 + $0x88] sm:$0xff]   ;;  %v12351_v25 = vld [vmem:[#allocation9 + $0xb0] sm:$0xff]  }
 0x44b   :  { %v3127_v51 = vpack.c.bf16 %v3054_v14, %v3053_v3  ;;  %vm3023_vm15 = vcmp.ge.f32.partialorder %v3007_v48, 0.0  ;;  %v3039_v28 = vmul.f32 0.2, %v3007_v48  ;;  %v12349_v27 = vld [vmem:[#allocation9 + $0xa0] sm:$0xff]   ;;  %v12350_v46 = vld [vmem:[#allocation9 + $0xa8] sm:$0xff]   ;;  %v12352_v21 = vld [vmem:[#allocation9 + $0xb8] sm:$0xff]  }
 0x44c   :  { %vm3024_vm0 = vcmp.ge.f32.partialorder %v3008_v1, 0.0  ;;  %v3040_v40 = vmul.f32 0.2, %v3008_v1  ;;  %v12378_v52 = vld [vmem:[%s18357_s11 + $0x128] sm:$0xff]   ;;  %v12379_v14 = vld [vmem:[%s18357_s11 + $0x160] sm:$0xff]   ;;  %v12380_v22 = vld [vmem:[%s18357_s11 + $0x130] sm:$0xff]  }
 0x44d   :  { %11831 = vmatpush3.bf16.msra.mxu0 %v3125_v6  ;;  %12154 = vmatpush3.bf16.msra.mxu1 %v3125_v6  ;;  %v3055_v47 = vsel %vm3023_vm15, %v3007_v48, %v3039_v28  ;;  %v12348_v6 = vld [vmem:[#allocation9 + $0x98] sm:$0xff]   ;;  %v12381_v20 = vld [vmem:[%s18357_s11 + $0x168] sm:$0xff]   ;;  %v12382_v62 = vld [vmem:[%s18357_s11 + $0x170] sm:$0xff]  }
 0x44e   :  { %11832 = vmatprep.subr.bf16.mxu0 %v3126_v53  ;;  %12147 = vmatprep.subr.bf16.mxu1 %v3126_v53  ;;  %v3056_v61 = vsel %vm3024_vm0, %v3008_v1, %v3040_v40  ;;  %v12383_v55 = vld [vmem:[%s18357_s11 + $0x138] sm:$0xff]   ;;  %v13842_v48 = vld [vmem:[%s18357_s11 + $0x80] sm:$0xff]  }
 0x44f   :  { %v3128_v42 = vpack.c.bf16 %v3056_v61, %v3055_v47 }
 0x451   :  { %11833 = vmatpush3.bf16.msra.mxu0 %v3126_v53  ;;  %12155 = vmatpush3.bf16.msra.mxu1 %v3126_v53  ;;  %v12384_v53 = vld [vmem:[%s18357_s11 + $0x178] sm:$0xff]  }
 0x452   :  { %11834 = vmatprep.subr.bf16.mxu0 %v3127_v51  ;;  %12148 = vmatprep.subr.bf16.mxu1 %v3127_v51 }
 0x455   :  { %11835 = vmatpush3.bf16.msra.mxu0 %v3127_v51  ;;  %12156 = vmatpush3.bf16.msra.mxu1 %v3127_v51 }
 0x456   :  { %11836 = vmatprep.subr.bf16.mxu0 %v3128_v42  ;;  %12149 = vmatprep.subr.bf16.mxu1 %v3128_v42 }
 0x459   :  { %11837 = vmatpush3.bf16.msra.mxu0 %v3128_v42  ;;  %12157 = vmatpush3.bf16.msra.mxu1 %v3128_v42 }
 0x45a   :  { %4964 = vmatprep.subr.bf16.mxu0 %v18376_v0  ;;  %11902 = vmatprep.subr.bf16.mxu1 %v12372_v45 }
 0x45c   :  { %11839 = vmatmul.mubr.bf16.vlgmr.msra.gmra.mrb[84].mxu0 %v12330_v63  ;;  %11887 = vmatmul.mubr.bf16.vlgmr.msra.gmra.mrb[76].mxu1 %v12354_v41 }
 0x45d   :  { %11842 = vmatprep.mubr.bf16.mxu0 %v12331_v29  ;;  %11890 = vmatprep.mubr.bf16.mxu1 %v12355_v59 }
 0x45e   :  { %4965 = vmatpush1.bf16.msra.mxu0 %v12361_v33  ;;  %11903 = vmatpush3.bf16.msra.mxu1 %v12372_v45 }
 0x45f   :  { %4966 = vmatprep.subr.bf16.mxu0 %v18376_v0  ;;  %11904 = vmatprep.subr.bf16.mxu1 %v12374_v38 }
 0x462   :  { %4967 = vmatpush1.bf16.msra.mxu0 %v12362_v37  ;;  %11905 = vmatpush3.bf16.msra.mxu1 %v12374_v38 }
 0x463   :  { %4968 = vmatprep.subr.bf16.mxu0 %v18376_v0  ;;  %11906 = vmatprep.subr.bf16.mxu1 %v12376_v5 }
 0x464   :  { %11843 = vmatmul.mubr.bf16.gmra.mrb[88].mxu0 %v12332_v30  ;;  %11891 = vmatmul.mubr.bf16.gmra.mrb[80].mxu1 %v12356_v39 }
 0x465   :  { %11846 = vmatprep.mubr.bf16.mxu0 %v12333_v11  ;;  %11894 = vmatprep.mubr.bf16.mxu1 %v12357_v58 }
 0x466   :  { %4969 = vmatpush1.bf16.msra.mxu0 %v12363_v23  ;;  %11907 = vmatpush3.bf16.msra.mxu1 %v12376_v5 }
 0x467   :  { %4970 = vmatprep.subr.bf16.mxu0 %v18376_v0  ;;  %11908 = vmatprep.subr.bf16.mxu1 %v12377_v19 }
 0x46a   :  { %4971 = vmatpush1.bf16.msra.mxu0 %v12364_v24  ;;  %11909 = vmatpush3.bf16.msra.mxu1 %v12377_v19 }
 0x46b   :  { %4972 = vmatprep.subr.bf16.mxu0 %v18376_v0  ;;  %11910 = vmatprep.subr.bf16.mxu1 %v12379_v14 }
 0x46c   :  { %11847 = vmatmul.mubr.bf16.gmra.mrb[92].mxu0 %v12334_v43  ;;  %11895 = vmatmul.mubr.bf16.gmra.mrb[84].mxu1 %v12358_v32 }
 0x46d   :  { %11850 = vmatprep.mubr.bf16.mxu0 %v12335_v31  ;;  %11898 = vmatprep.mubr.bf16.mxu1 %v12359_v4 }
 0x46e   :  { %4973 = vmatpush1.bf16.msra.mxu0 %v12365_v7  ;;  %11911 = vmatpush3.bf16.msra.mxu1 %v12379_v14 }
 0x46f   :  { %4974 = vmatprep.subr.bf16.mxu0 %v18376_v0  ;;  %11912 = vmatprep.subr.bf16.mxu1 %v12381_v20 }
 0x472   :  { %4975 = vmatpush1.bf16.msra.mxu0 %v12366_v54  ;;  %11913 = vmatpush3.bf16.msra.mxu1 %v12381_v20 }
 0x473   :  { %4976 = vmatprep.subr.bf16.mxu0 %v18376_v0  ;;  %11914 = vmatprep.subr.bf16.mxu1 %v12382_v62 }
 0x474   :  { %11851 = vmatmul.mubr.bf16.gmra.mrb[96].mxu0 %v12336_v12  ;;  %11899 = vmatmul.mubr.bf16.gmra.mrb[88].mxu1 %v12360_v16 }
 0x475   :  { %11854 = vmatprep.mubr.bf16.mxu0 %v12337_v18 }
 0x476   :  { %4977 = vmatpush1.bf16.msra.mxu0 %v12367_v57  ;;  %11915 = vmatpush3.bf16.msra.mxu1 %v12382_v62 }
 0x477   :  { %4978 = vmatprep.subr.bf16.mxu0 %v18376_v0  ;;  %11916 = vmatprep.subr.bf16.mxu1 %v12384_v53 }
 0x47a   :  { %4979 = vmatpush1.bf16.msra.mxu0 %v12368_v15  ;;  %11917 = vmatpush3.bf16.msra.mxu1 %v12384_v53 }
 0x47b   :  { %4980 = vmatprep.subr.bf16.mxu0 %v18376_v0  ;;  %5686 = vmatprep.subr.bf16.mxu1 %v18376_v0 }
 0x47c   :  { %11855 = vmatmul.mubr.bf16.gmra.mrb[100].mxu0 %v12338_v56 }
 0x47d   :  { %11858 = vmatprep.mubr.bf16.mxu0 %v12339_v35 }
 0x47e   :  { %4981 = vmatpush1.bf16.msra.mxu0 %v12369_v36 }
 0x47f   :  { %4982 = vmatprep.subr.bf16.mxu0 %v18376_v0 }
 0x482   :  { %4983 = vmatpush1.bf16.msra.mxu0 %v12370_v49 }
 0x483   :  { %4984 = vmatprep.subr.bf16.mxu0 %v18376_v0 }
 0x484   :  { %11859 = vmatmul.mubr.bf16.gmra.mrb[104].mxu0 %v12340_v26 }
 0x485   :  { %11862 = vmatprep.mubr.bf16.mxu0 %v12341_v17 }
 0x486   :  { %4985 = vmatpush1.bf16.msra.mxu0 %v12371_v34 }
 0x487   :  { %4986 = vmatprep.subr.bf16.mxu0 %v18376_v0 }
 0x48a   :  { %4987 = vmatpush1.bf16.msra.mxu0 %v12373_v13 }
 0x48b   :  { %4988 = vmatprep.subr.bf16.mxu0 %v18376_v0 }
 0x48c   :  { %11863 = vmatmul.mubr.bf16.gmra.mrb[108].mxu0 %v12342_v50 }
 0x48d   :  { %11866 = vmatprep.mubr.bf16.mxu0 %v12343_v10 }
 0x48e   :  { %4989 = vmatpush1.bf16.msra.mxu0 %v12375_v9 }
 0x48f   :  { %4990 = vmatprep.subr.bf16.mxu0 %v18376_v0 }
 0x492   :  { %4991 = vmatpush1.bf16.msra.mxu0 %v12378_v52 }
 0x493   :  { %4992 = vmatprep.subr.bf16.mxu0 %v18376_v0 }
 0x494   :  { %11867 = vmatmul.mubr.bf16.gmra.mrb[112].mxu0 %v12344_v8 }
 0x495   :  { %11870 = vmatprep.mubr.bf16.mxu0 %v12345_v44 }
 0x496   :  { %4993 = vmatpush1.bf16.msra.mxu0 %v12380_v22  ;;  %v12386_v22 = vld [vmem:[%s18357_s11 + $0x88] sm:$0xff]  }
 0x497   :  { %4994 = vmatprep.subr.bf16.mxu0 %v18376_v0 }
 0x49a   :  { %4995 = vmatpush1.bf16.msra.mxu0 %v12383_v55 }
 0x49b   :  { %11982 = vmatprep.subr.bf16.mxu0 %v13842_v48 }
 0x49c   :  { %11871 = vmatmul.mubr.bf16.gmra.mrb[116].mxu0 %v12346_v60 }
 0x49d   :  { %11874 = vmatprep.mubr.bf16.mxu0 %v12347_v2 }
 0x4a4   :  { %11875 = vmatmul.mubr.bf16.gmra.mrb[120].mxu0 %v12348_v6 }
 0x4a5   :  { %11878 = vmatprep.mubr.bf16.mxu0 %v12349_v27 }
 0x4ac   :  { %11879 = vmatmul.mubr.bf16.gmra.mrb[124].mxu0 %v12350_v46 }
 0x4ad   :  { %11882 = vmatprep.mubr.bf16.mxu0 %v12351_v25 }
 0x4b4   :  { %11883 = vmatmul.mubr.bf16.gmra.mrb[128].mxu0 %v12352_v21 }
 0x52f   :  { %v11840_v3 = vpop.f32.mrb[84].mxu0  ;;  %v11888_v1 = vpop.f32.mrb[76].mxu1 }
 0x530   :  { %v3894_v51 = vrot.slane %v11840_v3, 7  ;;  %v4184_v28 = vrot.slane %v11840_v3, 1  ;;  %v3355_v40 = vpop.f32.mrb[85].mxu0  ;;  %v3966_v47 = vrot.slane %v11888_v1, 7  ;;  %4166 = vst [vmem:[#allocation4 + $0x548] sm:$0xff] %v11888_v1  ;;  %v4256_v61 = vrot.slane %v11888_v1, 1 }
 0x531   :  { %v3547_v42 = vpop.f32.mrb[77].mxu1  ;;  %v3891_v45 = vrot.slane %v3355_v40, 7  ;;  %v4181_v63 = vrot.slane %v3355_v40, 1  ;;  %v11841_v41 = vpop.f32.mrb[86].mxu0 }
 0x532   :  { %v3963_v29 = vrot.slane %v3547_v42, 7  ;;  %4164 = vst [vmem:[#allocation4 + $0x518] sm:$0xff] %v3547_v42  ;;  %v4253_v59 = vrot.slane %v3547_v42, 1  ;;  %v11889_v33 = vpop.f32.mrb[78].mxu1  ;;  %4054 = vst [vmem:[#allocation4 + $0x60] sm:$0xfe] %v3894_v51  ;;  %v13846_v30 = vpack.c.bf16 %v11841_v41, %v11840_v3 }
 0x533   :  { %v3895_v38 = vrot.slane %v11841_v41, 7  ;;  %v4185_v37 = vrot.slane %v11841_v41, 1  ;;  %v3358_v5 = vpop.f32.mrb[87].mxu0  ;;  %4102 = vst [vmem:[#allocation4 + $0x540] sm:$0xfe] %v3966_v47  ;;  %v3967_v39 = vrot.slane %v11889_v33, 7 }
 0x534   :  { %18565 = vst [vmem:[#allocation15_spill] sm:$0xff] %v13846_v30  ;;  %4167 = vst [vmem:[#allocation4 + $0x560] sm:$0xff] %v11889_v33  ;;  %v13848_v11 = vpop.f32.mrb[79].mxu1  ;;  %v3892_v58 = vrot.slane %v3358_v5, 7  ;;  %v4182_v23 = vrot.slane %v3358_v5, 1  ;;  %v13850_v19 = vpack.c.bf16 %v3358_v5, %v3355_v40  ;;  %v4257_v24 = vrot.slane %v11889_v33, 1 }
 0x535   :  { %4052 = vst [vmem:[#allocation4 + $0x30] sm:$0xfe] %v3891_v45  ;;  %4100 = vst [vmem:[#allocation4 + $0x510] sm:$0xfe] %v3963_v29  ;;  %v13853_v43 = vsel %vm3890_vm1, %v3894_v51, %v3895_v38  ;;  %v13856_v32 = vsel %vm4180_vm2, %v4184_v28, %v4185_v37  ;;  %v3968_v31 = vsel %vm3890_vm1, %v3966_v47, %v3967_v39  ;;  %v3964_v4 = vrot.slane %v13848_v11, 7  ;;  %v12388_v47 = vld [vmem:[%s18357_s11] sm:$0xff]  }
 0x536   :  { %4344 = vst [vmem:[#allocation4 + $0x88] sm:$0x7f] %v4185_v37  ;;  %v3893_v7 = vsel %vm3890_vm1, %v3891_v45, %v3892_v58  ;;  %v4183_v54 = vsel %vm4180_vm2, %v4181_v63, %v4182_v23  ;;  %4342 = vst [vmem:[#allocation4 + $0x58] sm:$0x7f] %v4182_v23  ;;  %4996 = vmatprep.mubr.bf16.mxu0 %v13850_v19  ;;  %v4258_v12 = vsel %vm4180_vm2, %v4256_v61, %v4257_v24  ;;  %v12387_v33 = vld [vmem:[%s18357_s11 + $0x90] sm:$0xff]  }
 0x537   :  { %4103 = vst [vmem:[#allocation4 + $0x558] sm:$0xff] %v3968_v31  ;;  %4392 = vst [vmem:[#allocation4 + $0x568] sm:$0x7f] %v4257_v24  ;;  %v4254_v16 = vrot.slane %v13848_v11, 1  ;;  %v3965_v18 = vsel %vm3890_vm1, %v3963_v29, %v3964_v4  ;;  %v11844_v57 = vpop.f32.mrb[88].mxu0  ;;  %v11892_v56 = vpop.f32.mrb[80].mxu1 }
 0x538   :  { %4391 = vst [vmem:[#allocation4 + $0x550] sm:$0xff] %v4258_v12  ;;  %4101 = vst [vmem:[#allocation4 + $0x528] sm:$0xff] %v3965_v18  ;;  %v3900_v35 = vrot.slane %v11844_v57, 7  ;;  %v4190_v36 = vrot.slane %v11844_v57, 1  ;;  %v3371_v49 = vpop.f32.mrb[89].mxu0  ;;  %v3972_v26 = vrot.slane %v11892_v56, 7 }
 0x539   :  { %v4255_v15 = vsel %vm4180_vm2, %v4253_v59, %v4254_v16  ;;  %4390 = vst [vmem:[#allocation4 + $0x538] sm:$0x7f] %v4254_v16  ;;  %4170 = vst [vmem:[#allocation4 + $0x5a8] sm:$0xff] %v11892_v56  ;;  %v3563_v17 = vpop.f32.mrb[81].mxu1  ;;  %v3897_v34 = vrot.slane %v3371_v49, 7  ;;  %v4187_v13 = vrot.slane %v3371_v49, 1 }
 0x53a   :  { %4389 = vst [vmem:[#allocation4 + $0x520] sm:$0xff] %v4255_v15  ;;  %v11845_v50 = vpop.f32.mrb[90].mxu0  ;;  %v3969_v10 = vrot.slane %v3563_v17, 7  ;;  %4168 = vst [vmem:[#allocation4 + $0x578] sm:$0xff] %v3563_v17  ;;  %v4262_v6 = vrot.slane %v11892_v56, 1  ;;  %v11893_v27 = vpop.f32.mrb[82].mxu1 }
 0x53b   :  { %4058 = vst [vmem:[#allocation4 + $0xc0] sm:$0xfe] %v3900_v35  ;;  %v3901_v9 = vrot.slane %v11845_v50, 7  ;;  %v4191_v8 = vrot.slane %v11845_v50, 1  ;;  %v3374_v44 = vpop.f32.mrb[91].mxu0  ;;  %v13867_v2 = vpack.c.bf16 %v11845_v50, %v11844_v57  ;;  %4171 = vst [vmem:[#allocation4 + $0x5c0] sm:$0xff] %v11893_v27 }
 0x53c   :  { %v4411_v60 = vld [vmem:[#allocation4 + $0x30] sm:$0xff]  ;;  %4106 = vst [vmem:[#allocation4 + $0x5a0] sm:$0xfe] %v3972_v26  ;;  %4056 = vst [vmem:[#allocation4 + $0x90] sm:$0xfe] %v3897_v34  ;;  %v3898_v46 = vrot.slane %v3374_v44, 7  ;;  %v13871_v14 = vpack.c.bf16 %v3374_v44, %v3371_v49 }
 0x53d   :  { %18566 = vst [vmem:[#allocation16_spill] sm:$0xff] %v13867_v2  ;;  %v4188_v25 = vrot.slane %v3374_v44, 1  ;;  %v13869_v21 = vpack.c.bf16 %v3893_v7, %v4411_v60  ;;  %v4422_v52 = vld [vmem:[#allocation4 + $0x88] sm:$0xff]  ;;  %4104 = vst [vmem:[#allocation4 + $0x570] sm:$0xfe] %v3969_v10  ;;  %v3566_v20 = vpop.f32.mrb[83].mxu1  ;;  %v13877_v62 = vsel %vm3890_vm1, %v3900_v35, %v3901_v9  ;;  %v13880_v55 = vsel %vm4180_vm2, %v4190_v36, %v4191_v8 }
 0x53e   :  { %18567 = vst [vmem:[#allocation17_spill] sm:$0xff] %v13871_v14  ;;  %4348 = vst [vmem:[#allocation4 + $0xe8] sm:$0x7f] %v4191_v8  ;;  %v4416_v53 = vld [vmem:[#allocation4 + $0x58] sm:$0xff]  ;;  %v4259_v3 = vrot.slane %v3563_v17, 1  ;;  %v3973_v1 = vrot.slane %v11893_v27, 7  ;;  %v13883_v51 = vsel %vm3890_vm1, %v3897_v34, %v3898_v46  ;;  %v13896_v42 = vpack.c.bf16 %v4422_v52, %v13856_v32 }
 0x53f   :  { %4169 = vst [vmem:[#allocation4 + $0x590] sm:$0xff] %v3566_v20  ;;  %v13886_v28 = vsel %vm4180_vm2, %v4187_v13, %v4188_v25  ;;  %4346 = vst [vmem:[#allocation4 + $0xb8] sm:$0x7f] %v4188_v25  ;;  %4997 = vmatmul.mubr.bf16.vlgmr.msra.gmra.mrb[132].mxu0 %v13869_v21  ;;  %v13889_v40 = vpack.c.bf16 %v4416_v53, %v4183_v54  ;;  %v4263_v61 = vrot.slane %v11893_v27, 1  ;;  %v3970_v63 = vrot.slane %v3566_v20, 7  ;;  %v11848_v29 = vpop.f32.mrb[92].mxu0 }
 0x540   :  { %5004 = vmatprep.mubr.bf16.mxu0 %v13846_v30  ;;  %18569 = vst [vmem:[#allocation19_spill] sm:$0xff] %v13896_v42  ;;  %11983 = vmatpush3.bf16.msra.mxu0 %v13842_v48  ;;  %v3974_v45 = vsel %vm3890_vm1, %v3972_v26, %v3973_v1  ;;  %v4260_v41 = vrot.slane %v3566_v20, 1  ;;  %v4417_v59 = vld [vmem:[#allocation4 + $0x60] sm:$0xff]  ;;  %v13905_v37 = vpop.f32.mrb[84].mxu1  ;;  %v3906_v48 = vrot.slane %v11848_v29, 7  ;;  %v4196_v5 = vrot.slane %v11848_v29, 1 }
 0x541   :  { %18568 = vst [vmem:[#allocation18_spill] sm:$0xff] %v13889_v40  ;;  %11918 = vmatprep.mubr.bf16.mxu1 %v13889_v40  ;;  %11984 = vmatprep.subr.bf16.mxu0 %v12386_v22  ;;  %4107 = vst [vmem:[#allocation4 + $0x5b8] sm:$0xff] %v3974_v45  ;;  %v4264_v38 = vsel %vm4180_vm2, %v4262_v6, %v4263_v61  ;;  %v3387_v39 = vpop.f32.mrb[93].mxu0  ;;  %v3971_v58 = vsel %vm3890_vm1, %v3969_v10, %v3970_v63  ;;  %v13911_v24 = vpop.f32.mrb[85].mxu1  ;;  %v12389_v7 = vld [vmem:[%s18357_s11 + $0x8] sm:$0xff]   ;;  %v3978_v54 = vrot.slane %v13905_v37, 7 }
 0x542   :  { %4396 = vst [vmem:[#allocation4 + $0x5c8] sm:$0x7f] %v4263_v61  ;;  %11919 = vmatmul.mubr.bf16.vlgmr.msra.gmra.mrb[92].mxu1 %v13896_v42  ;;  %4395 = vst [vmem:[#allocation4 + $0x5b0] sm:$0xff] %v4264_v38  ;;  %v4261_v23 = vsel %vm4180_vm2, %v4259_v3, %v4260_v41  ;;  %v3903_v32 = vrot.slane %v3387_v39, 7  ;;  %v4193_v31 = vrot.slane %v3387_v39, 1  ;;  %v11849_v4 = vpop.f32.mrb[94].mxu0  ;;  %v13919_v57 = vpack.c.bf16 %v13853_v43, %v4417_v59 }
 0x543   :  { %4394 = vst [vmem:[#allocation4 + $0x598] sm:$0x7f] %v4260_v41  ;;  %4174 = vst [vmem:[#allocation4 + $0x608] sm:$0xff] %v13905_v37  ;;  %5687 = vmatpush1.bf16.msra.mxu1 %v12388_v47  ;;  %v3907_v12 = vrot.slane %v11849_v4, 7  ;;  %v4197_v16 = vrot.slane %v11849_v4, 1  ;;  %v3390_v18 = vpop.f32.mrb[95].mxu0  ;;  %v13921_v15 = vpack.c.bf16 %v11849_v4, %v11848_v29 }
 0x544   :  { %4105 = vst [vmem:[#allocation4 + $0x588] sm:$0xff] %v3971_v58  ;;  %4393 = vst [vmem:[#allocation4 + $0x580] sm:$0xff] %v4261_v23  ;;  %11985 = vmatpush3.bf16.msra.mxu0 %v12386_v22  ;;  %5688 = vmatprep.subr.bf16.mxu1 %v18376_v0  ;;  %v13924_v56 = vpop.f32.mrb[86].mxu1  ;;  %v3904_v35 = vrot.slane %v3390_v18, 7  ;;  %v4194_v36 = vrot.slane %v3390_v18, 1  ;;  %v13926_v26 = vpack.c.bf16 %v3390_v18, %v3387_v39  ;;  %v4268_v17 = vrot.slane %v13905_v37, 1 }
 0x545   :  { %4172 = vst [vmem:[#allocation4 + $0x5d8] sm:$0xff] %v13911_v24  ;;  %4062 = vst [vmem:[#allocation4 + $0x120] sm:$0xfe] %v3906_v48  ;;  %v4434_v49 = vld [vmem:[#allocation4 + $0xe8] sm:$0xff]  ;;  %11986 = vmatprep.subr.bf16.mxu0 %v12387_v33  ;;  %v13929_v34 = vpop.f32.mrb[87].mxu1  ;;  %v13932_v43 = vsel %vm3890_vm1, %v3906_v48, %v3907_v12  ;;  %v13935_v13 = vsel %vm4180_vm2, %v4196_v5, %v4197_v16  ;;  %v3975_v9 = vrot.slane %v13911_v24, 7 }
 0x546   :  { %18570 = vst [vmem:[#allocation20_spill] sm:$0xff] %v13919_v57  ;;  %18571 = vst [vmem:[#allocation21_spill] sm:$0xff] %v13921_v15  ;;  %v4428_v50 = vld [vmem:[#allocation4 + $0xb8] sm:$0xff]  ;;  %v13938_v10 = vpack.c.bf16 %v4434_v49, %v13880_v55  ;;  %v13945_v44 = vsel %vm3890_vm1, %v3903_v32, %v3904_v35  ;;  %v13948_v60 = vsel %vm4180_vm2, %v4193_v31, %v4194_v36  ;;  %v12390_v27 = vld [vmem:[%s18357_s11 + $0x10] sm:$0xff]   ;;  %v4265_v46 = vrot.slane %v13911_v24, 1 }
 0x547   :  { %4060 = vst [vmem:[#allocation4 + $0xf0] sm:$0xfe] %v3903_v32  ;;  %18572 = vst [vmem:[#allocation22_spill] sm:$0xff] %v13926_v26  ;;  %v12396_v8 = vld [vmem:[%s18357_s11 + $0x98] sm:$0xff]   ;;  %5005 = vmatmul.mubr.bf16.gmra.mrb[136].mxu0 %v13919_v57  ;;  %v13952_v6 = vpack.c.bf16 %v4428_v50, %v13886_v28  ;;  %5689 = vmatpush1.bf16.msra.mxu1 %v12389_v7  ;;  %v3979_v25 = vrot.slane %v13924_v56, 7  ;;  %v4269_v52 = vrot.slane %v13924_v56, 1 }
 0x548   :  { %4110 = vst [vmem:[#allocation4 + $0x600] sm:$0xfe] %v3978_v54  ;;  %4352 = vst [vmem:[#allocation4 + $0x148] sm:$0x7f] %v4197_v16  ;;  %5012 = vmatprep.mubr.bf16.mxu0 %v13871_v14  ;;  %11987 = vmatpush3.bf16.msra.mxu0 %v12387_v33  ;;  %v3976_v22 = vrot.slane %v13929_v34, 7  ;;  %v4266_v20 = vrot.slane %v13929_v34, 1 }
 0x549   :  { %18573 = vst [vmem:[#allocation23_spill] sm:$0xff] %v13938_v10  ;;  %4350 = vst [vmem:[#allocation4 + $0x118] sm:$0x7f] %v4194_v36  ;;  %v11852_v55 = vpop.f32.mrb[96].mxu0  ;;  %11922 = vmatprep.mubr.bf16.mxu1 %v13952_v6  ;;  %5690 = vmatprep.subr.bf16.mxu1 %v18376_v0  ;;  %v13965_v53 = vpop.f32.mrb[88].mxu1  ;;  %v12405_v3 = vld [vmem:[%s18357_s11 + $0xa0] sm:$0xff]   ;;  %v3980_v45 = vsel %vm3890_vm1, %v3978_v54, %v3979_v25  ;;  %v13973_v63 = vsel %vm4180_vm2, %v4268_v17, %v4269_v52 }
 0x54a   :  { %18574 = vst [vmem:[#allocation24_spill] sm:$0xff] %v13952_v6  ;;  %4108 = vst [vmem:[#allocation4 + $0x5d0] sm:$0xfe] %v3975_v9  ;;  %v3912_v1 = vrot.slane %v11852_v55, 7  ;;  %v4202_v28 = vrot.slane %v11852_v55, 1  ;;  %v3403_v47 = vpop.f32.mrb[97].mxu0  ;;  %11923 = vmatmul.mubr.bf16.gmra.mrb[96].mxu1 %v13938_v10  ;;  %11988 = vmatprep.subr.bf16.mxu0 %v12396_v8  ;;  %v3977_v37 = vsel %vm3890_vm1, %v3975_v9, %v3976_v22 }
 0x54b   :  { %v4423_v61 = vld [vmem:[#allocation4 + $0x90] sm:$0xff]  ;;  %4400 = vst [vmem:[#allocation4 + $0x628] sm:$0x7f] %v4269_v52  ;;  %4398 = vst [vmem:[#allocation4 + $0x5f8] sm:$0x7f] %v4266_v20  ;;  %v13975_v41 = vpop.f32.mrb[89].mxu1  ;;  %5691 = vmatpush1.bf16.msra.mxu1 %v12390_v27  ;;  %v13982_v48 = vsel %vm4180_vm2, %v4265_v46, %v4266_v20 }
 0x54c   :  { %v3909_v29 = vrot.slane %v3403_v47, 7  ;;  %v4199_v59 = vrot.slane %v3403_v47, 1  ;;  %v11853_v33 = vpop.f32.mrb[98].mxu0  ;;  %v12391_v38 = vld [vmem:[%s18357_s11 + $0x18] sm:$0xff]   ;;  %4111 = vst [vmem:[#allocation4 + $0x618] sm:$0xff] %v3980_v45  ;;  %v13984_v5 = vpop.f32.mrb[90].mxu1  ;;  %5692 = vmatprep.subr.bf16.mxu1 %v18376_v0  ;;  %11989 = vmatpush3.bf16.msra.mxu0 %v12396_v8  ;;  %v13992_v7 = vpack.c.bf16 %v13883_v51, %v4423_v61 }
 0x54d   :  { %4066 = vst [vmem:[#allocation4 + $0x180] sm:$0xfe] %v3912_v1  ;;  %v3913_v39 = vrot.slane %v11853_v33, 7  ;;  %v4203_v58 = vrot.slane %v11853_v33, 1  ;;  %v3406_v23 = vpop.f32.mrb[99].mxu0  ;;  %v13986_v24 = vpack.c.bf16 %v11853_v33, %v11852_v55  ;;  %4109 = vst [vmem:[#allocation4 + $0x5e8] sm:$0xff] %v3977_v37  ;;  %11990 = vmatprep.subr.bf16.mxu0 %v12405_v3 }
 0x54e   :  { %v13989_v32 = vpop.f32.mrb[91].mxu1  ;;  %4064 = vst [vmem:[#allocation4 + $0x150] sm:$0xfe] %v3909_v29  ;;  %v3910_v31 = vrot.slane %v3406_v23, 7  ;;  %v4200_v4 = vrot.slane %v3406_v23, 1  ;;  %18576 = vst [vmem:[#allocation26_spill] sm:$0xff] %v13992_v7  ;;  %v13994_v12 = vpack.c.bf16 %v3406_v23, %v3403_v47 }
 0x54f   :  { %18575 = vst [vmem:[#allocation25_spill] sm:$0xff] %v13986_v24  ;;  %v4446_v54 = vld [vmem:[#allocation4 + $0x148] sm:$0xff]  ;;  %v13997_v16 = vsel %vm3890_vm1, %v3912_v1, %v3913_v39  ;;  %v4204_v18 = vsel %vm4180_vm2, %v4202_v28, %v4203_v58  ;;  %4356 = vst [vmem:[#allocation4 + $0x1a8] sm:$0x7f] %v4203_v58  ;;  %v3984_v49 = vrot.slane %v13965_v53, 7  ;;  %5013 = vmatmul.mubr.bf16.gmra.mrb[140].mxu0 %v13992_v7  ;;  %5693 = vmatpush1.bf16.msra.mxu1 %v12391_v38  ;;  %v12392_v9 = vld [vmem:[%s18357_s11 + $0x20] sm:$0xff]  }
 0x550   :  { %18577 = vst [vmem:[#allocation27_spill] sm:$0xff] %v13994_v12  ;;  %v4440_v35 = vld [vmem:[#allocation4 + $0x118] sm:$0xff]  ;;  %v14001_v36 = vpack.c.bf16 %v4446_v54, %v13935_v13  ;;  %v14005_v17 = vsel %vm3890_vm1, %v3909_v29, %v3910_v31  ;;  %v4201_v51 = vsel %vm4180_vm2, %v4199_v59, %v4200_v4  ;;  %4354 = vst [vmem:[#allocation4 + $0x178] sm:$0x7f] %v4200_v4  ;;  %v4274_v13 = vrot.slane %v13965_v53, 1  ;;  %v11856_v46 = vpop.f32.mrb[100].mxu0 }
 0x551   :  { %v14010_v50 = vpack.c.bf16 %v4440_v35, %v13948_v60  ;;  %5020 = vmatprep.mubr.bf16.mxu0 %v13867_v2  ;;  %5694 = vmatprep.subr.bf16.mxu1 %v18376_v0  ;;  %4114 = vst [vmem:[#allocation4 + $0x660] sm:$0xfe] %v3984_v49  ;;  %v3981_v8 = vrot.slane %v13975_v41, 7  ;;  %v3985_v27 = vrot.slane %v13984_v5, 7  ;;  %v4275_v60 = vrot.slane %v13984_v5, 1  ;;  %v3419_v55 = vpop.f32.mrb[101].mxu0 }
 0x552   :  { %18578 = vst [vmem:[#allocation28_spill] sm:$0xff] %v14001_v36  ;;  %v3982_v25 = vrot.slane %v13989_v32, 7  ;;  %v4272_v52 = vrot.slane %v13989_v32, 1  ;;  %11991 = vmatpush3.bf16.msra.mxu0 %v12405_v3  ;;  %v3918_v22 = vrot.slane %v11856_v46, 7  ;;  %v4208_v20 = vrot.slane %v11856_v46, 1  ;;  %v4429_v1 = vld [vmem:[#allocation4 + $0xc0] sm:$0xff] }
 0x553   :  { %18579 = vst [vmem:[#allocation29_spill] sm:$0xff] %v14010_v50  ;;  %11926 = vmatprep.mubr.bf16.mxu1 %v14010_v50  ;;  %4112 = vst [vmem:[#allocation4 + $0x630] sm:$0xfe] %v3981_v8  ;;  %v4271_v28 = vrot.slane %v13975_v41, 1  ;;  %v3986_v47 = vsel %vm3890_vm1, %v3984_v49, %v3985_v27  ;;  %v3915_v61 = vrot.slane %v3419_v55, 7  ;;  %v4205_v45 = vrot.slane %v3419_v55, 1  ;;  %5695 = vmatpush1.bf16.msra.mxu1 %v12392_v9 }
 0x554   :  { %11927 = vmatmul.mubr.bf16.gmra.mrb[100].mxu1 %v14001_v36  ;;  %v11857_v29 = vpop.f32.mrb[102].mxu0  ;;  %v12393_v59 = vld [vmem:[%s18357_s11 + $0x28] sm:$0xff]   ;;  %4115 = vst [vmem:[#allocation4 + $0x678] sm:$0xff] %v3986_v47  ;;  %v14031_v3 = vsel %vm4180_vm2, %v4274_v13, %v4275_v60  ;;  %4404 = vst [vmem:[#allocation4 + $0x688] sm:$0x7f] %v4275_v60  ;;  %v3983_v33 = vsel %vm3890_vm1, %v3981_v8, %v3982_v25  ;;  %5696 = vmatprep.subr.bf16.mxu1 %v18376_v0  ;;  %v12394_v25 = vld [vmem:[%s18357_s11 + $0x30] sm:$0xff]  }
 0x555   :  { %4402 = vst [vmem:[#allocation4 + $0x658] sm:$0x7f] %v4272_v52  ;;  %4070 = vst [vmem:[#allocation4 + $0x1e0] sm:$0xfe] %v3918_v22  ;;  %v3919_v38 = vrot.slane %v11857_v29, 7  ;;  %v4209_v37 = vrot.slane %v11857_v29, 1  ;;  %v14034_v58 = vpack.c.bf16 %v11857_v29, %v11856_v46  ;;  %v14038_v4 = vpack.c.bf16 %v13877_v62, %v4429_v1 }
 0x556   :  { %v3422_v39 = vpop.f32.mrb[103].mxu0  ;;  %4113 = vst [vmem:[#allocation4 + $0x648] sm:$0xff] %v3983_v33  ;;  %4068 = vst [vmem:[#allocation4 + $0x1b0] sm:$0xfe] %v3915_v61  ;;  %v4458_v54 = vld [vmem:[#allocation4 + $0x1a8] sm:$0xff]  ;;  %v14049_v27 = vsel %vm4180_vm2, %v4271_v28, %v4272_v52  ;;  %v12395_v47 = vld [vmem:[%s18357_s11 + $0x38] sm:$0xff]  }
 0x557   :  { %18580 = vst [vmem:[#allocation30_spill] sm:$0xff] %v14034_v58  ;;  %v3916_v23 = vrot.slane %v3422_v39, 7  ;;  %v4206_v31 = vrot.slane %v3422_v39, 1  ;;  %18581 = vst [vmem:[#allocation31_spill] sm:$0xff] %v14038_v4  ;;  %v14040_v35 = vpack.c.bf16 %v3422_v39, %v3419_v55  ;;  %v14043_v49 = vsel %vm3890_vm1, %v3918_v22, %v3919_v38  ;;  %v4452_v13 = vld [vmem:[#allocation4 + $0x178] sm:$0xff]  ;;  %5021 = vmatmul.mubr.bf16.gmra.mrb[144].mxu0 %v14038_v4  ;;  %v4435_v55 = vld [vmem:[#allocation4 + $0xf0] sm:$0xff] }
 0x558   :  { %v4210_v9 = vsel %vm4180_vm2, %v4208_v20, %v4209_v37  ;;  %4360 = vst [vmem:[#allocation4 + $0x208] sm:$0x7f] %v4209_v37  ;;  %v14046_v8 = vpack.c.bf16 %v4458_v54, %v4204_v18  ;;  %v14056_v60 = vpack.c.bf16 %v4452_v13, %v4201_v51  ;;  %5697 = vmatpush1.bf16.msra.mxu1 %v12393_v59  ;;  %v11860_v18 = vpop.f32.mrb[104].mxu0 }
 0x559   :  { %18582 = vst [vmem:[#allocation32_spill] sm:$0xff] %v14040_v35  ;;  %v14052_v46 = vsel %vm3890_vm1, %v3915_v61, %v3916_v23  ;;  %v4207_v62 = vsel %vm4180_vm2, %v4205_v45, %v4206_v31  ;;  %4358 = vst [vmem:[#allocation4 + $0x1d8] sm:$0x7f] %v4206_v31  ;;  %5028 = vmatprep.mubr.bf16.mxu0 %v13926_v26  ;;  %5698 = vmatprep.subr.bf16.mxu1 %v18376_v0  ;;  %v3924_v52 = vrot.slane %v11860_v18, 7  ;;  %v3435_v20 = vpop.f32.mrb[105].mxu0 }
 0x55a   :  { %18583 = vst [vmem:[#allocation33_spill] sm:$0xff] %v14046_v8  ;;  %18584 = vst [vmem:[#allocation34_spill] sm:$0xff] %v14056_v60  ;;  %11930 = vmatprep.mubr.bf16.mxu1 %v14056_v60  ;;  %v4214_v22 = vrot.slane %v11860_v18, 1  ;;  %v3921_v51 = vrot.slane %v3435_v20, 7  ;;  %v4211_v1 = vrot.slane %v3435_v20, 1  ;;  %v11861_v28 = vpop.f32.mrb[106].mxu0  ;;  %v14072_v37 = vpack.c.bf16 %v13945_v44, %v4435_v55 }
 0x55b   :  { %4074 = vst [vmem:[#allocation4 + $0x240] sm:$0xfe] %v3924_v52  ;;  %v3925_v61 = vrot.slane %v11861_v28, 7  ;;  %v4215_v45 = vrot.slane %v11861_v28, 1  ;;  %v3438_v29 = vpop.f32.mrb[107].mxu0  ;;  %v14068_v59 = vpack.c.bf16 %v11861_v28, %v11860_v18 }
 0x55c   :  { %11931 = vmatmul.mubr.bf16.gmra.mrb[104].mxu1 %v14046_v8  ;;  %4072 = vst [vmem:[#allocation4 + $0x210] sm:$0xfe] %v3921_v51  ;;  %v3922_v33 = vrot.slane %v3438_v29, 7  ;;  %v4212_v38 = vrot.slane %v3438_v29, 1  ;;  %18586 = vst [vmem:[#allocation36_spill] sm:$0xff] %v14072_v37  ;;  %v14074_v23 = vpack.c.bf16 %v3438_v29, %v3435_v20 }
 0x55d   :  { %5699 = vmatpush1.bf16.msra.mxu1 %v12394_v25  ;;  %18585 = vst [vmem:[#allocation35_spill] sm:$0xff] %v14068_v59  ;;  %v14077_v31 = vsel %vm3890_vm1, %v3924_v52, %v3925_v61  ;;  %v4216_v54 = vsel %vm4180_vm2, %v4214_v22, %v4215_v45  ;;  %4364 = vst [vmem:[#allocation4 + $0x268] sm:$0x7f] %v4215_v45  ;;  %v12397_v52 = vld [vmem:[%s18357_s11 + $0x40] sm:$0xff]   ;;  %v12398_v45 = vld [vmem:[%s18357_s11 + $0x48] sm:$0xff]  }
 0x55e   :  { %5700 = vmatprep.subr.bf16.mxu1 %v18376_v0  ;;  %18587 = vst [vmem:[#allocation37_spill] sm:$0xff] %v14074_v23  ;;  %v14083_v18 = vsel %vm3890_vm1, %v3921_v51, %v3922_v33  ;;  %v4213_v28 = vsel %vm4180_vm2, %v4211_v1, %v4212_v38  ;;  %4362 = vst [vmem:[#allocation4 + $0x238] sm:$0x7f] %v4212_v38  ;;  %v4441_v51 = vld [vmem:[#allocation4 + $0x120] sm:$0xff] }
 0x55f   :  { %v4470_v39 = vld [vmem:[#allocation4 + $0x208] sm:$0xff]  ;;  %5029 = vmatmul.mubr.bf16.gmra.mrb[148].mxu0 %v14072_v37  ;;  %v11864_v22 = vpop.f32.mrb[108].mxu0 }
 0x560   :  { %v4464_v13 = vld [vmem:[#allocation4 + $0x1d8] sm:$0xff]  ;;  %v14080_v25 = vpack.c.bf16 %v4470_v39, %v4210_v9  ;;  %v12406_v9 = vld [vmem:[%s18357_s11 + $0xa8] sm:$0xff]   ;;  %5036 = vmatprep.mubr.bf16.mxu0 %v13921_v15  ;;  %v3930_v20 = vrot.slane %v11864_v22, 7  ;;  %v3451_v55 = vpop.f32.mrb[109].mxu0 }
 0x561   :  { %v14087_v44 = vpack.c.bf16 %v4464_v13, %v4207_v62  ;;  %5701 = vmatpush1.bf16.msra.mxu1 %v12395_v47  ;;  %11992 = vmatprep.subr.bf16.mxu0 %v12406_v9  ;;  %v4220_v62 = vrot.slane %v11864_v22, 1  ;;  %v3927_v1 = vrot.slane %v3451_v55, 7  ;;  %v4217_v47 = vrot.slane %v3451_v55, 1  ;;  %v11865_v61 = vpop.f32.mrb[110].mxu0 }
 0x562   :  { %18588 = vst [vmem:[#allocation38_spill] sm:$0xff] %v14080_v25  ;;  %5702 = vmatprep.subr.bf16.mxu1 %v18376_v0  ;;  %11993 = vmatpush3.bf16.msra.mxu0 %v12406_v9  ;;  %4078 = vst [vmem:[#allocation4 + $0x2a0] sm:$0xfe] %v3930_v20  ;;  %v3931_v29 = vrot.slane %v11865_v61, 7  ;;  %v4221_v33 = vrot.slane %v11865_v61, 1  ;;  %v3454_v38 = vpop.f32.mrb[111].mxu0  ;;  %v14102_v39 = vpack.c.bf16 %v11865_v61, %v11864_v22 }
 0x563   :  { %18589 = vst [vmem:[#allocation39_spill] sm:$0xff] %v14087_v44  ;;  %11934 = vmatprep.mubr.bf16.mxu1 %v14087_v44  ;;  %4076 = vst [vmem:[#allocation4 + $0x270] sm:$0xfe] %v3927_v1  ;;  %v3928_v13 = vrot.slane %v3454_v38, 7  ;;  %v14106_v9 = vpack.c.bf16 %v13932_v43, %v4441_v51 }
 0x564   :  { %11935 = vmatmul.mubr.bf16.gmra.mrb[108].mxu1 %v14080_v25  ;;  %18590 = vst [vmem:[#allocation40_spill] sm:$0xff] %v14102_v39  ;;  %v4218_v25 = vrot.slane %v3454_v38, 1  ;;  %v4482_v44 = vld [vmem:[#allocation4 + $0x268] sm:$0xff]  ;;  %v14111_v8 = vsel %vm3890_vm1, %v3930_v20, %v3931_v29  ;;  %v4222_v60 = vsel %vm4180_vm2, %v4220_v62, %v4221_v33  ;;  %4368 = vst [vmem:[#allocation4 + $0x2c8] sm:$0x7f] %v4221_v33  ;;  %v12399_v20 = vld [vmem:[%s18357_s11 + $0x50] sm:$0xff]  }
 0x565   :  { %5703 = vmatpush1.bf16.msra.mxu1 %v12397_v52  ;;  %18591 = vst [vmem:[#allocation41_spill] sm:$0xff] %v14106_v9  ;;  %v14108_v52 = vpack.c.bf16 %v3454_v38, %v3451_v55  ;;  %v4476_v36 = vld [vmem:[#allocation4 + $0x238] sm:$0xff]  ;;  %v14114_v22 = vpack.c.bf16 %v4482_v44, %v4216_v54  ;;  %v14117_v61 = vsel %vm3890_vm1, %v3927_v1, %v3928_v13  ;;  %v18595_v62 = vmov 0  }
 0x566   :  { %5704 = vmatprep.subr.bf16.mxu1 %v18376_v0  ;;  %v4219_v0 = vsel %vm4180_vm2, %v4217_v47, %v4218_v25  ;;  %4366 = vst [vmem:[#allocation4 + $0x298] sm:$0x7f] %v4218_v25  ;;  %v14121_v43 = vpack.c.bf16 %v4476_v36, %v4213_v28  ;;  %v4447_v25 = vld [vmem:[#allocation4 + $0x150] sm:$0xff]  ;;  %v12400_v47 = vld [vmem:[%s18357_s11 + $0x58] sm:$0xff]  }
 0x567   :  { %18592 = vst [vmem:[#allocation42_spill] sm:$0xff] %v14108_v52  ;;  %18593 = vst [vmem:[#allocation43_spill] sm:$0xff] %v14114_v22  ;;  %5037 = vmatmul.mubr.bf16.gmra.mrb[152].mxu0 %v14106_v9  ;;  %v11868_v54 = vpop.f32.mrb[112].mxu0 }
 0x568   :  { %18594 = vst [vmem:[#allocation44_spill] sm:$0xff] %v14121_v43  ;;  %5044 = vmatprep.mubr.bf16.mxu0 %v13994_v12  ;;  %11938 = vmatprep.mubr.bf16.mxu1 %v14121_v43  ;;  %v3936_v44 = vrot.slane %v11868_v54, 7  ;;  %v4226_v55 = vrot.slane %v11868_v54, 1  ;;  %v3467_v51 = vpop.f32.mrb[113].mxu0  ;;  %v14137_v43 = vpack.c.bf16 %v14005_v17, %v4447_v25 }
 0x569   :  { %5705 = vmatpush1.bf16.msra.mxu1 %v12398_v45  ;;  %v3933_v36 = vrot.slane %v3467_v51, 7  ;;  %v4223_v28 = vrot.slane %v3467_v51, 1  ;;  %v11869_v1 = vpop.f32.mrb[114].mxu0 }
 0x56a   :  { %5706 = vmatprep.subr.bf16.mxu1 %v18595_v62  ;;  %4082 = vst [vmem:[#allocation4 + $0x300] sm:$0xfe] %v3936_v44  ;;  %v3937_v45 = vrot.slane %v11869_v1, 7  ;;  %v4227_v29 = vrot.slane %v11869_v1, 1  ;;  %v3470_v33 = vpop.f32.mrb[115].mxu0  ;;  %v14134_v38 = vpack.c.bf16 %v11869_v1, %v11868_v54  ;;  %18597 = vst [vmem:[#allocation46_spill] sm:$0xff] %v14137_v43 }
 0x56b   :  { %4080 = vst [vmem:[#allocation4 + $0x2d0] sm:$0xfe] %v3933_v36  ;;  %v3934_v13 = vrot.slane %v3470_v33, 7  ;;  %v4494_v50 = vld [vmem:[#allocation4 + $0x2c8] sm:$0xff] }
 0x56c   :  { %11939 = vmatmul.mubr.bf16.gmra.mrb[112].mxu1 %v14114_v22  ;;  %18596 = vst [vmem:[#allocation45_spill] sm:$0xff] %v14134_v38  ;;  %v4224_v22 = vrot.slane %v3470_v33, 1  ;;  %v14142_v10 = vsel %vm3890_vm1, %v3936_v44, %v3937_v45  ;;  %v4228_v6 = vsel %vm4180_vm2, %v4226_v55, %v4227_v29  ;;  %4372 = vst [vmem:[#allocation4 + $0x328] sm:$0x7f] %v4227_v29  ;;  %v12401_v44 = vld [vmem:[%s18357_s11 + $0x60] sm:$0xff]  }
 0x56d   :  { %5707 = vmatpush1.bf16.msra.mxu1 %v12399_v20  ;;  %v14139_v20 = vpack.c.bf16 %v3470_v33, %v3467_v51  ;;  %v4488_v42 = vld [vmem:[#allocation4 + $0x298] sm:$0xff]  ;;  %v14145_v40 = vpack.c.bf16 %v4494_v50, %v4222_v60  ;;  %v14148_v54 = vsel %vm3890_vm1, %v3933_v36, %v3934_v13  ;;  %v12402_v36 = vld [vmem:[%s18357_s11 + $0x68] sm:$0xff]  }
 0x56e   :  { %5708 = vmatprep.subr.bf16.mxu1 %v18595_v62  ;;  %v4225_v1 = vsel %vm4180_vm2, %v4223_v28, %v4224_v22  ;;  %4370 = vst [vmem:[#allocation4 + $0x2f8] sm:$0x7f] %v4224_v22  ;;  %v14152_v17 = vpack.c.bf16 %v4488_v42, %v4219_v0  ;;  %v4453_v22 = vld [vmem:[#allocation4 + $0x180] sm:$0xff] }
 0x56f   :  { %18598 = vst [vmem:[#allocation47_spill] sm:$0xff] %v14139_v20  ;;  %18599 = vst [vmem:[#allocation48_spill] sm:$0xff] %v14145_v40  ;;  %5045 = vmatmul.mubr.bf16.gmra.mrb[156].mxu0 %v14137_v43  ;;  %v11872_v50 = vpop.f32.mrb[116].mxu0 }
 0x570   :  { %18600 = vst [vmem:[#allocation49_spill] sm:$0xff] %v14152_v17  ;;  %5052 = vmatprep.mubr.bf16.mxu0 %v13986_v24  ;;  %11942 = vmatprep.mubr.bf16.mxu1 %v14152_v17  ;;  %v3942_v60 = vrot.slane %v11872_v50, 7  ;;  %v4232_v55 = vrot.slane %v11872_v50, 1  ;;  %v3483_v51 = vpop.f32.mrb[117].mxu0 }
 0x571   :  { %5709 = vmatpush1.bf16.msra.mxu1 %v12400_v47  ;;  %v3939_v0 = vrot.slane %v3483_v51, 7  ;;  %v4229_v42 = vrot.slane %v3483_v51, 1  ;;  %v11873_v25 = vpop.f32.mrb[118].mxu0 }
 0x572   :  { %5710 = vmatprep.subr.bf16.mxu1 %v18595_v62  ;;  %4086 = vst [vmem:[#allocation4 + $0x3c0] sm:$0xfe] %v3942_v60  ;;  %v3943_v28 = vrot.slane %v11873_v25, 7  ;;  %v4233_v47 = vrot.slane %v11873_v25, 1  ;;  %v3486_v45 = vpop.f32.mrb[119].mxu0  ;;  %v14165_v29 = vpack.c.bf16 %v11873_v25, %v11872_v50 }
 0x573   :  { %4084 = vst [vmem:[#allocation4 + $0x390] sm:$0xfe] %v3939_v0  ;;  %v3940_v33 = vrot.slane %v3486_v45, 7  ;;  %v4230_v13 = vrot.slane %v3486_v45, 1  ;;  %v4506_v17 = vld [vmem:[#allocation4 + $0x328] sm:$0xff] }
 0x574   :  { %11943 = vmatmul.mubr.bf16.gmra.mrb[116].mxu1 %v14145_v40  ;;  %18601 = vst [vmem:[#allocation50_spill] sm:$0xff] %v14165_v29  ;;  %v14168_v40 = vpack.c.bf16 %v13997_v16, %v4453_v22  ;;  %v14173_v24 = vsel %vm3890_vm1, %v3942_v60, %v3943_v28  ;;  %v4234_v43 = vsel %vm4180_vm2, %v4232_v55, %v4233_v47  ;;  %4376 = vst [vmem:[#allocation4 + $0x3e8] sm:$0x7f] %v4233_v47  ;;  %v12403_v60 = vld [vmem:[%s18357_s11 + $0x70] sm:$0xff]  }
 0x575   :  { %5711 = vmatpush1.bf16.msra.mxu1 %v12401_v44  ;;  %v14170_v44 = vpack.c.bf16 %v3486_v45, %v3483_v51  ;;  %v4500_v12 = vld [vmem:[#allocation4 + $0x2f8] sm:$0xff]  ;;  %v14176_v9 = vpack.c.bf16 %v4506_v17, %v4228_v6  ;;  %v14179_v50 = vsel %vm3890_vm1, %v3939_v0, %v3940_v33  ;;  %v4231_v25 = vsel %vm4180_vm2, %v4229_v42, %v4230_v13  ;;  %v4459_v22 = vld [vmem:[#allocation4 + $0x1b0] sm:$0xff] }
 0x576   :  { %5712 = vmatprep.subr.bf16.mxu1 %v18595_v62  ;;  %18602 = vst [vmem:[#allocation51_spill] sm:$0xff] %v14168_v40  ;;  %4374 = vst [vmem:[#allocation4 + $0x3b8] sm:$0x7f] %v4230_v13  ;;  %v14183_v16 = vpack.c.bf16 %v4500_v12, %v4225_v1  ;;  %v12404_v42 = vld [vmem:[%s18357_s11 + $0x78] sm:$0xff]  }
 0x577   :  { %18603 = vst [vmem:[#allocation52_spill] sm:$0xff] %v14176_v9  ;;  %5053 = vmatmul.mubr.bf16.gmra.mrb[160].mxu0 %v14168_v40  ;;  %v11876_v6 = vpop.f32.mrb[120].mxu0 }
 0x578   :  { %18604 = vst [vmem:[#allocation53_spill] sm:$0xff] %v14183_v16  ;;  %5060 = vmatprep.mubr.bf16.mxu0 %v14040_v35  ;;  %11946 = vmatprep.mubr.bf16.mxu1 %v14183_v16  ;;  %v3948_v17 = vrot.slane %v11876_v6, 7  ;;  %v4238_v55 = vrot.slane %v11876_v6, 1  ;;  %v3499_v51 = vpop.f32.mrb[121].mxu0 }
 0x579   :  { %5713 = vmatpush1.bf16.msra.mxu1 %v12402_v36  ;;  %v3945_v12 = vrot.slane %v3499_v51, 7  ;;  %v4235_v1 = vrot.slane %v3499_v51, 1  ;;  %v11877_v0 = vpop.f32.mrb[122].mxu0  ;;  %v12604_v36 = vld [vmem:[#allocation4 + $0x518] sm:$0xff] }
 0x57a   :  { %5714 = vmatprep.subr.bf16.mxu1 %v18595_v62  ;;  %v14196_v28 = vpack.c.bf16 %v13848_v11, %v12604_v36  ;;  %4090 = vst [vmem:[#allocation4 + $0x420] sm:$0xfe] %v3948_v17  ;;  %v3949_v47 = vrot.slane %v11877_v0, 7  ;;  %v4239_v45 = vrot.slane %v11877_v0, 1  ;;  %v3502_v33 = vpop.f32.mrb[123].mxu0  ;;  %v14199_v13 = vpack.c.bf16 %v11877_v0, %v11876_v6 }
 0x57b   :  { %4088 = vst [vmem:[#allocation4 + $0x3f0] sm:$0xfe] %v3945_v12  ;;  %v4236_v16 = vrot.slane %v3502_v33, 1  ;;  %v4530_v35 = vld [vmem:[#allocation4 + $0x3e8] sm:$0xff]  ;;  %v14204_v40 = vpack.c.bf16 %v3502_v33, %v3499_v51 }
 0x57c   :  { %11947 = vmatmul.mubr.bf16.gmra.mrb[120].mxu1 %v14176_v9  ;;  %18605 = vst [vmem:[#allocation54_spill] sm:$0xff] %v14196_v28  ;;  %18606 = vst [vmem:[#allocation55_spill] sm:$0xff] %v14199_v13  ;;  %v3946_v9 = vrot.slane %v3502_v33, 7  ;;  %v14207_v11 = vsel %vm3890_vm1, %v3948_v17, %v3949_v47  ;;  %v4240_v36 = vsel %vm4180_vm2, %v4238_v55, %v4239_v45  ;;  %v12407_v17 = vld [vmem:[%s18357_s11 + $0xb0] sm:$0xff]   ;;  %v12605_v55 = vld [vmem:[#allocation4 + $0x548] sm:$0xff] }
 0x57d   :  { %5715 = vmatpush1.bf16.msra.mxu1 %v12403_v60  ;;  %v14202_v60 = vpack.c.bf16 %v14052_v46, %v4459_v22  ;;  %18608 = vst [vmem:[#allocation57_spill] sm:$0xff] %v14204_v40  ;;  %4380 = vst [vmem:[#allocation4 + $0x448] sm:$0x7f] %v4239_v45  ;;  %v4524_v28 = vld [vmem:[#allocation4 + $0x3b8] sm:$0xff]  ;;  %v14210_v15 = vpack.c.bf16 %v4530_v35, %v4234_v43  ;;  %v4237_v0 = vsel %vm4180_vm2, %v4235_v1, %v4236_v16  ;;  %v12606_v35 = vld [vmem:[#allocation4 + $0x560] sm:$0xff] }
 0x57e   :  { %5716 = vmatprep.subr.bf16.mxu1 %v18595_v62  ;;  %v14213_v6 = vsel %vm3890_vm1, %v3945_v12, %v3946_v9  ;;  %4378 = vst [vmem:[#allocation4 + $0x418] sm:$0x7f] %v4236_v16  ;;  %v14217_v46 = vpack.c.bf16 %v4524_v28, %v4231_v25  ;;  %v14223_v43 = vpack.c.bf16 %v12606_v35, %v12605_v55  ;;  %v4465_v25 = vld [vmem:[#allocation4 + $0x1e0] sm:$0xff] }
 0x57f   :  { %18607 = vst [vmem:[#allocation56_spill] sm:$0xff] %v14202_v60  ;;  %18609 = vst [vmem:[#allocation58_spill] sm:$0xff] %v14210_v15  ;;  %5061 = vmatmul.mubr.bf16.gmra.mrb[164].mxu0 %v14202_v60  ;;  %v11880_v9 = vpop.f32.mrb[124].mxu0  ;;  %11994 = vmatprep.subr.bf16.mxu0 %v12407_v17 }
 0x580   :  { %18610 = vst [vmem:[#allocation59_spill] sm:$0xff] %v14217_v46  ;;  %5068 = vmatprep.mubr.bf16.mxu0 %v14034_v58  ;;  %18611 = vst [vmem:[#allocation60_spill] sm:$0xff] %v14223_v43  ;;  %11950 = vmatprep.mubr.bf16.mxu1 %v14217_v46  ;;  %v3954_v16 = vrot.slane %v11880_v9, 7  ;;  %v4244_v51 = vrot.slane %v11880_v9, 1  ;;  %v3515_v22 = vpop.f32.mrb[125].mxu0  ;;  %v14230_v46 = vpack.c.bf16 %v14043_v49, %v4465_v25 }
 0x581   :  { %5717 = vmatpush1.bf16.msra.mxu1 %v12404_v42  ;;  %11995 = vmatpush3.bf16.msra.mxu0 %v12407_v17  ;;  %v3951_v12 = vrot.slane %v3515_v22, 7  ;;  %v4241_v1 = vrot.slane %v3515_v22, 1  ;;  %v11881_v42 = vpop.f32.mrb[126].mxu0 }
 0x582   :  { %4094 = vst [vmem:[#allocation4 + $0x480] sm:$0xfe] %v3954_v16  ;;  %v3955_v28 = vrot.slane %v11881_v42, 7  ;;  %v4245_v47 = vrot.slane %v11881_v42, 1  ;;  %v3518_v45 = vpop.f32.mrb[127].mxu0  ;;  %v14227_v33 = vpack.c.bf16 %v11881_v42, %v11880_v9  ;;  %18613 = vst [vmem:[#allocation62_spill] sm:$0xff] %v14230_v46 }
 0x583   :  { %4092 = vst [vmem:[#allocation4 + $0x450] sm:$0xfe] %v3951_v12  ;;  %v3952_v55 = vrot.slane %v3518_v45, 7  ;;  %v4242_v35 = vrot.slane %v3518_v45, 1  ;;  %v14232_v60 = vpack.c.bf16 %v3518_v45, %v3515_v22 }
 0x584   :  { %11951 = vmatmul.mubr.bf16.gmra.mrb[124].mxu1 %v14210_v15  ;;  %18612 = vst [vmem:[#allocation61_spill] sm:$0xff] %v14227_v33  ;;  %v4542_v58 = vld [vmem:[#allocation4 + $0x448] sm:$0xff]  ;;  %v14235_v17 = vsel %vm3890_vm1, %v3954_v16, %v3955_v28  ;;  %v4246_v15 = vsel %vm4180_vm2, %v4244_v51, %v4245_v47  ;;  %4384 = vst [vmem:[#allocation4 + $0x4a8] sm:$0x7f] %v4245_v47  ;;  %v12608_v47 = vld [vmem:[#allocation4 + $0x590] sm:$0xff] }
 0x585   :  { %18614 = vst [vmem:[#allocation63_spill] sm:$0xff] %v14232_v60  ;;  %18615 = vst [vmem:[#allocation64_spill] sm:$0xff] %v14235_v17  ;;  %v4536_v43 = vld [vmem:[#allocation4 + $0x418] sm:$0xff]  ;;  %v14238_v37 = vpack.c.bf16 %v4542_v58, %v4240_v36  ;;  %v14241_v9 = vsel %vm3890_vm1, %v3951_v12, %v3952_v55  ;;  %v4243_v42 = vsel %vm4180_vm2, %v4241_v1, %v4242_v35  ;;  %v4471_v58 = vld [vmem:[#allocation4 + $0x210] sm:$0xff] }
 0x586   :  { %4382 = vst [vmem:[#allocation4 + $0x478] sm:$0x7f] %v4242_v35  ;;  %v14245_v49 = vpack.c.bf16 %v4536_v43, %v4237_v0  ;;  %v12607_v1 = vld [vmem:[#allocation4 + $0x578] sm:$0xff] }
 0x587   :  { %18616 = vst [vmem:[#allocation65_spill] sm:$0xff] %v14238_v37  ;;  %5069 = vmatmul.mubr.bf16.gmra.mrb[168].mxu0 %v14230_v46  ;;  %v11884_v16 = vpop.f32.mrb[128].mxu0  ;;  %v14250_v45 = vpack.c.bf16 %v12608_v47, %v12607_v1  ;;  %v14255_v46 = vpack.c.bf16 %v14083_v18, %v4471_v58  ;;  %v12610_v58 = vld [vmem:[#allocation4 + $0x5c0] sm:$0xff] }
 0x588   :  { %18617 = vst [vmem:[#allocation66_spill] sm:$0xff] %v14245_v49  ;;  %5076 = vmatprep.mubr.bf16.mxu0 %v14074_v23  ;;  %11954 = vmatprep.mubr.bf16.mxu1 %v14245_v49  ;;  %v3960_v51 = vrot.slane %v11884_v16, 7  ;;  %v4250_v22 = vrot.slane %v11884_v16, 1  ;;  %v3531_v25 = vpop.f32.mrb[129].mxu0 }
 0x589   :  { %v3957_v36 = vrot.slane %v3531_v25, 7  ;;  %v4247_v12 = vrot.slane %v3531_v25, 1  ;;  %v11885_v28 = vpop.f32.mrb[130].mxu0  ;;  %18618 = vst [vmem:[#allocation67_spill] sm:$0xff] %v14250_v45  ;;  %18620 = vst [vmem:[#allocation69_spill] sm:$0xff] %v14255_v46 }
 0x58a   :  { %4098 = vst [vmem:[#allocation4 + $0x4e0] sm:$0xfe] %v3960_v51  ;;  %v3961_v0 = vrot.slane %v11885_v28, 7  ;;  %v4251_v43 = vrot.slane %v11885_v28, 1  ;;  %v3534_v55 = vpop.f32.mrb[131].mxu0  ;;  %v14252_v35 = vpack.c.bf16 %v11885_v28, %v11884_v16 }
 0x58b   :  { %4096 = vst [vmem:[#allocation4 + $0x4b0] sm:$0xfe] %v3957_v36  ;;  %v3958_v49 = vrot.slane %v3534_v55, 7  ;;  %v4248_v23 = vrot.slane %v3534_v55, 1  ;;  %v14257_v17 = vpack.c.bf16 %v3534_v55, %v3531_v25  ;;  %v12609_v25 = vld [vmem:[#allocation4 + $0x5a8] sm:$0xff]  ;;  %v12612_v55 = vld [vmem:[#allocation4 + $0x5d8] sm:$0xff] }
 0x58c   :  { %11955 = vmatmul.mubr.bf16.gmra.mrb[128].mxu1 %v14238_v37  ;;  %18619 = vst [vmem:[#allocation68_spill] sm:$0xff] %v14252_v35  ;;  %v4554_v37 = vld [vmem:[#allocation4 + $0x4a8] sm:$0xff]  ;;  %v14260_v26 = vsel %vm3890_vm1, %v3960_v51, %v3961_v0  ;;  %v4252_v1 = vsel %vm4180_vm2, %v4250_v22, %v4251_v43  ;;  %4388 = vst [vmem:[#allocation4 + $0x508] sm:$0x7f] %v4251_v43  ;;  %v14272_v51 = vpack.c.bf16 %v12610_v58, %v12609_v25  ;;  %v4483_v43 = vld [vmem:[#allocation4 + $0x270] sm:$0xff] }
 0x58d   :  { %18621 = vst [vmem:[#allocation70_spill] sm:$0xff] %v14257_v17  ;;  %v4548_v47 = vld [vmem:[#allocation4 + $0x478] sm:$0xff]  ;;  %v14263_v45 = vpack.c.bf16 %v4554_v37, %v4246_v15  ;;  %v14266_v16 = vsel %vm3890_vm1, %v3957_v36, %v3958_v49  ;;  %v4249_v28 = vsel %vm4180_vm2, %v4247_v12, %v4248_v23  ;;  %4386 = vst [vmem:[#allocation4 + $0x4d8] sm:$0x7f] %v4248_v23  ;;  %v4477_v15 = vld [vmem:[#allocation4 + $0x240] sm:$0xff] }
 0x58e   :  { %v14270_v18 = vpack.c.bf16 %v4548_v47, %v4243_v42  ;;  %18622 = vst [vmem:[#allocation71_spill] sm:$0xff] %v14272_v51  ;;  %v4572_v37 = vld [vmem:[#allocation4 + $0x538] sm:$0xff]  ;;  %v14278_v49 = vpack.c.bf16 %v14077_v31, %v4477_v15  ;;  %v12611_v12 = vld [vmem:[#allocation4 + $0x520] sm:$0xff]  ;;  %v4578_v31 = vld [vmem:[#allocation4 + $0x568] sm:$0xff] }
 0x58f   :  { %5077 = vmatmul.mubr.bf16.gmra.mrb[172].mxu0 %v14255_v46  ;;  %v14285_v0 = vpack.c.bf16 %v4572_v37, %v12611_v12  ;;  %v4584_v47 = vld [vmem:[#allocation4 + $0x598] sm:$0xff]  ;;  %v12613_v25 = vld [vmem:[#allocation4 + $0x550] sm:$0xff]  ;;  %v12614_v15 = vld [vmem:[#allocation4 + $0x580] sm:$0xff] }
 0x590   :  { %5084 = vmatprep.mubr.bf16.mxu0 %v14068_v59  ;;  %11958 = vmatprep.mubr.bf16.mxu1 %v14270_v18  ;;  %18623 = vst [vmem:[#allocation72_spill] sm:$0xff] %v14278_v49  ;;  %v14297_v58 = vpack.c.bf16 %v4578_v31, %v12613_v25  ;;  %v14300_v37 = vpack.c.bf16 %v4584_v47, %v12614_v15  ;;  %v4590_v12 = vld [vmem:[#allocation4 + $0x5c8] sm:$0xff]  ;;  %v4495_v25 = vld [vmem:[#allocation4 + $0x2d0] sm:$0xff] }
 0x591   :  { %v4602_v15 = vld [vmem:[#allocation4 + $0x628] sm:$0xff] }
 0x593   :  { %v4566_v23 = vld [vmem:[#allocation4 + $0x508] sm:$0xff] }
 0x594   :  { %11959 = vmatmul.mubr.bf16.gmra.mrb[132].mxu1 %v14263_v45  ;;  %v4560_v22 = vld [vmem:[#allocation4 + $0x4d8] sm:$0xff]  ;;  %v14280_v36 = vpack.c.bf16 %v4566_v23, %v4252_v1  ;;  %v14292_v1 = vpack.c.bf16 %v13929_v34, %v12612_v55  ;;  %v12615_v34 = vld [vmem:[#allocation4 + $0x608] sm:$0xff]  ;;  %v12616_v55 = vld [vmem:[#allocation4 + $0x5b0] sm:$0xff] }
 0x595   :  { %v14283_v42 = vpack.c.bf16 %v4560_v22, %v4249_v28  ;;  %v14295_v28 = vpack.c.bf16 %v14117_v61, %v4483_v43  ;;  %v12408_v23 = vld [vmem:[%s18357_s11 + $0xb8] sm:$0xff]   ;;  %v14307_v22 = vpack.c.bf16 %v13924_v56, %v12615_v34  ;;  %v4489_v61 = vld [vmem:[#allocation4 + $0x2a0] sm:$0xff]  ;;  %v14315_v47 = vpack.c.bf16 %v4590_v12, %v12616_v55 }
 0x596   :  { %18624 = vst [vmem:[#allocation73_spill] sm:$0xff] %v14292_v1  ;;  %11996 = vmatprep.subr.bf16.mxu0 %v12408_v23  ;;  %v4596_v43 = vld [vmem:[#allocation4 + $0x5f8] sm:$0xff]  ;;  %v14313_v31 = vpack.c.bf16 %v14111_v8, %v4489_v61  ;;  %v14326_v8 = vpack.c.bf16 %v13989_v32, %v13975_v41  ;;  %v14329_v34 = vpack.c.bf16 %v14148_v54, %v4495_v25  ;;  %v4501_v41 = vld [vmem:[#allocation4 + $0x300] sm:$0xff]  ;;  %v4614_v32 = vld [vmem:[#allocation4 + $0x688] sm:$0xff] }
 0x597   :  { %5085 = vmatmul.mubr.bf16.gmra.mrb[176].mxu0 %v14278_v49  ;;  %11962 = vmatprep.mubr.bf16.mxu1 %v14283_v42  ;;  %18625 = vst [vmem:[#allocation74_spill] sm:$0xff] %v14295_v28  ;;  %18626 = vst [vmem:[#allocation75_spill] sm:$0xff] %v14307_v22  ;;  %v14319_v56 = vpack.c.bf16 %v4596_v43, %v13982_v48  ;;  %v14332_v61 = vpack.c.bf16 %v4602_v15, %v13973_v63 }
 0x598   :  { %5092 = vmatprep.mubr.bf16.mxu0 %v14108_v52  ;;  %11997 = vmatpush3.bf16.msra.mxu0 %v12408_v23  ;;  %18627 = vst [vmem:[#allocation76_spill] sm:$0xff] %v14313_v31  ;;  %18629 = vst [vmem:[#allocation78_spill] sm:$0xff] %v14326_v8  ;;  %v4608_v23 = vld [vmem:[#allocation4 + $0x658] sm:$0xff]  ;;  %v14340_v12 = vpack.c.bf16 %v13984_v5, %v13965_v53  ;;  %v14346_v63 = vpack.c.bf16 %v14142_v10, %v4501_v41  ;;  %v4519_v53 = vld [vmem:[#allocation4 + $0x390] sm:$0xff] }
 0x599   :  { %6463 = vmatprep.subr.bf16.mxu0 %v18595_v62  ;;  %18628 = vst [vmem:[#allocation77_spill] sm:$0xff] %v14319_v56  ;;  %18630 = vst [vmem:[#allocation79_spill] sm:$0xff] %v14329_v34  ;;  %v14336_v48 = vpack.c.bf16 %v4608_v23, %v14049_v27  ;;  %v14349_v54 = vpack.c.bf16 %v4614_v32, %v14031_v3  ;;  %v12617_v27 = vld [vmem:[#allocation3] sm:$0xff]  ;;  %v14361_v5 = vpack.c.bf16 %v14179_v50, %v4519_v53  ;;  %v4531_v50 = vld [vmem:[#allocation4 + $0x3f0] sm:$0xff] }
 0x59a   :  { %18631 = vst [vmem:[#allocation80_spill] sm:$0xff] %v14332_v61  ;;  %18633 = vst [vmem:[#allocation82_spill] sm:$0xff] %v14340_v12  ;;  %v14352_v43 = vpack.c.bf16 %v12617_v27, %v12617_v27  ;;  %v12409_v10 = vld [vmem:[%s18357_s11 + $0x200] sm:$0xff]   ;;  %v14375_v25 = vpack.c.bf16 %v14213_v6, %v4531_v50  ;;  %v12414_v6 = vld [vmem:[%s18357_s11 + $0x208] sm:$0xff]  }
 0x59b   :  { %18632 = vst [vmem:[#allocation81_spill] sm:$0xff] %v14336_v48  ;;  %18634 = vst [vmem:[#allocation83_spill] sm:$0xff] %v14346_v63  ;;  %12062 = vmatprep.subr.bf16.mxu1 %v12409_v10  ;;  %v4525_v3 = vld [vmem:[#allocation4 + $0x3c0] sm:$0xff]  ;;  %v18640_v23 = vld [vmem:[#allocation22_spill] sm:$0xff] }
 0x59c   :  { %11963 = vmatmul.mubr.bf16.gmra.mrb[136].mxu1 %v14280_v36  ;;  %18635 = vst [vmem:[#allocation84_spill] sm:$0xff] %v14349_v54  ;;  %v14368_v55 = vpack.c.bf16 %v14173_v24, %v4525_v3  ;;  %18637 = vst [vmem:[#allocation86_spill] sm:$0xff] %v14375_v25  ;;  %v18641_v41 = vld [vmem:[#allocation64_spill] sm:$0xff]  ;;  %v4555_v27 = vld [vmem:[#allocation4 + $0x4b0] sm:$0xff] }
 0x59d   :  { %11966 = vmatprep.mubr.bf16.mxu1 %v14285_v0  ;;  %v18644_v53 = vld [vmem:[#allocation21_spill] sm:$0xff]  ;;  %v4561_v50 = vld [vmem:[#allocation4 + $0x4e0] sm:$0xff] }
 0x59e   :  { %18636 = vst [vmem:[#allocation85_spill] sm:$0xff] %v14368_v55  ;;  %v18646_v3 = vld [vmem:[#allocation41_spill] sm:$0xff] }
 0x59f   :  { %5093 = vmatmul.mubr.bf16.gmra.mrb[180].mxu0 %v14295_v28 }
 0x5a0   :  { %5100 = vmatprep.mubr.bf16.mxu0 %v14102_v39 }
 0x5a4   :  { %11967 = vmatmul.mubr.bf16.gmra.mrb[140].mxu1 %v14297_v58 }
 0x5a5   :  { %11970 = vmatprep.mubr.bf16.mxu1 %v14300_v37 }
 0x5a7   :  { %5101 = vmatmul.mubr.bf16.gmra.mrb[184].mxu0 %v14313_v31 }
 0x5a8   :  { %5108 = vmatprep.mubr.bf16.mxu0 %v14139_v20 }
 0x5ac   :  { %11971 = vmatmul.mubr.bf16.gmra.mrb[144].mxu1 %v14315_v47 }
 0x5ad   :  { %11974 = vmatprep.mubr.bf16.mxu1 %v14319_v56 }
 0x5af   :  { %5109 = vmatmul.mubr.bf16.gmra.mrb[188].mxu0 %v14329_v34 }
 0x5b0   :  { %5116 = vmatprep.mubr.bf16.mxu0 %v14134_v38  ;;  %v4573_v38 = vld [vmem:[#allocation4 + $0x540] sm:$0xff] }
 0x5b4   :  { %11975 = vmatmul.mubr.bf16.gmra.mrb[148].mxu1 %v14332_v61 }
 0x5b5   :  { %11978 = vmatprep.mubr.bf16.mxu1 %v14336_v48 }
 0x5b7   :  { %5117 = vmatmul.mubr.bf16.gmra.mrb[192].mxu0 %v14346_v63 }
 0x5b8   :  { %5124 = vmatprep.mubr.bf16.mxu0 %v14170_v44 }
 0x5bc   :  { %11979 = vmatmul.mubr.bf16.gmra.mrb[152].mxu1 %v14349_v54  ;;  %v12618_v54 = vld [vmem:[#allocation4 + $0x528] sm:$0xff] }
 0x5bd   :  { %5718 = vmatprep.mubr.bf16.mxu1 %v14352_v43 }
 0x5bf   :  { %5125 = vmatmul.mubr.bf16.gmra.mrb[196].mxu0 %v14361_v5 }
 0x5c0   :  { %5132 = vmatprep.mubr.bf16.mxu0 %v14165_v29 }
 0x5c4   :  { %5719 = vmatmul.mubr.bf16.vlgmr.msra.gmra.mrb[156].mxu1 %v14352_v43 }
 0x5c5   :  { %5726 = vmatprep.mubr.bf16.mxu1 %v13850_v19  ;;  %12063 = vmatpush3.bf16.msra.mxu1 %v12409_v10  ;;  %v4537_v19 = vld [vmem:[#allocation4 + $0x420] sm:$0xff]  ;;  %v14406_v10 = vpack.c.bf16 %v14266_v16, %v4555_v27  ;;  %v4567_v16 = vld [vmem:[#allocation4 + $0x510] sm:$0xff] }
 0x5c6   :  { %v14382_v24 = vpack.c.bf16 %v14207_v11, %v4537_v19  ;;  %12064 = vmatprep.subr.bf16.mxu1 %v12414_v6  ;;  %v4549_v11 = vld [vmem:[#allocation4 + $0x480] sm:$0xff]  ;;  %v12419_v27 = vld [vmem:[%s18357_s11 + $0x210] sm:$0xff]   ;;  %v14422_v63 = vpack.c.bf16 %v12618_v54, %v4567_v16  ;;  %v18658_v54 = vld [vmem:[#allocation56_spill] sm:$0xff] }
 0x5c7   :  { %5133 = vmatmul.mubr.bf16.gmra.mrb[200].mxu0 %v14368_v55  ;;  %v14399_v32 = vpack.c.bf16 %v18641_v41, %v4549_v11  ;;  %18645 = vst [vmem:[#allocation89_spill] sm:$0xff] %v14406_v10  ;;  %v18647_v19 = vld [vmem:[#allocation27_spill] sm:$0xff]  ;;  %v18650_v11 = vld [vmem:[#allocation46_spill] sm:$0xff]  ;;  %v18651_v41 = vld [vmem:[#allocation25_spill] sm:$0xff] }
 0x5c8   :  { %5140 = vmatprep.mubr.bf16.mxu0 %v14204_v40  ;;  %18638 = vst [vmem:[#allocation87_spill] sm:$0xff] %v14382_v24  ;;  %18652 = vst [vmem:[#allocation91_spill] sm:$0xff] %v14422_v63  ;;  %v4579_v16 = vld [vmem:[#allocation4 + $0x570] sm:$0xff] }
 0x5c9   :  { %12065 = vmatpush3.bf16.msra.mxu1 %v12414_v6  ;;  %18642 = vst [vmem:[#allocation64_spill] sm:$0xff] %v14399_v32  ;;  %v18649_v6 = vld [vmem:[#allocation54_spill] sm:$0xff] }
 0x5ca   :  { %12066 = vmatprep.subr.bf16.mxu1 %v12419_v27 }
 0x5cc   :  { %5727 = vmatmul.mubr.bf16.gmra.mrb[160].mxu1 %v13869_v21  ;;  %v4543_v21 = vld [vmem:[#allocation4 + $0x450] sm:$0xff] }
 0x5cd   :  { %5734 = vmatprep.mubr.bf16.mxu1 %v13846_v30  ;;  %v14392_v15 = vpack.c.bf16 %v14241_v9, %v4543_v21  ;;  %v18643_v9 = vld [vmem:[#allocation36_spill] sm:$0xff]  ;;  %v14413_v21 = vpack.c.bf16 %v14260_v26, %v4561_v50  ;;  %12067 = vmatpush3.bf16.msra.mxu1 %v12419_v27  ;;  %v18654_v50 = vld [vmem:[#allocation51_spill] sm:$0xff]  ;;  %v18659_v27 = vld [vmem:[#allocation30_spill] sm:$0xff] }
 0x5ce   :  { %v18653_v26 = vld [vmem:[#allocation60_spill] sm:$0xff] }
 0x5cf   :  { %5141 = vmatmul.mubr.bf16.gmra.mrb[204].mxu0 %v14375_v25  ;;  %18639 = vst [vmem:[#allocation88_spill] sm:$0xff] %v14392_v15  ;;  %18648 = vst [vmem:[#allocation90_spill] sm:$0xff] %v14413_v21 }
 0x5d0   :  { %5148 = vmatprep.mubr.bf16.mxu0 %v14199_v13 }
 0x5d4   :  { %5735 = vmatmul.mubr.bf16.gmra.mrb[164].mxu1 %v13919_v57 }
 0x5d5   :  { %5742 = vmatprep.mubr.bf16.mxu1 %v13871_v14 }
 0x5d7   :  { %5149 = vmatmul.mubr.bf16.gmra.mrb[208].mxu0 %v14382_v24 }
 0x5d8   :  { %5156 = vmatprep.mubr.bf16.mxu0 %v14232_v60 }
 0x5dc   :  { %5743 = vmatmul.mubr.bf16.gmra.mrb[168].mxu1 %v13992_v7  ;;  %v12621_v7 = vld [vmem:[#allocation4 + $0x5b8] sm:$0xff] }
 0x5dd   :  { %5750 = vmatprep.mubr.bf16.mxu1 %v13867_v2 }
 0x5df   :  { %5157 = vmatmul.mubr.bf16.gmra.mrb[212].mxu0 %v14392_v15 }
 0x5e0   :  { %5164 = vmatprep.mubr.bf16.mxu0 %v14227_v33 }
 0x5e4   :  { %5751 = vmatmul.mubr.bf16.gmra.mrb[172].mxu1 %v14038_v4 }
 0x5e5   :  { %5758 = vmatprep.mubr.bf16.mxu1 %v18640_v23 }
 0x5e7   :  { %5165 = vmatmul.mubr.bf16.gmra.mrb[216].mxu0 %v14399_v32 }
 0x5e8   :  { %5172 = vmatprep.mubr.bf16.mxu0 %v14257_v17 }
 0x5ec   :  { %5759 = vmatmul.mubr.bf16.gmra.mrb[176].mxu1 %v18643_v9 }
 0x5ed   :  { %5766 = vmatprep.mubr.bf16.mxu1 %v18644_v53  ;;  %v12620_v53 = vld [vmem:[#allocation4 + $0x588] sm:$0xff] }
 0x5ee   :  { %v14434_v9 = vpack.c.bf16 %v12620_v53, %v4579_v16 }
 0x5ef   :  { %5173 = vmatmul.mubr.bf16.gmra.mrb[220].mxu0 %v14406_v10 }
 0x5f0   :  { %5180 = vmatprep.mubr.bf16.mxu0 %v14252_v35  ;;  %18660 = vst [vmem:[#allocation93_spill] sm:$0xff] %v14434_v9 }
 0x5f4   :  { %5767 = vmatmul.mubr.bf16.gmra.mrb[180].mxu1 %v18646_v3  ;;  %v18657_v3 = vld [vmem:[#allocation67_spill] sm:$0xff] }
 0x5f5   :  { %5774 = vmatprep.mubr.bf16.mxu1 %v18647_v19  ;;  %v12619_v19 = vld [vmem:[#allocation4 + $0x558] sm:$0xff] }
 0x5f7   :  { %5181 = vmatmul.mubr.bf16.gmra.mrb[224].mxu0 %v14413_v21 }
 0x5f8   :  { %5188 = vmatprep.mubr.bf16.mxu0 %v18649_v6 }
 0x5fc   :  { %5775 = vmatmul.mubr.bf16.gmra.mrb[184].mxu1 %v18650_v11  ;;  %v18655_v11 = vld [vmem:[#allocation32_spill] sm:$0xff] }
 0x5fd   :  { %5782 = vmatprep.mubr.bf16.mxu1 %v18651_v41  ;;  %v14428_v41 = vpack.c.bf16 %v12619_v19, %v4573_v38  ;;  %v4585_v19 = vld [vmem:[#allocation4 + $0x5a0] sm:$0xff] }
 0x5fe   :  { %v14440_v14 = vpack.c.bf16 %v12621_v7, %v4585_v19 }
 0x5ff   :  { %5189 = vmatmul.mubr.bf16.gmra.mrb[228].mxu0 %v14422_v63  ;;  %18656 = vst [vmem:[#allocation92_spill] sm:$0xff] %v14428_v41 }
 0x600   :  { %5196 = vmatprep.mubr.bf16.mxu0 %v18653_v26  ;;  %18663 = vst [vmem:[#allocation94_spill] sm:$0xff] %v14440_v14 }
 0x604   :  { %5783 = vmatmul.mubr.bf16.gmra.mrb[188].mxu1 %v18654_v50  ;;  %v18662_v50 = vld [vmem:[#allocation37_spill] sm:$0xff] }
 0x605   :  { %5790 = vmatprep.mubr.bf16.mxu1 %v18655_v11  ;;  %v18661_v11 = vld [vmem:[#allocation62_spill] sm:$0xff] }
 0x607   :  { %5197 = vmatmul.mubr.bf16.gmra.mrb[232].mxu0 %v14428_v41 }
 0x608   :  { %5204 = vmatprep.mubr.bf16.mxu0 %v18657_v3 }
 0x60c   :  { %5791 = vmatmul.mubr.bf16.gmra.mrb[192].mxu1 %v18658_v54 }
 0x60d   :  { %5798 = vmatprep.mubr.bf16.mxu1 %v18659_v27 }
 0x60f   :  { %5205 = vmatmul.mubr.bf16.gmra.mrb[236].mxu0 %v14434_v9 }
 0x610   :  { %5212 = vmatprep.mubr.bf16.mxu0 %v14272_v51 }
 0x612   :  { %v4998_v38 = vpop.f32.mrb[132].mxu0 }
 0x613   :  { %v5000_v23 = vpop.f32.mrb[133].mxu0 }
 0x614   :  { %5799 = vmatmul.mubr.bf16.gmra.mrb[196].mxu1 %v18661_v11  ;;  %v5001_v4 = vpop.f32.mrb[134].mxu0 }
 0x615   :  { %5806 = vmatprep.mubr.bf16.mxu1 %v18662_v50  ;;  %v11920_v2 = vpop.f32.mrb[92].mxu1  ;;  %v5003_v54 = vpop.f32.mrb[135].mxu0  ;;  %v4591_v50 = vld [vmem:[#allocation4 + $0x5d0] sm:$0xff] }
 0x616   :  { %v5287_v27 = vpop.f32.mrb[93].mxu1 }
 0x617   :  { %v14442_v53 = vadd.f32 %v5287_v27, %v4998_v38  ;;  %v11921_v16 = vpop.f32.mrb[94].mxu1  ;;  %5213 = vmatmul.mubr.bf16.gmra.mrb[240].mxu0 %v14440_v14  ;;  %v12424_v27 = vld [vmem:[%s18357_s11 + $0x218] sm:$0xff]  }
 0x618   :  { %v5290_v57 = vpop.f32.mrb[95].mxu1  ;;  %5220 = vmatprep.mubr.bf16.mxu0 %v14292_v1  ;;  %12068 = vmatprep.subr.bf16.mxu1 %v12424_v27 }
 0x619   :  { %v14446_v11 = vadd.f32 %v5290_v57, %v5001_v4  ;;  %v12622_v57 = vld [vmem:[#allocation4 + $0x5e8] sm:$0xff]  ;;  %12069 = vmatpush3.bf16.msra.mxu1 %v12424_v27  ;;  %v12623_v27 = vld [vmem:[#allocation4 + $0x618] sm:$0xff] }
 0x61a   :  { %v5006_v23 = vpop.f32.mrb[136].mxu0  ;;  %v14457_v4 = vpack.c.bf16 %v12622_v57, %v4591_v50 }
 0x61b   :  { %v14450_v54 = vadd.f32 %v11920_v2, %v5006_v23  ;;  %v5008_v7 = vpop.f32.mrb[137].mxu0 }
 0x61c   :  { %5807 = vmatmul.mubr.bf16.gmra.mrb[200].mxu1 %v14255_v46  ;;  %v5009_v38 = vpop.f32.mrb[138].mxu0  ;;  %18664 = vst [vmem:[#allocation95_spill] sm:$0xff] %v14457_v4  ;;  %v4597_v7 = vld [vmem:[#allocation4 + $0x600] sm:$0xff] }
 0x61d   :  { %5814 = vmatprep.mubr.bf16.mxu1 %v14068_v59  ;;  %v14455_v19 = vadd.f32 %v11921_v16, %v5009_v38  ;;  %v11924_v30 = vpop.f32.mrb[96].mxu1  ;;  %v5011_v48 = vpop.f32.mrb[139].mxu0  ;;  %v14467_v59 = vpack.c.bf16 %v12623_v27, %v4597_v7  ;;  %v12624_v27 = vld [vmem:[#allocation4 + $0x648] sm:$0xff] }
 0x61e   :  { %v5303_v46 = vpop.f32.mrb[97].mxu1 }
 0x61f   :  { %v11925_v61 = vpop.f32.mrb[98].mxu1  ;;  %5221 = vmatmul.mubr.bf16.gmra.mrb[244].mxu0 %v14457_v4  ;;  %18665 = vst [vmem:[#allocation96_spill] sm:$0xff] %v14467_v59 }
 0x620   :  { %v5306_v2 = vpop.f32.mrb[99].mxu1  ;;  %5228 = vmatprep.mubr.bf16.mxu0 %v14307_v22 }
 0x622   :  { %v5014_v23 = vpop.f32.mrb[140].mxu0 }
 0x623   :  { %v14463_v16 = vadd.f32 %v5303_v46, %v5014_v23  ;;  %v5016_v48 = vpop.f32.mrb[141].mxu0  ;;  %v4603_v23 = vld [vmem:[#allocation4 + $0x630] sm:$0xff] }
 0x624   :  { %5815 = vmatmul.mubr.bf16.gmra.mrb[204].mxu1 %v14278_v49  ;;  %v5017_v50 = vpop.f32.mrb[142].mxu0 }
 0x625   :  { %5822 = vmatprep.mubr.bf16.mxu1 %v14108_v52  ;;  %v14465_v38 = vadd.f32 %v5306_v2, %v5017_v50  ;;  %v5019_v57 = vpop.f32.mrb[143].mxu0  ;;  %v14477_v52 = vpack.c.bf16 %v12624_v27, %v4603_v23 }
 0x627   :  { %v11928_v56 = vpop.f32.mrb[100].mxu1  ;;  %5229 = vmatmul.mubr.bf16.gmra.mrb[248].mxu0 %v14467_v59  ;;  %18667 = vst [vmem:[#allocation98_spill] sm:$0xff] %v14477_v52 }
 0x628   :  { %v5319_v4 = vpop.f32.mrb[101].mxu1  ;;  %5236 = vmatprep.mubr.bf16.mxu0 %v14326_v8 }
 0x629   :  { %v11929_v22 = vpop.f32.mrb[102].mxu1 }
 0x62a   :  { %v5322_v49 = vpop.f32.mrb[103].mxu1  ;;  %v5022_v46 = vpop.f32.mrb[144].mxu0 }
 0x62b   :  { %v14473_v2 = vadd.f32 %v11924_v30, %v5022_v46  ;;  %v5024_v48 = vpop.f32.mrb[145].mxu0  ;;  %v4609_v46 = vld [vmem:[#allocation4 + $0x660] sm:$0xff] }
 0x62c   :  { %5823 = vmatmul.mubr.bf16.gmra.mrb[208].mxu1 %v14295_v28  ;;  %v5025_v50 = vpop.f32.mrb[146].mxu0 }
 0x62d   :  { %5830 = vmatprep.mubr.bf16.mxu1 %v14102_v39  ;;  %v14475_v7 = vadd.f32 %v11925_v61, %v5025_v50  ;;  %v5027_v57 = vpop.f32.mrb[147].mxu0  ;;  %v12428_v61 = vld [vmem:[%s18357_s11 + $0x220] sm:$0xff]  }
 0x62e   :  { %12070 = vmatprep.subr.bf16.mxu1 %v12428_v61 }
 0x62f   :  { %18666 = vst [vmem:[#allocation97_spill] sm:$0xff] %v14475_v7  ;;  %v14479_v59 = vpop.f32.mrb[104].mxu1  ;;  %5237 = vmatmul.mubr.bf16.gmra.mrb[252].mxu0 %v14477_v52  ;;  %12071 = vmatpush3.bf16.msra.mxu1 %v12428_v61 }
 0x630   :  { %v5335_v8 = vpop.f32.mrb[105].mxu1  ;;  %5244 = vmatprep.mubr.bf16.mxu0 %v14340_v12  ;;  %v12625_v12 = vld [vmem:[#allocation4 + $0x678] sm:$0xff] }
 0x631   :  { %v14482_v28 = vpop.f32.mrb[106].mxu1  ;;  %v14494_v52 = vpack.c.bf16 %v12625_v12, %v4609_v46 }
 0x632   :  { %v5338_v39 = vpop.f32.mrb[107].mxu1  ;;  %v5030_v30 = vpop.f32.mrb[148].mxu0 }
 0x633   :  { %v14490_v23 = vadd.f32 %v5319_v4, %v5030_v30  ;;  %v5032_v48 = vpop.f32.mrb[149].mxu0  ;;  %18670 = vst [vmem:[#allocation101_spill] sm:$0xff] %v14494_v52  ;;  %v12431_v30 = vld [vmem:[%s18357_s11 + $0x230] sm:$0xff]  }
 0x634   :  { %5831 = vmatmul.mubr.bf16.gmra.mrb[212].mxu1 %v14313_v31  ;;  %v5033_v50 = vpop.f32.mrb[150].mxu0 }
 0x635   :  { %5838 = vmatprep.mubr.bf16.mxu1 %v14139_v20  ;;  %18668 = vst [vmem:[#allocation99_spill] sm:$0xff] %v14490_v23  ;;  %v14492_v57 = vadd.f32 %v5322_v49, %v5033_v50  ;;  %v5035_v27 = vpop.f32.mrb[151].mxu0  ;;  %v12429_v20 = vld [vmem:[%s18357_s11 + $0x228] sm:$0xff]   ;;  %v12410_v50 = vld [vmem:[%s18357_s11 + $0x180] sm:$0xff]  }
 0x636   :  { %12072 = vmatprep.subr.bf16.mxu1 %v12429_v20 }
 0x637   :  { %18669 = vst [vmem:[#allocation100_spill] sm:$0xff] %v14492_v57  ;;  %v14496_v31 = vpop.f32.mrb[108].mxu1  ;;  %5245 = vmatmul.mubr.bf16.gmra.mrb[0].mxu0 %v14494_v52  ;;  %12073 = vmatpush3.bf16.msra.mxu1 %v12429_v20 }
 0x638   :  { %v14498_v7 = vpop.f32.mrb[109].mxu1  ;;  %11998 = vmatprep.mubr.bf16.mxu0 %v14352_v43  ;;  %12074 = vmatprep.subr.bf16.mxu1 %v12431_v30 }
 0x639   :  { %v14504_v4 = vpop.f32.mrb[110].mxu1 }
 0x63a   :  { %v14507_v49 = vpop.f32.mrb[111].mxu1  ;;  %v5038_v12 = vpop.f32.mrb[152].mxu0 }
 0x63b   :  { %v14513_v46 = vadd.f32 %v11928_v56, %v5038_v12  ;;  %v5040_v61 = vpop.f32.mrb[153].mxu0  ;;  %12075 = vmatpush3.bf16.msra.mxu1 %v12431_v30  ;;  %v12432_v56 = vld [vmem:[%s18357_s11 + $0x238] sm:$0xff]  }
 0x63c   :  { %5839 = vmatmul.mubr.bf16.gmra.mrb[216].mxu1 %v14329_v34  ;;  %v5041_v48 = vpop.f32.mrb[154].mxu0  ;;  %v18673_v12 = vld [vmem:[#allocation18_spill] sm:$0xff]  ;;  %12076 = vmatprep.subr.bf16.mxu1 %v12432_v56 }
 0x63d   :  { %18671 = vst [vmem:[#allocation102_spill] sm:$0xff] %v14513_v46  ;;  %5846 = vmatprep.mubr.bf16.mxu1 %v14352_v43  ;;  %v14519_v27 = vadd.f32 %v11929_v22, %v5041_v48  ;;  %v5043_v20 = vpop.f32.mrb[155].mxu0  ;;  %v18674_v46 = vld [vmem:[#allocation19_spill] sm:$0xff]  ;;  %v12411_v22 = vld [vmem:[%s18357_s11 + $0x188] sm:$0xff]  }
 0x63f   :  { %18672 = vst [vmem:[#allocation103_spill] sm:$0xff] %v14519_v27  ;;  %v14521_v52 = vpop.f32.mrb[112].mxu1  ;;  %11999 = vmatmul.mubr.bf16.vlgmr.msra.gmra.mrb[4].mxu0 %v18673_v12  ;;  %12077 = vmatpush3.bf16.msra.mxu1 %v12432_v56 }
 0x640   :  { %v14523_v34 = vpop.f32.mrb[113].mxu1  ;;  %12002 = vmatprep.mubr.bf16.mxu0 %v18674_v46  ;;  %6464 = vmatpush1.bf16.msra.mxu0 %v12410_v50  ;;  %v12412_v50 = vld [vmem:[%s18357_s11 + $0x190] sm:$0xff]  }
 0x641   :  { %v14529_v61 = vpop.f32.mrb[114].mxu1  ;;  %6465 = vmatprep.subr.bf16.mxu0 %v18595_v62  ;;  %9318 = vmatprep.subr.bf16.mxu1 %v18595_v62 }
 0x642   :  { %v14535_v48 = vpop.f32.mrb[115].mxu1  ;;  %v5046_v30 = vpop.f32.mrb[156].mxu0 }
 0x643   :  { %v14540_v20 = vadd.f32 %v5335_v8, %v5046_v30  ;;  %v5048_v12 = vpop.f32.mrb[157].mxu0  ;;  %v18677_v8 = vld [vmem:[#allocation24_spill] sm:$0xff]  ;;  %v12413_v30 = vld [vmem:[%s18357_s11 + $0x198] sm:$0xff]  }
 0x644   :  { %5847 = vmatmul.mubr.bf16.gmra.mrb[220].mxu1 %v14352_v43  ;;  %v5049_v27 = vpop.f32.mrb[158].mxu0  ;;  %6466 = vmatpush1.bf16.msra.mxu0 %v12411_v22  ;;  %v18678_v22 = vld [vmem:[#allocation23_spill] sm:$0xff] }
 0x645   :  { %5854 = vmatprep.mubr.bf16.mxu1 %v14170_v44  ;;  %18675 = vst [vmem:[#allocation18_spill] sm:$0xff] %v14540_v20  ;;  %v14546_v46 = vadd.f32 %v5338_v39, %v5049_v27  ;;  %v5051_v57 = vpop.f32.mrb[159].mxu0  ;;  %6467 = vmatprep.subr.bf16.mxu0 %v18595_v62 }
 0x647   :  { %18676 = vst [vmem:[#allocation104_spill] sm:$0xff] %v14546_v46  ;;  %v14549_v23 = vpop.f32.mrb[116].mxu1  ;;  %12003 = vmatmul.mubr.bf16.gmra.mrb[8].mxu0 %v18677_v8 }
 0x648   :  { %v14551_v44 = vpop.f32.mrb[117].mxu1  ;;  %12006 = vmatprep.mubr.bf16.mxu0 %v18678_v22  ;;  %6468 = vmatpush1.bf16.msra.mxu0 %v12412_v50  ;;  %v12415_v50 = vld [vmem:[%s18357_s11 + $0x1a0] sm:$0xff]  }
 0x649   :  { %v14554_v56 = vpop.f32.mrb[118].mxu1  ;;  %6469 = vmatprep.subr.bf16.mxu0 %v18595_v62 }
 0x64a   :  { %v14560_v39 = vpop.f32.mrb[119].mxu1  ;;  %v5054_v57 = vpop.f32.mrb[160].mxu0 }
 0x64b   :  { %v14566_v27 = vadd.f32 %v14479_v59, %v5054_v57  ;;  %v5056_v12 = vpop.f32.mrb[161].mxu0  ;;  %v18682_v57 = vld [vmem:[#allocation28_spill] sm:$0xff] }
 0x64c   :  { %5855 = vmatmul.mubr.bf16.gmra.mrb[224].mxu1 %v14361_v5  ;;  %v5057_v46 = vpop.f32.mrb[162].mxu0  ;;  %6470 = vmatpush1.bf16.msra.mxu0 %v12413_v30  ;;  %v12416_v30 = vld [vmem:[%s18357_s11 + $0x1a8] sm:$0xff]  }
 0x64d   :  { %5862 = vmatprep.mubr.bf16.mxu1 %v14165_v29  ;;  %18679 = vst [vmem:[#allocation105_spill] sm:$0xff] %v14566_v27  ;;  %v14572_v20 = vadd.f32 %v14482_v28, %v5057_v46  ;;  %v5059_v22 = vpop.f32.mrb[163].mxu0  ;;  %6471 = vmatprep.subr.bf16.mxu0 %v18595_v62  ;;  %v18681_v29 = vld [vmem:[#allocation29_spill] sm:$0xff] }
 0x64f   :  { %18680 = vst [vmem:[#allocation106_spill] sm:$0xff] %v14572_v20  ;;  %v14575_v5 = vpop.f32.mrb[120].mxu1  ;;  %12007 = vmatmul.mubr.bf16.gmra.mrb[12].mxu0 %v18681_v29 }
 0x650   :  { %v14577_v8 = vpop.f32.mrb[121].mxu1  ;;  %12010 = vmatprep.mubr.bf16.mxu0 %v18682_v57  ;;  %6472 = vmatpush1.bf16.msra.mxu0 %v12415_v50  ;;  %v12417_v50 = vld [vmem:[%s18357_s11 + $0x1b0] sm:$0xff]  }
 0x651   :  { %v14580_v59 = vpop.f32.mrb[122].mxu1  ;;  %6473 = vmatprep.subr.bf16.mxu0 %v18595_v62 }
 0x652   :  { %v14586_v28 = vpop.f32.mrb[123].mxu1  ;;  %v5062_v46 = vpop.f32.mrb[164].mxu0 }
 0x653   :  { %v14592_v22 = vadd.f32 %v14498_v7, %v5062_v46  ;;  %v5064_v12 = vpop.f32.mrb[165].mxu0  ;;  %v18686_v46 = vld [vmem:[#allocation33_spill] sm:$0xff] }
 0x654   :  { %5863 = vmatmul.mubr.bf16.gmra.mrb[228].mxu1 %v14368_v55  ;;  %v5065_v20 = vpop.f32.mrb[166].mxu0  ;;  %6474 = vmatpush1.bf16.msra.mxu0 %v12416_v30 }
 0x655   :  { %5870 = vmatprep.mubr.bf16.mxu1 %v14204_v40  ;;  %18683 = vst [vmem:[#allocation107_spill] sm:$0xff] %v14592_v22  ;;  %v14598_v27 = vadd.f32 %v14507_v49, %v5065_v20  ;;  %v5067_v57 = vpop.f32.mrb[167].mxu0  ;;  %6475 = vmatprep.subr.bf16.mxu0 %v18595_v62  ;;  %v18685_v40 = vld [vmem:[#allocation34_spill] sm:$0xff] }
 0x656   :  { %v12418_v49 = vld [vmem:[%s18357_s11 + $0x1b8] sm:$0xff]  }
 0x657   :  { %18684 = vst [vmem:[#allocation108_spill] sm:$0xff] %v14598_v27  ;;  %v14601_v55 = vpop.f32.mrb[124].mxu1  ;;  %12011 = vmatmul.mubr.bf16.gmra.mrb[16].mxu0 %v18685_v40 }
 0x658   :  { %v14603_v29 = vpop.f32.mrb[125].mxu1  ;;  %12014 = vmatprep.mubr.bf16.mxu0 %v18686_v46  ;;  %6476 = vmatpush1.bf16.msra.mxu0 %v12417_v50  ;;  %v12420_v50 = vld [vmem:[%s18357_s11 + $0x1c0] sm:$0xff]  }
 0x659   :  { %v14606_v7 = vpop.f32.mrb[126].mxu1  ;;  %6477 = vmatprep.subr.bf16.mxu0 %v18595_v62 }
 0x65a   :  { %v14609_v30 = vpop.f32.mrb[127].mxu1  ;;  %v5070_v20 = vpop.f32.mrb[168].mxu0 }
 0x65b   :  { %v14618_v57 = vadd.f32 %v14496_v31, %v5070_v20  ;;  %v5072_v12 = vpop.f32.mrb[169].mxu0  ;;  %v18690_v20 = vld [vmem:[#allocation38_spill] sm:$0xff] }
 0x65c   :  { %5871 = vmatmul.mubr.bf16.gmra.mrb[232].mxu1 %v14375_v25  ;;  %v5073_v27 = vpop.f32.mrb[170].mxu0  ;;  %6478 = vmatpush1.bf16.msra.mxu0 %v12418_v49 }
 0x65d   :  { %5878 = vmatprep.mubr.bf16.mxu1 %v14199_v13  ;;  %18687 = vst [vmem:[#allocation109_spill] sm:$0xff] %v14618_v57  ;;  %v14624_v22 = vadd.f32 %v14504_v4, %v5073_v27  ;;  %v5075_v46 = vpop.f32.mrb[171].mxu0  ;;  %6479 = vmatprep.subr.bf16.mxu0 %v18595_v62  ;;  %v18689_v13 = vld [vmem:[#allocation39_spill] sm:$0xff]  ;;  %v12421_v4 = vld [vmem:[%s18357_s11 + $0x1c8] sm:$0xff]  }
 0x65f   :  { %18688 = vst [vmem:[#allocation110_spill] sm:$0xff] %v14624_v22  ;;  %v14626_v40 = vpop.f32.mrb[128].mxu1  ;;  %12015 = vmatmul.mubr.bf16.gmra.mrb[20].mxu0 %v18689_v13 }
 0x660   :  { %v14629_v25 = vpop.f32.mrb[129].mxu1  ;;  %12018 = vmatprep.mubr.bf16.mxu0 %v18690_v20  ;;  %6480 = vmatpush1.bf16.msra.mxu0 %v12420_v50  ;;  %v12422_v50 = vld [vmem:[%s18357_s11 + $0x1d0] sm:$0xff]  }
 0x661   :  { %v14632_v31 = vpop.f32.mrb[130].mxu1  ;;  %6481 = vmatprep.subr.bf16.mxu0 %v18595_v62 }
 0x662   :  { %v14635_v49 = vpop.f32.mrb[131].mxu1  ;;  %v5078_v27 = vpop.f32.mrb[172].mxu0 }
 0x663   :  { %v14644_v46 = vadd.f32 %v14523_v34, %v5078_v27  ;;  %v5080_v12 = vpop.f32.mrb[173].mxu0  ;;  %v18694_v27 = vld [vmem:[#allocation43_spill] sm:$0xff] }
 0x664   :  { %5879 = vmatmul.mubr.bf16.gmra.mrb[236].mxu1 %v14382_v24  ;;  %v5081_v22 = vpop.f32.mrb[174].mxu0  ;;  %6482 = vmatpush1.bf16.msra.mxu0 %v12421_v4 }
 0x665   :  { %5886 = vmatprep.mubr.bf16.mxu1 %v14232_v60  ;;  %18691 = vst [vmem:[#allocation111_spill] sm:$0xff] %v14644_v46  ;;  %v14650_v57 = vadd.f32 %v14535_v48, %v5081_v22  ;;  %v5083_v20 = vpop.f32.mrb[175].mxu0  ;;  %6483 = vmatprep.subr.bf16.mxu0 %v18595_v62  ;;  %v18693_v60 = vld [vmem:[#allocation44_spill] sm:$0xff]  ;;  %v12423_v48 = vld [vmem:[%s18357_s11 + $0x1d8] sm:$0xff]  }
 0x667   :  { %18692 = vst [vmem:[#allocation112_spill] sm:$0xff] %v14650_v57  ;;  %v14652_v13 = vpop.f32.mrb[132].mxu1  ;;  %12019 = vmatmul.mubr.bf16.gmra.mrb[24].mxu0 %v18693_v60 }
 0x668   :  { %v14655_v24 = vpop.f32.mrb[133].mxu1  ;;  %12022 = vmatprep.mubr.bf16.mxu0 %v18694_v27  ;;  %6484 = vmatpush1.bf16.msra.mxu0 %v12422_v50  ;;  %v12425_v50 = vld [vmem:[%s18357_s11 + $0x1e0] sm:$0xff]  }
 0x669   :  { %v14658_v34 = vpop.f32.mrb[134].mxu1  ;;  %6485 = vmatprep.subr.bf16.mxu0 %v18595_v62 }
 0x66a   :  { %v14661_v4 = vpop.f32.mrb[135].mxu1  ;;  %v5086_v22 = vpop.f32.mrb[176].mxu0 }
 0x66b   :  { %v14670_v20 = vadd.f32 %v14521_v52, %v5086_v22  ;;  %v5088_v12 = vpop.f32.mrb[177].mxu0  ;;  %v18698_v22 = vld [vmem:[#allocation48_spill] sm:$0xff] }
 0x66c   :  { %5887 = vmatmul.mubr.bf16.gmra.mrb[240].mxu1 %v14392_v15  ;;  %v5089_v57 = vpop.f32.mrb[178].mxu0  ;;  %6486 = vmatpush1.bf16.msra.mxu0 %v12423_v48 }
 0x66d   :  { %5894 = vmatprep.mubr.bf16.mxu1 %v14227_v33  ;;  %18695 = vst [vmem:[#allocation113_spill] sm:$0xff] %v14670_v20  ;;  %v14676_v46 = vadd.f32 %v14529_v61, %v5089_v57  ;;  %v5091_v27 = vpop.f32.mrb[179].mxu0  ;;  %6487 = vmatprep.subr.bf16.mxu0 %v18595_v62  ;;  %v18697_v33 = vld [vmem:[#allocation49_spill] sm:$0xff]  ;;  %v12426_v61 = vld [vmem:[%s18357_s11 + $0x1e8] sm:$0xff]  }
 0x66f   :  { %18696 = vst [vmem:[#allocation114_spill] sm:$0xff] %v14676_v46  ;;  %v14678_v60 = vpop.f32.mrb[136].mxu1  ;;  %12023 = vmatmul.mubr.bf16.gmra.mrb[28].mxu0 %v18697_v33 }
 0x670   :  { %v14681_v15 = vpop.f32.mrb[137].mxu1  ;;  %12026 = vmatprep.mubr.bf16.mxu0 %v18698_v22  ;;  %6488 = vmatpush1.bf16.msra.mxu0 %v12425_v50  ;;  %v12427_v50 = vld [vmem:[%s18357_s11 + $0x1f0] sm:$0xff]  }
 0x671   :  { %v14684_v52 = vpop.f32.mrb[138].mxu1  ;;  %6489 = vmatprep.subr.bf16.mxu0 %v18595_v62 }
 0x672   :  { %v14687_v48 = vpop.f32.mrb[139].mxu1  ;;  %v5094_v57 = vpop.f32.mrb[180].mxu0 }
 0x673   :  { %v14696_v27 = vadd.f32 %v14551_v44, %v5094_v57  ;;  %v5096_v12 = vpop.f32.mrb[181].mxu0 }
 0x674   :  { %5895 = vmatmul.mubr.bf16.gmra.mrb[244].mxu1 %v14399_v32  ;;  %v5097_v46 = vpop.f32.mrb[182].mxu0  ;;  %6490 = vmatpush1.bf16.msra.mxu0 %v12426_v61 }
 0x675   :  { %5902 = vmatprep.mubr.bf16.mxu1 %v14257_v17  ;;  %18699 = vst [vmem:[#allocation115_spill] sm:$0xff] %v14696_v27  ;;  %v14702_v20 = vadd.f32 %v14560_v39, %v5097_v46  ;;  %v5099_v22 = vpop.f32.mrb[183].mxu0  ;;  %6491 = vmatprep.subr.bf16.mxu0 %v18595_v62  ;;  %v18701_v17 = vld [vmem:[#allocation53_spill] sm:$0xff]  ;;  %v12430_v39 = vld [vmem:[%s18357_s11 + $0x1f8] sm:$0xff]  }
 0x677   :  { %18700 = vst [vmem:[#allocation116_spill] sm:$0xff] %v14702_v20  ;;  %v14704_v33 = vpop.f32.mrb[140].mxu1  ;;  %12027 = vmatmul.mubr.bf16.gmra.mrb[32].mxu0 %v18701_v17 }
 0x678   :  { %v14707_v32 = vpop.f32.mrb[141].mxu1  ;;  %12030 = vmatprep.mubr.bf16.mxu0 %v14352_v43  ;;  %6492 = vmatpush1.bf16.msra.mxu0 %v12427_v50 }
 0x679   :  { %v14710_v44 = vpop.f32.mrb[142].mxu1  ;;  %6493 = vmatprep.subr.bf16.mxu0 %v18595_v62 }
 0x67a   :  { %v14713_v61 = vpop.f32.mrb[143].mxu1  ;;  %v5102_v46 = vpop.f32.mrb[184].mxu0 }
 0x67b   :  { %v14722_v22 = vadd.f32 %v14549_v23, %v5102_v46  ;;  %v5104_v57 = vpop.f32.mrb[185].mxu0 }
 0x67c   :  { %5903 = vmatmul.mubr.bf16.gmra.mrb[248].mxu1 %v14406_v10  ;;  %v5105_v12 = vpop.f32.mrb[186].mxu0  ;;  %6494 = vmatpush1.bf16.msra.mxu0 %v12430_v39  ;;  %v18704_v10 = vld [vmem:[#allocation59_spill] sm:$0xff] }
 0x67d   :  { %5910 = vmatprep.mubr.bf16.mxu1 %v14252_v35  ;;  %18702 = vst [vmem:[#allocation117_spill] sm:$0xff] %v14722_v22  ;;  %v14725_v43 = vadd.f32 %v14554_v56, %v5105_v12  ;;  %v5107_v50 = vpop.f32.mrb[187].mxu0  ;;  %9685 = vmatprep.subr.bf16.mxu0 %v18595_v62  ;;  %v18705_v35 = vld [vmem:[#allocation58_spill] sm:$0xff] }
 0x67f   :  { %18703 = vst [vmem:[#allocation118_spill] sm:$0xff] %v14725_v43  ;;  %v14727_v20 = vpop.f32.mrb[144].mxu1  ;;  %12031 = vmatmul.mubr.bf16.gmra.mrb[52].mxu0 %v18704_v10  ;;  %v18708_v43 = vld [vmem:[#allocation66_spill] sm:$0xff] }
 0x680   :  { %v14730_v27 = vpop.f32.mrb[145].mxu1  ;;  %12034 = vmatprep.mubr.bf16.mxu0 %v18705_v35 }
 0x681   :  { %v14733_v17 = vpop.f32.mrb[146].mxu1 }
 0x682   :  { %v14736_v23 = vpop.f32.mrb[147].mxu1  ;;  %v5110_v39 = vpop.f32.mrb[188].mxu0 }
 0x683   :  { %v14741_v56 = vadd.f32 %v14577_v8, %v5110_v39  ;;  %v5112_v46 = vpop.f32.mrb[189].mxu0 }
 0x684   :  { %5911 = vmatmul.mubr.bf16.gmra.mrb[252].mxu1 %v14413_v21  ;;  %v5113_v57 = vpop.f32.mrb[190].mxu0  ;;  %v18709_v21 = vld [vmem:[#allocation65_spill] sm:$0xff] }
 0x685   :  { %5918 = vmatprep.mubr.bf16.mxu1 %v18649_v6  ;;  %18706 = vst [vmem:[#allocation59_spill] sm:$0xff] %v14741_v56  ;;  %v14744_v12 = vadd.f32 %v14586_v28, %v5113_v57  ;;  %v5115_v10 = vpop.f32.mrb[191].mxu0 }
 0x687   :  { %18707 = vst [vmem:[#allocation58_spill] sm:$0xff] %v14744_v12  ;;  %v14746_v50 = vpop.f32.mrb[148].mxu1  ;;  %12035 = vmatmul.mubr.bf16.gmra.mrb[56].mxu0 %v18708_v43 }
 0x688   :  { %v14748_v62 = vpop.f32.mrb[149].mxu1  ;;  %12038 = vmatprep.mubr.bf16.mxu0 %v18709_v21 }
 0x689   :  { %v14751_v22 = vpop.f32.mrb[150].mxu1 }
 0x68a   :  { %v14754_v6 = vpop.f32.mrb[151].mxu1  ;;  %v5118_v8 = vpop.f32.mrb[192].mxu0 }
 0x68b   :  { %v14759_v28 = vadd.f32 %v14575_v5, %v5118_v8  ;;  %v5120_v39 = vpop.f32.mrb[193].mxu0 }
 0x68c   :  { %5919 = vmatmul.mubr.bf16.gmra.mrb[0].mxu1 %v14422_v63  ;;  %v5121_v46 = vpop.f32.mrb[194].mxu0 }
 0x68d   :  { %5926 = vmatprep.mubr.bf16.mxu1 %v18653_v26  ;;  %18710 = vst [vmem:[#allocation66_spill] sm:$0xff] %v14759_v28  ;;  %v14762_v57 = vadd.f32 %v14580_v59, %v5121_v46  ;;  %v5123_v10 = vpop.f32.mrb[195].mxu0 }
 0x68f   :  { %18711 = vst [vmem:[#allocation119_spill] sm:$0xff] %v14762_v57  ;;  %v14764_v12 = vpop.f32.mrb[152].mxu1  ;;  %12039 = vmatmul.mubr.bf16.gmra.mrb[60].mxu0 %v14270_v18 }
 0x690   :  { %v14766_v56 = vpop.f32.mrb[153].mxu1  ;;  %12042 = vmatprep.mubr.bf16.mxu0 %v14263_v45 }
 0x691   :  { %v14769_v21 = vpop.f32.mrb[154].mxu1 }
 0x692   :  { %18712 = vst [vmem:[#allocation120_spill] sm:$0xff] %v14769_v21  ;;  %v14772_v26 = vpop.f32.mrb[155].mxu1  ;;  %v5126_v5 = vpop.f32.mrb[196].mxu0 }
 0x693   :  { %v14777_v59 = vadd.f32 %v14603_v29, %v5126_v5  ;;  %v5128_v8 = vpop.f32.mrb[197].mxu0 }
 0x694   :  { %5927 = vmatmul.mubr.bf16.gmra.mrb[4].mxu1 %v14428_v41  ;;  %v5129_v39 = vpop.f32.mrb[198].mxu0 }
 0x695   :  { %5934 = vmatprep.mubr.bf16.mxu1 %v18657_v3  ;;  %v14780_v10 = vadd.f32 %v14609_v30, %v5129_v39  ;;  %v5131_v63 = vpop.f32.mrb[199].mxu0 }
 0x697   :  { %v5720_v46 = vpop.f32.mrb[156].mxu1  ;;  %12043 = vmatmul.mubr.bf16.gmra.mrb[64].mxu0 %v14283_v42 }
 0x698   :  { %v14783_v57 = vadd.f32 %v5720_v46, %v14442_v53  ;;  %v5722_v28 = vpop.f32.mrb[157].mxu1  ;;  %12046 = vmatprep.mubr.bf16.mxu0 %v14280_v36 }
 0x699   :  { %v5723_v21 = vpop.f32.mrb[158].mxu1 }
 0x69a   :  { %v14787_v41 = vadd.f32 %v5723_v21, %v14446_v11  ;;  %v5725_v29 = vpop.f32.mrb[159].mxu1  ;;  %v5134_v5 = vpop.f32.mrb[200].mxu0 }
 0x69b   :  { %v14793_v63 = vadd.f32 %v14601_v55, %v5134_v5  ;;  %v5136_v53 = vpop.f32.mrb[201].mxu0 }
 0x69c   :  { %5935 = vmatmul.mubr.bf16.gmra.mrb[8].mxu1 %v14434_v9  ;;  %v5137_v30 = vpop.f32.mrb[202].mxu0  ;;  %v18721_v9 = vld [vmem:[#allocation78_spill] sm:$0xff] }
 0x69d   :  { %5942 = vmatprep.mubr.bf16.mxu1 %v14272_v51  ;;  %v14796_v8 = vadd.f32 %v14606_v7, %v5137_v30  ;;  %v5139_v39 = vpop.f32.mrb[203].mxu0 }
 0x69f   :  { %v5728_v28 = vpop.f32.mrb[160].mxu1  ;;  %12047 = vmatmul.mubr.bf16.gmra.mrb[68].mxu0 %v14285_v0 }
 0x6a0   :  { %v14799_v21 = vadd.f32 %v5728_v28, %v14450_v54  ;;  %v5730_v11 = vpop.f32.mrb[161].mxu1  ;;  %12050 = vmatprep.mubr.bf16.mxu0 %v14297_v58 }
 0x6a1   :  { %v5731_v46 = vpop.f32.mrb[162].mxu1 }
 0x6a2   :  { %v14803_v29 = vadd.f32 %v5731_v46, %v14455_v19  ;;  %v5733_v51 = vpop.f32.mrb[163].mxu1  ;;  %v5142_v55 = vpop.f32.mrb[204].mxu0 }
 0x6a3   :  { %v14809_v7 = vadd.f32 %v14629_v25, %v5142_v55  ;;  %v5144_v54 = vpop.f32.mrb[205].mxu0  ;;  %v18713_v25 = vld [vmem:[#allocation95_spill] sm:$0xff] }
 0x6a4   :  { %5943 = vmatmul.mubr.bf16.gmra.mrb[12].mxu1 %v14440_v14  ;;  %v5145_v5 = vpop.f32.mrb[206].mxu0  ;;  %v18714_v54 = vld [vmem:[#allocation75_spill] sm:$0xff] }
 0x6a5   :  { %5950 = vmatprep.mubr.bf16.mxu1 %v14292_v1  ;;  %v14812_v30 = vadd.f32 %v14635_v49, %v5145_v5  ;;  %v5147_v28 = vpop.f32.mrb[207].mxu0  ;;  %v18717_v1 = vld [vmem:[#allocation77_spill] sm:$0xff] }
 0x6a7   :  { %v5736_v53 = vpop.f32.mrb[164].mxu1  ;;  %12051 = vmatmul.mubr.bf16.gmra.mrb[72].mxu0 %v14300_v37 }
 0x6a8   :  { %v14815_v19 = vadd.f32 %v5736_v53, %v14463_v16  ;;  %v5738_v51 = vpop.f32.mrb[165].mxu1  ;;  %12054 = vmatprep.mubr.bf16.mxu0 %v14315_v47 }
 0x6a9   :  { %v5739_v39 = vpop.f32.mrb[166].mxu1 }
 0x6aa   :  { %v14819_v11 = vadd.f32 %v5739_v39, %v14465_v38  ;;  %v5741_v46 = vpop.f32.mrb[167].mxu1  ;;  %v5150_v55 = vpop.f32.mrb[208].mxu0 }
 0x6ab   :  { %v14825_v49 = vadd.f32 %v14626_v40, %v5150_v55  ;;  %v5152_v16 = vpop.f32.mrb[209].mxu0  ;;  %v18719_v40 = vld [vmem:[#allocation80_spill] sm:$0xff] }
 0x6ac   :  { %5951 = vmatmul.mubr.bf16.gmra.mrb[16].mxu1 %v18713_v25  ;;  %v5153_v5 = vpop.f32.mrb[210].mxu0  ;;  %v18718_v25 = vld [vmem:[#allocation97_spill] sm:$0xff]  ;;  %v18720_v55 = vld [vmem:[#allocation96_spill] sm:$0xff] }
 0x6ad   :  { %5958 = vmatprep.mubr.bf16.mxu1 %v18714_v54  ;;  %18715 = vst [vmem:[#allocation121_spill] sm:$0xff] %v14825_v49  ;;  %v14828_v28 = vadd.f32 %v14632_v31, %v5153_v5  ;;  %v5155_v51 = vpop.f32.mrb[211].mxu0 }
 0x6af   :  { %v5744_v53 = vpop.f32.mrb[168].mxu1  ;;  %18716 = vst [vmem:[#allocation122_spill] sm:$0xff] %v14828_v28  ;;  %12055 = vmatmul.mubr.bf16.gmra.mrb[76].mxu0 %v18717_v1  ;;  %v18725_v28 = vld [vmem:[#allocation81_spill] sm:$0xff] }
 0x6b0   :  { %v14831_v38 = vadd.f32 %v5744_v53, %v14473_v2  ;;  %v5746_v39 = vpop.f32.mrb[169].mxu1  ;;  %12058 = vmatprep.mubr.bf16.mxu0 %v18719_v40 }
 0x6b1   :  { %v5747_v46 = vpop.f32.mrb[170].mxu1 }
 0x6b2   :  { %v14835_v14 = vadd.f32 %v5747_v46, %v18718_v25  ;;  %v5749_v54 = vpop.f32.mrb[171].mxu1  ;;  %v5158_v16 = vpop.f32.mrb[212].mxu0  ;;  %v18724_v25 = vld [vmem:[#allocation99_spill] sm:$0xff] }
 0x6b3   :  { %v14841_v31 = vadd.f32 %v14655_v24, %v5158_v16  ;;  %v5160_v2 = vpop.f32.mrb[213].mxu0  ;;  %v18727_v24 = vld [vmem:[#allocation15_spill] sm:$0xff]  ;;  %v18728_v16 = vld [vmem:[#allocation98_spill] sm:$0xff] }
 0x6b4   :  { %5959 = vmatmul.mubr.bf16.gmra.mrb[20].mxu1 %v18720_v55  ;;  %v5161_v5 = vpop.f32.mrb[214].mxu0  ;;  %v18726_v55 = vld [vmem:[#allocation100_spill] sm:$0xff] }
 0x6b5   :  { %5966 = vmatprep.mubr.bf16.mxu1 %v18721_v9  ;;  %18722 = vst [vmem:[#allocation77_spill] sm:$0xff] %v14841_v31  ;;  %v14844_v51 = vadd.f32 %v14661_v4, %v5161_v5  ;;  %v5163_v39 = vpop.f32.mrb[215].mxu0  ;;  %v18729_v31 = vld [vmem:[#allocation19_spill] sm:$0xff] }
 0x6b7   :  { %v5752_v53 = vpop.f32.mrb[172].mxu1  ;;  %18723 = vst [vmem:[#allocation97_spill] sm:$0xff] %v14844_v51  ;;  %12059 = vmatmul.mubr.bf16.gmra.mrb[80].mxu0 %v18725_v28  ;;  %v18733_v51 = vld [vmem:[#allocation20_spill] sm:$0xff] }
 0x6b8   :  { %v14847_v46 = vadd.f32 %v5752_v53, %v18724_v25  ;;  %v5754_v54 = vpop.f32.mrb[173].mxu1  ;;  %6495 = vmatprep.mubr.bf16.mxu0 %v18727_v24 }
 0x6b9   :  { %v5755_v3 = vpop.f32.mrb[174].mxu1 }
 0x6ba   :  { %v14851_v49 = vadd.f32 %v5755_v3, %v18726_v55  ;;  %v5757_v9 = vpop.f32.mrb[175].mxu1  ;;  %v5166_v2 = vpop.f32.mrb[216].mxu0  ;;  %v18732_v3 = vld [vmem:[#allocation102_spill] sm:$0xff] }
 0x6bb   :  { %v14857_v4 = vadd.f32 %v14652_v13, %v5166_v2  ;;  %v5168_v5 = vpop.f32.mrb[217].mxu0  ;;  %v18735_v13 = vld [vmem:[#allocation17_spill] sm:$0xff]  ;;  %v18736_v2 = vld [vmem:[#allocation24_spill] sm:$0xff] }
 0x6bc   :  { %5967 = vmatmul.mubr.bf16.gmra.mrb[24].mxu1 %v18728_v16  ;;  %v5169_v53 = vpop.f32.mrb[218].mxu0  ;;  %v18734_v16 = vld [vmem:[#allocation103_spill] sm:$0xff] }
 0x6bd   :  { %12078 = vmatprep.mubr.bf16.mxu1 %v18729_v31  ;;  %18730 = vst [vmem:[#allocation80_spill] sm:$0xff] %v14857_v4  ;;  %v14860_v25 = vadd.f32 %v14658_v34, %v5169_v53  ;;  %v5171_v54 = vpop.f32.mrb[219].mxu0  ;;  %v18737_v4 = vld [vmem:[#allocation23_spill] sm:$0xff] }
 0x6bf   :  { %v5760_v39 = vpop.f32.mrb[176].mxu1  ;;  %18731 = vst [vmem:[#allocation99_spill] sm:$0xff] %v14860_v25  ;;  %6496 = vmatmul.mubr.bf16.vlgmr.msra.gmra.mrb[36].mxu0 %v18733_v51 }
 0x6c0   :  { %v14863_v55 = vadd.f32 %v5760_v39, %v18732_v3  ;;  %v5762_v9 = vpop.f32.mrb[177].mxu1  ;;  %6503 = vmatprep.mubr.bf16.mxu0 %v18735_v13  ;;  %v18741_v13 = vld [vmem:[#allocation26_spill] sm:$0xff] }
 0x6c1   :  { %v5763_v24 = vpop.f32.mrb[178].mxu1 }
 0x6c2   :  { %v14867_v28 = vadd.f32 %v5763_v24, %v18734_v16  ;;  %v5765_v31 = vpop.f32.mrb[179].mxu1  ;;  %v5174_v5 = vpop.f32.mrb[220].mxu0  ;;  %v18740_v16 = vld [vmem:[#allocation18_spill] sm:$0xff] }
 0x6c3   :  { %v14873_v34 = vadd.f32 %v14681_v15, %v5174_v5  ;;  %v5176_v53 = vpop.f32.mrb[221].mxu0  ;;  %v18743_v15 = vld [vmem:[#allocation16_spill] sm:$0xff]  ;;  %v18744_v5 = vld [vmem:[#allocation29_spill] sm:$0xff] }
 0x6c4   :  { %12079 = vmatmul.mubr.bf16.vlgmr.msra.gmra.mrb[28].mxu1 %v18736_v2  ;;  %v5177_v39 = vpop.f32.mrb[222].mxu0  ;;  %v18742_v2 = vld [vmem:[#allocation104_spill] sm:$0xff] }
 0x6c5   :  { %12082 = vmatprep.mubr.bf16.mxu1 %v18737_v4  ;;  %18738 = vst [vmem:[#allocation100_spill] sm:$0xff] %v14873_v34  ;;  %v14876_v3 = vadd.f32 %v14687_v48, %v5177_v39  ;;  %v5179_v51 = vpop.f32.mrb[223].mxu0  ;;  %v18745_v34 = vld [vmem:[#allocation28_spill] sm:$0xff] }
 0x6c7   :  { %v5768_v54 = vpop.f32.mrb[180].mxu1  ;;  %18739 = vst [vmem:[#allocation15_spill] sm:$0xff] %v14876_v3  ;;  %6504 = vmatmul.mubr.bf16.gmra.mrb[40].mxu0 %v18741_v13 }
 0x6c8   :  { %v14879_v9 = vadd.f32 %v5768_v54, %v18740_v16  ;;  %v5770_v24 = vpop.f32.mrb[181].mxu1  ;;  %6511 = vmatprep.mubr.bf16.mxu0 %v18743_v15  ;;  %v18749_v15 = vld [vmem:[#allocation31_spill] sm:$0xff] }
 0x6c9   :  { %v5771_v31 = vpop.f32.mrb[182].mxu1 }
 0x6ca   :  { %v14883_v25 = vadd.f32 %v5771_v31, %v18742_v2  ;;  %v5773_v4 = vpop.f32.mrb[183].mxu1  ;;  %v5182_v53 = vpop.f32.mrb[224].mxu0  ;;  %v18748_v31 = vld [vmem:[#allocation105_spill] sm:$0xff] }
 0x6cb   :  { %v14889_v48 = vadd.f32 %v14678_v60, %v5182_v53  ;;  %v5184_v39 = vpop.f32.mrb[225].mxu0  ;;  %v18751_v60 = vld [vmem:[#allocation22_spill] sm:$0xff] }
 0x6cc   :  { %12083 = vmatmul.mubr.bf16.gmra.mrb[32].mxu1 %v18744_v5  ;;  %v5185_v54 = vpop.f32.mrb[226].mxu0  ;;  %v18750_v5 = vld [vmem:[#allocation106_spill] sm:$0xff] }
 0x6cd   :  { %12086 = vmatprep.mubr.bf16.mxu1 %v18745_v34  ;;  %18746 = vst [vmem:[#allocation19_spill] sm:$0xff] %v14889_v48  ;;  %v14892_v16 = vadd.f32 %v14684_v52, %v5185_v54  ;;  %v5187_v24 = vpop.f32.mrb[227].mxu0  ;;  %v18752_v53 = vld [vmem:[#allocation34_spill] sm:$0xff]  ;;  %v18753_v48 = vld [vmem:[#allocation33_spill] sm:$0xff] }
 0x6cf   :  { %v5776_v51 = vpop.f32.mrb[184].mxu1  ;;  %18747 = vst [vmem:[#allocation102_spill] sm:$0xff] %v14892_v16  ;;  %6512 = vmatmul.mubr.bf16.gmra.mrb[44].mxu0 %v18749_v15 }
 0x6d0   :  { %v14895_v13 = vadd.f32 %v5776_v51, %v18748_v31  ;;  %v5778_v2 = vpop.f32.mrb[185].mxu1  ;;  %6519 = vmatprep.mubr.bf16.mxu0 %v18751_v60  ;;  %v18757_v60 = vld [vmem:[#allocation36_spill] sm:$0xff] }
 0x6d1   :  { %v5779_v4 = vpop.f32.mrb[186].mxu1 }
 0x6d2   :  { %v14899_v3 = vadd.f32 %v5779_v4, %v18750_v5  ;;  %v5781_v34 = vpop.f32.mrb[187].mxu1  ;;  %v5190_v39 = vpop.f32.mrb[228].mxu0  ;;  %v18756_v4 = vld [vmem:[#allocation107_spill] sm:$0xff] }
 0x6d3   :  { %v14905_v52 = vadd.f32 %v14707_v32, %v5190_v39  ;;  %v5192_v54 = vpop.f32.mrb[229].mxu0  ;;  %v18759_v32 = vld [vmem:[#allocation21_spill] sm:$0xff]  ;;  %v18760_v39 = vld [vmem:[#allocation39_spill] sm:$0xff] }
 0x6d4   :  { %12087 = vmatmul.mubr.bf16.gmra.mrb[36].mxu1 %v18752_v53  ;;  %v5193_v51 = vpop.f32.mrb[230].mxu0  ;;  %v18758_v53 = vld [vmem:[#allocation108_spill] sm:$0xff] }
 0x6d5   :  { %12090 = vmatprep.mubr.bf16.mxu1 %v18753_v48  ;;  %18754 = vst [vmem:[#allocation20_spill] sm:$0xff] %v14905_v52  ;;  %v14908_v31 = vadd.f32 %v14713_v61, %v5193_v51  ;;  %v5195_v2 = vpop.f32.mrb[231].mxu0  ;;  %v18761_v52 = vld [vmem:[#allocation38_spill] sm:$0xff] }
 0x6d7   :  { %v5784_v24 = vpop.f32.mrb[188].mxu1  ;;  %18755 = vst [vmem:[#allocation103_spill] sm:$0xff] %v14908_v31  ;;  %6520 = vmatmul.mubr.bf16.gmra.mrb[48].mxu0 %v18757_v60 }
 0x6d8   :  { %v14911_v15 = vadd.f32 %v5784_v24, %v18756_v4  ;;  %v5786_v5 = vpop.f32.mrb[189].mxu1  ;;  %6527 = vmatprep.mubr.bf16.mxu0 %v18759_v32  ;;  %v18765_v32 = vld [vmem:[#allocation41_spill] sm:$0xff] }
 0x6d9   :  { %v5787_v34 = vpop.f32.mrb[190].mxu1 }
 0x6da   :  { %v14915_v16 = vadd.f32 %v5787_v34, %v18758_v53  ;;  %v5789_v48 = vpop.f32.mrb[191].mxu1  ;;  %v5198_v54 = vpop.f32.mrb[232].mxu0  ;;  %v18764_v34 = vld [vmem:[#allocation109_spill] sm:$0xff] }
 0x6db   :  { %v14921_v61 = vadd.f32 %v14704_v33, %v5198_v54  ;;  %v5200_v51 = vpop.f32.mrb[233].mxu0  ;;  %v18767_v33 = vld [vmem:[#allocation27_spill] sm:$0xff]  ;;  %v18768_v54 = vld [vmem:[#allocation44_spill] sm:$0xff] }
 0x6dc   :  { %12091 = vmatmul.mubr.bf16.gmra.mrb[40].mxu1 %v18760_v39  ;;  %v5201_v24 = vpop.f32.mrb[234].mxu0  ;;  %v18766_v39 = vld [vmem:[#allocation110_spill] sm:$0xff] }
 0x6dd   :  { %12094 = vmatprep.mubr.bf16.mxu1 %v18761_v52  ;;  %18762 = vst [vmem:[#allocation17_spill] sm:$0xff] %v14921_v61  ;;  %v14924_v4 = vadd.f32 %v14710_v44, %v5201_v24  ;;  %v5203_v5 = vpop.f32.mrb[235].mxu0  ;;  %v18769_v61 = vld [vmem:[#allocation43_spill] sm:$0xff] }
 0x6df   :  { %v5792_v2 = vpop.f32.mrb[192].mxu1  ;;  %18763 = vst [vmem:[#allocation24_spill] sm:$0xff] %v14924_v4  ;;  %6528 = vmatmul.mubr.bf16.gmra.mrb[84].mxu0 %v18765_v32 }
 0x6e0   :  { %v14927_v60 = vadd.f32 %v5792_v2, %v18764_v34  ;;  %v5794_v53 = vpop.f32.mrb[193].mxu1  ;;  %6535 = vmatprep.mubr.bf16.mxu0 %v18767_v33  ;;  %v18773_v33 = vld [vmem:[#allocation46_spill] sm:$0xff] }
 0x6e1   :  { %v5795_v48 = vpop.f32.mrb[194].mxu1 }
 0x6e2   :  { %v14931_v31 = vadd.f32 %v5795_v48, %v18766_v39  ;;  %v5797_v52 = vpop.f32.mrb[195].mxu1  ;;  %v5206_v51 = vpop.f32.mrb[236].mxu0  ;;  %v18772_v48 = vld [vmem:[#allocation111_spill] sm:$0xff] }
 0x6e3   :  { %v14937_v44 = vadd.f32 %v14730_v27, %v5206_v51  ;;  %v5208_v24 = vpop.f32.mrb[237].mxu0  ;;  %v18775_v27 = vld [vmem:[#allocation25_spill] sm:$0xff] }
 0x6e4   :  { %12095 = vmatmul.mubr.bf16.gmra.mrb[44].mxu1 %v18768_v54  ;;  %v5209_v2 = vpop.f32.mrb[238].mxu0  ;;  %v18774_v54 = vld [vmem:[#allocation112_spill] sm:$0xff]  ;;  %v18776_v51 = vld [vmem:[#allocation49_spill] sm:$0xff] }
 0x6e5   :  { %12098 = vmatprep.mubr.bf16.mxu1 %v18769_v61  ;;  %18770 = vst [vmem:[#allocation23_spill] sm:$0xff] %v14937_v44  ;;  %v14940_v34 = vadd.f32 %v14736_v23, %v5209_v2  ;;  %v5211_v53 = vpop.f32.mrb[239].mxu0  ;;  %v18777_v44 = vld [vmem:[#allocation48_spill] sm:$0xff] }
 0x6e7   :  { %v5800_v5 = vpop.f32.mrb[196].mxu1  ;;  %18771 = vst [vmem:[#allocation18_spill] sm:$0xff] %v14940_v34  ;;  %6536 = vmatmul.mubr.bf16.gmra.mrb[88].mxu0 %v18773_v33 }
 0x6e8   :  { %v14943_v32 = vadd.f32 %v5800_v5, %v18772_v48  ;;  %v5802_v39 = vpop.f32.mrb[197].mxu1  ;;  %6543 = vmatprep.mubr.bf16.mxu0 %v18775_v27  ;;  %v18781_v27 = vld [vmem:[#allocation51_spill] sm:$0xff] }
 0x6e9   :  { %v5803_v52 = vpop.f32.mrb[198].mxu1 }
 0x6ea   :  { %v14947_v4 = vadd.f32 %v5803_v52, %v18774_v54  ;;  %v5805_v61 = vpop.f32.mrb[199].mxu1  ;;  %v5214_v24 = vpop.f32.mrb[240].mxu0  ;;  %v18780_v52 = vld [vmem:[#allocation113_spill] sm:$0xff] }
 0x6eb   :  { %v14953_v23 = vadd.f32 %v14727_v20, %v5214_v24  ;;  %v5216_v2 = vpop.f32.mrb[241].mxu0  ;;  %v18783_v20 = vld [vmem:[#allocation32_spill] sm:$0xff]  ;;  %v18784_v24 = vld [vmem:[#allocation53_spill] sm:$0xff] }
 0x6ec   :  { %12099 = vmatmul.mubr.bf16.gmra.mrb[48].mxu1 %v18776_v51  ;;  %v5217_v5 = vpop.f32.mrb[242].mxu0  ;;  %v18782_v51 = vld [vmem:[#allocation114_spill] sm:$0xff] }
 0x6ed   :  { %12102 = vmatprep.mubr.bf16.mxu1 %v18777_v44  ;;  %18778 = vst [vmem:[#allocation26_spill] sm:$0xff] %v14953_v23  ;;  %v14956_v48 = vadd.f32 %v14733_v17, %v5217_v5  ;;  %v5219_v39 = vpop.f32.mrb[243].mxu0  ;;  %v18785_v23 = vld [vmem:[#allocation52_spill] sm:$0xff] }
 0x6ef   :  { %v5808_v53 = vpop.f32.mrb[200].mxu1  ;;  %18779 = vst [vmem:[#allocation104_spill] sm:$0xff] %v14956_v48  ;;  %6544 = vmatmul.mubr.bf16.gmra.mrb[92].mxu0 %v18781_v27  ;;  %v18796_v48 = vld [vmem:[#allocation118_spill] sm:$0xff] }
 0x6f0   :  { %v14959_v33 = vadd.f32 %v5808_v53, %v18780_v52  ;;  %v5810_v54 = vpop.f32.mrb[201].mxu1  ;;  %6551 = vmatprep.mubr.bf16.mxu0 %v18783_v20 }
 0x6f1   :  { %v5811_v61 = vpop.f32.mrb[202].mxu1 }
 0x6f2   :  { %v14963_v34 = vadd.f32 %v5811_v61, %v18782_v51  ;;  %v5813_v44 = vpop.f32.mrb[203].mxu1  ;;  %v5222_v2 = vpop.f32.mrb[244].mxu0  ;;  %v18788_v61 = vld [vmem:[#allocation115_spill] sm:$0xff] }
 0x6f3   :  { %v14969_v17 = vadd.f32 %v14748_v62, %v5222_v2  ;;  %v5224_v5 = vpop.f32.mrb[245].mxu0  ;;  %v14977_v44 = vld [vmem:[#allocation3] sm:$0xff]  ;;  %v18789_v62 = vld [vmem:[#allocation56_spill] sm:$0xff] }
 0x6f4   :  { %12103 = vmatmul.mubr.bf16.gmra.mrb[52].mxu1 %v18784_v24  ;;  %v5225_v53 = vpop.f32.mrb[246].mxu0  ;;  %v14981_v20 = vpack.c.bf16 %v14977_v44, %v14977_v44  ;;  %v18790_v24 = vld [vmem:[#allocation116_spill] sm:$0xff]  ;;  %7974 = vst.msk [vmem:[#allocation5 + $0x8] sm:$0xff] %vm7176_vm3, %v14977_v44  ;;  %7976 = vst.msk [vmem:[#allocation5 + $0x18] sm:$0xff] %vm7176_vm3, %v14977_v44 }
 0x6f5   :  { %12106 = vmatprep.mubr.bf16.mxu1 %v18785_v23  ;;  %18786 = vst [vmem:[#allocation16_spill] sm:$0xff] %v14969_v17  ;;  %v14972_v52 = vadd.f32 %v14754_v6, %v5225_v53  ;;  %v5227_v54 = vpop.f32.mrb[247].mxu0  ;;  %v18792_v6 = vld [vmem:[#allocation30_spill] sm:$0xff]  ;;  %7978 = vst.msk [vmem:[#allocation5 + $0x28] sm:$0xff] %vm7176_vm3, %v14977_v44 }
 0x6f6   :  { %v18795_v17 = vld [vmem:[#allocation62_spill] sm:$0xff]  ;;  %7980 = vst.msk [vmem:[#allocation5 + $0x38] sm:$0xff] %vm7176_vm3, %v14977_v44  ;;  %7982 = vst.msk [vmem:[#allocation5 + $0x48] sm:$0xff] %vm7176_vm3, %v14977_v44 }
 0x6f7   :  { %v5816_v39 = vpop.f32.mrb[204].mxu1  ;;  %18787 = vst [vmem:[#allocation29_spill] sm:$0xff] %v14972_v52  ;;  %6552 = vmatmul.mubr.bf16.gmra.mrb[96].mxu0 %v18789_v62  ;;  %7984 = vst.msk [vmem:[#allocation5 + $0x58] sm:$0xff] %vm7176_vm3, %v14977_v44 }
 0x6f8   :  { %v14975_v27 = vadd.f32 %v5816_v39, %v18788_v61  ;;  %v5818_v51 = vpop.f32.mrb[205].mxu1  ;;  %6559 = vmatprep.mubr.bf16.mxu0 %v18792_v6  ;;  %7986 = vst.msk [vmem:[#allocation5 + $0x68] sm:$0xff] %vm7176_vm3, %v14977_v44  ;;  %7988 = vst.msk [vmem:[#allocation5 + $0x78] sm:$0xff] %vm7176_vm3, %v14977_v44 }
 0x6f9   :  { %v5819_v23 = vpop.f32.mrb[206].mxu1  ;;  %7990 = vst.msk [vmem:[#allocation5 + $0x88] sm:$0xff] %vm7176_vm3, %v14977_v44  ;;  %7992 = vst.msk [vmem:[#allocation5 + $0x98] sm:$0xff] %vm7176_vm3, %v14977_v44 }
 0x6fa   :  { %v14985_v2 = vadd.f32 %v5819_v23, %v18790_v24  ;;  %v5821_v5 = vpop.f32.mrb[207].mxu1  ;;  %v5230_v53 = vpop.f32.mrb[248].mxu0  ;;  %v18794_v23 = vld [vmem:[#allocation117_spill] sm:$0xff]  ;;  %7994 = vst.msk [vmem:[#allocation5 + $0xa8] sm:$0xff] %vm7176_vm3, %v14977_v44  ;;  %7996 = vst.msk [vmem:[#allocation5 + $0xb8] sm:$0xff] %vm7176_vm3, %v14977_v44 }
 0x6fb   :  { %v14991_v39 = vadd.f32 %v14746_v50, %v5230_v53  ;;  %v5232_v54 = vpop.f32.mrb[249].mxu0  ;;  %v18797_v50 = vld [vmem:[#allocation37_spill] sm:$0xff]  ;;  %7998 = vst.msk [vmem:[#allocation5 + $0xc8] sm:$0xff] %vm7176_vm3, %v14977_v44  ;;  %8000 = vst.msk [vmem:[#allocation5 + $0xd8] sm:$0xff] %vm7176_vm3, %v14977_v44 }
 0x6fc   :  { %18791 = vst [vmem:[#allocation28_spill] sm:$0xff] %v14985_v2  ;;  %12107 = vmatmul.mubr.bf16.gmra.mrb[56].mxu1 %v14981_v20  ;;  %v5233_v61 = vpop.f32.mrb[250].mxu0  ;;  %v18798_v54 = vld [vmem:[#allocation65_spill] sm:$0xff]  ;;  %8002 = vst.msk [vmem:[#allocation5 + $0xe8] sm:$0xff] %vm7176_vm3, %v14977_v44 }
 0x6fd   :  { %12110 = vmatprep.mubr.bf16.mxu1 %v18705_v35  ;;  %v14994_v52 = vadd.f32 %v14751_v22, %v5233_v61  ;;  %v5235_v62 = vpop.f32.mrb[251].mxu0  ;;  %8004 = vst.msk [vmem:[#allocation5 + $0xf8] sm:$0xff] %vm7176_vm3, %v14977_v44  ;;  %8006 = vst.msk [vmem:[#allocation5 + $0x108] sm:$0xff] %vm7176_vm3, %v14977_v44 }
 0x6fe   :  { %8008 = vst.msk [vmem:[#allocation5 + $0x118] sm:$0xff] %vm7176_vm3, %v14977_v44  ;;  %8010 = vst.msk [vmem:[#allocation5 + $0x128] sm:$0xff] %vm7176_vm3, %v14977_v44 }
 0x6ff   :  { %v5824_v51 = vpop.f32.mrb[208].mxu1  ;;  %18793 = vst [vmem:[#allocation105_spill] sm:$0xff] %v14994_v52  ;;  %6560 = vmatmul.mubr.bf16.gmra.mrb[100].mxu0 %v18795_v17  ;;  %8012 = vst.msk [vmem:[#allocation5 + $0x138] sm:$0xff] %vm7176_vm3, %v14977_v44 }
 0x700   :  { %v14997_v24 = vadd.f32 %v5824_v51, %v18794_v23  ;;  %v5826_v5 = vpop.f32.mrb[209].mxu1  ;;  %6567 = vmatprep.mubr.bf16.mxu0 %v18797_v50  ;;  %v18801_v50 = vld [vmem:[#allocation69_spill] sm:$0xff]  ;;  %8014 = vst.msk [vmem:[#allocation5 + $0x148] sm:$0xff] %vm7176_vm3, %v14977_v44  ;;  %8016 = vst.msk [vmem:[#allocation5 + $0x158] sm:$0xff] %vm7176_vm3, %v14977_v44 }
 0x701   :  { %v5827_v6 = vpop.f32.mrb[210].mxu1  ;;  %8018 = vst.msk [vmem:[#allocation5 + $0x168] sm:$0xff] %vm7176_vm3, %v14977_v44  ;;  %8020 = vst.msk [vmem:[#allocation5 + $0x178] sm:$0xff] %vm7176_vm3, %v14977_v44 }
 0x702   :  { %v15001_v2 = vadd.f32 %v5827_v6, %v18796_v48  ;;  %v5829_v35 = vpop.f32.mrb[211].mxu1  ;;  %v5238_v53 = vpop.f32.mrb[252].mxu0  ;;  %v18800_v48 = vld [vmem:[#allocation59_spill] sm:$0xff]  ;;  %8022 = vst.msk [vmem:[#allocation5 + $0x188] sm:$0xff] %vm7176_vm3, %v14977_v44  ;;  %8024 = vst.msk [vmem:[#allocation5 + $0x198] sm:$0xff] %vm7176_vm3, %v14977_v44 }
 0x703   :  { %v15007_v22 = vadd.f32 %v14766_v56, %v5238_v53  ;;  %v5240_v61 = vpop.f32.mrb[253].mxu0  ;;  %v18803_v56 = vld [vmem:[#allocation35_spill] sm:$0xff]  ;;  %8026 = vst.msk [vmem:[#allocation5 + $0x1a8] sm:$0xff] %vm7176_vm3, %v14977_v44  ;;  %8028 = vst.msk [vmem:[#allocation5 + $0x1b8] sm:$0xff] %vm7176_vm3, %v14977_v44 }
 0x704   :  { %12111 = vmatmul.mubr.bf16.gmra.mrb[60].mxu1 %v18708_v43  ;;  %v5241_v51 = vpop.f32.mrb[254].mxu0  ;;  %v18802_v43 = vld [vmem:[#allocation58_spill] sm:$0xff]  ;;  %8030 = vst.msk [vmem:[#allocation5 + $0x1c8] sm:$0xff] %vm7176_vm3, %v14977_v44  ;;  %8032 = vst.msk [vmem:[#allocation5 + $0x1d8] sm:$0xff] %vm7176_vm3, %v14977_v44 }
 0x705   :  { %12114 = vmatprep.mubr.bf16.mxu1 %v18798_v54  ;;  %v15010_v23 = vadd.f32 %v14772_v26, %v5241_v51  ;;  %v5243_v17 = vpop.f32.mrb[255].mxu0  ;;  %8034 = vst.msk [vmem:[#allocation5 + $0x1e8] sm:$0xff] %vm7176_vm3, %v14977_v44  ;;  %8036 = vst.msk [vmem:[#allocation5 + $0x1f8] sm:$0xff] %vm7176_vm3, %v14977_v44 }
 0x706   :  { %v18804_v17 = vld [vmem:[#allocation120_spill] sm:$0xff]  ;;  %8038 = vst.msk [vmem:[#allocation5 + $0x208] sm:$0xff] %vm7176_vm3, %v14977_v44  ;;  %8040 = vst.msk [vmem:[#allocation5 + $0x218] sm:$0xff] %vm7176_vm3, %v14977_v44 }
 0x707   :  { %v5832_v62 = vpop.f32.mrb[212].mxu1  ;;  %18799 = vst [vmem:[#allocation31_spill] sm:$0xff] %v15010_v23  ;;  %6568 = vmatmul.mubr.bf16.gmra.mrb[104].mxu0 %v18801_v50  ;;  %8042 = vst.msk [vmem:[#allocation5 + $0x228] sm:$0xff] %vm7176_vm3, %v14977_v44 }
 0x708   :  { %v15013_v5 = vadd.f32 %v5832_v62, %v18800_v48  ;;  %v5834_v6 = vpop.f32.mrb[213].mxu1  ;;  %6575 = vmatprep.mubr.bf16.mxu0 %v18803_v56  ;;  %v18806_v56 = vld [vmem:[#allocation72_spill] sm:$0xff]  ;;  %8044 = vst.msk [vmem:[#allocation5 + $0x238] sm:$0xff] %vm7176_vm3, %v14977_v44  ;;  %8046 = vst.msk [vmem:[#allocation5 + $0x248] sm:$0xff] %vm7176_vm3, %v14977_v44 }
 0x709   :  { %v5835_v35 = vpop.f32.mrb[214].mxu1  ;;  %8048 = vst.msk [vmem:[#allocation5 + $0x258] sm:$0xff] %vm7176_vm3, %v14977_v44  ;;  %8050 = vst.msk [vmem:[#allocation5 + $0x268] sm:$0xff] %vm7176_vm3, %v14977_v44 }
 0x70a   :  { %v15017_v52 = vadd.f32 %v5835_v35, %v18802_v43  ;;  %v5837_v54 = vpop.f32.mrb[215].mxu1  ;;  %v5246_v53 = vpop.f32.mrb[0].mxu0  ;;  %v18805_v35 = vld [vmem:[#allocation66_spill] sm:$0xff]  ;;  %8052 = vst.msk [vmem:[#allocation5 + $0x278] sm:$0xff] %vm7176_vm3, %v14977_v44  ;;  %8054 = vst.msk [vmem:[#allocation5 + $0x288] sm:$0xff] %vm7176_vm3, %v14977_v44 }
 0x70b   :  { %v15023_v26 = vadd.f32 %v14764_v12, %v5246_v53  ;;  %v5248_v61 = vpop.f32.mrb[1].mxu0  ;;  %v18808_v12 = vld [vmem:[#allocation42_spill] sm:$0xff]  ;;  %8056 = vst.msk [vmem:[#allocation5 + $0x298] sm:$0xff] %vm7176_vm3, %v14977_v44  ;;  %8058 = vst.msk [vmem:[#allocation5 + $0x2a8] sm:$0xff] %vm7176_vm3, %v14977_v44 }
 0x70c   :  { %12115 = vmatmul.mubr.bf16.gmra.mrb[64].mxu1 %v14270_v18  ;;  %v5249_v51 = vpop.f32.mrb[2].mxu0  ;;  %v18807_v18 = vld [vmem:[#allocation119_spill] sm:$0xff]  ;;  %8060 = vst.msk [vmem:[#allocation5 + $0x2b8] sm:$0xff] %vm7176_vm3, %v14977_v44  ;;  %8062 = vst.msk [vmem:[#allocation5 + $0x2c8] sm:$0xff] %vm7176_vm3, %v14977_v44 }
 0x70d   :  { %12118 = vmatprep.mubr.bf16.mxu1 %v14263_v45  ;;  %v15026_v48 = vadd.f32 %v18804_v17, %v5249_v51  ;;  %v5251_v6 = vpop.f32.mrb[3].mxu0  ;;  %8064 = vst.msk [vmem:[#allocation5 + $0x2d8] sm:$0xff] %vm7176_vm3, %v14977_v44  ;;  %8066 = vst.msk [vmem:[#allocation5 + $0x2e8] sm:$0xff] %vm7176_vm3, %v14977_v44 }
 0x70e   :  { %8068 = vst.msk [vmem:[#allocation5 + $0x2f8] sm:$0xff] %vm7176_vm3, %v14977_v44  ;;  %8070 = vst.msk [vmem:[#allocation5 + $0x308] sm:$0xff] %vm7176_vm3, %v14977_v44 }
 0x70f   :  { %v5840_v62 = vpop.f32.mrb[216].mxu1  ;;  %6576 = vmatmul.mubr.bf16.gmra.mrb[108].mxu0 %v18806_v56  ;;  %8072 = vst.msk [vmem:[#allocation5 + $0x318] sm:$0xff] %vm7176_vm3, %v14977_v44  ;;  %8074 = vst.msk [vmem:[#allocation5 + $0x328] sm:$0xff] %vm7176_vm3, %v14977_v44 }
 0x710   :  { %v15029_v50 = vadd.f32 %v5840_v62, %v18805_v35  ;;  %v5842_v43 = vpop.f32.mrb[217].mxu1  ;;  %6583 = vmatprep.mubr.bf16.mxu0 %v18808_v12  ;;  %8076 = vst.msk [vmem:[#allocation5 + $0x338] sm:$0xff] %vm7176_vm3, %v14977_v44  ;;  %8078 = vst.msk [vmem:[#allocation5 + $0x348] sm:$0xff] %vm7176_vm3, %v14977_v44 }
 0x711   :  { %v5843_v54 = vpop.f32.mrb[218].mxu1  ;;  %8080 = vst.msk [vmem:[#allocation5 + $0x358] sm:$0xff] %vm7176_vm3, %v14977_v44  ;;  %8082 = vst.msk [vmem:[#allocation5 + $0x368] sm:$0xff] %vm7176_vm3, %v14977_v44 }
 0x712   :  { %v15033_v23 = vadd.f32 %v5843_v54, %v18807_v18  ;;  %v5845_v45 = vpop.f32.mrb[219].mxu1  ;;  %v12000_v53 = vpop.f32.mrb[4].mxu0  ;;  %8084 = vst.msk [vmem:[#allocation5 + $0x378] sm:$0xff] %vm7176_vm3, %v14977_v44  ;;  %8086 = vst.msk [vmem:[#allocation5 + $0x388] sm:$0xff] %vm7176_vm3, %v14977_v44 }
 0x713   :  { %v15039_v61 = vadd.f32 %v12000_v53, %v14799_v21  ;;  %v6009_v51 = vpop.f32.mrb[5].mxu0  ;;  %v18809_v21 = vld [vmem:[#allocation74_spill] sm:$0xff]  ;;  %8088 = vst.msk [vmem:[#allocation5 + $0x398] sm:$0xff] %vm7176_vm3, %v14977_v44  ;;  %8090 = vst.msk [vmem:[#allocation5 + $0x3a8] sm:$0xff] %vm7176_vm3, %v14977_v44 }
 0x714   :  { %12119 = vmatmul.mubr.bf16.gmra.mrb[68].mxu1 %v14283_v42  ;;  %v15042_v62 = vadd.f32 %v6009_v51, %v14783_v57  ;;  %v12001_v17 = vpop.f32.mrb[6].mxu0  ;;  %v18810_v57 = vld [vmem:[#allocation40_spill] sm:$0xff]  ;;  %8092 = vst.msk [vmem:[#allocation5 + $0x3b8] sm:$0xff] %vm7176_vm3, %v14977_v44  ;;  %8094 = vst.msk [vmem:[#allocation5 + $0x3c8] sm:$0xff] %vm7176_vm3, %v14977_v44 }
 0x715   :  { %12122 = vmatprep.mubr.bf16.mxu1 %v14280_v36  ;;  %v15045_v35 = vadd.f32 %v12001_v17, %v14803_v29  ;;  %v6012_v43 = vpop.f32.mrb[7].mxu0  ;;  %8096 = vst.msk [vmem:[#allocation5 + $0x3d8] sm:$0xff] %vm7176_vm3, %v14977_v44  ;;  %8098 = vst.msk [vmem:[#allocation5 + $0x3e8] sm:$0xff] %vm7176_vm3, %v14977_v44 }
 0x716   :  { %v15051_v56 = vadd.f32 %v6012_v43, %v14787_v41  ;;  %8100 = vst.msk [vmem:[#allocation5 + $0x3f8] sm:$0xff] %vm7176_vm3, %v14977_v44  ;;  %8102 = vst.msk [vmem:[#allocation5 + $0x408] sm:$0xff] %vm7176_vm3, %v14977_v44 }
 0x717   :  { %v5848_v6 = vpop.f32.mrb[220].mxu1  ;;  %6584 = vmatmul.mubr.bf16.gmra.mrb[112].mxu0 %v18809_v21  ;;  %8104 = vst.msk [vmem:[#allocation5 + $0x418] sm:$0xff] %vm7176_vm3, %v14977_v44  ;;  %8106 = vst.msk [vmem:[#allocation5 + $0x428] sm:$0xff] %vm7176_vm3, %v14977_v44 }
 0x718   :  { %v15048_v54 = vadd.f32 %v5848_v6, %v14777_v59  ;;  %v5850_v42 = vpop.f32.mrb[221].mxu1  ;;  %6591 = vmatprep.mubr.bf16.mxu0 %v18810_v57  ;;  %8108 = vst.msk [vmem:[#allocation5 + $0x438] sm:$0xff] %vm7176_vm3, %v14977_v44  ;;  %8110 = vst.msk [vmem:[#allocation5 + $0x448] sm:$0xff] %vm7176_vm3, %v14977_v44  ;;  %v18811_v6 = vld [vmem:[#allocation76_spill] sm:$0xff] }
 0x719   :  { %v5851_v36 = vpop.f32.mrb[222].mxu1  ;;  %8112 = vst.msk [vmem:[#allocation5 + $0x458] sm:$0xff] %vm7176_vm3, %v14977_v44  ;;  %8114 = vst.msk [vmem:[#allocation5 + $0x468] sm:$0xff] %vm7176_vm3, %v14977_v44  ;;  %v18812_v42 = vld [vmem:[#allocation47_spill] sm:$0xff] }
 0x71a   :  { %v15055_v18 = vadd.f32 %v5851_v36, %v14780_v10  ;;  %v5853_v45 = vpop.f32.mrb[223].mxu1  ;;  %v12004_v29 = vpop.f32.mrb[8].mxu0  ;;  %8116 = vst.msk [vmem:[#allocation5 + $0x478] sm:$0xff] %vm7176_vm3, %v14977_v44 }
 0x71b   :  { %v15061_v59 = vadd.f32 %v12004_v29, %v14831_v38  ;;  %v6025_v12 = vpop.f32.mrb[9].mxu0 }
 0x71c   :  { %12123 = vmatmul.mubr.bf16.gmra.mrb[72].mxu1 %v14285_v0  ;;  %v15064_v41 = vadd.f32 %v6025_v12, %v14815_v19  ;;  %v15066_v53 = vpop.f32.mrb[10].mxu0 }
 0x71d   :  { %12126 = vmatprep.mubr.bf16.mxu1 %v14297_v58  ;;  %v15214_v58 = vadd.f32 %v15066_v53, %v14835_v14  ;;  %v6028_v10 = vpop.f32.mrb[11].mxu0 }
 0x71e   :  { %v15220_v51 = vadd.f32 %v6028_v10, %v14819_v11 }
 0x71f   :  { %v5856_v0 = vpop.f32.mrb[224].mxu1  ;;  %6592 = vmatmul.mubr.bf16.gmra.mrb[116].mxu0 %v18811_v6 }
 0x720   :  { %v15217_v19 = vadd.f32 %v5856_v0, %v14793_v63  ;;  %v5858_v38 = vpop.f32.mrb[225].mxu1  ;;  %6599 = vmatprep.mubr.bf16.mxu0 %v18812_v42  ;;  %v18814_v0 = vld [vmem:[#allocation45_spill] sm:$0xff] }
 0x721   :  { %v5859_v17 = vpop.f32.mrb[226].mxu1 }
 0x722   :  { %v15224_v43 = vadd.f32 %v5859_v17, %v14796_v8  ;;  %v5861_v44 = vpop.f32.mrb[227].mxu1  ;;  %v12008_v14 = vpop.f32.mrb[12].mxu0 }
 0x723   :  { %v15230_v63 = vadd.f32 %v12008_v14, %v14863_v55  ;;  %v6041_v36 = vpop.f32.mrb[13].mxu0  ;;  %v18813_v55 = vld [vmem:[#allocation79_spill] sm:$0xff]  ;;  %v18815_v44 = vld [vmem:[#allocation121_spill] sm:$0xff] }
 0x724   :  { %12127 = vmatmul.mubr.bf16.gmra.mrb[76].mxu1 %v14300_v37  ;;  %v15233_v11 = vadd.f32 %v6041_v36, %v14847_v46  ;;  %v12009_v21 = vpop.f32.mrb[14].mxu0  ;;  %v18817_v36 = vld [vmem:[#allocation122_spill] sm:$0xff] }
 0x725   :  { %12130 = vmatprep.mubr.bf16.mxu1 %v14315_v47  ;;  %v15236_v8 = vadd.f32 %v12009_v21, %v14867_v28  ;;  %v6044_v45 = vpop.f32.mrb[15].mxu0 }
 0x726   :  { %v15242_v12 = vadd.f32 %v6044_v45, %v14851_v49  ;;  %v18819_v45 = vld [vmem:[#allocation84_spill] sm:$0xff] }
 0x727   :  { %v5864_v57 = vpop.f32.mrb[228].mxu1  ;;  %6600 = vmatmul.mubr.bf16.gmra.mrb[120].mxu0 %v18813_v55 }
 0x728   :  { %v15239_v29 = vadd.f32 %v5864_v57, %v14809_v7  ;;  %v5866_v37 = vpop.f32.mrb[229].mxu1  ;;  %6607 = vmatprep.mubr.bf16.mxu0 %v18814_v0  ;;  %v18818_v57 = vld [vmem:[#allocation81_spill] sm:$0xff] }
 0x729   :  { %v5867_v47 = vpop.f32.mrb[230].mxu1 }
 0x72a   :  { %v15246_v53 = vadd.f32 %v5867_v47, %v14812_v30  ;;  %v5869_v46 = vpop.f32.mrb[231].mxu1  ;;  %v12012_v28 = vpop.f32.mrb[16].mxu0 }
 0x72b   :  { %v15252_v7 = vadd.f32 %v12012_v28, %v14895_v13  ;;  %v6057_v10 = vpop.f32.mrb[17].mxu0  ;;  %v18816_v13 = vld [vmem:[#allocation83_spill] sm:$0xff] }
 0x72c   :  { %12131 = vmatmul.mubr.bf16.gmra.mrb[80].mxu1 %v18717_v1  ;;  %v15255_v49 = vadd.f32 %v6057_v10, %v14879_v9  ;;  %v12013_v38 = vpop.f32.mrb[18].mxu0  ;;  %v18820_v10 = vld [vmem:[#allocation77_spill] sm:$0xff] }
 0x72d   :  { %12134 = vmatprep.mubr.bf16.mxu1 %v18719_v40  ;;  %v15258_v30 = vadd.f32 %v12013_v38, %v14899_v3  ;;  %v6060_v6 = vpop.f32.mrb[19].mxu0 }
 0x72e   :  { %v15264_v14 = vadd.f32 %v6060_v6, %v14883_v25 }
 0x72f   :  { %v5872_v17 = vpop.f32.mrb[232].mxu1  ;;  %6608 = vmatmul.mubr.bf16.gmra.mrb[124].mxu0 %v18816_v13 }
 0x730   :  { %v15261_v42 = vadd.f32 %v5872_v17, %v18815_v44  ;;  %v5874_v1 = vpop.f32.mrb[233].mxu1  ;;  %6615 = vmatprep.mubr.bf16.mxu0 %v14981_v20 }
 0x731   :  { %v5875_v40 = vpop.f32.mrb[234].mxu1 }
 0x732   :  { %v15268_v21 = vadd.f32 %v5875_v40, %v18817_v36  ;;  %v5877_v9 = vpop.f32.mrb[235].mxu1  ;;  %v12016_v3 = vpop.f32.mrb[20].mxu0  ;;  %v18822_v40 = vld [vmem:[#allocation50_spill] sm:$0xff] }
 0x733   :  { %v15274_v37 = vadd.f32 %v12016_v3, %v14927_v60  ;;  %v6073_v47 = vpop.f32.mrb[21].mxu0  ;;  %v18821_v60 = vld [vmem:[#allocation97_spill] sm:$0xff] }
 0x734   :  { %12135 = vmatmul.mubr.bf16.gmra.mrb[84].mxu1 %v18818_v57  ;;  %v15277_v25 = vadd.f32 %v6073_v47, %v14911_v15  ;;  %v12017_v55 = vpop.f32.mrb[22].mxu0  ;;  %v18823_v47 = vld [vmem:[#allocation80_spill] sm:$0xff] }
 0x735   :  { %12138 = vmatprep.mubr.bf16.mxu1 %v18819_v45  ;;  %v15280_v0 = vadd.f32 %v12017_v55, %v14931_v31  ;;  %v6076_v28 = vpop.f32.mrb[23].mxu0 }
 0x736   :  { %v15286_v6 = vadd.f32 %v6076_v28, %v14915_v16 }
 0x737   :  { %v5880_v46 = vpop.f32.mrb[236].mxu1  ;;  %6616 = vmatmul.mubr.bf16.gmra.mrb[128].mxu0 %v14981_v20 }
 0x738   :  { %v15283_v38 = vadd.f32 %v5880_v46, %v18820_v10  ;;  %v5882_v17 = vpop.f32.mrb[237].mxu1  ;;  %6623 = vmatprep.mubr.bf16.mxu0 %v18822_v40 }
 0x739   :  { %v5883_v44 = vpop.f32.mrb[238].mxu1  ;;  %v18825_v17 = vld [vmem:[#allocation99_spill] sm:$0xff] }
 0x73a   :  { %v15290_v1 = vadd.f32 %v5883_v44, %v18821_v60  ;;  %v5885_v15 = vpop.f32.mrb[239].mxu1  ;;  %v12020_v13 = vpop.f32.mrb[24].mxu0  ;;  %v18826_v60 = vld [vmem:[#allocation57_spill] sm:$0xff] }
 0x73b   :  { %v15295_v31 = vadd.f32 %v12020_v13, %v14959_v33  ;;  %v6089_v36 = vpop.f32.mrb[25].mxu0  ;;  %v18824_v33 = vld [vmem:[#allocation85_spill] sm:$0xff] }
 0x73c   :  { %12139 = vmatmul.mubr.bf16.gmra.mrb[88].mxu1 %v14981_v20  ;;  %v15298_v9 = vadd.f32 %v6089_v36, %v14943_v32  ;;  %v12021_v16 = vpop.f32.mrb[26].mxu0 }
 0x73d   :  { %v15301_v3 = vadd.f32 %v12021_v16, %v14963_v34  ;;  %v6092_v45 = vpop.f32.mrb[27].mxu0 }
 0x73e   :  { %v15307_v28 = vadd.f32 %v6092_v45, %v14947_v4  ;;  %v18828_v45 = vld [vmem:[#allocation100_spill] sm:$0xff] }
 0x73f   :  { %v5888_v57 = vpop.f32.mrb[240].mxu1  ;;  %6624 = vmatmul.mubr.bf16.gmra.mrb[132].mxu0 %v18824_v33 }
 0x740   :  { %v15304_v55 = vadd.f32 %v5888_v57, %v18823_v47  ;;  %v5890_v46 = vpop.f32.mrb[241].mxu1  ;;  %6631 = vmatprep.mubr.bf16.mxu0 %v18826_v60 }
 0x741   :  { %v5891_v10 = vpop.f32.mrb[242].mxu1 }
 0x742   :  { %v15311_v44 = vadd.f32 %v5891_v10, %v18825_v17  ;;  %v5893_v32 = vpop.f32.mrb[243].mxu1  ;;  %v12024_v15 = vpop.f32.mrb[28].mxu0  ;;  %v18829_v10 = vld [vmem:[#allocation28_spill] sm:$0xff] }
 0x743   :  { %v15315_v34 = vadd.f32 %v12024_v15, %v14997_v24  ;;  %v6105_v40 = vpop.f32.mrb[29].mxu0  ;;  %v18830_v24 = vld [vmem:[#allocation86_spill] sm:$0xff]  ;;  %v18831_v32 = vld [vmem:[#allocation15_spill] sm:$0xff] }
 0x744   :  { %v15318_v13 = vadd.f32 %v6105_v40, %v14975_v27  ;;  %v12025_v36 = vpop.f32.mrb[30].mxu0  ;;  %v18832_v15 = vld [vmem:[#allocation55_spill] sm:$0xff] }
 0x745   :  { %v15321_v16 = vadd.f32 %v12025_v36, %v15001_v2  ;;  %v6108_v57 = vpop.f32.mrb[31].mxu0 }
 0x746   :  { %v15327_v33 = vadd.f32 %v6108_v57, %v18829_v10 }
 0x747   :  { %v5896_v4 = vpop.f32.mrb[244].mxu1  ;;  %18827 = vst [vmem:[#allocation106_spill] sm:$0xff] %v15321_v16  ;;  %6632 = vmatmul.mubr.bf16.gmra.mrb[136].mxu0 %v18830_v24  ;;  %v18835_v24 = vld [vmem:[#allocation19_spill] sm:$0xff] }
 0x748   :  { %v15324_v47 = vadd.f32 %v5896_v4, %v18828_v45  ;;  %v5898_v46 = vpop.f32.mrb[245].mxu1  ;;  %6639 = vmatprep.mubr.bf16.mxu0 %v18832_v15  ;;  %v18836_v16 = vld [vmem:[#allocation87_spill] sm:$0xff] }
 0x749   :  { %v5899_v17 = vpop.f32.mrb[246].mxu1 }
 0x74a   :  { %v15331_v60 = vadd.f32 %v5899_v17, %v18831_v32  ;;  %v5901_v27 = vpop.f32.mrb[247].mxu1  ;;  %v12028_v40 = vpop.f32.mrb[32].mxu0 }
 0x74b   :  { %v15335_v2 = vadd.f32 %v12028_v40, %v15029_v50  ;;  %v6121_v36 = vpop.f32.mrb[33].mxu0  ;;  %v18837_v50 = vld [vmem:[#allocation102_spill] sm:$0xff] }
 0x74c   :  { %v15338_v4 = vadd.f32 %v6121_v36, %v15013_v5  ;;  %v12029_v45 = vpop.f32.mrb[34].mxu0  ;;  %v18838_v5 = vld [vmem:[#allocation63_spill] sm:$0xff] }
 0x74d   :  { %18833 = vst [vmem:[#allocation22_spill] sm:$0xff] %v15335_v2  ;;  %v15341_v46 = vadd.f32 %v12029_v45, %v15033_v23  ;;  %v6124_v10 = vpop.f32.mrb[35].mxu0 }
 0x74e   :  { %18834 = vst [vmem:[#allocation34_spill] sm:$0xff] %v15338_v4  ;;  %v15345_v27 = vadd.f32 %v6124_v10, %v15017_v52 }
 0x74f   :  { %v5904_v57 = vpop.f32.mrb[248].mxu1  ;;  %6640 = vmatmul.mubr.bf16.gmra.mrb[140].mxu0 %v18836_v16  ;;  %v18841_v16 = vld [vmem:[#allocation20_spill] sm:$0xff] }
 0x750   :  { %v5905_v17 = vadd.f32 %v5904_v57, %v18835_v24  ;;  %v5906_v32 = vpop.f32.mrb[249].mxu1  ;;  %6647 = vmatprep.mubr.bf16.mxu0 %v18838_v5  ;;  %v18842_v5 = vld [vmem:[#allocation88_spill] sm:$0xff] }
 0x751   :  { %v5907_v15 = vpop.f32.mrb[250].mxu1 }
 0x752   :  { %v5908_v40 = vadd.f32 %v5907_v15, %v18837_v50  ;;  %v5909_v2 = vpop.f32.mrb[251].mxu1  ;;  %v12032_v36 = vpop.f32.mrb[52].mxu0 }
 0x753   :  { %v15351_v4 = vadd.f32 %v12032_v36, %v15217_v19  ;;  %v6137_v23 = vpop.f32.mrb[53].mxu0  ;;  %v18843_v19 = vld [vmem:[#allocation103_spill] sm:$0xff] }
 0x754   :  { %v15354_v45 = vadd.f32 %v6137_v23, %v15048_v54  ;;  %v12033_v57 = vpop.f32.mrb[54].mxu0  ;;  %v18844_v54 = vld [vmem:[#allocation61_spill] sm:$0xff] }
 0x755   :  { %18839 = vst [vmem:[#allocation33_spill] sm:$0xff] %v15351_v4  ;;  %v15357_v52 = vadd.f32 %v12033_v57, %v15224_v43  ;;  %v6140_v10 = vpop.f32.mrb[55].mxu0 }
 0x756   :  { %18840 = vst [vmem:[#allocation107_spill] sm:$0xff] %v15354_v45  ;;  %v15361_v2 = vadd.f32 %v6140_v10, %v15055_v18 }
 0x757   :  { %v5912_v24 = vpop.f32.mrb[252].mxu1  ;;  %6648 = vmatmul.mubr.bf16.gmra.mrb[144].mxu0 %v18842_v5 }
 0x758   :  { %v5913_v32 = vadd.f32 %v5912_v24, %v18841_v16  ;;  %v5914_v15 = vpop.f32.mrb[253].mxu1  ;;  %6655 = vmatprep.mubr.bf16.mxu0 %v18844_v54  ;;  %v18848_v54 = vld [vmem:[#allocation64_spill] sm:$0xff] }
 0x759   :  { %v5915_v50 = vpop.f32.mrb[254].mxu1  ;;  %v18847_v15 = vld [vmem:[#allocation17_spill] sm:$0xff] }
 0x75a   :  { %v5916_v36 = vadd.f32 %v5915_v50, %v18843_v19  ;;  %v5917_v4 = vpop.f32.mrb[255].mxu1  ;;  %v12036_v23 = vpop.f32.mrb[56].mxu0 }
 0x75b   :  { %v15367_v45 = vadd.f32 %v12036_v23, %v15261_v42  ;;  %v6153_v43 = vpop.f32.mrb[57].mxu0  ;;  %v18849_v42 = vld [vmem:[#allocation24_spill] sm:$0xff] }
 0x75c   :  { %v15370_v57 = vadd.f32 %v6153_v43, %v15239_v29  ;;  %v12037_v24 = vpop.f32.mrb[58].mxu0  ;;  %v18850_v29 = vld [vmem:[#allocation70_spill] sm:$0xff] }
 0x75d   :  { %18845 = vst [vmem:[#allocation36_spill] sm:$0xff] %v15367_v45  ;;  %v15373_v18 = vadd.f32 %v12037_v24, %v15268_v21  ;;  %v6156_v10 = vpop.f32.mrb[59].mxu0 }
 0x75e   :  { %18846 = vst [vmem:[#allocation108_spill] sm:$0xff] %v15370_v57  ;;  %v15377_v4 = vadd.f32 %v6156_v10, %v15246_v53 }
 0x75f   :  { %v5920_v16 = vpop.f32.mrb[0].mxu1  ;;  %6656 = vmatmul.mubr.bf16.gmra.mrb[148].mxu0 %v18848_v54 }
 0x760   :  { %v5921_v5 = vadd.f32 %v5920_v16, %v18847_v15  ;;  %v5922_v50 = vpop.f32.mrb[1].mxu1  ;;  %6663 = vmatprep.mubr.bf16.mxu0 %v18850_v29  ;;  %v18855_v29 = vld [vmem:[#allocation89_spill] sm:$0xff] }
 0x761   :  { %v5923_v19 = vpop.f32.mrb[2].mxu1  ;;  %v18854_v50 = vld [vmem:[#allocation23_spill] sm:$0xff] }
 0x762   :  { %v5924_v23 = vadd.f32 %v5923_v19, %v18849_v42  ;;  %v5925_v45 = vpop.f32.mrb[3].mxu1  ;;  %v12040_v43 = vpop.f32.mrb[60].mxu0 }
 0x763   :  { %v15383_v57 = vadd.f32 %v12040_v43, %v15304_v55  ;;  %v6169_v21 = vpop.f32.mrb[61].mxu0  ;;  %v18856_v55 = vld [vmem:[#allocation18_spill] sm:$0xff] }
 0x764   :  { %v15386_v24 = vadd.f32 %v6169_v21, %v15283_v38  ;;  %v12041_v16 = vpop.f32.mrb[62].mxu0  ;;  %v18857_v38 = vld [vmem:[#allocation68_spill] sm:$0xff] }
 0x765   :  { %18851 = vst [vmem:[#allocation21_spill] sm:$0xff] %v15383_v57  ;;  %v15389_v53 = vadd.f32 %v12041_v16, %v15311_v44  ;;  %v6172_v10 = vpop.f32.mrb[63].mxu0 }
 0x766   :  { %18852 = vst [vmem:[#allocation39_spill] sm:$0xff] %v15386_v24  ;;  %v15393_v45 = vadd.f32 %v6172_v10, %v15290_v1  ;;  %v18860_v10 = vld [vmem:[#allocation26_spill] sm:$0xff] }
 0x767   :  { %v5928_v15 = vpop.f32.mrb[4].mxu1  ;;  %18853 = vst [vmem:[#allocation38_spill] sm:$0xff] %v15389_v53  ;;  %6664 = vmatmul.mubr.bf16.gmra.mrb[152].mxu0 %v18855_v29 }
 0x768   :  { %v5929_v54 = vadd.f32 %v5928_v15, %v18854_v50  ;;  %v5930_v19 = vpop.f32.mrb[5].mxu1  ;;  %6671 = vmatprep.mubr.bf16.mxu0 %v18857_v38 }
 0x769   :  { %v5931_v42 = vpop.f32.mrb[6].mxu1 }
 0x76a   :  { %v5932_v43 = vadd.f32 %v5931_v42, %v18856_v55  ;;  %v5933_v57 = vpop.f32.mrb[7].mxu1  ;;  %v12044_v21 = vpop.f32.mrb[64].mxu0  ;;  %v18862_v55 = vld [vmem:[#allocation90_spill] sm:$0xff] }
 0x76b   :  { %v15398_v24 = vadd.f32 %v12044_v21, %v5905_v17  ;;  %v6185_v44 = vpop.f32.mrb[65].mxu0  ;;  %v18863_v17 = vld [vmem:[#allocation104_spill] sm:$0xff] }
 0x76c   :  { %v15401_v16 = vadd.f32 %v6185_v44, %v15324_v47  ;;  %v12045_v15 = vpop.f32.mrb[66].mxu0 }
 0x76d   :  { %18858 = vst [vmem:[#allocation109_spill] sm:$0xff] %v15398_v24  ;;  %v15403_v19 = vadd.f32 %v12045_v15, %v5908_v40  ;;  %v6188_v1 = vpop.f32.mrb[67].mxu0  ;;  %v18864_v24 = vld [vmem:[#allocation54_spill] sm:$0xff] }
 0x76e   :  { %v15407_v42 = vadd.f32 %v6188_v1, %v15331_v60  ;;  %v18867_v1 = vld [vmem:[#allocation16_spill] sm:$0xff] }
 0x76f   :  { %v5936_v50 = vpop.f32.mrb[8].mxu1  ;;  %18859 = vst [vmem:[#allocation41_spill] sm:$0xff] %v15403_v19  ;;  %6672 = vmatmul.mubr.bf16.gmra.mrb[156].mxu0 %v18862_v55 }
 0x770   :  { %v5937_v53 = vadd.f32 %v5936_v50, %v18860_v10  ;;  %v5938_v29 = vpop.f32.mrb[9].mxu1  ;;  %18861 = vst [vmem:[#allocation110_spill] sm:$0xff] %v15407_v42  ;;  %6679 = vmatprep.mubr.bf16.mxu0 %v18864_v24  ;;  %v18870_v24 = vld [vmem:[#allocation29_spill] sm:$0xff] }
 0x771   :  { %v5939_v57 = vpop.f32.mrb[10].mxu1 }
 0x772   :  { %v5940_v38 = vadd.f32 %v5939_v57, %v18863_v17  ;;  %v5941_v21 = vpop.f32.mrb[11].mxu1  ;;  %v12048_v47 = vpop.f32.mrb[68].mxu0  ;;  %v18869_v17 = vld [vmem:[#allocation91_spill] sm:$0xff] }
 0x773   :  { %v15412_v44 = vadd.f32 %v12048_v47, %v5921_v5  ;;  %v6201_v40 = vpop.f32.mrb[69].mxu0  ;;  %v18871_v47 = vld [vmem:[#allocation60_spill] sm:$0xff] }
 0x774   :  { %v15414_v15 = vadd.f32 %v6201_v40, %v5913_v32  ;;  %v12049_v19 = vpop.f32.mrb[70].mxu0 }
 0x775   :  { %18865 = vst [vmem:[#allocation27_spill] sm:$0xff] %v15412_v44  ;;  %v15416_v10 = vadd.f32 %v12049_v19, %v5924_v23  ;;  %v6204_v60 = vpop.f32.mrb[71].mxu0 }
 0x776   :  { %v15419_v55 = vadd.f32 %v6204_v60, %v5916_v36 }
 0x777   :  { %v5944_v50 = vpop.f32.mrb[12].mxu1  ;;  %18866 = vst [vmem:[#allocation44_spill] sm:$0xff] %v15416_v10  ;;  %6680 = vmatmul.mubr.bf16.gmra.mrb[160].mxu0 %v18869_v17  ;;  %v18876_v17 = vld [vmem:[#allocation92_spill] sm:$0xff] }
 0x778   :  { %v5945_v29 = vadd.f32 %v5944_v50, %v18867_v1  ;;  %v5946_v42 = vpop.f32.mrb[13].mxu1  ;;  %18868 = vst [vmem:[#allocation43_spill] sm:$0xff] %v15419_v55  ;;  %6687 = vmatprep.mubr.bf16.mxu0 %v18871_v47  ;;  %v18878_v47 = vld [vmem:[#allocation67_spill] sm:$0xff] }
 0x779   :  { %v5947_v57 = vpop.f32.mrb[14].mxu1 }
 0x77a   :  { %v5948_v21 = vadd.f32 %v5947_v57, %v18870_v24  ;;  %v5949_v5 = vpop.f32.mrb[15].mxu1  ;;  %v12052_v32 = vpop.f32.mrb[72].mxu0  ;;  %v18877_v24 = vld [vmem:[#allocation105_spill] sm:$0xff] }
 0x77b   :  { %v15424_v40 = vadd.f32 %v12052_v32, %v5937_v53  ;;  %v6217_v44 = vpop.f32.mrb[73].mxu0 }
 0x77c   :  { %v15426_v23 = vadd.f32 %v6217_v44, %v5929_v54  ;;  %v12053_v19 = vpop.f32.mrb[74].mxu0 }
 0x77d   :  { %18872 = vst [vmem:[#allocation111_spill] sm:$0xff] %v15424_v40  ;;  %v15428_v50 = vadd.f32 %v12053_v19, %v5940_v38  ;;  %v6220_v36 = vpop.f32.mrb[75].mxu0 }
 0x77e   :  { %18873 = vst [vmem:[#allocation46_spill] sm:$0xff] %v15426_v23  ;;  %v15431_v1 = vadd.f32 %v6220_v36, %v5932_v43 }
 0x77f   :  { %v5952_v10 = vpop.f32.mrb[16].mxu1  ;;  %18874 = vst [vmem:[#allocation112_spill] sm:$0xff] %v15428_v50  ;;  %6688 = vmatmul.mubr.bf16.gmra.mrb[164].mxu0 %v18876_v17  ;;  %v18883_v17 = vld [vmem:[#allocation93_spill] sm:$0xff] }
 0x780   :  { %v5953_v42 = vadd.f32 %v5952_v10, %v14991_v39  ;;  %v5954_v60 = vpop.f32.mrb[17].mxu1  ;;  %18875 = vst [vmem:[#allocation25_spill] sm:$0xff] %v15431_v1  ;;  %6695 = vmatprep.mubr.bf16.mxu0 %v18878_v47  ;;  %v18885_v47 = vld [vmem:[#allocation71_spill] sm:$0xff] }
 0x781   :  { %v5955_v57 = vpop.f32.mrb[18].mxu1 }
 0x782   :  { %v5956_v5 = vadd.f32 %v5955_v57, %v18877_v24  ;;  %v5957_v53 = vpop.f32.mrb[19].mxu1  ;;  %v12056_v54 = vpop.f32.mrb[76].mxu0  ;;  %v18884_v24 = vld [vmem:[#allocation31_spill] sm:$0xff] }
 0x783   :  { %v15436_v44 = vadd.f32 %v12056_v54, %v5953_v42  ;;  %v6233_v32 = vpop.f32.mrb[77].mxu0 }
 0x784   :  { %v15438_v38 = vadd.f32 %v6233_v32, %v5945_v29  ;;  %v12057_v19 = vpop.f32.mrb[78].mxu0 }
 0x785   :  { %18879 = vst [vmem:[#allocation49_spill] sm:$0xff] %v15436_v44  ;;  %v15440_v39 = vadd.f32 %v12057_v19, %v5956_v5  ;;  %v6236_v43 = vpop.f32.mrb[79].mxu0 }
 0x786   :  { %18880 = vst [vmem:[#allocation48_spill] sm:$0xff] %v15438_v38  ;;  %v15443_v60 = vadd.f32 %v6236_v43, %v5948_v21 }
 0x787   :  { %v5960_v50 = vpop.f32.mrb[20].mxu1  ;;  %18881 = vst [vmem:[#allocation113_spill] sm:$0xff] %v15440_v39  ;;  %6696 = vmatmul.mubr.bf16.gmra.mrb[168].mxu0 %v18883_v17 }
 0x788   :  { %v5961_v10 = vadd.f32 %v5960_v50, %v15007_v22  ;;  %v5962_v36 = vpop.f32.mrb[21].mxu1  ;;  %18882 = vst [vmem:[#allocation51_spill] sm:$0xff] %v15443_v60  ;;  %6703 = vmatprep.mubr.bf16.mxu0 %v18885_v47 }
 0x789   :  { %v5963_v57 = vpop.f32.mrb[22].mxu1  ;;  %v18888_v36 = vld [vmem:[#allocation94_spill] sm:$0xff] }
 0x78a   :  { %v5964_v53 = vadd.f32 %v5963_v57, %v18884_v24  ;;  %v5965_v42 = vpop.f32.mrb[23].mxu1  ;;  %v12060_v29 = vpop.f32.mrb[80].mxu0  ;;  %v18889_v24 = vld [vmem:[#allocation73_spill] sm:$0xff] }
 0x78b   :  { %v6249_v54 = vpop.f32.mrb[81].mxu0 }
 0x78c   :  { %v15448_v32 = vadd.f32 %v6249_v54, %v5961_v10  ;;  %v12061_v5 = vpop.f32.mrb[82].mxu0 }
 0x78d   :  { %v6252_v39 = vpop.f32.mrb[83].mxu0 }
 0x78e   :  { %18886 = vst [vmem:[#allocation114_spill] sm:$0xff] %v15448_v32  ;;  %v15451_v21 = vadd.f32 %v6252_v39, %v5964_v53 }
 0x78f   :  { %v5968_v19 = vpop.f32.mrb[24].mxu1  ;;  %6704 = vmatmul.mubr.bf16.gmra.mrb[172].mxu0 %v18888_v36 }
 0x790   :  { %v5969_v22 = vadd.f32 %v5968_v19, %v15023_v26  ;;  %v5970_v50 = vpop.f32.mrb[25].mxu1  ;;  %18887 = vst [vmem:[#allocation32_spill] sm:$0xff] %v15451_v21  ;;  %6711 = vmatprep.mubr.bf16.mxu0 %v18889_v24  ;;  %v18893_v21 = vld [vmem:[#allocation75_spill] sm:$0xff] }
 0x791   :  { %v5971_v43 = vpop.f32.mrb[26].mxu1  ;;  %v18892_v50 = vld [vmem:[#allocation95_spill] sm:$0xff] }
 0x792   :  { %v5972_v57 = vadd.f32 %v5971_v43, %v15026_v48  ;;  %v5973_v17 = vpop.f32.mrb[27].mxu1  ;;  %v15456_v42 = vadd.f32 %v12060_v29, %v5969_v22  ;;  %v6497_v10 = vpop.f32.mrb[36].mxu0 }
 0x793   :  { %v6499_v54 = vpop.f32.mrb[37].mxu0 }
 0x794   :  { %18890 = vst [vmem:[#allocation53_spill] sm:$0xff] %v15456_v42  ;;  %v15458_v47 = vadd.f32 %v12061_v5, %v5972_v57  ;;  %v6500_v32 = vpop.f32.mrb[38].mxu0 }
 0x795   :  { %v6502_v26 = vpop.f32.mrb[39].mxu0 }
 0x796   :  { %18891 = vst [vmem:[#allocation52_spill] sm:$0xff] %v15458_v47  ;;  %v18898_v47 = vld [vmem:[#allocation101_spill] sm:$0xff] }
 0x797   :  { %v12080_v44 = vpop.f32.mrb[28].mxu1  ;;  %6712 = vmatmul.mubr.bf16.gmra.mrb[176].mxu0 %v18892_v50  ;;  %v18895_v50 = vld [vmem:[#allocation78_spill] sm:$0xff] }
 0x798   :  { %v6786_v19 = vpop.f32.mrb[29].mxu1  ;;  %6719 = vmatprep.mubr.bf16.mxu0 %v18893_v21 }
 0x799   :  { %v6787_v39 = vadd.f32 %v6786_v19, %v6497_v10  ;;  %v12081_v53 = vpop.f32.mrb[30].mxu1 }
 0x79a   :  { %v6789_v36 = vpop.f32.mrb[31].mxu1  ;;  %v6505_v22 = vpop.f32.mrb[40].mxu0 }
 0x79b   :  { %v15463_v48 = vadd.f32 %v6787_v39, %v15042_v62  ;;  %v6790_v29 = vadd.f32 %v6789_v36, %v6500_v32  ;;  %v6795_v43 = vadd.f32 %v12080_v44, %v6505_v22  ;;  %v6507_v57 = vpop.f32.mrb[41].mxu0  ;;  %v18894_v39 = vld [vmem:[#allocation96_spill] sm:$0xff] }
 0x79c   :  { %v6508_v17 = vpop.f32.mrb[42].mxu0 }
 0x79d   :  { %v15466_v5 = vadd.f32 %v6790_v29, %v15051_v56  ;;  %v15469_v24 = vadd.f32 %v6795_v43, %v15039_v61  ;;  %v6798_v54 = vadd.f32 %v12081_v53, %v6508_v17  ;;  %v6510_v26 = vpop.f32.mrb[43].mxu0 }
 0x79f   :  { %v12084_v10 = vpop.f32.mrb[32].mxu1  ;;  %v15472_v21 = vadd.f32 %v6798_v54, %v15045_v35  ;;  %6720 = vmatmul.mubr.bf16.gmra.mrb[180].mxu0 %v18894_v39  ;;  %v18896_v54 = vld [vmem:[#allocation98_spill] sm:$0xff] }
 0x7a0   :  { %v6802_v19 = vpop.f32.mrb[33].mxu1  ;;  %6727 = vmatprep.mubr.bf16.mxu0 %v18895_v50  ;;  %v18897_v39 = vld [vmem:[#allocation82_spill] sm:$0xff] }
 0x7a1   :  { %v12085_v62 = vpop.f32.mrb[34].mxu1 }
 0x7a2   :  { %v6805_v32 = vpop.f32.mrb[35].mxu1  ;;  %v6513_v56 = vpop.f32.mrb[44].mxu0 }
 0x7a3   :  { %v6803_v44 = vadd.f32 %v6802_v19, %v6513_v56  ;;  %v6515_v36 = vpop.f32.mrb[45].mxu0 }
 0x7a4   :  { %v6516_v29 = vpop.f32.mrb[46].mxu0 }
 0x7a5   :  { %v15477_v61 = vadd.f32 %v6803_v44, %v15064_v41  ;;  %v6806_v53 = vadd.f32 %v6805_v32, %v6516_v29  ;;  %v6518_v43 = vpop.f32.mrb[47].mxu0 }
 0x7a7   :  { %v12088_v22 = vpop.f32.mrb[36].mxu1  ;;  %v15480_v35 = vadd.f32 %v6806_v53, %v15220_v51  ;;  %6728 = vmatmul.mubr.bf16.gmra.mrb[184].mxu0 %v18896_v54 }
 0x7a8   :  { %v6818_v57 = vpop.f32.mrb[37].mxu1  ;;  %6735 = vmatprep.mubr.bf16.mxu0 %v18897_v39 }
 0x7a9   :  { %v12089_v17 = vpop.f32.mrb[38].mxu1 }
 0x7aa   :  { %v6821_v26 = vpop.f32.mrb[39].mxu1  ;;  %v6521_v50 = vpop.f32.mrb[48].mxu0 }
 0x7ab   :  { %v6811_v19 = vadd.f32 %v12084_v10, %v6521_v50  ;;  %v6523_v56 = vpop.f32.mrb[49].mxu0 }
 0x7ac   :  { %v6524_v36 = vpop.f32.mrb[50].mxu0 }
 0x7ad   :  { %v15485_v41 = vadd.f32 %v6811_v19, %v15061_v59  ;;  %v6814_v32 = vadd.f32 %v12085_v62, %v6524_v36  ;;  %v6526_v29 = vpop.f32.mrb[51].mxu0 }
 0x7af   :  { %v12092_v44 = vpop.f32.mrb[40].mxu1  ;;  %v15488_v51 = vadd.f32 %v6814_v32, %v15214_v58  ;;  %6736 = vmatmul.mubr.bf16.gmra.mrb[188].mxu0 %v18898_v47 }
 0x7b0   :  { %v6834_v43 = vpop.f32.mrb[41].mxu1  ;;  %6743 = vmatprep.mubr.bf16.mxu0 %v14981_v20 }
 0x7b1   :  { %v12093_v53 = vpop.f32.mrb[42].mxu1 }
 0x7b2   :  { %v6837_v54 = vpop.f32.mrb[43].mxu1  ;;  %v6529_v39 = vpop.f32.mrb[84].mxu0 }
 0x7b3   :  { %v6819_v10 = vadd.f32 %v6818_v57, %v6529_v39  ;;  %v6531_v50 = vpop.f32.mrb[85].mxu0 }
 0x7b4   :  { %v6532_v56 = vpop.f32.mrb[86].mxu0 }
 0x7b5   :  { %v15493_v59 = vadd.f32 %v6819_v10, %v15233_v11  ;;  %v6822_v62 = vadd.f32 %v6821_v26, %v6532_v56  ;;  %v6534_v36 = vpop.f32.mrb[87].mxu0 }
 0x7b7   :  { %v15495_v19 = vpop.f32.mrb[44].mxu1  ;;  %v15498_v58 = vadd.f32 %v6822_v62, %v15242_v12  ;;  %6744 = vmatmul.mubr.bf16.gmra.mrb[192].mxu0 %v14981_v20 }
 0x7b8   :  { %v6850_v29 = vpop.f32.mrb[45].mxu1 }
 0x7b9   :  { %v15500_v32 = vpop.f32.mrb[46].mxu1 }
 0x7ba   :  { %v6853_v47 = vpop.f32.mrb[47].mxu1  ;;  %v6537_v42 = vpop.f32.mrb[88].mxu0 }
 0x7bb   :  { %v6827_v57 = vadd.f32 %v12088_v22, %v6537_v42  ;;  %v6539_v39 = vpop.f32.mrb[89].mxu0 }
 0x7bc   :  { %v6540_v50 = vpop.f32.mrb[90].mxu0 }
 0x7bd   :  { %v15504_v11 = vadd.f32 %v6827_v57, %v15230_v63  ;;  %v6830_v26 = vadd.f32 %v12089_v17, %v6540_v50  ;;  %v6542_v56 = vpop.f32.mrb[91].mxu0 }
 0x7bf   :  { %v15506_v10 = vpop.f32.mrb[48].mxu1  ;;  %v15511_v12 = vadd.f32 %v6830_v26, %v15236_v8 }
 0x7c0   :  { %v15508_v36 = vpop.f32.mrb[49].mxu1 }
 0x7c1   :  { %v15513_v62 = vpop.f32.mrb[50].mxu1 }
 0x7c2   :  { %v15515_v20 = vpop.f32.mrb[51].mxu1  ;;  %v6545_v60 = vpop.f32.mrb[92].mxu0 }
 0x7c3   :  { %v6835_v42 = vadd.f32 %v6834_v43, %v6545_v60  ;;  %v6547_v22 = vpop.f32.mrb[93].mxu0  ;;  %v15534_v60 = vld [vmem:[%s18358_s12] ss:$0 sm:$0xff] }
 0x7c4   :  { %v6548_v39 = vpop.f32.mrb[94].mxu0  ;;  %v15538_v43 = vadd.f32 %v15534_v60, %v15466_v5 }
 0x7c5   :  { %v15518_v63 = vadd.f32 %v6835_v42, %v15255_v49  ;;  %v6838_v17 = vadd.f32 %v6837_v54, %v6548_v39  ;;  %v6550_v50 = vpop.f32.mrb[95].mxu0 }
 0x7c6   :  { %18899 = vst [vmem:[#allocation115_spill] sm:$0xff] %v15538_v43  ;;  %v7178_v5 = vsel %vm7176_vm3, %v15538_v43, 0.0 }
 0x7c7   :  { %v15520_v57 = vpop.f32.mrb[52].mxu1  ;;  %v15525_v8 = vadd.f32 %v6838_v17, %v15264_v14  ;;  %v15542_v14 = vadd.f32 %v15534_v60, %v15463_v48 }
 0x7c8   :  { %v15522_v56 = vpop.f32.mrb[53].mxu1 }
 0x7c9   :  { %v15527_v26 = vpop.f32.mrb[54].mxu1  ;;  %18900 = vst [vmem:[#allocation56_spill] sm:$0xff] %v15542_v14 }
 0x7ca   :  { %v15529_v38 = vpop.f32.mrb[55].mxu1  ;;  %v6553_v49 = vpop.f32.mrb[96].mxu0 }
 0x7cb   :  { %v6843_v54 = vadd.f32 %v12092_v44, %v6553_v49  ;;  %v6555_v42 = vpop.f32.mrb[97].mxu0  ;;  %v15555_v44 = vadd.f32 %v15534_v60, %v15469_v24 }
 0x7cc   :  { %v6556_v22 = vpop.f32.mrb[98].mxu0 }
 0x7cd   :  { %v15545_v39 = vadd.f32 %v6843_v54, %v15252_v7  ;;  %v6846_v17 = vadd.f32 %v12093_v53, %v6556_v22  ;;  %v6558_v50 = vpop.f32.mrb[99].mxu0  ;;  %18901 = vst [vmem:[#allocation116_spill] sm:$0xff] %v15555_v44  ;;  %v7177_v53 = vsel %vm7176_vm3, %v15542_v14, 0.0  ;;  %v7180_v22 = vsel %vm7176_vm3, %v15555_v44, 0.0 }
 0x7ce   :  { %v7179_v54 = vadd.f32 %v7178_v5, %v7177_v53  ;;  %v15570_v50 = vadd.f32 %v15534_v60, %v15472_v21 }
 0x7cf   :  { %v15547_v40 = vpop.f32.mrb[56].mxu1  ;;  %v15558_v49 = vadd.f32 %v6846_v17, %v15258_v30  ;;  %v15574_v17 = vadd.f32 %v15534_v60, %v15477_v61 }
 0x7d0   :  { %v15549_v1 = vpop.f32.mrb[57].mxu1  ;;  %18902 = vst [vmem:[#allocation30_spill] sm:$0xff] %v15570_v50  ;;  %v7181_v55 = vadd.f32 %v7180_v22, %v7179_v54  ;;  %v7182_v21 = vsel %vm7176_vm3, %v15570_v50, 0.0  ;;  %v15600_v22 = vadd.f32 %v15534_v60, %v15485_v41 }
 0x7d1   :  { %v15560_v48 = vpop.f32.mrb[58].mxu1  ;;  %18903 = vst [vmem:[#allocation117_spill] sm:$0xff] %v15574_v17 }
 0x7d2   :  { %v15562_v7 = vpop.f32.mrb[59].mxu1  ;;  %v6561_v42 = vpop.f32.mrb[100].mxu0  ;;  %v7183_v54 = vadd.f32 %v7182_v21, %v7181_v55  ;;  %18905 = vst [vmem:[#allocation118_spill] sm:$0xff] %v15600_v22  ;;  %v7188_v41 = vsel %vm7176_vm3, %v15600_v22, 0.0 }
 0x7d3   :  { %v6851_v24 = vadd.f32 %v6850_v29, %v6561_v42  ;;  %v6563_v43 = vpop.f32.mrb[101].mxu0 }
 0x7d4   :  { %v6564_v30 = vpop.f32.mrb[102].mxu0 }
 0x7d5   :  { %v15577_v23 = vadd.f32 %v6851_v24, %v15277_v25  ;;  %v6854_v5 = vadd.f32 %v6853_v47, %v6564_v30  ;;  %v6566_v53 = vpop.f32.mrb[103].mxu0  ;;  %v7184_v25 = vsel %vm7176_vm3, %v15574_v17, 0.0  ;;  %v15596_v47 = vadd.f32 %v15534_v60, %v15480_v35 }
 0x7d6   :  { %v7185_v30 = vadd.f32 %v7184_v25, %v7183_v54 }
 0x7d7   :  { %v15579_v14 = vpop.f32.mrb[60].mxu1  ;;  %v15586_v29 = vadd.f32 %v6854_v5, %v15286_v6  ;;  %18904 = vst [vmem:[#allocation62_spill] sm:$0xff] %v15596_v47  ;;  %v7186_v53 = vsel %vm7176_vm3, %v15596_v47, 0.0 }
 0x7d8   :  { %v15581_v44 = vpop.f32.mrb[61].mxu1 }
 0x7d9   :  { %v15588_v43 = vpop.f32.mrb[62].mxu1 }
 0x7da   :  { %v15590_v61 = vpop.f32.mrb[63].mxu1  ;;  %v6569_v42 = vpop.f32.mrb[104].mxu0 }
 0x7db   :  { %v6859_v6 = vadd.f32 %v15495_v19, %v6569_v42  ;;  %v6571_v24 = vpop.f32.mrb[105].mxu0  ;;  %v15617_v19 = vadd.f32 %v15534_v60, %v15488_v51 }
 0x7dc   :  { %v6572_v5 = vpop.f32.mrb[106].mxu0 }
 0x7dd   :  { %v15606_v17 = vadd.f32 %v6859_v6, %v15274_v37  ;;  %v6862_v55 = vadd.f32 %v15500_v32, %v6572_v5  ;;  %v6574_v35 = vpop.f32.mrb[107].mxu0  ;;  %18906 = vst [vmem:[#allocation37_spill] sm:$0xff] %v15617_v19  ;;  %v7187_v37 = vadd.f32 %v7186_v53, %v7185_v30  ;;  %v15628_v32 = vadd.f32 %v15534_v60, %v15493_v59 }
 0x7de   :  { %v7190_v5 = vsel %vm7176_vm3, %v15617_v19, 0.0  ;;  %v15637_v30 = vadd.f32 %v15534_v60, %v15498_v58 }
 0x7df   :  { %v15608_v50 = vpop.f32.mrb[64].mxu1  ;;  %v15620_v25 = vadd.f32 %v6862_v55, %v15280_v0  ;;  %18907 = vst [vmem:[#allocation65_spill] sm:$0xff] %v15628_v32  ;;  %v7189_v6 = vadd.f32 %v7188_v41, %v7187_v37  ;;  %v7192_v0 = vsel %vm7176_vm3, %v15628_v32, 0.0 }
 0x7e0   :  { %v15611_v21 = vpop.f32.mrb[65].mxu1  ;;  %18908 = vst [vmem:[#allocation59_spill] sm:$0xff] %v15637_v30 }
 0x7e1   :  { %v15622_v54 = vpop.f32.mrb[66].mxu1  ;;  %v7191_v37 = vadd.f32 %v7190_v5, %v7189_v6  ;;  %v15664_v6 = vadd.f32 %v15534_v60, %v15511_v12 }
 0x7e2   :  { %v15624_v42 = vpop.f32.mrb[67].mxu1  ;;  %v6577_v24 = vpop.f32.mrb[108].mxu0 }
 0x7e3   :  { %v6867_v51 = vadd.f32 %v15508_v36, %v6577_v24  ;;  %v6579_v35 = vpop.f32.mrb[109].mxu0  ;;  %v15649_v36 = vadd.f32 %v15534_v60, %v15504_v11  ;;  %18910 = vst [vmem:[#allocation58_spill] sm:$0xff] %v15664_v6 }
 0x7e4   :  { %v6580_v22 = vpop.f32.mrb[110].mxu0  ;;  %v7193_v35 = vadd.f32 %v7192_v0, %v7191_v37  ;;  %v15669_v0 = vadd.f32 %v15534_v60, %v15518_v63 }
 0x7e5   :  { %v15640_v53 = vadd.f32 %v6867_v51, %v15298_v9  ;;  %v6870_v55 = vadd.f32 %v15515_v20, %v6580_v22  ;;  %v6582_v41 = vpop.f32.mrb[111].mxu0  ;;  %18909 = vst [vmem:[#allocation69_spill] sm:$0xff] %v15649_v36  ;;  %v7194_v51 = vsel %vm7176_vm3, %v15637_v30, 0.0  ;;  %v7196_v22 = vsel %vm7176_vm3, %v15649_v36, 0.0 }
 0x7e6   :  { %v7195_v5 = vadd.f32 %v7194_v51, %v7193_v35  ;;  %18911 = vst [vmem:[#allocation35_spill] sm:$0xff] %v15669_v0 }
 0x7e7   :  { %v15642_v59 = vpop.f32.mrb[68].mxu1  ;;  %v15652_v24 = vadd.f32 %v6870_v55, %v15307_v28 }
 0x7e8   :  { %v15645_v19 = vpop.f32.mrb[69].mxu1  ;;  %v7197_v32 = vadd.f32 %v7196_v22, %v7195_v5  ;;  %v15696_v22 = vadd.f32 %v15534_v60, %v15545_v39 }
 0x7e9   :  { %v15654_v58 = vpop.f32.mrb[70].mxu1 }
 0x7ea   :  { %v15656_v9 = vpop.f32.mrb[71].mxu1  ;;  %v6585_v20 = vpop.f32.mrb[112].mxu0  ;;  %18913 = vst [vmem:[#allocation66_spill] sm:$0xff] %v15696_v22  ;;  %v7204_v39 = vsel %vm7176_vm3, %v15696_v22, 0.0 }
 0x7eb   :  { %v6875_v11 = vadd.f32 %v15506_v10, %v6585_v20  ;;  %v6587_v28 = vpop.f32.mrb[113].mxu0  ;;  %v7198_v10 = vsel %vm7176_vm3, %v15664_v6, 0.0 }
 0x7ec   :  { %v6588_v55 = vpop.f32.mrb[114].mxu0 }
 0x7ed   :  { %v15672_v41 = vadd.f32 %v6875_v11, %v15295_v31  ;;  %v6878_v36 = vadd.f32 %v15513_v62, %v6588_v55  ;;  %v6590_v30 = vpop.f32.mrb[115].mxu0  ;;  %v7200_v31 = vsel %vm7176_vm3, %v15669_v0, 0.0  ;;  %v15692_v62 = vadd.f32 %v15534_v60, %v15525_v8 }
 0x7ee   :  { %v7199_v30 = vadd.f32 %v7198_v10, %v7197_v32 }
 0x7ef   :  { %v15674_v37 = vpop.f32.mrb[72].mxu1  ;;  %v15682_v35 = vadd.f32 %v6878_v36, %v15301_v3  ;;  %18912 = vst [vmem:[#allocation120_spill] sm:$0xff] %v15692_v62  ;;  %v7202_v5 = vsel %vm7176_vm3, %v15692_v62, 0.0 }
 0x7f0   :  { %v15677_v12 = vpop.f32.mrb[73].mxu1  ;;  %v7201_v11 = vadd.f32 %v7200_v31, %v7199_v30 }
 0x7f1   :  { %v15684_v51 = vpop.f32.mrb[74].mxu1 }
 0x7f2   :  { %v15686_v63 = vpop.f32.mrb[75].mxu1  ;;  %v6593_v20 = vpop.f32.mrb[116].mxu0 }
 0x7f3   :  { %v6883_v3 = vadd.f32 %v15522_v56, %v6593_v20  ;;  %v6595_v36 = vpop.f32.mrb[117].mxu0  ;;  %v15713_v56 = vadd.f32 %v15534_v60, %v15558_v49 }
 0x7f4   :  { %v6596_v28 = vpop.f32.mrb[118].mxu0 }
 0x7f5   :  { %v15702_v55 = vadd.f32 %v6883_v3, %v15318_v13  ;;  %v6886_v8 = vadd.f32 %v15529_v38, %v6596_v28  ;;  %v6598_v32 = vpop.f32.mrb[119].mxu0  ;;  %18914 = vst [vmem:[#allocation72_spill] sm:$0xff] %v15713_v56  ;;  %v7203_v13 = vadd.f32 %v7202_v5, %v7201_v11  ;;  %v15724_v38 = vadd.f32 %v15534_v60, %v15577_v23 }
 0x7f6   :  { %v7206_v28 = vsel %vm7176_vm3, %v15713_v56, 0.0  ;;  %v15733_v11 = vadd.f32 %v15534_v60, %v15586_v29 }
 0x7f7   :  { %v15704_v0 = vpop.f32.mrb[76].mxu1  ;;  %v15716_v31 = vadd.f32 %v6886_v8, %v15327_v33  ;;  %18915 = vst [vmem:[#allocation119_spill] sm:$0xff] %v15724_v38  ;;  %v7205_v3 = vadd.f32 %v7204_v39, %v7203_v13  ;;  %v7208_v33 = vsel %vm7176_vm3, %v15724_v38, 0.0 }
 0x7f8   :  { %v15707_v10 = vpop.f32.mrb[77].mxu1  ;;  %18916 = vst [vmem:[#allocation42_spill] sm:$0xff] %v15733_v11 }
 0x7f9   :  { %v15718_v30 = vpop.f32.mrb[78].mxu1  ;;  %v7207_v13 = vadd.f32 %v7206_v28, %v7205_v3  ;;  %v15760_v3 = vadd.f32 %v15534_v60, %v15620_v25 }
 0x7fa   :  { %v15720_v20 = vpop.f32.mrb[79].mxu1  ;;  %v6601_v36 = vpop.f32.mrb[120].mxu0 }
 0x7fb   :  { %v6891_v49 = vadd.f32 %v15520_v57, %v6601_v36  ;;  %v6603_v32 = vpop.f32.mrb[121].mxu0  ;;  %v15745_v57 = vadd.f32 %v15534_v60, %v15606_v17  ;;  %v18918_v36 = vld [vmem:[#allocation106_spill] sm:$0xff]  ;;  %v7209_v38 = vadd.f32 %v7208_v33, %v7207_v13  ;;  %18919 = vst [vmem:[#allocation40_spill] sm:$0xff] %v15760_v3  ;;  %v15765_v33 = vadd.f32 %v15534_v60, %v15640_v53 }
 0x7fc   :  { %v6604_v22 = vpop.f32.mrb[122].mxu0  ;;  %v18921_v13 = vld [vmem:[#allocation34_spill] sm:$0xff] }
 0x7fd   :  { %v15736_v5 = vadd.f32 %v6891_v49, %v15315_v34  ;;  %v6894_v8 = vadd.f32 %v15527_v26, %v6604_v22  ;;  %v6606_v39 = vpop.f32.mrb[123].mxu0  ;;  %18917 = vst [vmem:[#allocation74_spill] sm:$0xff] %v15745_v57  ;;  %v7210_v49 = vsel %vm7176_vm3, %v15733_v11, 0.0  ;;  %v7212_v22 = vsel %vm7176_vm3, %v15745_v57, 0.0  ;;  %18920 = vst [vmem:[#allocation76_spill] sm:$0xff] %v15765_v33 }
 0x7fe   :  { %v7216_v53 = vsel %vm7176_vm3, %v15765_v33, 0.0 }
 0x7ff   :  { %v15738_v23 = vpop.f32.mrb[80].mxu1  ;;  %v15748_v32 = vadd.f32 %v6894_v8, %v18918_v36  ;;  %v7211_v8 = vadd.f32 %v7210_v49, %v7209_v38 }
 0x800   :  { %v15741_v56 = vpop.f32.mrb[81].mxu1 }
 0x801   :  { %v15750_v29 = vpop.f32.mrb[82].mxu1  ;;  %v7213_v6 = vadd.f32 %v7212_v22, %v7211_v8  ;;  %v15788_v22 = vadd.f32 %v15534_v60, %v15672_v41 }
 0x802   :  { %v15752_v34 = vpop.f32.mrb[83].mxu1  ;;  %v6609_v26 = vpop.f32.mrb[124].mxu0 }
 0x803   :  { %v6899_v17 = vadd.f32 %v15549_v1, %v6609_v26  ;;  %v6611_v28 = vpop.f32.mrb[125].mxu0  ;;  %v7214_v1 = vsel %vm7176_vm3, %v15760_v3, 0.0  ;;  %v15784_v26 = vadd.f32 %v15534_v60, %v15652_v24  ;;  %v7220_v41 = vsel %vm7176_vm3, %v15788_v22, 0.0 }
 0x804   :  { %v6612_v39 = vpop.f32.mrb[126].mxu0 }
 0x805   :  { %v7069_v36 = vadd.f32 %v6899_v17, %v18921_v13  ;;  %v6902_v62 = vadd.f32 %v15562_v7, %v6612_v39  ;;  %v6614_v57 = vpop.f32.mrb[127].mxu0  ;;  %v7215_v7 = vadd.f32 %v7214_v1, %v7213_v6  ;;  %v7218_v8 = vsel %vm7176_vm3, %v15784_v26, 0.0  ;;  %v18922_v39 = vld [vmem:[#allocation22_spill] sm:$0xff] }
 0x807   :  { %v15768_v11 = vpop.f32.mrb[84].mxu1  ;;  %v7070_v25 = vadd.f32 %v6902_v62, %v15345_v27  ;;  %v7217_v62 = vadd.f32 %v7216_v53, %v7215_v7 }
 0x808   :  { %v15771_v47 = vpop.f32.mrb[85].mxu1 }
 0x809   :  { %v15776_v38 = vpop.f32.mrb[86].mxu1  ;;  %v7219_v7 = vadd.f32 %v7218_v8, %v7217_v62  ;;  %v18925_v62 = vld [vmem:[#allocation107_spill] sm:$0xff] }
 0x80a   :  { %v15778_v49 = vpop.f32.mrb[87].mxu1  ;;  %v6617_v57 = vpop.f32.mrb[128].mxu0 }
 0x80b   :  { %v6907_v17 = vadd.f32 %v15547_v40, %v6617_v57  ;;  %v6619_v27 = vpop.f32.mrb[129].mxu0  ;;  %v15803_v40 = vadd.f32 %v15534_v60, %v15682_v35 }
 0x80c   :  { %v6620_v28 = vpop.f32.mrb[130].mxu0 }
 0x80d   :  { %v7071_v13 = vadd.f32 %v6907_v17, %v18922_v39  ;;  %v6910_v33 = vadd.f32 %v15560_v48, %v6620_v28  ;;  %v6622_v24 = vpop.f32.mrb[131].mxu0  ;;  %18923 = vst [vmem:[#allocation47_spill] sm:$0xff] %v15803_v40  ;;  %v15812_v48 = vadd.f32 %v15534_v60, %v15702_v55  ;;  %v7221_v17 = vadd.f32 %v7220_v41, %v7219_v7 }
 0x80e   :  { %v7222_v28 = vsel %vm7176_vm3, %v15803_v40, 0.0  ;;  %v15827_v40 = vadd.f32 %v15534_v60, %v15736_v5 }
 0x80f   :  { %v15795_v3 = vpop.f32.mrb[88].mxu1  ;;  %v7072_v1 = vadd.f32 %v6910_v33, %v15341_v46  ;;  %18924 = vst [vmem:[#allocation79_spill] sm:$0xff] %v15812_v48  ;;  %v7224_v46 = vsel %vm7176_vm3, %v15812_v48, 0.0  ;;  %v15821_v33 = vadd.f32 %v15534_v60, %v15716_v31  ;;  %v7223_v7 = vadd.f32 %v7222_v28, %v7221_v17 }
 0x810   :  { %v15797_v6 = vpop.f32.mrb[89].mxu1  ;;  %v7228_v31 = vsel %vm7176_vm3, %v15827_v40, 0.0 }
 0x811   :  { %v15806_v53 = vpop.f32.mrb[90].mxu1 }
 0x812   :  { %v15808_v57 = vpop.f32.mrb[91].mxu1  ;;  %v6625_v27 = vpop.f32.mrb[132].mxu0 }
 0x813   :  { %v6915_v39 = vadd.f32 %v15581_v44, %v6625_v27  ;;  %v6627_v35 = vpop.f32.mrb[133].mxu0  ;;  %v7225_v27 = vadd.f32 %v7224_v46, %v7223_v7 }
 0x814   :  { %v6628_v24 = vpop.f32.mrb[134].mxu0  ;;  %v7226_v35 = vsel %vm7176_vm3, %v15821_v33, 0.0 }
 0x815   :  { %v7073_v8 = vadd.f32 %v6915_v39, %v18925_v62  ;;  %v6918_v55 = vadd.f32 %v15590_v61, %v6628_v24  ;;  %v6630_v41 = vpop.f32.mrb[135].mxu0  ;;  %v15836_v39 = vadd.f32 %v15534_v60, %v15748_v32  ;;  %v7227_v28 = vadd.f32 %v7226_v35, %v7225_v27 }
 0x816   :  { %v15840_v24 = vadd.f32 %v15534_v60, %v7069_v36  ;;  %v15853_v35 = vadd.f32 %v15534_v60, %v7071_v13 }
 0x817   :  { %v7074_v44 = vadd.f32 %v6918_v55, %v15361_v2  ;;  %v18926_v2 = vld [vmem:[#allocation33_spill] sm:$0xff]  ;;  %v7229_v41 = vadd.f32 %v7228_v31, %v7227_v28  ;;  %v7230_v7 = vsel %vm7176_vm3, %v15836_v39, 0.0 }
 0x819   :  { %v7231_v27 = vadd.f32 %v7230_v7, %v7229_v41  ;;  %v15867_v41 = vadd.f32 %v15534_v60, %v7073_v8 }
 0x81a   :  { %v6633_v48 = vpop.f32.mrb[136].mxu0 }
 0x81b   :  { %v6923_v61 = vadd.f32 %v15579_v14, %v6633_v48  ;;  %v6635_v17 = vpop.f32.mrb[137].mxu0  ;;  %v7232_v14 = vsel %vm7176_vm3, %v15840_v24, 0.0  ;;  %v15850_v48 = vadd.f32 %v15534_v60, %v7070_v25  ;;  %v7236_v25 = vsel %vm7176_vm3, %v15853_v35, 0.0 }
 0x81c   :  { %v6636_v5 = vpop.f32.mrb[138].mxu0  ;;  %v7233_v31 = vadd.f32 %v7232_v14, %v7231_v27 }
 0x81d   :  { %v7075_v46 = vadd.f32 %v6923_v61, %v18926_v2  ;;  %v6926_v62 = vadd.f32 %v15588_v43, %v6636_v5  ;;  %v6638_v55 = vpop.f32.mrb[139].mxu0  ;;  %v7234_v28 = vsel %vm7176_vm3, %v15850_v48, 0.0 }
 0x81e   :  { %v15863_v55 = vadd.f32 %v15534_v60, %v7072_v1  ;;  %v15875_v1 = vadd.f32 %v15534_v60, %v7074_v44 }
 0x81f   :  { %v7076_v32 = vadd.f32 %v6926_v62, %v15357_v52  ;;  %v18927_v52 = vld [vmem:[#allocation108_spill] sm:$0xff] }
 0x820   :  { %v7238_v27 = vsel %vm7176_vm3, %v15863_v55, 0.0 }
 0x822   :  { %v6641_v36 = vpop.f32.mrb[140].mxu0 }
 0x823   :  { %v6931_v43 = vadd.f32 %v15611_v21, %v6641_v36  ;;  %v6643_v61 = vpop.f32.mrb[141].mxu0  ;;  %v7235_v21 = vadd.f32 %v7234_v28, %v7233_v31 }
 0x824   :  { %v6644_v17 = vpop.f32.mrb[142].mxu0  ;;  %v7240_v61 = vsel %vm7176_vm3, %v15867_v41, 0.0 }
 0x825   :  { %v7077_v5 = vadd.f32 %v6931_v43, %v18927_v52  ;;  %v6934_v2 = vadd.f32 %v15624_v42, %v6644_v17  ;;  %v6646_v62 = vpop.f32.mrb[143].mxu0  ;;  %v7237_v7 = vadd.f32 %v7236_v25, %v7235_v21  ;;  %v15880_v52 = vadd.f32 %v15534_v60, %v7075_v46 }
 0x826   :  { %v7242_v62 = vsel %vm7176_vm3, %v15875_v1, 0.0  ;;  %v15888_v21 = vadd.f32 %v15534_v60, %v7076_v32 }
 0x827   :  { %v7078_v13 = vadd.f32 %v6934_v2, %v15377_v4  ;;  %v18928_v4 = vld [vmem:[#allocation36_spill] sm:$0xff]  ;;  %v7239_v28 = vadd.f32 %v7238_v27, %v7237_v7  ;;  %v7244_v44 = vsel %vm7176_vm3, %v15880_v52, 0.0  ;;  %v15892_v46 = vadd.f32 %v15534_v60, %v7077_v5 }
 0x82a   :  { %v6649_v14 = vpop.f32.mrb[144].mxu0 }
 0x82b   :  { %v6939_v42 = vadd.f32 %v15608_v50, %v6649_v14  ;;  %v6651_v36 = vpop.f32.mrb[145].mxu0  ;;  %v7241_v50 = vadd.f32 %v7240_v61, %v7239_v28 }
 0x82c   :  { %v6652_v43 = vpop.f32.mrb[146].mxu0 }
 0x82d   :  { %v7079_v31 = vadd.f32 %v6939_v42, %v18928_v4  ;;  %v6942_v8 = vadd.f32 %v15622_v54, %v6652_v43  ;;  %v6654_v17 = vpop.f32.mrb[147].mxu0  ;;  %v7243_v7 = vadd.f32 %v7242_v62, %v7241_v50  ;;  %v7246_v4 = vsel %vm7176_vm3, %v15888_v21, 0.0 }
 0x82f   :  { %v7080_v2 = vadd.f32 %v6942_v8, %v15373_v18  ;;  %v18929_v18 = vld [vmem:[#allocation39_spill] sm:$0xff]  ;;  %v7245_v61 = vadd.f32 %v7244_v44, %v7243_v7  ;;  %v15902_v8 = vadd.f32 %v15534_v60, %v7078_v13  ;;  %v15905_v28 = vadd.f32 %v15534_v60, %v7079_v31  ;;  %v18931_v31 = vld [vmem:[#allocation38_spill] sm:$0xff] }
 0x831   :  { %v7247_v17 = vadd.f32 %v7246_v4, %v7245_v61  ;;  %v7250_v44 = vsel %vm7176_vm3, %v15902_v8, 0.0  ;;  %v7252_v13 = vsel %vm7176_vm3, %v15905_v28, 0.0 }
 0x832   :  { %v6657_v25 = vpop.f32.mrb[148].mxu0 }
 0x833   :  { %v6947_v54 = vadd.f32 %v15645_v19, %v6657_v25  ;;  %v6659_v14 = vpop.f32.mrb[149].mxu0  ;;  %v7248_v19 = vsel %vm7176_vm3, %v15892_v46, 0.0 }
 0x834   :  { %v6660_v27 = vpop.f32.mrb[150].mxu0  ;;  %v7249_v62 = vadd.f32 %v7248_v19, %v7247_v17 }
 0x835   :  { %v7081_v42 = vadd.f32 %v6947_v54, %v18929_v18  ;;  %v6950_v36 = vadd.f32 %v15656_v9, %v6660_v27  ;;  %v6662_v43 = vpop.f32.mrb[151].mxu0  ;;  %v15915_v27 = vadd.f32 %v15534_v60, %v7080_v2 }
 0x837   :  { %v7082_v32 = vadd.f32 %v6950_v36, %v15393_v45  ;;  %v18930_v45 = vld [vmem:[#allocation21_spill] sm:$0xff]  ;;  %v15919_v36 = vadd.f32 %v15534_v60, %v7081_v42  ;;  %v7254_v4 = vsel %vm7176_vm3, %v15915_v27, 0.0 }
 0x839   :  { %v15927_v2 = vadd.f32 %v15534_v60, %v7082_v32 }
 0x83a   :  { %v6665_v5 = vpop.f32.mrb[152].mxu0 }
 0x83b   :  { %v6955_v9 = vadd.f32 %v15642_v59, %v6665_v5  ;;  %v6667_v50 = vpop.f32.mrb[153].mxu0  ;;  %v7251_v59 = vadd.f32 %v7250_v44, %v7249_v62  ;;  %v7256_v5 = vsel %vm7176_vm3, %v15919_v36, 0.0  ;;  %v18932_v44 = vld [vmem:[#allocation110_spill] sm:$0xff] }
 0x83c   :  { %v6668_v25 = vpop.f32.mrb[154].mxu0 }
 0x83d   :  { %v7083_v54 = vadd.f32 %v6955_v9, %v18930_v45  ;;  %v6958_v14 = vadd.f32 %v15654_v58, %v6668_v25  ;;  %v6670_v7 = vpop.f32.mrb[155].mxu0  ;;  %v7253_v43 = vadd.f32 %v7252_v13, %v7251_v59 }
 0x83f   :  { %v7084_v18 = vadd.f32 %v6958_v14, %v18931_v31  ;;  %v7255_v62 = vadd.f32 %v7254_v4, %v7253_v43  ;;  %v15932_v25 = vadd.f32 %v15534_v60, %v7083_v54  ;;  %v7258_v14 = vsel %vm7176_vm3, %v15927_v2, 0.0  ;;  %v18933_v43 = vld [vmem:[#allocation109_spill] sm:$0xff] }
 0x841   :  { %v7260_v32 = vsel %vm7176_vm3, %v15932_v25, 0.0  ;;  %v15940_v13 = vadd.f32 %v15534_v60, %v7084_v18 }
 0x842   :  { %v6673_v61 = vpop.f32.mrb[156].mxu0 }
 0x843   :  { %v6963_v58 = vadd.f32 %v15677_v12, %v6673_v61  ;;  %v6675_v19 = vpop.f32.mrb[157].mxu0  ;;  %v7257_v12 = vadd.f32 %v7256_v5, %v7255_v62  ;;  %v18934_v5 = vld [vmem:[#allocation41_spill] sm:$0xff] }
 0x844   :  { %v6676_v17 = vpop.f32.mrb[158].mxu0 }
 0x845   :  { %v7085_v9 = vadd.f32 %v6963_v58, %v15401_v16  ;;  %v6966_v42 = vadd.f32 %v15686_v63, %v6676_v17  ;;  %v6678_v50 = vpop.f32.mrb[159].mxu0  ;;  %v7259_v31 = vadd.f32 %v7258_v14, %v7257_v12  ;;  %v7262_v17 = vsel %vm7176_vm3, %v15940_v13, 0.0 }
 0x847   :  { %v7086_v45 = vadd.f32 %v6966_v42, %v18932_v44  ;;  %v15944_v54 = vadd.f32 %v15534_v60, %v7085_v9  ;;  %v7261_v19 = vadd.f32 %v7260_v32, %v7259_v31 }
 0x849   :  { %v15954_v42 = vadd.f32 %v15534_v60, %v7086_v45  ;;  %v7263_v50 = vadd.f32 %v7262_v17, %v7261_v19 }
 0x84a   :  { %v6681_v7 = vpop.f32.mrb[160].mxu0 }
 0x84b   :  { %v6971_v16 = vadd.f32 %v15674_v37, %v6681_v7  ;;  %v6683_v63 = vpop.f32.mrb[161].mxu0  ;;  %v7264_v37 = vsel %vm7176_vm3, %v15944_v54, 0.0  ;;  %v7266_v7 = vsel %vm7176_vm3, %v15954_v42, 0.0 }
 0x84c   :  { %v6684_v59 = vpop.f32.mrb[162].mxu0  ;;  %v7265_v12 = vadd.f32 %v7264_v37, %v7263_v50  ;;  %v18936_v37 = vld [vmem:[#allocation27_spill] sm:$0xff] }
 0x84d   :  { %v7087_v61 = vadd.f32 %v6971_v16, %v18933_v43  ;;  %v6974_v4 = vadd.f32 %v15684_v51, %v6684_v59  ;;  %v6686_v58 = vpop.f32.mrb[163].mxu0  ;;  %v18935_v59 = vld [vmem:[#allocation43_spill] sm:$0xff] }
 0x84f   :  { %v7088_v18 = vadd.f32 %v6974_v4, %v18934_v5  ;;  %v15957_v62 = vadd.f32 %v15534_v60, %v7087_v61 }
 0x851   :  { %v7268_v45 = vsel %vm7176_vm3, %v15957_v62, 0.0  ;;  %v15967_v31 = vadd.f32 %v15534_v60, %v7088_v18 }
 0x852   :  { %v6689_v9 = vpop.f32.mrb[164].mxu0 }
 0x853   :  { %v6979_v51 = vadd.f32 %v15707_v10, %v6689_v9  ;;  %v6691_v44 = vpop.f32.mrb[165].mxu0  ;;  %v7267_v10 = vadd.f32 %v7266_v7, %v7265_v12 }
 0x854   :  { %v6692_v14 = vpop.f32.mrb[166].mxu0 }
 0x855   :  { %v7089_v32 = vadd.f32 %v6979_v51, %v15414_v15  ;;  %v6982_v16 = vadd.f32 %v15720_v20, %v6692_v14  ;;  %v6694_v63 = vpop.f32.mrb[167].mxu0  ;;  %v7269_v4 = vadd.f32 %v7268_v45, %v7267_v10  ;;  %v7270_v15 = vsel %vm7176_vm3, %v15967_v31, 0.0  ;;  %v18937_v14 = vld [vmem:[#allocation44_spill] sm:$0xff] }
 0x857   :  { %v7090_v43 = vadd.f32 %v6982_v16, %v18935_v59  ;;  %v15971_v61 = vadd.f32 %v15534_v60, %v7089_v32  ;;  %v7271_v44 = vadd.f32 %v7270_v15, %v7269_v4  ;;  %v18938_v4 = vld [vmem:[#allocation46_spill] sm:$0xff] }
 0x859   :  { %v7272_v5 = vsel %vm7176_vm3, %v15971_v61, 0.0  ;;  %v15979_v18 = vadd.f32 %v15534_v60, %v7090_v43 }
 0x85a   :  { %v6697_v58 = vpop.f32.mrb[168].mxu0 }
 0x85b   :  { %v6987_v20 = vadd.f32 %v15704_v0, %v6697_v58  ;;  %v6699_v19 = vpop.f32.mrb[169].mxu0  ;;  %v7273_v0 = vadd.f32 %v7272_v5, %v7271_v44  ;;  %v7274_v32 = vsel %vm7176_vm3, %v15979_v18, 0.0 }
 0x85c   :  { %v6700_v17 = vpop.f32.mrb[170].mxu0 }
 0x85d   :  { %v7091_v50 = vadd.f32 %v6987_v20, %v18936_v37  ;;  %v6990_v9 = vadd.f32 %v15718_v30, %v6700_v17  ;;  %v6702_v51 = vpop.f32.mrb[171].mxu0  ;;  %v7275_v43 = vadd.f32 %v7274_v32, %v7273_v0  ;;  %v18939_v37 = vld [vmem:[#allocation25_spill] sm:$0xff] }
 0x85f   :  { %v15984_v12 = vadd.f32 %v15534_v60, %v7091_v50  ;;  %v7092_v7 = vadd.f32 %v6990_v9, %v18937_v14 }
 0x861   :  { %v7276_v63 = vsel %vm7176_vm3, %v15984_v12, 0.0  ;;  %v15992_v45 = vadd.f32 %v15534_v60, %v7092_v7 }
 0x862   :  { %v6705_v16 = vpop.f32.mrb[172].mxu0  ;;  %v7277_v19 = vadd.f32 %v7276_v63, %v7275_v43 }
 0x863   :  { %v6995_v30 = vadd.f32 %v15741_v56, %v6705_v16  ;;  %v6707_v59 = vpop.f32.mrb[173].mxu0  ;;  %v7278_v17 = vsel %vm7176_vm3, %v15992_v45, 0.0  ;;  %v18940_v16 = vld [vmem:[#allocation111_spill] sm:$0xff] }
 0x864   :  { %v6708_v10 = vpop.f32.mrb[174].mxu0  ;;  %v7279_v51 = vadd.f32 %v7278_v17, %v7277_v19 }
 0x865   :  { %v7093_v58 = vadd.f32 %v6995_v30, %v18938_v4  ;;  %v6998_v15 = vadd.f32 %v15752_v34, %v6708_v10  ;;  %v6710_v20 = vpop.f32.mrb[175].mxu0  ;;  %v18941_v10 = vld [vmem:[#allocation112_spill] sm:$0xff] }
 0x867   :  { %v16000_v5 = vadd.f32 %v15534_v60, %v7093_v58  ;;  %v7094_v50 = vadd.f32 %v6998_v15, %v18939_v37 }
 0x869   :  { %v7280_v56 = vsel %vm7176_vm3, %v16000_v5, 0.0  ;;  %v16006_v9 = vadd.f32 %v15534_v60, %v7094_v50 }
 0x86a   :  { %v6713_v44 = vpop.f32.mrb[176].mxu0  ;;  %v7281_v7 = vadd.f32 %v7280_v56, %v7279_v51  ;;  %v18942_v51 = vld [vmem:[#allocation48_spill] sm:$0xff] }
 0x86b   :  { %v7003_v34 = vadd.f32 %v15738_v23, %v6713_v44  ;;  %v6715_v14 = vpop.f32.mrb[177].mxu0  ;;  %v7282_v32 = vsel %vm7176_vm3, %v16006_v9, 0.0 }
 0x86c   :  { %v6716_v0 = vpop.f32.mrb[178].mxu0  ;;  %v7283_v58 = vadd.f32 %v7282_v32, %v7281_v7 }
 0x86d   :  { %v7095_v63 = vadd.f32 %v7003_v34, %v18940_v16  ;;  %v7006_v30 = vadd.f32 %v15750_v29, %v6716_v0  ;;  %v6718_v59 = vpop.f32.mrb[179].mxu0  ;;  %v18943_v0 = vld [vmem:[#allocation51_spill] sm:$0xff] }
 0x86f   :  { %v16014_v43 = vadd.f32 %v15534_v60, %v7095_v63  ;;  %v7096_v4 = vadd.f32 %v7006_v30, %v18941_v10 }
 0x871   :  { %v7284_v23 = vsel %vm7176_vm3, %v16014_v43, 0.0  ;;  %v16020_v15 = vadd.f32 %v15534_v60, %v7096_v4 }
 0x872   :  { %v7285_v20 = vadd.f32 %v7284_v23, %v7283_v58  ;;  %v6721_v19 = vpop.f32.mrb[180].mxu0 }
 0x873   :  { %v7286_v17 = vsel %vm7176_vm3, %v16020_v15, 0.0  ;;  %v7011_v29 = vadd.f32 %v15771_v47, %v6721_v19  ;;  %v6723_v37 = vpop.f32.mrb[181].mxu0 }
 0x874   :  { %v7287_v50 = vadd.f32 %v7286_v17, %v7285_v20  ;;  %v6724_v56 = vpop.f32.mrb[182].mxu0  ;;  %v18944_v20 = vld [vmem:[#allocation49_spill] sm:$0xff] }
 0x875   :  { %v7097_v44 = vadd.f32 %v7011_v29, %v18942_v51  ;;  %v7014_v34 = vadd.f32 %v15778_v49, %v6724_v56  ;;  %v6726_v14 = vpop.f32.mrb[183].mxu0  ;;  %v18945_v37 = vld [vmem:[#allocation113_spill] sm:$0xff] }
 0x877   :  { %v7168_v7 = vadd.f32 %v15534_v60, %v7097_v44  ;;  %v7098_v32 = vadd.f32 %v7014_v34, %v18943_v0 }
 0x879   :  { %v7288_v16 = vsel %vm7176_vm3, %v7168_v7, 0.0  ;;  %v7169_v63 = vadd.f32 %v15534_v60, %v7098_v32 }
 0x87a   :  { %v7289_v30 = vadd.f32 %v7288_v16, %v7287_v50  ;;  %v6729_v59 = vpop.f32.mrb[184].mxu0 }
 0x87b   :  { %v7290_v47 = vsel %vm7176_vm3, %v7169_v63, 0.0  ;;  %v7019_v10 = vadd.f32 %v15768_v11, %v6729_v59  ;;  %v6731_v4 = vpop.f32.mrb[185].mxu0 }
 0x87c   :  { %v7291_v58 = vadd.f32 %v7290_v47, %v7289_v30  ;;  %v6732_v23 = vpop.f32.mrb[186].mxu0  ;;  %v18946_v30 = vld [vmem:[#allocation114_spill] sm:$0xff]  ;;  %v18947_v4 = vld [vmem:[#allocation32_spill] sm:$0xff] }
 0x87d   :  { %v7099_v49 = vadd.f32 %v7019_v10, %v18944_v20  ;;  %v7022_v19 = vadd.f32 %v15776_v38, %v6732_v23  ;;  %v6734_v17 = vpop.f32.mrb[187].mxu0 }
 0x87f   :  { %v7170_v29 = vadd.f32 %v15534_v60, %v7099_v49  ;;  %v7100_v56 = vadd.f32 %v7022_v19, %v18945_v37 }
 0x881   :  { %v7292_v51 = vsel %vm7176_vm3, %v7170_v29, 0.0  ;;  %v7171_v50 = vadd.f32 %v15534_v60, %v7100_v56 }
 0x882   :  { %v7293_v44 = vadd.f32 %v7292_v51, %v7291_v58  ;;  %v6737_v34 = vpop.f32.mrb[188].mxu0 }
 0x883   :  { %v7294_v11 = vsel %vm7176_vm3, %v7171_v50, 0.0  ;;  %v7027_v14 = vadd.f32 %v15797_v6, %v6737_v34  ;;  %v6739_v0 = vpop.f32.mrb[189].mxu0 }
 0x884   :  { %v7295_v32 = vadd.f32 %v7294_v11, %v7293_v44  ;;  %v6740_v16 = vpop.f32.mrb[190].mxu0  ;;  %v18948_v44 = vld [vmem:[#allocation53_spill] sm:$0xff]  ;;  %v18949_v0 = vld [vmem:[#allocation52_spill] sm:$0xff] }
 0x885   :  { %v7101_v38 = vadd.f32 %v7027_v14, %v18946_v30  ;;  %v7030_v59 = vadd.f32 %v15808_v57, %v6740_v16  ;;  %v6742_v47 = vpop.f32.mrb[191].mxu0 }
 0x887   :  { %v7172_v10 = vadd.f32 %v15534_v60, %v7101_v38  ;;  %v7102_v23 = vadd.f32 %v7030_v59, %v18947_v4 }
 0x889   :  { %v7296_v20 = vsel %vm7176_vm3, %v7172_v10, 0.0  ;;  %v7173_v58 = vadd.f32 %v15534_v60, %v7102_v23 }
 0x88a   :  { %v7297_v49 = vadd.f32 %v7296_v20, %v7295_v32  ;;  %v6745_v19 = vpop.f32.mrb[192].mxu0 }
 0x88b   :  { %v7298_v6 = vsel %vm7176_vm3, %v7173_v58, 0.0  ;;  %v7035_v17 = vadd.f32 %v15795_v3, %v6745_v19  ;;  %v6747_v37 = vpop.f32.mrb[193].mxu0 }
 0x88c   :  { %v7299_v56 = vadd.f32 %v7298_v6, %v7297_v49  ;;  %v6748_v51 = vpop.f32.mrb[194].mxu0 }
 0x88d   :  { %v7103_v57 = vadd.f32 %v7035_v17, %v18948_v44  ;;  %v7038_v34 = vadd.f32 %v15806_v53, %v6748_v51  ;;  %v6750_v11 = vpop.f32.mrb[195].mxu0 }
 0x88f   :  { %v7174_v14 = vadd.f32 %v15534_v60, %v7103_v57  ;;  %v7104_v16 = vadd.f32 %v7038_v34, %v18949_v0 }
 0x891   :  { %v7300_v30 = vsel %vm7176_vm3, %v7174_v14, 0.0  ;;  %v7175_v32 = vadd.f32 %v15534_v60, %v7104_v16  ;;  %v18958_v16 = vld [vmem:[#allocation117_spill] sm:$0xff] }
 0x892   :  { %v7301_v38 = vadd.f32 %v7300_v30, %v7299_v56 }
 0x893   :  { %v7302_v59 = vsel %vm7176_vm3, %v7175_v32, 0.0 }
 0x894   :  { %v7303_v3 = vadd.f32 %v7302_v59, %v7301_v38  ;;  %v18959_v38 = vld [vmem:[#allocation62_spill] sm:$0xff] }
 0x896   :  { %v7304_v47 = vrot.slane %v7303_v3, 4 }
 0x898   :  { %v7305_v4 = vadd.f32 %v7304_v47, %v7303_v3 }
 0x89a   :  { %v7306_v23 = vrot.slane %v7305_v4, 2 }
 0x89c   :  { %v7307_v20 = vadd.f32 %v7306_v23, %v7305_v4 }
 0x89e   :  { %v7308_v49 = vrot.slane %v7307_v20, 1 }
 0x8a0   :  { %v7309_v19 = vadd.f32 %v7308_v49, %v7307_v20  ;;  %v18960_v20 = vld [vmem:[#allocation118_spill] sm:$0xff] }
 0x8a2   :  { %v16056_v53 = vmul.f32 0.001953125, %v7309_v19 }
 0x8a4   :  { %v16060_v6 = vsub.f32 %v16014_v43, %v16056_v53  ;;  %v16064_v17 = vsub.f32 %v16020_v15, %v16056_v53  ;;  %v16067_v60 = vsub.f32 %v7168_v7, %v16056_v53  ;;  %v16070_v37 = vsub.f32 %v7169_v63, %v16056_v53  ;;  %v18952_v63 = vld [vmem:[#allocation56_spill] sm:$0xff] }
 0x8a5   :  { %v16073_v56 = vsub.f32 %v7170_v29, %v16056_v53  ;;  %v16076_v51 = vsub.f32 %v7171_v50, %v16056_v53  ;;  %v16079_v44 = vsub.f32 %v7172_v10, %v16056_v53  ;;  %v16082_v43 = vsub.f32 %v7173_v58, %v16056_v53  ;;  %v18954_v29 = vld [vmem:[#allocation115_spill] sm:$0xff]  ;;  %v18956_v10 = vld [vmem:[#allocation116_spill] sm:$0xff]  ;;  %v18957_v58 = vld [vmem:[#allocation30_spill] sm:$0xff] }
 0x8a6   :  { %v16085_v15 = vsub.f32 %v7174_v14, %v16056_v53  ;;  %v16088_v7 = vsub.f32 %v7175_v32, %v16056_v53  ;;  %v16092_v57 = vsub.f32 %v18952_v63, %v16056_v53  ;;  %v16096_v50 = vsub.f32 %v18954_v29, %v16056_v53 }
 0x8a7   :  { %18950 = vst [vmem:[#allocation45_spill] sm:$0xff] %v16079_v44  ;;  %18951 = vst [vmem:[#allocation121_spill] sm:$0xff] %v16082_v43  ;;  %v16100_v34 = vsub.f32 %v18956_v10, %v16056_v53  ;;  %v16104_v11 = vsub.f32 %v18957_v58, %v16056_v53  ;;  %v16112_v30 = vsub.f32 %v18958_v16, %v16056_v53  ;;  %v18961_v10 = vld [vmem:[#allocation37_spill] sm:$0xff] }
 0x8a8   :  { %18953 = vst [vmem:[#allocation83_spill] sm:$0xff] %v16092_v57  ;;  %18955 = vst [vmem:[#allocation122_spill] sm:$0xff] %v16096_v50  ;;  %v7375_v14 = vmul.f32 %v16092_v57, %v16092_v57  ;;  %v7376_v0 = vmul.f32 %v16096_v50, %v16096_v50  ;;  %v16118_v59 = vsub.f32 %v18959_v38, %v16056_v53  ;;  %v18962_v38 = vld [vmem:[#allocation65_spill] sm:$0xff] }
 0x8a9   :  { %v7377_v32 = vmul.f32 %v16100_v34, %v16100_v34  ;;  %v7378_v3 = vmul.f32 %v16104_v11, %v16104_v11  ;;  %v16126_v49 = vsub.f32 %v18960_v20, %v16056_v53  ;;  %v7379_v19 = vmul.f32 %v16112_v30, %v16112_v30  ;;  %v18964_v20 = vld [vmem:[#allocation59_spill] sm:$0xff] }
 0x8aa   :  { %v7439_v47 = vsel %vm7176_vm3, %v7375_v14, 0.0  ;;  %v7440_v4 = vsel %vm7176_vm3, %v7376_v0, 0.0  ;;  %v16133_v58 = vsub.f32 %v18961_v10, %v16056_v53  ;;  %v7380_v14 = vmul.f32 %v16118_v59, %v16118_v59 }
 0x8ab   :  { %v7441_v23 = vadd.f32 %v7440_v4, %v7439_v47  ;;  %v7442_v63 = vsel %vm7176_vm3, %v7377_v32, 0.0  ;;  %v7444_v0 = vsel %vm7176_vm3, %v7378_v3, 0.0  ;;  %v16140_v47 = vsub.f32 %v18962_v38, %v16056_v53 }
 0x8ac   :  { %v7381_v4 = vmul.f32 %v16126_v49, %v16126_v49  ;;  %v7446_v32 = vsel %vm7176_vm3, %v7379_v19, 0.0  ;;  %v7382_v10 = vmul.f32 %v16133_v58, %v16133_v58  ;;  %v7448_v3 = vsel %vm7176_vm3, %v7380_v14, 0.0 }
 0x8ad   :  { %v7443_v29 = vadd.f32 %v7442_v63, %v7441_v23  ;;  %18963 = vst [vmem:[#allocation81_spill] sm:$0xff] %v16140_v47  ;;  %v16147_v63 = vsub.f32 %v18964_v20, %v16056_v53  ;;  %v7383_v50 = vmul.f32 %v16140_v47, %v16140_v47 }
 0x8ae   :  { %v7450_v19 = vsel %vm7176_vm3, %v7381_v4, 0.0  ;;  %v7452_v14 = vsel %vm7176_vm3, %v7382_v10, 0.0 }
 0x8af   :  { %v7445_v16 = vadd.f32 %v7444_v0, %v7443_v29  ;;  %18965 = vst [vmem:[#allocation84_spill] sm:$0xff] %v16147_v63  ;;  %v18966_v0 = vld [vmem:[#allocation69_spill] sm:$0xff]  ;;  %v7384_v57 = vmul.f32 %v16147_v63, %v16147_v63  ;;  %v7454_v4 = vsel %vm7176_vm3, %v7383_v50, 0.0 }
 0x8b0   :  { %v16154_v38 = vsub.f32 %v18966_v0, %v16056_v53 }
 0x8b1   :  { %v7447_v23 = vadd.f32 %v7446_v32, %v7445_v16  ;;  %v18968_v32 = vld [vmem:[#allocation58_spill] sm:$0xff]  ;;  %v7456_v10 = vsel %vm7176_vm3, %v7384_v57, 0.0  ;;  %v18977_v57 = vld [vmem:[#allocation72_spill] sm:$0xff] }
 0x8b2   :  { %18967 = vst [vmem:[#allocation77_spill] sm:$0xff] %v16154_v38  ;;  %v16161_v20 = vsub.f32 %v18968_v32, %v16056_v53  ;;  %v7385_v47 = vmul.f32 %v16154_v38, %v16154_v38 }
 0x8b3   :  { %v7449_v29 = vadd.f32 %v7448_v3, %v7447_v23  ;;  %v18970_v3 = vld [vmem:[#allocation35_spill] sm:$0xff] }
 0x8b4   :  { %18969 = vst [vmem:[#allocation97_spill] sm:$0xff] %v16161_v20  ;;  %v16168_v0 = vsub.f32 %v18970_v3, %v16056_v53  ;;  %v7386_v63 = vmul.f32 %v16161_v20, %v16161_v20  ;;  %v18974_v3 = vld [vmem:[#allocation66_spill] sm:$0xff]  ;;  %v16193_v20 = vsub.f32 %v18977_v57, %v16056_v53 }
 0x8b5   :  { %v7451_v16 = vadd.f32 %v7450_v19, %v7449_v29  ;;  %v18972_v19 = vld [vmem:[#allocation120_spill] sm:$0xff]  ;;  %v16185_v38 = vsub.f32 %v18974_v3, %v16056_v53 }
 0x8b6   :  { %18971 = vst [vmem:[#allocation50_spill] sm:$0xff] %v16168_v0  ;;  %v16175_v32 = vsub.f32 %v18972_v19, %v16056_v53  ;;  %v7387_v50 = vmul.f32 %v16168_v0, %v16168_v0  ;;  %v18976_v19 = vmov 0   ;;  %18978 = vst [vmem:[#allocation99_spill] sm:$0xff] %v16193_v20  ;;  %v12434_v3 = vld [vmem:[%s18361_s15 + $0x8] sm:$0xff]  }
 0x8b7   :  { %v7453_v23 = vadd.f32 %v7452_v14, %v7451_v16  ;;  %v12433_v16 = vld [vmem:[%s18361_s15] sm:$0xff]   ;;  %18975 = vst [vmem:[#allocation85_spill] sm:$0xff] %v16185_v38 }
 0x8b8   :  { %18973 = vst [vmem:[#allocation80_spill] sm:$0xff] %v16175_v32  ;;  %9686 = vmatpush1.bf16.msra.mxu0 %v12433_v16 }
 0x8b9   :  { %v7455_v29 = vadd.f32 %v7454_v4, %v7453_v23  ;;  %v7458_v23 = vsel %vm7176_vm3, %v7385_v47, 0.0  ;;  %9687 = vmatprep.subr.bf16.mxu0 %v18976_v19  ;;  %v18979_v47 = vld [vmem:[#allocation119_spill] sm:$0xff] }
 0x8ba   :  { %v16203_v16 = vsub.f32 %v18979_v47, %v16056_v53  ;;  %v12435_v47 = vld [vmem:[%s18361_s15 + $0x10] sm:$0xff]  }
 0x8bb   :  { %v7457_v14 = vadd.f32 %v7456_v10, %v7455_v29  ;;  %v7388_v29 = vmul.f32 %v16175_v32, %v16175_v32  ;;  %v7460_v10 = vsel %vm7176_vm3, %v7386_v63, 0.0  ;;  %v18981_v63 = vld [vmem:[#allocation42_spill] sm:$0xff] }
 0x8bc   :  { %18980 = vst [vmem:[#allocation57_spill] sm:$0xff] %v16203_v16  ;;  %9688 = vmatpush1.bf16.msra.mxu0 %v12434_v3  ;;  %v16211_v32 = vsub.f32 %v18981_v63, %v16056_v53 }
 0x8bd   :  { %v7459_v4 = vadd.f32 %v7458_v23, %v7457_v14  ;;  %v7389_v14 = vmul.f32 %v16185_v38, %v16185_v38  ;;  %v7462_v23 = vsel %vm7176_vm3, %v7387_v50, 0.0  ;;  %9689 = vmatprep.subr.bf16.mxu0 %v18976_v19  ;;  %v18982_v50 = vld [vmem:[#allocation74_spill] sm:$0xff] }
 0x8be   :  { %v16221_v3 = vsub.f32 %v18982_v50, %v16056_v53  ;;  %v12436_v50 = vld [vmem:[%s18361_s15 + $0x18] sm:$0xff]  }
 0x8bf   :  { %v7461_v0 = vadd.f32 %v7460_v10, %v7459_v4  ;;  %v7390_v4 = vmul.f32 %v16193_v20, %v16193_v20  ;;  %v7464_v10 = vsel %vm7176_vm3, %v7388_v29, 0.0  ;;  %v18984_v29 = vld [vmem:[#allocation40_spill] sm:$0xff] }
 0x8c0   :  { %18983 = vst [vmem:[#allocation100_spill] sm:$0xff] %v16221_v3  ;;  %9690 = vmatpush1.bf16.msra.mxu0 %v12435_v47  ;;  %v16229_v20 = vsub.f32 %v18984_v29, %v16056_v53 }
 0x8c1   :  { %v7463_v57 = vadd.f32 %v7462_v23, %v7461_v0  ;;  %v7391_v0 = vmul.f32 %v16203_v16, %v16203_v16  ;;  %v7466_v23 = vsel %vm7176_vm3, %v7389_v14, 0.0  ;;  %9691 = vmatprep.subr.bf16.mxu0 %v18976_v19  ;;  %v18985_v14 = vld [vmem:[#allocation76_spill] sm:$0xff] }
 0x8c2   :  { %v16239_v47 = vsub.f32 %v18985_v14, %v16056_v53  ;;  %v12437_v14 = vld [vmem:[%s18361_s15 + $0x20] sm:$0xff]  }
 0x8c3   :  { %v7465_v38 = vadd.f32 %v7464_v10, %v7463_v57  ;;  %v7392_v57 = vmul.f32 %v16211_v32, %v16211_v32  ;;  %v7468_v10 = vsel %vm7176_vm3, %v7390_v4, 0.0  ;;  %v16247_v4 = vsub.f32 %v15784_v26, %v16056_v53 }
 0x8c4   :  { %18986 = vst [vmem:[#allocation28_spill] sm:$0xff] %v16239_v47  ;;  %9692 = vmatpush1.bf16.msra.mxu0 %v12436_v50 }
 0x8c5   :  { %v7467_v63 = vadd.f32 %v7466_v23, %v7465_v38  ;;  %v7393_v38 = vmul.f32 %v16221_v3, %v16221_v3  ;;  %v7470_v23 = vsel %vm7176_vm3, %v7391_v0, 0.0  ;;  %9693 = vmatprep.subr.bf16.mxu0 %v18976_v19  ;;  %v16257_v0 = vsub.f32 %v15788_v22, %v16056_v53  ;;  %v12438_v22 = vld [vmem:[%s18361_s15 + $0x28] sm:$0xff]  }
 0x8c7   :  { %v7469_v16 = vadd.f32 %v7468_v10, %v7467_v63  ;;  %v7394_v63 = vmul.f32 %v16229_v20, %v16229_v20  ;;  %v7472_v10 = vsel %vm7176_vm3, %v7392_v57, 0.0  ;;  %18987 = vst [vmem:[#allocation86_spill] sm:$0xff] %v16257_v0  ;;  %v7474_v26 = vsel %vm7176_vm3, %v7393_v38, 0.0  ;;  %v18988_v57 = vld [vmem:[#allocation47_spill] sm:$0xff] }
 0x8c8   :  { %9694 = vmatpush1.bf16.msra.mxu0 %v12437_v14  ;;  %v18989_v38 = vld [vmem:[#allocation79_spill] sm:$0xff] }
 0x8c9   :  { %v7471_v29 = vadd.f32 %v7470_v23, %v7469_v16  ;;  %v7395_v16 = vmul.f32 %v16239_v47, %v16239_v47  ;;  %9695 = vmatprep.subr.bf16.mxu0 %v18976_v19  ;;  %v16265_v23 = vsub.f32 %v18988_v57, %v16056_v53  ;;  %v16275_v14 = vsub.f32 %v18989_v38, %v16056_v53  ;;  %v12439_v38 = vld [vmem:[%s18361_s15 + $0x30] sm:$0xff]  }
 0x8cb   :  { %v7473_v3 = vadd.f32 %v7472_v10, %v7471_v29  ;;  %v7396_v29 = vmul.f32 %v16247_v4, %v16247_v4  ;;  %v7476_v10 = vsel %vm7176_vm3, %v7394_v63, 0.0  ;;  %v16283_v63 = vsub.f32 %v15821_v33, %v16056_v53 }
 0x8cc   :  { %9696 = vmatpush1.bf16.msra.mxu0 %v12438_v22  ;;  %v12440_v22 = vld [vmem:[%s18361_s15 + $0x38] sm:$0xff]  }
 0x8cd   :  { %v7475_v50 = vadd.f32 %v7474_v26, %v7473_v3  ;;  %v7397_v3 = vmul.f32 %v16257_v0, %v16257_v0  ;;  %v7478_v26 = vsel %vm7176_vm3, %v7395_v16, 0.0  ;;  %9697 = vmatprep.subr.bf16.mxu0 %v18976_v19  ;;  %v16293_v16 = vsub.f32 %v15827_v40, %v16056_v53 }
 0x8ce   :  { %v7400_v40 = vmul.f32 %v16283_v63, %v16283_v63 }
 0x8cf   :  { %v7477_v47 = vadd.f32 %v7476_v10, %v7475_v50  ;;  %v7398_v50 = vmul.f32 %v16265_v23, %v16265_v23  ;;  %v7480_v10 = vsel %vm7176_vm3, %v7396_v29, 0.0  ;;  %v7482_v33 = vsel %vm7176_vm3, %v7397_v3, 0.0 }
 0x8d0   :  { %9698 = vmatpush1.bf16.msra.mxu0 %v12439_v38  ;;  %v16311_v3 = vsub.f32 %v15840_v24, %v16056_v53  ;;  %v7401_v38 = vmul.f32 %v16293_v16, %v16293_v16 }
 0x8d1   :  { %v7479_v57 = vadd.f32 %v7478_v26, %v7477_v47  ;;  %v7399_v47 = vmul.f32 %v16275_v14, %v16275_v14  ;;  %9699 = vmatprep.subr.bf16.mxu0 %v18976_v19  ;;  %v16304_v26 = vsub.f32 %v15836_v39, %v16056_v53  ;;  %v12441_v39 = vld [vmem:[%s18361_s15 + $0x40] sm:$0xff]  }
 0x8d3   :  { %v7481_v0 = vadd.f32 %v7480_v10, %v7479_v57  ;;  %v7484_v57 = vsel %vm7176_vm3, %v7398_v50, 0.0  ;;  %v16322_v50 = vsub.f32 %v15850_v48, %v16056_v53  ;;  %v7402_v24 = vmul.f32 %v16304_v26, %v16304_v26  ;;  %v12442_v48 = vld [vmem:[%s18361_s15 + $0x48] sm:$0xff]  }
 0x8d4   :  { %9700 = vmatpush1.bf16.msra.mxu0 %v12440_v22  ;;  %v7403_v22 = vmul.f32 %v16311_v3, %v16311_v3 }
 0x8d5   :  { %v7483_v29 = vadd.f32 %v7482_v33, %v7481_v0  ;;  %v7486_v0 = vsel %vm7176_vm3, %v7399_v47, 0.0  ;;  %9701 = vmatprep.subr.bf16.mxu0 %v18976_v19  ;;  %v16329_v47 = vsub.f32 %v15853_v35, %v16056_v53  ;;  %v16343_v35 = vsub.f32 %v15863_v55, %v16056_v53 }
 0x8d7   :  { %v7485_v10 = vadd.f32 %v7484_v57, %v7483_v29  ;;  %v7488_v29 = vsel %vm7176_vm3, %v7400_v40, 0.0  ;;  %18990 = vst [vmem:[#allocation15_spill] sm:$0xff] %v16329_v47  ;;  %18991 = vst [vmem:[#allocation55_spill] sm:$0xff] %v16343_v35 }
 0x8d8   :  { %9702 = vmatpush1.bf16.msra.mxu0 %v12441_v39 }
 0x8d9   :  { %v7487_v33 = vadd.f32 %v7486_v0, %v7485_v10  ;;  %v7490_v10 = vsel %vm7176_vm3, %v7401_v38, 0.0  ;;  %v12443_v0 = vld [vmem:[%s18361_s15 + $0x60] sm:$0xff]   ;;  %9703 = vmatprep.subr.bf16.mxu0 %v18976_v19  ;;  %v7492_v38 = vsel %vm7176_vm3, %v7402_v24, 0.0  ;;  %v12444_v24 = vld [vmem:[%s18361_s15 + $0x50] sm:$0xff]  }
 0x8da   :  { %9319 = vmatpush1.bf16.msra.mxu1 %v12443_v0  ;;  %v16362_v0 = vsub.f32 %v15875_v1, %v16056_v53  ;;  %v12445_v1 = vld [vmem:[%s18361_s15 + $0x58] sm:$0xff]  }
 0x8db   :  { %v7489_v57 = vadd.f32 %v7488_v29, %v7487_v33  ;;  %v7404_v33 = vmul.f32 %v16322_v50, %v16322_v50  ;;  %9320 = vmatprep.subr.bf16.mxu1 %v18976_v19  ;;  %v16351_v29 = vsub.f32 %v15867_v41, %v16056_v53  ;;  %v7406_v41 = vmul.f32 %v16343_v35, %v16343_v35 }
 0x8dc   :  { %9704 = vmatpush1.bf16.msra.mxu0 %v12442_v48 }
 0x8dd   :  { %v7491_v40 = vadd.f32 %v7490_v10, %v7489_v57  ;;  %18992 = vst [vmem:[#allocation19_spill] sm:$0xff] %v16351_v29  ;;  %v7405_v57 = vmul.f32 %v16329_v47, %v16329_v47  ;;  %v7494_v10 = vsel %vm7176_vm3, %v7403_v22, 0.0  ;;  %9705 = vmatprep.subr.bf16.mxu0 %v18976_v19  ;;  %v16369_v22 = vsub.f32 %v15880_v52, %v16056_v53  ;;  %v8892_v47 = vld [vmem:[#allocation5 + $0x18] sm:$0xff] }
 0x8de   :  { %v7407_v48 = vmul.f32 %v16351_v29, %v16351_v29  ;;  %v16380_v52 = vsub.f32 %v15888_v21, %v16056_v53 }
 0x8df   :  { %v7493_v39 = vadd.f32 %v7492_v38, %v7491_v40  ;;  %v7496_v40 = vsel %vm7176_vm3, %v7404_v33, 0.0 }
 0x8e0   :  { %9706 = vmatpush1.bf16.msra.mxu0 %v12444_v24  ;;  %v7502_v21 = vsel %vm7176_vm3, %v7407_v48, 0.0  ;;  %v16406_v48 = vsub.f32 %v15905_v28, %v16056_v53  ;;  %v16420_v28 = vsub.f32 %v15919_v36, %v16056_v53 }
 0x8e1   :  { %v7495_v55 = vadd.f32 %v7494_v10, %v7493_v39  ;;  %v7498_v39 = vsel %vm7176_vm3, %v7405_v57, 0.0  ;;  %v8890_v10 = vld [vmem:[#allocation5 + $0x8] sm:$0xff]  ;;  %9707 = vmatprep.subr.bf16.mxu0 %v18976_v19  ;;  %v7500_v57 = vsel %vm7176_vm3, %v7406_v41, 0.0 }
 0x8e2   :  { %v9034_v33 = vpack.c.bf16 %v8892_v47, %v8890_v10  ;;  %v7409_v47 = vmul.f32 %v16369_v22, %v16369_v22  ;;  %v7410_v10 = vmul.f32 %v16380_v52, %v16380_v52 }
 0x8e3   :  { %v7497_v38 = vadd.f32 %v7496_v40, %v7495_v55  ;;  %v7408_v55 = vmul.f32 %v16362_v0, %v16362_v0  ;;  %v12627_v40 = vld [vmem:[#allocation3] sm:$0xff] }
 0x8e4   :  { %11195 = vmatprep.mubr.msk.bf16.mxu0 %vm7176_vm3, %v9034_v33  ;;  %v9033_v29 = vpack.c.bf16 %v12627_v40, %v12627_v40  ;;  %9708 = vmatpush1.bf16.msra.mxu0 %v12445_v1 }
 0x8e5   :  { %v7499_v35 = vadd.f32 %v7498_v39, %v7497_v38  ;;  %v16388_v38 = vsub.f32 %v15892_v46, %v16056_v53  ;;  %v12446_v39 = vld [vmem:[%s18361_s15 + $0x68] sm:$0xff]   ;;  %v7504_v46 = vsel %vm7176_vm3, %v7408_v55, 0.0 }
 0x8e6   :  { %9321 = vmatpush1.bf16.msra.mxu1 %v12446_v39 }
 0x8e7   :  { %v7501_v24 = vadd.f32 %v7500_v57, %v7499_v35  ;;  %v16398_v35 = vsub.f32 %v15902_v8, %v16056_v53  ;;  %9718 = vmatmul.mubr.bf16.vlgmr.msra.gmra.mrb[196].mxu0 %v9033_v29  ;;  %9322 = vmatprep.subr.bf16.mxu1 %v18976_v19  ;;  %v7411_v1 = vmul.f32 %v16388_v38, %v16388_v38  ;;  %v7506_v8 = vsel %vm7176_vm3, %v7409_v47, 0.0 }
 0x8e8   :  { %v7508_v29 = vsel %vm7176_vm3, %v7410_v10, 0.0 }
 0x8e9   :  { %v7503_v41 = vadd.f32 %v7502_v21, %v7501_v24  ;;  %v16413_v24 = vsub.f32 %v15915_v27, %v16056_v53  ;;  %v7412_v55 = vmul.f32 %v16398_v35, %v16398_v35  ;;  %v7413_v21 = vmul.f32 %v16406_v48, %v16406_v48  ;;  %v12447_v27 = vld [vmem:[%s18361_s15 + $0x70] sm:$0xff]  }
 0x8ea   :  { %v7510_v47 = vsel %vm7176_vm3, %v7411_v1, 0.0  ;;  %9323 = vmatpush1.bf16.msra.mxu1 %v12447_v27  ;;  %v7415_v1 = vmul.f32 %v16420_v28, %v16420_v28 }
 0x8eb   :  { %v7505_v33 = vadd.f32 %v7504_v46, %v7503_v41  ;;  %v16430_v41 = vsub.f32 %v15927_v2, %v16056_v53  ;;  %v7414_v10 = vmul.f32 %v16413_v24, %v16413_v24  ;;  %v7512_v36 = vsel %vm7176_vm3, %v7412_v55, 0.0  ;;  %9324 = vmatprep.subr.bf16.mxu1 %v18976_v19 }
 0x8ed   :  { %v7507_v57 = vadd.f32 %v7506_v8, %v7505_v33  ;;  %v16438_v33 = vsub.f32 %v15932_v25, %v16056_v53  ;;  %v7514_v8 = vsel %vm7176_vm3, %v7413_v21, 0.0  ;;  %v7416_v55 = vmul.f32 %v16430_v41, %v16430_v41 }
 0x8ee   :  { %v16452_v25 = vsub.f32 %v15944_v54, %v16056_v53  ;;  %v7518_v21 = vsel %vm7176_vm3, %v7415_v1, 0.0  ;;  %v16466_v54 = vsub.f32 %v15957_v62, %v16056_v53 }
 0x8ef   :  { %v7509_v40 = vadd.f32 %v7508_v29, %v7507_v57  ;;  %v16445_v57 = vsub.f32 %v15940_v13, %v16056_v53  ;;  %v7516_v29 = vsel %vm7176_vm3, %v7414_v10, 0.0  ;;  %v16459_v13 = vsub.f32 %v15954_v42, %v16056_v53  ;;  %v12448_v42 = vld [vmem:[%s18361_s15 + $0x78] sm:$0xff]  }
 0x8f0   :  { %v7520_v10 = vsel %vm7176_vm3, %v7416_v55, 0.0  ;;  %9325 = vmatpush1.bf16.msra.mxu1 %v12448_v42 }
 0x8f1   :  { %v7511_v39 = vadd.f32 %v7510_v47, %v7509_v40  ;;  %v7417_v47 = vmul.f32 %v16438_v33, %v16438_v33  ;;  %v7420_v55 = vmul.f32 %v16459_v13, %v16459_v13  ;;  %9326 = vmatprep.subr.bf16.mxu1 %v18976_v19 }
 0x8f3   :  { %v7513_v46 = vadd.f32 %v7512_v36, %v7511_v39  ;;  %v7418_v39 = vmul.f32 %v16445_v57, %v16445_v57  ;;  %v7522_v1 = vsel %vm7176_vm3, %v7417_v47, 0.0  ;;  %v7421_v47 = vmul.f32 %v16466_v54, %v16466_v54 }
 0x8f5   :  { %v7515_v2 = vadd.f32 %v7514_v8, %v7513_v46  ;;  %v7419_v46 = vmul.f32 %v16452_v25, %v16452_v25  ;;  %v7524_v62 = vsel %vm7176_vm3, %v7418_v39, 0.0 }
 0x8f7   :  { %v7517_v40 = vadd.f32 %v7516_v29, %v7515_v2  ;;  %v16476_v2 = vsub.f32 %v15967_v31, %v16056_v53 }
 0x8f9   :  { %v7519_v27 = vadd.f32 %v7518_v21, %v7517_v40  ;;  %v16484_v40 = vsub.f32 %v15971_v61, %v16056_v53  ;;  %v7526_v21 = vsel %vm7176_vm3, %v7419_v46, 0.0  ;;  %v7422_v39 = vmul.f32 %v16476_v2, %v16476_v2 }
 0x8fa   :  { %v16498_v61 = vsub.f32 %v15984_v12, %v16056_v53  ;;  %v7530_v46 = vsel %vm7176_vm3, %v7421_v47, 0.0  ;;  %v16512_v12 = vsub.f32 %v16000_v5, %v16056_v53 }
 0x8fb   :  { %v7521_v36 = vadd.f32 %v7520_v10, %v7519_v27  ;;  %v16491_v27 = vsub.f32 %v15979_v18, %v16056_v53  ;;  %v7528_v10 = vsel %vm7176_vm3, %v7420_v55, 0.0  ;;  %v16505_v18 = vsub.f32 %v15992_v45, %v16056_v53  ;;  %v12449_v45 = vld [vmem:[%s18361_s15 + $0x80] sm:$0xff]  }
 0x8fc   :  { %v7532_v55 = vsel %vm7176_vm3, %v7422_v39, 0.0  ;;  %9327 = vmatpush1.bf16.msra.mxu1 %v12449_v45 }
 0x8fd   :  { %v7523_v8 = vadd.f32 %v7522_v1, %v7521_v36  ;;  %v7423_v1 = vmul.f32 %v16484_v40, %v16484_v40  ;;  %v7426_v39 = vmul.f32 %v16505_v18, %v16505_v18  ;;  %9328 = vmatprep.subr.bf16.mxu1 %v18976_v19 }
 0x8ff   :  { %v7525_v29 = vadd.f32 %v7524_v62, %v7523_v8  ;;  %v7424_v8 = vmul.f32 %v16491_v27, %v16491_v27  ;;  %v7534_v47 = vsel %vm7176_vm3, %v7423_v1, 0.0 }
 0x901   :  { %v7527_v31 = vadd.f32 %v7526_v21, %v7525_v29  ;;  %v7425_v29 = vmul.f32 %v16498_v61, %v16498_v61  ;;  %v7536_v5 = vsel %vm7176_vm3, %v7424_v8, 0.0 }
 0x903   :  { %v7529_v36 = vadd.f32 %v7528_v10, %v7527_v31  ;;  %v16522_v31 = vsub.f32 %v16006_v9, %v16056_v53  ;;  %v7538_v1 = vsel %vm7176_vm3, %v7425_v29, 0.0  ;;  %v7540_v9 = vsel %vm7176_vm3, %v7426_v39, 0.0  ;;  %v12450_v29 = vld [vmem:[%s18361_s15 + $0x88] sm:$0xff]  }
 0x904   :  { %v7431_v39 = vmul.f32 %v16067_v60, %v16067_v60  ;;  %9329 = vmatpush1.bf16.msra.mxu1 %v12450_v29 }
 0x905   :  { %v7531_v42 = vadd.f32 %v7530_v46, %v7529_v36  ;;  %v7427_v36 = vmul.f32 %v16512_v12, %v16512_v12  ;;  %9330 = vmatprep.subr.bf16.mxu1 %v18976_v19 }
 0x907   :  { %v7533_v62 = vadd.f32 %v7532_v55, %v7531_v42  ;;  %v7428_v42 = vmul.f32 %v16522_v31, %v16522_v31  ;;  %v7429_v55 = vmul.f32 %v16060_v6, %v16060_v6  ;;  %v7542_v8 = vsel %vm7176_vm3, %v7427_v36, 0.0 }
 0x908   :  { %v7432_v36 = vmul.f32 %v16070_v37, %v16070_v37 }
 0x909   :  { %v7535_v21 = vadd.f32 %v7534_v47, %v7533_v62  ;;  %v7430_v47 = vmul.f32 %v16064_v17, %v16064_v17  ;;  %v7544_v45 = vsel %vm7176_vm3, %v7428_v42, 0.0  ;;  %v7433_v42 = vmul.f32 %v16073_v56, %v16073_v56 }
 0x90b   :  { %v7537_v10 = vadd.f32 %v7536_v5, %v7535_v21  ;;  %v7546_v5 = vsel %vm7176_vm3, %v7429_v55, 0.0  ;;  %v7552_v55 = vsel %vm7176_vm3, %v7432_v36, 0.0  ;;  %v7554_v29 = vsel %vm7176_vm3, %v7433_v42, 0.0 }
 0x90c   :  { %v7437_v36 = vmul.f32 %v16085_v15, %v16085_v15  ;;  %v7438_v42 = vmul.f32 %v16088_v7, %v16088_v7 }
 0x90d   :  { %v7539_v46 = vadd.f32 %v7538_v1, %v7537_v10  ;;  %v7548_v1 = vsel %vm7176_vm3, %v7430_v47, 0.0  ;;  %v12451_v47 = vld [vmem:[%s18361_s15 + $0x90] sm:$0xff]  }
 0x90e   :  { %9331 = vmatpush1.bf16.msra.mxu1 %v12451_v47 }
 0x90f   :  { %v7541_v53 = vadd.f32 %v7540_v9, %v7539_v46  ;;  %v7550_v9 = vsel %vm7176_vm3, %v7431_v39, 0.0  ;;  %v7436_v39 = vmul.f32 %v16082_v43, %v16082_v43  ;;  %9332 = vmatprep.subr.bf16.mxu1 %v18976_v19 }
 0x911   :  { %v7543_v62 = vadd.f32 %v7542_v8, %v7541_v53  ;;  %v7434_v8 = vmul.f32 %v16076_v51, %v16076_v51 }
 0x913   :  { %v7545_v21 = vadd.f32 %v7544_v45, %v7543_v62  ;;  %v7435_v45 = vmul.f32 %v16079_v44, %v16079_v44  ;;  %v19006_v44 = vld [vmem:[#allocation86_spill] sm:$0xff] }
 0x915   :  { %v7547_v10 = vadd.f32 %v7546_v5, %v7545_v21  ;;  %v7556_v5 = vsel %vm7176_vm3, %v7434_v8, 0.0  ;;  %v7564_v8 = vsel %vm7176_vm3, %v7438_v42, 0.0 }
 0x917   :  { %v7549_v46 = vadd.f32 %v7548_v1, %v7547_v10  ;;  %v7558_v1 = vsel %vm7176_vm3, %v7435_v45, 0.0  ;;  %v12452_v45 = vld [vmem:[%s18361_s15 + $0x98] sm:$0xff]  }
 0x918   :  { %9333 = vmatpush1.bf16.msra.mxu1 %v12452_v45  ;;  %v18995_v45 = vld [vmem:[#allocation81_spill] sm:$0xff] }
 0x919   :  { %v7551_v53 = vadd.f32 %v7550_v9, %v7549_v46  ;;  %v7560_v9 = vsel %vm7176_vm3, %v7436_v39, 0.0  ;;  %9334 = vmatprep.subr.bf16.mxu1 %v18976_v19  ;;  %v12453_v39 = vld [vmem:[%s18361_s15 + $0xa0] sm:$0xff]  }
 0x91b   :  { %v7553_v62 = vadd.f32 %v7552_v55, %v7551_v53  ;;  %v7562_v55 = vsel %vm7176_vm3, %v7437_v36, 0.0 }
 0x91c   :  { %9335 = vmatpush1.bf16.msra.mxu1 %v12453_v39  ;;  %v18999_v39 = vld [vmem:[#allocation50_spill] sm:$0xff] }
 0x91d   :  { %v7555_v21 = vadd.f32 %v7554_v29, %v7553_v62  ;;  %9336 = vmatprep.subr.bf16.mxu1 %v18976_v19 }
 0x91f   :  { %v7557_v10 = vadd.f32 %v7556_v5, %v7555_v21 }
 0x921   :  { %v7559_v46 = vadd.f32 %v7558_v1, %v7557_v10 }
 0x923   :  { %v7561_v53 = vadd.f32 %v7560_v9, %v7559_v46  ;;  %v12454_v9 = vld [vmem:[%s18361_s15 + $0xa8] sm:$0xff]  }
 0x924   :  { %9337 = vmatpush1.bf16.msra.mxu1 %v12454_v9  ;;  %v19002_v9 = vld [vmem:[#allocation99_spill] sm:$0xff] }
 0x925   :  { %v7563_v62 = vadd.f32 %v7562_v55, %v7561_v53  ;;  %9338 = vmatprep.subr.bf16.mxu1 %v18976_v19 }
 0x927   :  { %v7565_v29 = vadd.f32 %v7564_v8, %v7563_v62 }
 0x929   :  { %v7566_v21 = vrot.slane %v7565_v29, 4 }
 0x92b   :  { %v7567_v47 = vadd.f32 %v7566_v21, %v7565_v29 }
 0x92d   :  { %v7568_v5 = vrot.slane %v7567_v47, 2 }
 0x92f   :  { %v7569_v10 = vadd.f32 %v7568_v5, %v7567_v47  ;;  %v18996_v47 = vld [vmem:[#allocation84_spill] sm:$0xff]  ;;  %v18997_v5 = vld [vmem:[#allocation77_spill] sm:$0xff] }
 0x931   :  { %v7570_v36 = vrot.slane %v7569_v10, 1 }
 0x933   :  { %v7571_v1 = vadd.f32 %v7570_v36, %v7569_v10  ;;  %v18998_v10 = vld [vmem:[#allocation97_spill] sm:$0xff]  ;;  %v19000_v36 = vld [vmem:[#allocation80_spill] sm:$0xff] }
 0x935   :  { %v7572_v46 = vmul.f32 0.001953125, %v7571_v1 }
 0x937   :  { %v7573_v42 = vadd.f32 0.8, %v7572_v46  ;;  %v19001_v46 = vld [vmem:[#allocation85_spill] sm:$0xff] }
 0x939   :  { %12473 = vrsqrt.f32 %v7573_v42 }
 0x943   :  { %v16586_v53 = vpop.eup %12473 }
 0x944   :  { %18993 = vst [vmem:[#allocation87_spill] sm:$0xff] %v16586_v53  ;;  %v16590_v55 = vmul.f32 %v16586_v53, %v16088_v7  ;;  %v16594_v62 = vmul.f32 %v16586_v53, %v16100_v34  ;;  %v16598_v8 = vmul.f32 %v16586_v53, %v16104_v11  ;;  %v16602_v29 = vmul.f32 %v16586_v53, %v16112_v30 }
 0x945   :  { %v16606_v21 = vmul.f32 %v16586_v53, %v16118_v59  ;;  %v16610_v7 = vmul.f32 %v16586_v53, %v16126_v49  ;;  %v16614_v34 = vmul.f32 %v16586_v53, %v16133_v58  ;;  %v16618_v11 = vmul.f32 %v16586_v53, %v18995_v45 }
 0x946   :  { %18994 = vst [vmem:[#allocation102_spill] sm:$0xff] %v16590_v55  ;;  %v16622_v30 = vmul.f32 %v16586_v53, %v18996_v47  ;;  %v16626_v59 = vmul.f32 %v16586_v53, %v18997_v5  ;;  %v16630_v49 = vmul.f32 %v16586_v53, %v18998_v10  ;;  %v16634_v58 = vmul.f32 %v16586_v53, %v18999_v39  ;;  %v19003_v47 = vld [vmem:[#allocation57_spill] sm:$0xff]  ;;  %v19004_v39 = vld [vmem:[#allocation100_spill] sm:$0xff] }
 0x947   :  { %v16638_v1 = vmul.f32 %v16586_v53, %v19000_v36  ;;  %v16642_v42 = vmul.f32 %v16586_v53, %v19001_v46  ;;  %v16646_v45 = vmul.f32 %v16586_v53, %v19002_v9  ;;  %v16650_v5 = vmul.f32 %v16586_v53, %v19003_v47  ;;  %v19005_v55 = vld [vmem:[#allocation28_spill] sm:$0xff]  ;;  %v12455_v47 = vld [vmem:[%s18361_s15 + $0xb0] sm:$0xff]  }
 0x948   :  { %v16654_v10 = vmul.f32 %v16586_v53, %v16211_v32  ;;  %v16658_v36 = vmul.f32 %v16586_v53, %v19004_v39  ;;  %v16662_v46 = vmul.f32 %v16586_v53, %v16229_v20  ;;  %v16666_v9 = vmul.f32 %v16586_v53, %v19005_v55  ;;  %9339 = vmatpush1.bf16.msra.mxu1 %v12455_v47 }
 0x949   :  { %v16673_v32 = vmul.f32 %v16586_v53, %v16247_v4  ;;  %v16677_v39 = vmul.f32 %v16586_v53, %v19006_v44  ;;  %v16681_v20 = vmul.f32 %v16586_v53, %v16265_v23  ;;  %v16685_v55 = vmul.f32 %v16586_v53, %v16275_v14  ;;  %9340 = vmatprep.subr.bf16.mxu1 %v18976_v19 }
 0x94a   :  { %v16689_v43 = vmul.f32 %v16586_v53, %v16283_v63  ;;  %v16693_v4 = vmul.f32 %v16586_v53, %v16293_v16  ;;  %v16697_v44 = vmul.f32 %v16586_v53, %v16304_v26  ;;  %v16701_v23 = vmul.f32 %v16586_v53, %v16311_v3 }
 0x94b   :  { %19007 = vst [vmem:[#allocation63_spill] sm:$0xff] %v16685_v55  ;;  %v16705_v14 = vmul.f32 %v16586_v53, %v16322_v50  ;;  %v19010_v55 = vld [vmem:[#allocation15_spill] sm:$0xff]  ;;  %v16722_v3 = vmul.f32 %v16586_v53, %v16362_v0  ;;  %v16726_v50 = vmul.f32 %v16586_v53, %v16369_v22  ;;  %v16730_v47 = vmul.f32 %v16586_v53, %v16380_v52 }
 0x94c   :  { %19008 = vst [vmem:[#allocation20_spill] sm:$0xff] %v16689_v43  ;;  %19009 = vst [vmem:[#allocation88_spill] sm:$0xff] %v16693_v4  ;;  %v16709_v63 = vmul.f32 %v16586_v53, %v19010_v55  ;;  %v19011_v43 = vld [vmem:[#allocation55_spill] sm:$0xff]  ;;  %v16738_v55 = vmul.f32 %v16586_v53, %v16398_v35  ;;  %v16742_v0 = vmul.f32 %v16586_v53, %v16406_v48 }
 0x94d   :  { %v16713_v16 = vmul.f32 %v16586_v53, %v19011_v43  ;;  %v19012_v4 = vld [vmem:[#allocation19_spill] sm:$0xff]  ;;  %v16734_v43 = vmul.f32 %v16586_v53, %v16388_v38  ;;  %v16746_v22 = vmul.f32 %v16586_v53, %v16413_v24  ;;  %v16750_v52 = vmul.f32 %v16586_v53, %v16420_v28 }
 0x94e   :  { %v16717_v26 = vmul.f32 %v16586_v53, %v19012_v4  ;;  %v16754_v38 = vmul.f32 %v16586_v53, %v16430_v41  ;;  %v16758_v35 = vmul.f32 %v16586_v53, %v16438_v33  ;;  %v16762_v48 = vmul.f32 %v16586_v53, %v16445_v57 }
 0x94f   :  { %v16766_v24 = vmul.f32 %v16586_v53, %v16452_v25  ;;  %v16770_v28 = vmul.f32 %v16586_v53, %v16459_v13  ;;  %v16774_v41 = vmul.f32 %v16586_v53, %v16466_v54  ;;  %v16778_v33 = vmul.f32 %v16586_v53, %v16476_v2 }
 0x950   :  { %v16782_v57 = vmul.f32 %v16586_v53, %v16484_v40  ;;  %v16786_v25 = vmul.f32 %v16586_v53, %v16491_v27  ;;  %v16790_v13 = vmul.f32 %v16586_v53, %v16498_v61  ;;  %v16794_v54 = vmul.f32 %v16586_v53, %v16505_v18  ;;  %v16803_v40 = vld [vmem:[%s18359_s13] ss:$0 sm:$0xff] }
 0x951   :  { %v16798_v2 = vmul.f32 %v16586_v53, %v16512_v12  ;;  %v16807_v27 = vmul.f32 %v16586_v53, %v16522_v31  ;;  %v16811_v61 = vmul.f32 %v16586_v53, %v16060_v6  ;;  %v16815_v18 = vmul.f32 %v16586_v53, %v16064_v17 }
 0x952   :  { %19013 = vst [vmem:[#allocation103_spill] sm:$0xff] %v16782_v57  ;;  %19014 = vst [vmem:[#allocation61_spill] sm:$0xff] %v16786_v25  ;;  %v16819_v12 = vmul.f32 %v16586_v53, %v16067_v60  ;;  %v16823_v4 = vmul.f32 %v16586_v53, %v16070_v37  ;;  %v16827_v31 = vmul.f32 %v16586_v53, %v16073_v56  ;;  %v16840_v60 = vld [vmem:[%s18360_s14] ss:$0 sm:$0xff] }
 0x953   :  { %19015 = vst [vmem:[#allocation17_spill] sm:$0xff] %v16790_v13  ;;  %19016 = vst [vmem:[#allocation64_spill] sm:$0xff] %v16794_v54  ;;  %v16831_v6 = vmul.f32 %v16586_v53, %v16076_v51  ;;  %v16835_v17 = vmul.f32 %v16586_v53, %v16085_v15  ;;  %v7648_v37 = vmul.f32 %v16803_v40, %v16594_v62 }
 0x954   :  { %19017 = vst [vmem:[#allocation24_spill] sm:$0xff] %v16798_v2  ;;  %19018 = vst [vmem:[#allocation70_spill] sm:$0xff] %v16807_v27  ;;  %v7649_v51 = vmul.f32 %v16803_v40, %v16598_v8  ;;  %v7651_v15 = vmul.f32 %v16803_v40, %v16606_v21  ;;  %v7652_v62 = vmul.f32 %v16803_v40, %v16610_v7 }
 0x955   :  { %19019 = vst [vmem:[#allocation23_spill] sm:$0xff] %v16811_v61  ;;  %19020 = vst [vmem:[#allocation89_spill] sm:$0xff] %v16815_v18 }
 0x956   :  { %19021 = vst [vmem:[#allocation18_spill] sm:$0xff] %v16819_v12  ;;  %19022 = vst [vmem:[#allocation68_spill] sm:$0xff] %v16823_v4  ;;  %v19026_v12 = vld [vmem:[#allocation83_spill] sm:$0xff]  ;;  %v7653_v4 = vmul.f32 %v16803_v40, %v16614_v34  ;;  %v7720_v8 = vadd.f32 %v16840_v60, %v7649_v51  ;;  %v16866_v18 = vadd.f32 %v16840_v60, %v7652_v62 }
 0x957   :  { %19023 = vst [vmem:[#allocation26_spill] sm:$0xff] %v16827_v31  ;;  %19024 = vst [vmem:[#allocation90_spill] sm:$0xff] %v16831_v6  ;;  %v7575_v56 = vmul.f32 %v16586_v53, %v19026_v12  ;;  %v19027_v31 = vld [vmem:[#allocation122_spill] sm:$0xff]  ;;  %v7719_v12 = vadd.f32 %v16840_v60, %v7648_v37 }
 0x958   :  { %19025 = vst [vmem:[#allocation104_spill] sm:$0xff] %v16835_v17  ;;  %v7576_v6 = vmul.f32 %v16586_v53, %v19027_v31  ;;  %v7650_v17 = vmul.f32 %v16803_v40, %v16602_v29  ;;  %v7722_v53 = vadd.f32 %v16840_v60, %v7651_v15  ;;  %v7724_v29 = vadd.f32 %v16840_v60, %v7653_v4 }
 0x959   :  { %v7646_v61 = vmul.f32 %v16803_v40, %v7575_v56  ;;  %vm7783_vm5 = vcmp.ge.f32.partialorder %v7719_v12, 0.0  ;;  %v7847_v34 = vmul.f32 0.2, %v7719_v12  ;;  %vm7784_vm6 = vcmp.ge.f32.partialorder %v7720_v8, 0.0 }
 0x95a   :  { %v7647_v31 = vmul.f32 %v16803_v40, %v7576_v6  ;;  %v7721_v21 = vadd.f32 %v16840_v60, %v7650_v17  ;;  %v7848_v37 = vmul.f32 0.2, %v7720_v8  ;;  %vm7786_vm7 = vcmp.ge.f32.partialorder %v7722_v53, 0.0 }
 0x95b   :  { %v7717_v7 = vadd.f32 %v16840_v60, %v7646_v61  ;;  %v7850_v51 = vmul.f32 0.2, %v7722_v53  ;;  %v16870_v6 = vsel %vm7783_vm5, %v7719_v12, %v7847_v34  ;;  %v12456_v12 = vld [vmem:[%s18361_s15 + $0xb8] sm:$0xff]   ;;  %vm7788_vm11 = vcmp.ge.f32.partialorder %v7724_v29, 0.0 }
 0x95c   :  { %v7718_v56 = vadd.f32 %v16840_v60, %v7647_v31  ;;  %vm7785_vm9 = vcmp.ge.f32.partialorder %v7721_v21, 0.0  ;;  %8411 = vrot.lane.b32.xlu1 %v16870_v6, %s12706_s21  ;;  %v8667_v17 = vrot.slane %v16870_v6, 1  ;;  %v7912_v62 = vsel %vm7784_vm6, %v7720_v8, %v7848_v37  ;;  %9341 = vmatpush1.bf16.msra.mxu1 %v12456_v12 }
 0x95d   :  { %vm7781_vm8 = vcmp.ge.f32.partialorder %v7717_v7, 0.0  ;;  %v7845_v15 = vmul.f32 0.2, %v7717_v7  ;;  %v8185_v2 = vrot.slane %v7912_v62, 7  ;;  %v8668_v31 = vrot.slane %v7912_v62, 1  ;;  %10081 = vmatprep.subr.bf16.mxu1 %v18976_v19 }
 0x95e   :  { %vm7782_vm10 = vcmp.ge.f32.partialorder %v7718_v56, 0.0  ;;  %v7846_v27 = vmul.f32 0.2, %v7718_v56  ;;  %v7914_v13 = vsel %vm7786_vm7, %v7722_v53, %v7850_v51  ;;  %v7849_v8 = vmul.f32 0.2, %v7721_v21 }
 0x95f   :  { %v16876_v61 = vsel %vm7781_vm8, %v7717_v7, %v7845_v15  ;;  %8828 = vst.msk [vmem:[#allocation5 + $0x58] sm:$0x7f] %vm8825_vm4, %v8668_v31  ;;  %v19028_v7 = vrot.slane %v16870_v6, 7  ;;  %v8669_v15 = vsel %vm4180_vm2, %v8667_v17, %v8668_v31  ;;  %v8188_v57 = vrot.slane %v7914_v13, 7 }
 0x960   :  { %8407 = vrot.lane.b32.xlu0 %v16876_v61, %s12706_s21  ;;  %v8664_v4 = vrot.slane %v16876_v61, 1  ;;  %v7910_v54 = vsel %vm7782_vm10, %v7718_v56, %v7846_v27  ;;  %8413 = vrot.lane.b32.xlu1 %v7912_v62, %s12706_s21  ;;  %8827 = vst.msk [vmem:[#allocation5 + $0x48] sm:$0xff] %vm7176_vm3, %v8669_v15  ;;  %v8671_v51 = vrot.slane %v7914_v13, 1  ;;  %v16895_v25 = vsel %vm7785_vm9, %v7721_v21, %v7849_v8 }
 0x961   :  { %v8186_v37 = vsel %vm3890_vm1, %v19028_v7, %v8185_v2  ;;  %v8182_v34 = vrot.slane %v7910_v54, 7  ;;  %v8665_v53 = vrot.slane %v7910_v54, 1  ;;  %v8187_v2 = vrot.slane %v16895_v25, 7 }
 0x962   :  { %8346 = vst.msk [vmem:[#allocation5 + $0x50] sm:$0xff] %vm7176_vm3, %v8186_v37  ;;  %v8670_v27 = vrot.slane %v16895_v25, 1  ;;  %v7852_v56 = vmul.f32 0.2, %v7724_v29  ;;  %v19029_v17 = vrot.slane %v16876_v61, 7  ;;  %vm7787_vm12 = vcmp.ge.f32.partialorder %v16866_v18, 0.0 }
 0x963   :  { %8826 = vst.msk [vmem:[#allocation5 + $0x38] sm:$0x7f] %vm8825_vm4, %v8665_v53  ;;  %v8666_v31 = vsel %vm4180_vm2, %v8664_v4, %v8665_v53  ;;  %8830 = vst.msk [vmem:[#allocation5 + $0x78] sm:$0x7f] %vm8825_vm4, %v8671_v51  ;;  %v7851_v21 = vmul.f32 0.2, %v16866_v18  ;;  %v7655_v4 = vmul.f32 %v16803_v40, %v16622_v30  ;;  %v7656_v53 = vmul.f32 %v16803_v40, %v16626_v59 }
 0x964   :  { %8409 = vrot.lane.b32.xlu0 %v7910_v54, %s12706_s21  ;;  %v8183_v62 = vsel %vm3890_vm1, %v19029_v17, %v8182_v34  ;;  %8824 = vst.msk [vmem:[#allocation5 + $0x28] sm:$0xff] %vm7176_vm3, %v8666_v31  ;;  %v8189_v54 = vsel %vm3890_vm1, %v8187_v2, %v8188_v57  ;;  %v8672_v12 = vsel %vm4180_vm2, %v8670_v27, %v8671_v51 }
 0x965   :  { %8344 = vst.msk [vmem:[#allocation5 + $0x30] sm:$0xff] %vm7176_vm3, %v8183_v62  ;;  %v7916_v8 = vsel %vm7788_vm11, %v7724_v29, %v7852_v56  ;;  %8417 = vrot.lane.b32.xlu1 %v7914_v13, %s12706_s21  ;;  %8829 = vst.msk [vmem:[#allocation5 + $0x68] sm:$0xff] %vm7176_vm3, %v8672_v12  ;;  %v16921_v37 = vsel %vm7787_vm12, %v16866_v18, %v7851_v21  ;;  %v7654_v57 = vmul.f32 %v16803_v40, %v16618_v11 }
 0x966   :  { %8348 = vst.msk [vmem:[#allocation5 + $0x70] sm:$0xff] %vm7176_vm3, %v8189_v54  ;;  %v8191_v34 = vrot.slane %v7916_v8, 7  ;;  %v8674_v7 = vrot.slane %v7916_v8, 1  ;;  %v8190_v15 = vrot.slane %v16921_v37, 7  ;;  %v8673_v29 = vrot.slane %v16921_v37, 1 }
 0x967   :  { %v7726_v30 = vadd.f32 %v16840_v60, %v7655_v4  ;;  %v7657_v13 = vmul.f32 %v16803_v40, %v16630_v49  ;;  %v7725_v18 = vadd.f32 %v16840_v60, %v7654_v57  ;;  %v7659_v11 = vmul.f32 %v16803_v40, %v16638_v1 }
 0x968   :  { %8415 = vrot.lane.b32.xlu0 %v16895_v25, %s12706_s21  ;;  %8832 = vst.msk [vmem:[#allocation5 + $0x98] sm:$0x7f] %vm8825_vm4, %v8674_v7  ;;  %v7658_v51 = vmul.f32 %v16803_v40, %v16634_v58  ;;  %v8192_v49 = vsel %vm3890_vm1, %v8190_v15, %v8191_v34  ;;  %v8675_v27 = vsel %vm4180_vm2, %v8673_v29, %v8674_v7 }
 0x969   :  { %vm7790_vm13 = vcmp.ge.f32.partialorder %v7726_v30, 0.0  ;;  %v7854_v56 = vmul.f32 0.2, %v7726_v30  ;;  %8421 = vrot.lane.b32.xlu1 %v7916_v8, %s12706_s21  ;;  %8831 = vst.msk [vmem:[#allocation5 + $0x88] sm:$0xff] %vm7176_vm3, %v8675_v27  ;;  %8350 = vst.msk [vmem:[#allocation5 + $0x90] sm:$0xff] %vm7176_vm3, %v8192_v49  ;;  %vm7789_vm14 = vcmp.ge.f32.partialorder %v7725_v18, 0.0  ;;  %v7728_v1 = vadd.f32 %v16840_v60, %v7657_v13 }
 0x96a   :  { %v7853_v59 = vmul.f32 0.2, %v7725_v18  ;;  %v7727_v58 = vadd.f32 %v16840_v60, %v7656_v53  ;;  %v8896_v17 = vld [vmem:[#allocation5 + $0x38] sm:$0xff]  ;;  %v7730_v31 = vadd.f32 %v16840_v60, %v7659_v11  ;;  %v7729_v21 = vadd.f32 %v16840_v60, %v7658_v51 }
 0x96b   :  { %v7918_v62 = vsel %vm7790_vm13, %v7726_v30, %v7854_v56  ;;  %v7661_v54 = vmul.f32 %v16803_v40, %v16646_v45  ;;  %v8894_v12 = vld [vmem:[#allocation5 + $0x28] sm:$0xff]  ;;  %vm7792_vm15 = vcmp.ge.f32.partialorder %v7728_v1, 0.0  ;;  %v7856_v30 = vmul.f32 0.2, %v7728_v1 }
 0x96c   :  { %8419 = vrot.lane.b32.xlu0 %v16921_v37, %s12706_s21  ;;  %v8194_v8 = vrot.slane %v7918_v62, 7  ;;  %v8677_v4 = vrot.slane %v7918_v62, 1  ;;  %v16955_v34 = vsel %vm7789_vm14, %v7725_v18, %v7853_v59  ;;  %v9036_v7 = vpack.c.bf16 %v8896_v17, %v8894_v12 }
 0x96d   :  { %v8193_v57 = vrot.slane %v16955_v34, 7  ;;  %v8676_v29 = vrot.slane %v16955_v34, 1  ;;  %8425 = vrot.lane.b32.xlu1 %v7918_v62, %s12706_s21  ;;  %vm7791_vm0 = vcmp.ge.f32.partialorder %v7727_v58, 0.0  ;;  %v7855_v45 = vmul.f32 0.2, %v7727_v58 }
 0x96e   :  { %8834 = vst.msk [vmem:[#allocation5 + $0xb8] sm:$0x7f] %vm8825_vm4, %v8677_v4  ;;  %vm7794_vm5 = vcmp.ge.f32.partialorder %v7730_v31, 0.0  ;;  %v7858_v13 = vmul.f32 0.2, %v7730_v31  ;;  %11151 = vmatprep.mubr.msk.bf16.mxu1 %vm7176_vm3, %v9036_v7  ;;  %11196 = vmatprep.mubr.msk.bf16.mxu0 %vm7176_vm3, %v9036_v7  ;;  %v7920_v11 = vsel %vm7792_vm15, %v7728_v1, %v7856_v30  ;;  %vm7793_vm6 = vcmp.ge.f32.partialorder %v7729_v21, 0.0 }
 0x96f   :  { %v8195_v18 = vsel %vm3890_vm1, %v8193_v57, %v8194_v8  ;;  %v8678_v53 = vsel %vm4180_vm2, %v8676_v29, %v8677_v4  ;;  %v8197_v51 = vrot.slane %v7920_v11, 7  ;;  %v8680_v49 = vrot.slane %v7920_v11, 1 }
 0x970   :  { %8833 = vst.msk [vmem:[#allocation5 + $0xa8] sm:$0xff] %vm7176_vm3, %v8678_v53  ;;  %8423 = vrot.lane.b32.xlu0 %v16955_v34, %s12706_s21  ;;  %8352 = vst.msk [vmem:[#allocation5 + $0xb0] sm:$0xff] %vm7176_vm3, %v8195_v18  ;;  %v16971_v27 = vsel %vm7791_vm0, %v7727_v58, %v7855_v45  ;;  %v7922_v56 = vsel %vm7794_vm5, %v7730_v31, %v7858_v13  ;;  %v7857_v1 = vmul.f32 0.2, %v7729_v21 }
 0x971   :  { %v8196_v59 = vrot.slane %v16971_v27, 7  ;;  %v8679_v17 = vrot.slane %v16971_v27, 1  ;;  %v8200_v62 = vrot.slane %v7922_v56, 7  ;;  %v8683_v12 = vrot.slane %v7922_v56, 1  ;;  %8836 = vst.msk [vmem:[#allocation5 + $0xd8] sm:$0x7f] %vm8825_vm4, %v8680_v49  ;;  %8429 = vrot.lane.b32.xlu1 %v7920_v11, %s12706_s21 }
 0x972   :  { %v7732_v8 = vadd.f32 %v16840_v60, %v7661_v54  ;;  %v7660_v4 = vmul.f32 %v16803_v40, %v16642_v42  ;;  %v7663_v58 = vmul.f32 %v16803_v40, %v16654_v10  ;;  %v7662_v29 = vmul.f32 %v16803_v40, %v16650_v5 }
 0x973   :  { %v8198_v31 = vsel %vm3890_vm1, %v8196_v59, %v8197_v51  ;;  %v8681_v7 = vsel %vm4180_vm2, %v8679_v17, %v8680_v49  ;;  %8838 = vst.msk [vmem:[#allocation5 + $0xf8] sm:$0x7f] %vm8825_vm4, %v8683_v12  ;;  %v7665_v54 = vmul.f32 %v16803_v40, %v16662_v46  ;;  %v16996_v42 = vsel %vm7793_vm6, %v7729_v21, %v7857_v1 }
 0x974   :  { %8835 = vst.msk [vmem:[#allocation5 + $0xc8] sm:$0xff] %vm7176_vm3, %v8681_v7  ;;  %8427 = vrot.lane.b32.xlu0 %v16971_v27, %s12706_s21  ;;  %8354 = vst.msk [vmem:[#allocation5 + $0xd0] sm:$0xff] %vm7176_vm3, %v8198_v31  ;;  %vm7796_vm7 = vcmp.ge.f32.partialorder %v7732_v8, 0.0  ;;  %v7860_v10 = vmul.f32 0.2, %v7732_v8  ;;  %v7731_v30 = vadd.f32 %v16840_v60, %v7660_v4  ;;  %v8199_v45 = vrot.slane %v16996_v42, 7 }
 0x975   :  { %v8682_v5 = vrot.slane %v16996_v42, 1  ;;  %v7734_v46 = vadd.f32 %v16840_v60, %v7663_v58  ;;  %v7733_v13 = vadd.f32 %v16840_v60, %v7662_v29  ;;  %8433 = vrot.lane.b32.xlu1 %v7922_v56, %s12706_s21  ;;  %v7736_v21 = vadd.f32 %v16840_v60, %v7665_v54 }
 0x976   :  { %v7924_v18 = vsel %vm7796_vm7, %v7732_v8, %v7860_v10  ;;  %vm7795_vm8 = vcmp.ge.f32.partialorder %v7731_v30, 0.0  ;;  %v7859_v53 = vmul.f32 0.2, %v7731_v30  ;;  %v8201_v11 = vsel %vm3890_vm1, %v8199_v45, %v8200_v62 }
 0x977   :  { %v8684_v51 = vsel %vm4180_vm2, %v8682_v5, %v8683_v12  ;;  %v8203_v49 = vrot.slane %v7924_v18, 7  ;;  %v8686_v17 = vrot.slane %v7924_v18, 1  ;;  %8356 = vst.msk [vmem:[#allocation5 + $0xf0] sm:$0xff] %vm7176_vm3, %v8201_v11  ;;  %vm7798_vm9 = vcmp.ge.f32.partialorder %v7734_v46, 0.0 }
 0x978   :  { %8837 = vst.msk [vmem:[#allocation5 + $0xe8] sm:$0xff] %vm7176_vm3, %v8684_v51  ;;  %8431 = vrot.lane.b32.xlu0 %v16996_v42, %s12706_s21  ;;  %v17013_v56 = vsel %vm7795_vm8, %v7731_v30, %v7859_v53  ;;  %v7862_v1 = vmul.f32 0.2, %v7734_v46  ;;  %vm7797_vm10 = vcmp.ge.f32.partialorder %v7733_v13, 0.0  ;;  %v7861_v8 = vmul.f32 0.2, %v7733_v13 }
 0x979   :  { %8840 = vst.msk [vmem:[#allocation5 + $0x118] sm:$0x7f] %vm8825_vm4, %v8686_v17  ;;  %v8202_v62 = vrot.slane %v17013_v56, 7  ;;  %v8685_v12 = vrot.slane %v17013_v56, 1  ;;  %vm7800_vm11 = vcmp.ge.f32.partialorder %v7736_v21, 0.0  ;;  %8437 = vrot.lane.b32.xlu1 %v7924_v18, %s12706_s21  ;;  %v7664_v31 = vmul.f32 %v16803_v40, %v16658_v36 }
 0x97a   :  { %v7926_v4 = vsel %vm7798_vm9, %v7734_v46, %v7862_v1  ;;  %v7864_v58 = vmul.f32 0.2, %v7736_v21  ;;  %v7667_v7 = vmul.f32 %v16803_v40, %v16673_v32  ;;  %v17032_v36 = vsel %vm7797_vm10, %v7733_v13, %v7861_v8 }
 0x97b   :  { %v8204_v29 = vsel %vm3890_vm1, %v8202_v62, %v8203_v49  ;;  %v8687_v54 = vsel %vm4180_vm2, %v8685_v12, %v8686_v17  ;;  %v8206_v10 = vrot.slane %v7926_v4, 7  ;;  %v8689_v30 = vrot.slane %v7926_v4, 1 }
 0x97c   :  { %8839 = vst.msk [vmem:[#allocation5 + $0x108] sm:$0xff] %vm7176_vm3, %v8687_v54  ;;  %8435 = vrot.lane.b32.xlu0 %v17013_v56, %s12706_s21  ;;  %8358 = vst.msk [vmem:[#allocation5 + $0x110] sm:$0xff] %vm7176_vm3, %v8204_v29  ;;  %v7928_v5 = vsel %vm7800_vm11, %v7736_v21, %v7864_v58  ;;  %v7735_v32 = vadd.f32 %v16840_v60, %v7664_v31  ;;  %v7738_v46 = vadd.f32 %v16840_v60, %v7667_v7  ;;  %v19030_v31 = vld [vmem:[#allocation20_spill] sm:$0xff] }
 0x97d   :  { %8842 = vst.msk [vmem:[#allocation5 + $0x138] sm:$0x7f] %vm8825_vm4, %v8689_v30  ;;  %v8205_v18 = vrot.slane %v17032_v36, 7  ;;  %v8688_v53 = vrot.slane %v17032_v36, 1  ;;  %v8209_v11 = vrot.slane %v7928_v5, 7  ;;  %v8692_v51 = vrot.slane %v7928_v5, 1  ;;  %8441 = vrot.lane.b32.xlu1 %v7926_v4, %s12706_s21 }
 0x97e   :  { %vm7799_vm12 = vcmp.ge.f32.partialorder %v7735_v32, 0.0  ;;  %v7863_v49 = vmul.f32 0.2, %v7735_v32  ;;  %vm7802_vm13 = vcmp.ge.f32.partialorder %v7738_v46, 0.0  ;;  %v7866_v13 = vmul.f32 0.2, %v7738_v46 }
 0x97f   :  { %v8207_v21 = vsel %vm3890_vm1, %v8205_v18, %v8206_v10  ;;  %v8690_v17 = vsel %vm4180_vm2, %v8688_v53, %v8689_v30  ;;  %8844 = vst.msk [vmem:[#allocation5 + $0x158] sm:$0x7f] %vm8825_vm4, %v8692_v51  ;;  %v7666_v1 = vmul.f32 %v16803_v40, %v16666_v9  ;;  %v7669_v12 = vmul.f32 %v16803_v40, %v16681_v20 }
 0x980   :  { %8841 = vst.msk [vmem:[#allocation5 + $0x128] sm:$0xff] %vm7176_vm3, %v8690_v17  ;;  %8439 = vrot.lane.b32.xlu0 %v17032_v36, %s12706_s21  ;;  %8360 = vst.msk [vmem:[#allocation5 + $0x130] sm:$0xff] %vm7176_vm3, %v8207_v21  ;;  %v17053_v8 = vsel %vm7799_vm12, %v7735_v32, %v7863_v49  ;;  %v7930_v4 = vsel %vm7802_vm13, %v7738_v46, %v7866_v13  ;;  %v7668_v58 = vmul.f32 %v16803_v40, %v16677_v39  ;;  %v19031_v49 = vld [vmem:[#allocation63_spill] sm:$0xff] }
 0x981   :  { %v7671_v7 = vmul.f32 %v16803_v40, %v19030_v31  ;;  %v8208_v9 = vrot.slane %v17053_v8, 7  ;;  %v8691_v20 = vrot.slane %v17053_v8, 1  ;;  %v8212_v29 = vrot.slane %v7930_v4, 7  ;;  %8445 = vrot.lane.b32.xlu1 %v7928_v5, %s12706_s21 }
 0x982   :  { %v8695_v54 = vrot.slane %v7930_v4, 1  ;;  %v7737_v10 = vadd.f32 %v16840_v60, %v7666_v1  ;;  %v7740_v30 = vadd.f32 %v16840_v60, %v7669_v12  ;;  %v7739_v32 = vadd.f32 %v16840_v60, %v7668_v58 }
 0x983   :  { %v7742_v46 = vadd.f32 %v16840_v60, %v7671_v7  ;;  %v8210_v39 = vsel %vm3890_vm1, %v8208_v9, %v8209_v11  ;;  %v8693_v53 = vsel %vm4180_vm2, %v8691_v20, %v8692_v51  ;;  %v7670_v13 = vmul.f32 %v16803_v40, %v19031_v49 }
 0x984   :  { %8846 = vst.msk [vmem:[#allocation5 + $0x178] sm:$0x7f] %vm8825_vm4, %v8695_v54  ;;  %v7673_v5 = vmul.f32 %v16803_v40, %v16697_v44  ;;  %8443 = vrot.lane.b32.xlu0 %v17053_v8, %s12706_s21  ;;  %vm7801_vm14 = vcmp.ge.f32.partialorder %v7737_v10, 0.0  ;;  %v7865_v21 = vmul.f32 0.2, %v7737_v10  ;;  %vm7804_vm15 = vcmp.ge.f32.partialorder %v7740_v30, 0.0 }
 0x985   :  { %8843 = vst.msk [vmem:[#allocation5 + $0x148] sm:$0xff] %vm7176_vm3, %v8693_v53  ;;  %8362 = vst.msk [vmem:[#allocation5 + $0x150] sm:$0xff] %vm7176_vm3, %v8210_v39  ;;  %v7868_v11 = vmul.f32 0.2, %v7740_v30  ;;  %vm7803_vm0 = vcmp.ge.f32.partialorder %v7739_v32, 0.0  ;;  %vm7806_vm5 = vcmp.ge.f32.partialorder %v7742_v46, 0.0  ;;  %8449 = vrot.lane.b32.xlu1 %v7930_v4, %s12706_s21  ;;  %v7741_v12 = vadd.f32 %v16840_v60, %v7670_v13 }
 0x986   :  { %v7867_v51 = vmul.f32 0.2, %v7739_v32  ;;  %v7870_v17 = vmul.f32 0.2, %v7742_v46  ;;  %v17080_v1 = vsel %vm7801_vm14, %v7737_v10, %v7865_v21  ;;  %v7744_v58 = vadd.f32 %v16840_v60, %v7673_v5 }
 0x987   :  { %v7932_v44 = vsel %vm7804_vm15, %v7740_v30, %v7868_v11  ;;  %v8211_v31 = vrot.slane %v17080_v1, 7  ;;  %v8694_v7 = vrot.slane %v17080_v1, 1  ;;  %vm7805_vm6 = vcmp.ge.f32.partialorder %v7741_v12, 0.0 }
 0x988   :  { %v8215_v20 = vrot.slane %v7932_v44, 7  ;;  %v8698_v39 = vrot.slane %v7932_v44, 1  ;;  %8447 = vrot.lane.b32.xlu0 %v17080_v1, %s12706_s21  ;;  %v17088_v53 = vsel %vm7803_vm0, %v7739_v32, %v7867_v51  ;;  %v7934_v49 = vsel %vm7806_vm5, %v7742_v46, %v7870_v17 }
 0x989   :  { %v7869_v4 = vmul.f32 0.2, %v7741_v12  ;;  %v8213_v10 = vsel %vm3890_vm1, %v8211_v31, %v8212_v29  ;;  %v8696_v30 = vsel %vm4180_vm2, %v8694_v7, %v8695_v54  ;;  %v8214_v13 = vrot.slane %v17088_v53, 7  ;;  %8453 = vrot.lane.b32.xlu1 %v7932_v44, %s12706_s21  ;;  %v19032_v44 = vld [vmem:[#allocation88_spill] sm:$0xff] }
 0x98a   :  { %8848 = vst.msk [vmem:[#allocation5 + $0x198] sm:$0x7f] %vm8825_vm4, %v8698_v39  ;;  %v8697_v5 = vrot.slane %v17088_v53, 1  ;;  %v8218_v32 = vrot.slane %v7934_v49, 7  ;;  %v8701_v46 = vrot.slane %v7934_v49, 1  ;;  %vm7808_vm7 = vcmp.ge.f32.partialorder %v7744_v58, 0.0 }
 0x98b   :  { %8845 = vst.msk [vmem:[#allocation5 + $0x168] sm:$0xff] %vm7176_vm3, %v8696_v30  ;;  %8364 = vst.msk [vmem:[#allocation5 + $0x170] sm:$0xff] %vm7176_vm3, %v8213_v10  ;;  %v17100_v21 = vsel %vm7805_vm6, %v7741_v12, %v7869_v4  ;;  %v8216_v29 = vsel %vm3890_vm1, %v8214_v13, %v8215_v20  ;;  %v7872_v17 = vmul.f32 0.2, %v7744_v58  ;;  %v7672_v12 = vmul.f32 %v16803_v40, %v19032_v44 }
 0x98c   :  { %v8699_v54 = vsel %vm4180_vm2, %v8697_v5, %v8698_v39  ;;  %v18538_v11 = vrot.slane %v17100_v21, 7  ;;  %v8700_v51 = vrot.slane %v17100_v21, 1  ;;  %8451 = vrot.lane.b32.xlu0 %v17088_v53, %s12706_s21  ;;  %8366 = vst.msk [vmem:[#allocation5 + $0x190] sm:$0xff] %vm7176_vm3, %v8216_v29  ;;  %v7675_v7 = vmul.f32 %v16803_v40, %v16705_v14 }
 0x98d   :  { %8847 = vst.msk [vmem:[#allocation5 + $0x188] sm:$0xff] %vm7176_vm3, %v8699_v54  ;;  %v7674_v20 = vmul.f32 %v16803_v40, %v16701_v23  ;;  %v7677_v10 = vmul.f32 %v16803_v40, %v16713_v16  ;;  %v7676_v30 = vmul.f32 %v16803_v40, %v16709_v63  ;;  %8457 = vrot.lane.b32.xlu1 %v7934_v49, %s12706_s21  ;;  %v19045_v25 = vrot.slane %v17100_v21, 7 }
 0x98e   :  { %8850 = vst.msk [vmem:[#allocation5 + $0x1b8] sm:$0x7f] %vm8825_vm4, %v8701_v46  ;;  %v8219_v39 = vsel %vm3890_vm1, %v18538_v11, %v8218_v32  ;;  %v8702_v4 = vsel %vm4180_vm2, %v8700_v51, %v8701_v46  ;;  %v7936_v23 = vsel %vm7808_vm7, %v7744_v58, %v7872_v17  ;;  %v7743_v14 = vadd.f32 %v16840_v60, %v7672_v12 }
 0x98f   :  { %8849 = vst.msk [vmem:[#allocation5 + $0x1a8] sm:$0xff] %vm7176_vm3, %v8702_v4  ;;  %8368 = vst.msk [vmem:[#allocation5 + $0x1b0] sm:$0xff] %vm7176_vm3, %v8219_v39  ;;  %v7746_v5 = vadd.f32 %v16840_v60, %v7675_v7  ;;  %v7745_v32 = vadd.f32 %v16840_v60, %v7674_v20  ;;  %v8221_v46 = vrot.slane %v7936_v23, 7  ;;  %v8704_v29 = vrot.slane %v7936_v23, 1 }
 0x990   :  { %v7748_v16 = vadd.f32 %v16840_v60, %v7677_v10  ;;  %v7747_v63 = vadd.f32 %v16840_v60, %v7676_v30  ;;  %8455 = vrot.lane.b32.xlu0 %v17100_v21, %s12706_s21  ;;  %vm7807_vm8 = vcmp.ge.f32.partialorder %v7743_v14, 0.0  ;;  %v7871_v49 = vmul.f32 0.2, %v7743_v14 }
 0x991   :  { %vm7810_vm9 = vcmp.ge.f32.partialorder %v7746_v5, 0.0  ;;  %v7874_v54 = vmul.f32 0.2, %v7746_v5  ;;  %8852 = vst.msk [vmem:[#allocation5 + $0x1d8] sm:$0x7f] %vm8825_vm4, %v8704_v29  ;;  %vm7809_vm10 = vcmp.ge.f32.partialorder %v7745_v32, 0.0  ;;  %8461 = vrot.lane.b32.xlu1 %v7936_v23, %s12706_s21  ;;  %v7679_v23 = vmul.f32 %v16803_v40, %v16722_v3 }
 0x992   :  { %v7873_v58 = vmul.f32 0.2, %v7745_v32  ;;  %vm7812_vm11 = vcmp.ge.f32.partialorder %v7748_v16, 0.0  ;;  %v7876_v51 = vmul.f32 0.2, %v7748_v16  ;;  %v17140_v17 = vsel %vm7807_vm8, %v7743_v14, %v7871_v49 }
 0x993   :  { %v7938_v44 = vsel %vm7810_vm9, %v7746_v5, %v7874_v54  ;;  %vm7811_vm12 = vcmp.ge.f32.partialorder %v7747_v63, 0.0  ;;  %v7875_v12 = vmul.f32 0.2, %v7747_v63  ;;  %v8220_v7 = vrot.slane %v17140_v17, 7 }
 0x994   :  { %v8703_v20 = vrot.slane %v17140_v17, 1  ;;  %v8224_v39 = vrot.slane %v7938_v44, 7  ;;  %v8707_v4 = vrot.slane %v7938_v44, 1  ;;  %8459 = vrot.lane.b32.xlu0 %v17140_v17, %s12706_s21  ;;  %v17146_v10 = vsel %vm7809_vm10, %v7745_v32, %v7873_v58 }
 0x995   :  { %v7940_v30 = vsel %vm7812_vm11, %v7748_v16, %v7876_v51  ;;  %v17148_v11 = vsel %vm7811_vm12, %v7747_v63, %v7875_v12  ;;  %v8222_v14 = vsel %vm3890_vm1, %v8220_v7, %v8221_v46  ;;  %v8223_v49 = vrot.slane %v17146_v10, 7  ;;  %8465 = vrot.lane.b32.xlu1 %v7938_v44, %s12706_s21 }
 0x996   :  { %v8705_v5 = vsel %vm4180_vm2, %v8703_v20, %v8704_v29  ;;  %8854 = vst.msk [vmem:[#allocation5 + $0x1f8] sm:$0x7f] %vm8825_vm4, %v8707_v4  ;;  %v8706_v54 = vrot.slane %v17146_v10, 1  ;;  %v8227_v32 = vrot.slane %v7940_v30, 7  ;;  %v8710_v3 = vrot.slane %v7940_v30, 1 }
 0x997   :  { %8851 = vst.msk [vmem:[#allocation5 + $0x1c8] sm:$0xff] %vm7176_vm3, %v8705_v5  ;;  %8370 = vst.msk [vmem:[#allocation5 + $0x1d0] sm:$0xff] %vm7176_vm3, %v8222_v14  ;;  %v8226_v16 = vrot.slane %v17148_v11, 7  ;;  %v8709_v46 = vrot.slane %v17148_v11, 1  ;;  %v8225_v29 = vsel %vm3890_vm1, %v8223_v49, %v8224_v39  ;;  %v7750_v58 = vadd.f32 %v16840_v60, %v7679_v23 }
 0x998   :  { %v8708_v63 = vsel %vm4180_vm2, %v8706_v54, %v8707_v4  ;;  %v7678_v51 = vmul.f32 %v16803_v40, %v16717_v26  ;;  %8463 = vrot.lane.b32.xlu0 %v17146_v10, %s12706_s21  ;;  %8372 = vst.msk [vmem:[#allocation5 + $0x1f0] sm:$0xff] %vm7176_vm3, %v8225_v29  ;;  %v7681_v20 = vmul.f32 %v16803_v40, %v16730_v47 }
 0x999   :  { %8853 = vst.msk [vmem:[#allocation5 + $0x1e8] sm:$0xff] %vm7176_vm3, %v8708_v63  ;;  %v8228_v44 = vsel %vm3890_vm1, %v8226_v16, %v8227_v32  ;;  %v8711_v12 = vsel %vm4180_vm2, %v8709_v46, %v8710_v3  ;;  %v7680_v26 = vmul.f32 %v16803_v40, %v16726_v50  ;;  %vm7814_vm13 = vcmp.ge.f32.partialorder %v7750_v58, 0.0  ;;  %8469 = vrot.lane.b32.xlu1 %v7940_v30, %s12706_s21 }
 0x99a   :  { %8856 = vst.msk [vmem:[#allocation5 + $0x218] sm:$0x7f] %vm8825_vm4, %v8710_v3  ;;  %v7878_v39 = vmul.f32 0.2, %v7750_v58  ;;  %v7749_v4 = vadd.f32 %v16840_v60, %v7678_v51  ;;  %v7683_v23 = vmul.f32 %v16803_v40, %v16738_v55  ;;  %v7752_v14 = vadd.f32 %v16840_v60, %v7681_v20 }
 0x99b   :  { %8855 = vst.msk [vmem:[#allocation5 + $0x208] sm:$0xff] %vm7176_vm3, %v8711_v12  ;;  %8374 = vst.msk [vmem:[#allocation5 + $0x210] sm:$0xff] %vm7176_vm3, %v8228_v44  ;;  %v7751_v47 = vadd.f32 %v16840_v60, %v7680_v26  ;;  %v7682_v50 = vmul.f32 %v16803_v40, %v16734_v43  ;;  %v7685_v5 = vmul.f32 %v16803_v40, %v16746_v22 }
 0x99c   :  { %v7942_v54 = vsel %vm7814_vm13, %v7750_v58, %v7878_v39  ;;  %vm7813_vm14 = vcmp.ge.f32.partialorder %v7749_v4, 0.0  ;;  %v7877_v32 = vmul.f32 0.2, %v7749_v4  ;;  %v7754_v3 = vadd.f32 %v16840_v60, %v7683_v23  ;;  %8467 = vrot.lane.b32.xlu0 %v17148_v11, %s12706_s21 }
 0x99d   :  { %v8230_v55 = vrot.slane %v7942_v54, 7  ;;  %v8713_v30 = vrot.slane %v7942_v54, 1  ;;  %vm7816_vm15 = vcmp.ge.f32.partialorder %v7752_v14, 0.0  ;;  %v7880_v46 = vmul.f32 0.2, %v7752_v14  ;;  %8473 = vrot.lane.b32.xlu1 %v7942_v54, %s12706_s21 }
 0x99e   :  { %v17199_v29 = vsel %vm7813_vm14, %v7749_v4, %v7877_v32  ;;  %vm7815_vm0 = vcmp.ge.f32.partialorder %v7751_v47, 0.0  ;;  %v7879_v63 = vmul.f32 0.2, %v7751_v47  ;;  %vm7818_vm5 = vcmp.ge.f32.partialorder %v7754_v3, 0.0 }
 0x99f   :  { %8858 = vst.msk [vmem:[#allocation5 + $0x278] sm:$0x7f] %vm8825_vm4, %v8713_v30  ;;  %v8229_v43 = vrot.slane %v17199_v29, 7  ;;  %v8712_v22 = vrot.slane %v17199_v29, 1  ;;  %v7944_v58 = vsel %vm7816_vm15, %v7752_v14, %v7880_v46  ;;  %v7882_v51 = vmul.f32 0.2, %v7754_v3 }
 0x9a0   :  { %v8233_v44 = vrot.slane %v7944_v58, 7  ;;  %v8716_v12 = vrot.slane %v7944_v58, 1  ;;  %v17205_v20 = vsel %vm7815_vm0, %v7751_v47, %v7879_v63  ;;  %v7753_v26 = vadd.f32 %v16840_v60, %v7682_v50  ;;  %8471 = vrot.lane.b32.xlu0 %v17199_v29, %s12706_s21 }
 0x9a1   :  { %v8231_v39 = vsel %vm3890_vm1, %v8229_v43, %v8230_v55  ;;  %v8714_v4 = vsel %vm4180_vm2, %v8712_v22, %v8713_v30  ;;  %v8232_v23 = vrot.slane %v17205_v20, 7  ;;  %v8715_v14 = vrot.slane %v17205_v20, 1  ;;  %8477 = vrot.lane.b32.xlu1 %v7944_v58, %s12706_s21 }
 0x9a2   :  { %8857 = vst.msk [vmem:[#allocation5 + $0x268] sm:$0xff] %vm7176_vm3, %v8714_v4  ;;  %8376 = vst.msk [vmem:[#allocation5 + $0x270] sm:$0xff] %vm7176_vm3, %v8231_v39  ;;  %v7946_v47 = vsel %vm7818_vm5, %v7754_v3, %v7882_v51  ;;  %vm7817_vm6 = vcmp.ge.f32.partialorder %v7753_v26, 0.0  ;;  %v7881_v50 = vmul.f32 0.2, %v7753_v26  ;;  %v7756_v54 = vadd.f32 %v16840_v60, %v7685_v5 }
 0x9a3   :  { %8860 = vst.msk [vmem:[#allocation5 + $0x298] sm:$0x7f] %vm8825_vm4, %v8716_v12  ;;  %v8234_v32 = vsel %vm3890_vm1, %v8232_v23, %v8233_v44  ;;  %v8717_v55 = vsel %vm4180_vm2, %v8715_v14, %v8716_v12  ;;  %v8236_v30 = vrot.slane %v7946_v47, 7  ;;  %v8719_v46 = vrot.slane %v7946_v47, 1 }
 0x9a4   :  { %8859 = vst.msk [vmem:[#allocation5 + $0x288] sm:$0xff] %vm7176_vm3, %v8717_v55  ;;  %8378 = vst.msk [vmem:[#allocation5 + $0x290] sm:$0xff] %vm7176_vm3, %v8234_v32  ;;  %v17228_v63 = vsel %vm7817_vm6, %v7753_v26, %v7881_v50  ;;  %vm7820_vm7 = vcmp.ge.f32.partialorder %v7756_v54, 0.0  ;;  %v7884_v3 = vmul.f32 0.2, %v7756_v54  ;;  %v7684_v5 = vmul.f32 %v16803_v40, %v16742_v0  ;;  %8475 = vrot.lane.b32.xlu0 %v17205_v20, %s12706_s21 }
 0x9a5   :  { %8862 = vst.msk [vmem:[#allocation5 + $0x2b8] sm:$0x7f] %vm8825_vm4, %v8719_v46  ;;  %v18545_v22 = vrot.slane %v17228_v63, 7  ;;  %v8718_v58 = vrot.slane %v17228_v63, 1  ;;  %v7687_v51 = vmul.f32 %v16803_v40, %v16754_v38  ;;  %v7686_v44 = vmul.f32 %v16803_v40, %v16750_v52  ;;  %8481 = vrot.lane.b32.xlu1 %v7946_v47, %s12706_s21 }
 0x9a6   :  { %v7948_v12 = vsel %vm7820_vm7, %v7756_v54, %v7884_v3  ;;  %v7755_v26 = vadd.f32 %v16840_v60, %v7684_v5  ;;  %v7689_v0 = vmul.f32 %v16803_v40, %v16762_v48  ;;  %v7688_v39 = vmul.f32 %v16803_v40, %v16758_v35 }
 0x9a7   :  { %v8237_v4 = vsel %vm3890_vm1, %v18545_v22, %v8236_v30  ;;  %v8720_v38 = vsel %vm4180_vm2, %v8718_v58, %v8719_v46  ;;  %v8239_v14 = vrot.slane %v7948_v12, 7  ;;  %v8722_v50 = vrot.slane %v7948_v12, 1 }
 0x9a8   :  { %8861 = vst.msk [vmem:[#allocation5 + $0x2a8] sm:$0xff] %vm7176_vm3, %v8720_v38  ;;  %8380 = vst.msk [vmem:[#allocation5 + $0x2b0] sm:$0xff] %vm7176_vm3, %v8237_v4  ;;  %vm7819_vm8 = vcmp.ge.f32.partialorder %v7755_v26, 0.0  ;;  %v7883_v52 = vmul.f32 0.2, %v7755_v26  ;;  %v7758_v48 = vadd.f32 %v16840_v60, %v7687_v51  ;;  %v7757_v35 = vadd.f32 %v16840_v60, %v7686_v44  ;;  %8479 = vrot.lane.b32.xlu0 %v17228_v63, %s12706_s21 }
 0x9a9   :  { %8864 = vst.msk [vmem:[#allocation5 + $0x2d8] sm:$0x7f] %vm8825_vm4, %v8722_v50  ;;  %v7760_v47 = vadd.f32 %v16840_v60, %v7689_v0  ;;  %v7759_v54 = vadd.f32 %v16840_v60, %v7688_v39  ;;  %v7691_v32 = vmul.f32 %v16803_v40, %v16770_v28  ;;  %v7690_v55 = vmul.f32 %v16803_v40, %v16766_v24 }
 0x9aa   :  { %v17264_v30 = vsel %vm7819_vm8, %v7755_v26, %v7883_v52  ;;  %vm7822_vm9 = vcmp.ge.f32.partialorder %v7758_v48, 0.0  ;;  %v7886_v46 = vmul.f32 0.2, %v7758_v48  ;;  %vm7821_vm10 = vcmp.ge.f32.partialorder %v7757_v35, 0.0  ;;  %8485 = vrot.lane.b32.xlu1 %v7948_v12, %s12706_s21 }
 0x9ab   :  { %v18544_v3 = vrot.slane %v17264_v30, 7  ;;  %v8721_v5 = vrot.slane %v17264_v30, 1  ;;  %v7885_v58 = vmul.f32 0.2, %v7757_v35  ;;  %vm7824_vm11 = vcmp.ge.f32.partialorder %v7760_v47, 0.0 }
 0x9ac   :  { %v7950_v51 = vsel %vm7822_vm9, %v7758_v48, %v7886_v46  ;;  %v7888_v44 = vmul.f32 0.2, %v7760_v47  ;;  %vm7823_vm12 = vcmp.ge.f32.partialorder %v7759_v54, 0.0  ;;  %v7887_v28 = vmul.f32 0.2, %v7759_v54  ;;  %8483 = vrot.lane.b32.xlu0 %v17264_v30, %s12706_s21 }
 0x9ad   :  { %v8240_v24 = vsel %vm3890_vm1, %v18544_v3, %v8239_v14  ;;  %v8723_v26 = vsel %vm4180_vm2, %v8721_v5, %v8722_v50  ;;  %v8242_v12 = vrot.slane %v7950_v51, 7  ;;  %v8725_v0 = vrot.slane %v7950_v51, 1 }
 0x9ae   :  { %8863 = vst.msk [vmem:[#allocation5 + $0x2c8] sm:$0xff] %vm7176_vm3, %v8723_v26  ;;  %8382 = vst.msk [vmem:[#allocation5 + $0x2d0] sm:$0xff] %vm7176_vm3, %v8240_v24  ;;  %v17278_v39 = vsel %vm7821_vm10, %v7757_v35, %v7885_v58  ;;  %v7952_v4 = vsel %vm7824_vm11, %v7760_v47, %v7888_v44  ;;  %v17280_v38 = vsel %vm7823_vm12, %v7759_v54, %v7887_v28  ;;  %8489 = vrot.lane.b32.xlu1 %v7950_v51, %s12706_s21  ;;  %vm8342_vm10 = vcmask 523265  }
 0x9af   :  { %v7762_v52 = vadd.f32 %v16840_v60, %v7691_v32  ;;  %8866 = vst.msk [vmem:[#allocation5 + $0x2f8] sm:$0x7f] %vm8825_vm4, %v8725_v0  ;;  %v18543_v14 = vrot.slane %v17278_v39, 7  ;;  %v8724_v50 = vrot.slane %v17278_v39, 1  ;;  %v8245_v48 = vrot.slane %v7952_v4, 7 }
 0x9b0   :  { %v8728_v46 = vrot.slane %v7952_v4, 1  ;;  %v18539_v5 = vrot.slane %v17280_v38, 7  ;;  %v8727_v35 = vrot.slane %v17280_v38, 1  ;;  %8487 = vrot.lane.b32.xlu0 %v17278_v39, %s12706_s21  ;;  %v7761_v58 = vadd.f32 %v16840_v60, %v7690_v55  ;;  %8347 = vst.msk [vmem:[#allocation5 + $0x60] sm:$0xfe] %vm8342_vm10, %v8187_v2 }
 0x9b1   :  { %vm7826_vm13 = vcmp.ge.f32.partialorder %v7762_v52, 0.0  ;;  %v7890_v47 = vmul.f32 0.2, %v7762_v52  ;;  %v8243_v54 = vsel %vm3890_vm1, %v18543_v14, %v8242_v12  ;;  %v8726_v32 = vsel %vm4180_vm2, %v8724_v50, %v8725_v0  ;;  %8349 = vst.msk [vmem:[#allocation5 + $0x80] sm:$0xfe] %vm8342_vm10, %v8190_v15 }
 0x9b2   :  { %8868 = vst.msk [vmem:[#allocation5 + $0x318] sm:$0x7f] %vm8825_vm4, %v8728_v46  ;;  %v7693_v51 = vmul.f32 %v16803_v40, %v16778_v33  ;;  %v8246_v44 = vsel %vm3890_vm1, %v18539_v5, %v8245_v48  ;;  %v8729_v28 = vsel %vm4180_vm2, %v8727_v35, %v8728_v46  ;;  %v7692_v26 = vmul.f32 %v16803_v40, %v16774_v41  ;;  %v19033_v48 = vld [vmem:[#allocation61_spill] sm:$0xff]  ;;  %v19034_v46 = vld [vmem:[#allocation103_spill] sm:$0xff]  ;;  %v19035_v35 = vld [vmem:[#allocation64_spill] sm:$0xff] }
 0x9b3   :  { %8865 = vst.msk [vmem:[#allocation5 + $0x2e8] sm:$0xff] %vm7176_vm3, %v8726_v32  ;;  %8384 = vst.msk [vmem:[#allocation5 + $0x2f0] sm:$0xff] %vm7176_vm3, %v8243_v54  ;;  %v7954_v24 = vsel %vm7826_vm13, %v7762_v52, %v7890_v47  ;;  %8493 = vrot.lane.b32.xlu1 %v7952_v4, %s12706_s21  ;;  %vm7825_vm14 = vcmp.ge.f32.partialorder %v7761_v58, 0.0  ;;  %v7889_v12 = vmul.f32 0.2, %v7761_v58  ;;  %v7695_v52 = vmul.f32 %v16803_v40, %v19033_v48  ;;  %v19036_v54 = vld [vmem:[#allocation17_spill] sm:$0xff] }
 0x9b4   :  { %8867 = vst.msk [vmem:[#allocation5 + $0x308] sm:$0xff] %vm7176_vm3, %v8729_v28  ;;  %8386 = vst.msk [vmem:[#allocation5 + $0x310] sm:$0xff] %vm7176_vm3, %v8246_v44  ;;  %v8248_v33 = vrot.slane %v7954_v24, 7  ;;  %v8731_v55 = vrot.slane %v7954_v24, 1  ;;  %v7764_v0 = vadd.f32 %v16840_v60, %v7693_v51  ;;  %v7763_v50 = vadd.f32 %v16840_v60, %v7692_v26  ;;  %8491 = vrot.lane.b32.xlu0 %v17280_v38, %s12706_s21  ;;  %v19037_v51 = vld [vmem:[#allocation70_spill] sm:$0xff] }
 0x9b5   :  { %v7694_v41 = vmul.f32 %v16803_v40, %v19034_v46  ;;  %v17319_v4 = vsel %vm7825_vm14, %v7761_v58, %v7889_v12  ;;  %v7697_v47 = vmul.f32 %v16803_v40, %v19035_v35  ;;  %v7696_v32 = vmul.f32 %v16803_v40, %v19036_v54  ;;  %8351 = vst.msk [vmem:[#allocation5 + $0xa0] sm:$0xfe] %vm8342_vm10, %v8193_v57 }
 0x9b6   :  { %8870 = vst.msk [vmem:[#allocation5 + $0x338] sm:$0x7f] %vm8825_vm4, %v8731_v55  ;;  %v7699_v44 = vmul.f32 %v16803_v40, %v19037_v51  ;;  %v18540_v28 = vrot.slane %v17319_v4, 7  ;;  %v8730_v26 = vrot.slane %v17319_v4, 1  ;;  %vm7828_vm15 = vcmp.ge.f32.partialorder %v7764_v0, 0.0 }
 0x9b7   :  { %v7892_v48 = vmul.f32 0.2, %v7764_v0  ;;  %8497 = vrot.lane.b32.xlu1 %v7954_v24, %s12706_s21  ;;  %vm7827_vm0 = vcmp.ge.f32.partialorder %v7763_v50, 0.0  ;;  %v7891_v58 = vmul.f32 0.2, %v7763_v50  ;;  %v7766_v12 = vadd.f32 %v16840_v60, %v7695_v52 }
 0x9b8   :  { %v7765_v46 = vadd.f32 %v16840_v60, %v7694_v41  ;;  %v8249_v35 = vsel %vm3890_vm1, %v18540_v28, %v8248_v33  ;;  %v8732_v40 = vsel %vm4180_vm2, %v8730_v26, %v8731_v55  ;;  %v7768_v51 = vadd.f32 %v16840_v60, %v7697_v47  ;;  %8495 = vrot.lane.b32.xlu0 %v17319_v4, %s12706_s21  ;;  %v17350_v47 = vld [vmem:[%s18360_s14] ss:$0 sm:$0xff] }
 0x9b9   :  { %v7956_v54 = vsel %vm7828_vm15, %v7764_v0, %v7892_v48  ;;  %8869 = vst.msk [vmem:[#allocation5 + $0x328] sm:$0xff] %vm7176_vm3, %v8732_v40  ;;  %8388 = vst.msk [vmem:[#allocation5 + $0x330] sm:$0xff] %vm7176_vm3, %v8249_v35  ;;  %v17341_v5 = vsel %vm7827_vm0, %v7763_v50, %v7891_v58  ;;  %vm7830_vm5 = vcmp.ge.f32.partialorder %v7766_v12, 0.0  ;;  %v7894_v55 = vmul.f32 0.2, %v7766_v12 }
 0x9ba   :  { %v8251_v24 = vrot.slane %v7956_v54, 7  ;;  %v8734_v52 = vrot.slane %v7956_v54, 1  ;;  %v18542_v41 = vrot.slane %v17341_v5, 7  ;;  %v8733_v33 = vrot.slane %v17341_v5, 1  ;;  %8353 = vst.msk [vmem:[#allocation5 + $0xc0] sm:$0xfe] %vm8342_vm10, %v8196_v59 }
 0x9bb   :  { %vm7829_vm6 = vcmp.ge.f32.partialorder %v7765_v46, 0.0  ;;  %8501 = vrot.lane.b32.xlu1 %v7956_v54, %s12706_s21  ;;  %v7893_v60 = vmul.f32 0.2, %v7765_v46  ;;  %vm7832_vm7 = vcmp.ge.f32.partialorder %v7768_v51, 0.0  ;;  %v7896_v0 = vmul.f32 0.2, %v7768_v51 }
 0x9bc   :  { %8872 = vst.msk [vmem:[#allocation5 + $0x358] sm:$0x7f] %vm8825_vm4, %v8734_v52  ;;  %v7767_v50 = vadd.f32 %v17350_v47, %v7696_v32  ;;  %v8252_v26 = vsel %vm3890_vm1, %v18542_v41, %v8251_v24  ;;  %v8735_v48 = vsel %vm4180_vm2, %v8733_v33, %v8734_v52  ;;  %v7958_v58 = vsel %vm7830_vm5, %v7766_v12, %v7894_v55  ;;  %v19041_v41 = vld [vmem:[#allocation68_spill] sm:$0xff] }
 0x9bd   :  { %v7770_v35 = vadd.f32 %v17350_v47, %v7699_v44  ;;  %8871 = vst.msk [vmem:[#allocation5 + $0x348] sm:$0xff] %vm7176_vm3, %v8735_v48  ;;  %8499 = vrot.lane.b32.xlu0 %v17341_v5, %s12706_s21  ;;  %8390 = vst.msk [vmem:[#allocation5 + $0x350] sm:$0xff] %vm7176_vm3, %v8252_v26  ;;  %v8254_v40 = vrot.slane %v7958_v58, 7  ;;  %v8737_v54 = vrot.slane %v7958_v58, 1  ;;  %v17363_v32 = vsel %vm7829_vm6, %v7765_v46, %v7893_v60  ;;  %v17377_v60 = vld [vmem:[%s18359_s13] ss:$0 sm:$0xff] }
 0x9be   :  { %v7960_v28 = vsel %vm7832_vm7, %v7768_v51, %v7896_v0  ;;  %v18541_v24 = vrot.slane %v17363_v32, 7  ;;  %v8736_v52 = vrot.slane %v17363_v32, 1  ;;  %vm7831_vm8 = vcmp.ge.f32.partialorder %v7767_v50, 0.0  ;;  %v19038_v0 = vld [vmem:[#allocation24_spill] sm:$0xff]  ;;  %v19039_v48 = vld [vmem:[#allocation89_spill] sm:$0xff] }
 0x9bf   :  { %v8257_v12 = vrot.slane %v7960_v28, 7  ;;  %v8740_v33 = vrot.slane %v7960_v28, 1  ;;  %8874 = vst.msk [vmem:[#allocation5 + $0x378] sm:$0x7f] %vm8825_vm4, %v8737_v54  ;;  %8505 = vrot.lane.b32.xlu1 %v7958_v58, %s12706_s21  ;;  %v7895_v44 = vmul.f32 0.2, %v7767_v50  ;;  %v7698_v26 = vmul.f32 %v17377_v60, %v19038_v0 }
 0x9c0   :  { %vm7834_vm9 = vcmp.ge.f32.partialorder %v7770_v35, 0.0  ;;  %v7898_v55 = vmul.f32 0.2, %v7770_v35  ;;  %v8255_v46 = vsel %vm3890_vm1, %v18541_v24, %v8254_v40  ;;  %v8738_v51 = vsel %vm4180_vm2, %v8736_v52, %v8737_v54  ;;  %v19040_v52 = vld [vmem:[#allocation23_spill] sm:$0xff]  ;;  %8355 = vst.msk [vmem:[#allocation5 + $0xe0] sm:$0xfe] %vm8342_vm10, %v8199_v45 }
 0x9c1   :  { %8876 = vst.msk [vmem:[#allocation5 + $0x398] sm:$0x7f] %vm8825_vm4, %v8740_v33  ;;  %v7701_v58 = vmul.f32 %v17377_v60, %v19039_v48  ;;  %8503 = vrot.lane.b32.xlu0 %v17363_v32, %s12706_s21  ;;  %v7959_v40 = vsel %vm7831_vm8, %v7767_v50, %v7895_v44  ;;  %v7700_v24 = vmul.f32 %v17377_v60, %v19040_v52  ;;  %v19048_v2 = vrot.slane %v17278_v39, 7  ;;  %v19055_v39 = vld [vmem:[#allocation121_spill] sm:$0xff] }
 0x9c2   :  { %8873 = vst.msk [vmem:[#allocation5 + $0x368] sm:$0xff] %vm7176_vm3, %v8738_v51  ;;  %8392 = vst.msk [vmem:[#allocation5 + $0x370] sm:$0xff] %vm7176_vm3, %v8255_v46  ;;  %v17387_v54 = vsel %vm7834_vm9, %v7770_v35, %v7898_v55  ;;  %v7703_v14 = vmul.f32 %v17377_v60, %v19041_v41  ;;  %v8256_v0 = vrot.slane %v7959_v40, 7  ;;  %v8739_v3 = vrot.slane %v7959_v40, 1  ;;  %v19042_v46 = vld [vmem:[#allocation18_spill] sm:$0xff] }
 0x9c3   :  { %v8260_v48 = vrot.slane %v17387_v54, 7  ;;  %v8743_v51 = vrot.slane %v17387_v54, 1  ;;  %8509 = vrot.lane.b32.xlu1 %v7960_v28, %s12706_s21  ;;  %v7769_v22 = vadd.f32 %v17350_v47, %v7698_v26  ;;  %v7772_v50 = vadd.f32 %v17350_v47, %v7701_v58  ;;  %8357 = vst.msk [vmem:[#allocation5 + $0x100] sm:$0xfe] %vm8342_vm10, %v8202_v62  ;;  %8359 = vst.msk [vmem:[#allocation5 + $0x120] sm:$0xfe] %vm8342_vm10, %v8205_v18 }
 0x9c4   :  { %v7771_v35 = vadd.f32 %v17350_v47, %v7700_v24  ;;  %v7774_v44 = vadd.f32 %v17350_v47, %v7703_v14  ;;  %v8258_v55 = vsel %vm3890_vm1, %v8256_v0, %v8257_v12  ;;  %v8741_v41 = vsel %vm4180_vm2, %v8739_v3, %v8740_v33  ;;  %8361 = vst.msk [vmem:[#allocation5 + $0x140] sm:$0xfe] %vm8342_vm10, %v8208_v9  ;;  %v19058_v26 = vld [vmem:[#allocation102_spill] sm:$0xff] }
 0x9c5   :  { %8878 = vst.msk [vmem:[#allocation5 + $0x3b8] sm:$0x7f] %vm8825_vm4, %v8743_v51  ;;  %v7702_v52 = vmul.f32 %v17377_v60, %v19042_v46  ;;  %8507 = vrot.lane.b32.xlu0 %v7959_v40, %s12706_s21  ;;  %vm7833_vm11 = vcmp.ge.f32.partialorder %v7769_v22, 0.0  ;;  %v7897_v14 = vmul.f32 0.2, %v7769_v22  ;;  %vm7836_vm12 = vcmp.ge.f32.partialorder %v7772_v50, 0.0 }
 0x9c6   :  { %8875 = vst.msk [vmem:[#allocation5 + $0x388] sm:$0xff] %vm7176_vm3, %v8741_v41  ;;  %8394 = vst.msk [vmem:[#allocation5 + $0x390] sm:$0xff] %vm7176_vm3, %v8258_v55  ;;  %v7900_v28 = vmul.f32 0.2, %v7772_v50  ;;  %v19043_v3 = vrot.slane %v16870_v6, 7  ;;  %v19044_v24 = vrot.slane %v16876_v61, 7  ;;  %v7709_v58 = vmul.f32 %v17377_v60, %v19058_v26 }
 0x9c7   :  { %8363 = vst.msk [vmem:[#allocation5 + $0x160] sm:$0xfe] %vm8342_vm10, %v8211_v31  ;;  %8365 = vst.msk [vmem:[#allocation5 + $0x180] sm:$0xfe] %vm8342_vm10, %v8214_v13  ;;  %v19046_v6 = vrot.slane %v17228_v63, 7  ;;  %v19047_v61 = vrot.slane %v17264_v30, 7  ;;  %8513 = vrot.lane.b32.xlu1 %v17387_v54, %s12706_s21  ;;  %v7961_v42 = vsel %vm7833_vm11, %v7769_v22, %v7897_v14  ;;  %v7773_v56 = vadd.f32 %v17350_v47, %v7702_v52 }
 0x9c8   :  { %8345 = vst.msk [vmem:[#allocation5 + $0x40] sm:$0xfe] %vm8342_vm10, %v19043_v3  ;;  %8343 = vst.msk [vmem:[#allocation5 + $0x20] sm:$0xfe] %vm8342_vm10, %v19044_v24  ;;  %v19049_v37 = vrot.slane %v17280_v38, 7  ;;  %v19050_v15 = vrot.slane %v17319_v4, 7  ;;  %v7964_v45 = vsel %vm7836_vm12, %v7772_v50, %v7900_v28 }
 0x9c9   :  { %8367 = vst.msk [vmem:[#allocation5 + $0x1a0] sm:$0xfe] %vm8342_vm10, %v19045_v25  ;;  %8369 = vst.msk [vmem:[#allocation5 + $0x1c0] sm:$0xfe] %vm8342_vm10, %v8220_v7  ;;  %v19051_v34 = vrot.slane %v17341_v5, 7  ;;  %v19052_v57 = vrot.slane %v17363_v32, 7  ;;  %8511 = vrot.lane.b32.xlu0 %v7961_v42, %s12706_s21 }
 0x9ca   :  { %8371 = vst.msk [vmem:[#allocation5 + $0x1e0] sm:$0xfe] %vm8342_vm10, %v8223_v49  ;;  %8373 = vst.msk [vmem:[#allocation5 + $0x200] sm:$0xfe] %vm8342_vm10, %v8226_v16  ;;  %vm7835_vm13 = vcmp.ge.f32.partialorder %v7771_v35, 0.0  ;;  %vm7838_vm14 = vcmp.ge.f32.partialorder %v7774_v44, 0.0 }
 0x9cb   :  { %8375 = vst.msk [vmem:[#allocation5 + $0x260] sm:$0xfe] %vm8342_vm10, %v8229_v43  ;;  %8377 = vst.msk [vmem:[#allocation5 + $0x280] sm:$0xfe] %vm8342_vm10, %v8232_v23  ;;  %v7899_v27 = vmul.f32 0.2, %v7771_v35  ;;  %8517 = vrot.lane.b32.xlu1 %v7964_v45, %s12706_s21 }
 0x9cc   :  { %8379 = vst.msk [vmem:[#allocation5 + $0x2a0] sm:$0xfe] %vm8342_vm10, %v19046_v6  ;;  %8381 = vst.msk [vmem:[#allocation5 + $0x2c0] sm:$0xfe] %vm8342_vm10, %v19047_v61  ;;  %v7902_v59 = vmul.f32 0.2, %v7774_v44 }
 0x9cd   :  { %8383 = vst.msk [vmem:[#allocation5 + $0x2e0] sm:$0xfe] %vm8342_vm10, %v19048_v2  ;;  %8385 = vst.msk [vmem:[#allocation5 + $0x300] sm:$0xfe] %vm8342_vm10, %v19049_v37  ;;  %vm8599_vm15 = vcmask 1048064   ;;  %v8259_v62 = vrot.slane %v7961_v42, 7  ;;  %v7963_v9 = vsel %vm7835_vm13, %v7771_v35, %v7899_v27  ;;  %v7780_v35 = vadd.f32 %v17350_v47, %v7709_v58 }
 0x9ce   :  { %8387 = vst.msk [vmem:[#allocation5 + $0x320] sm:$0xfe] %vm8342_vm10, %v19050_v15  ;;  %8389 = vst.msk [vmem:[#allocation5 + $0x340] sm:$0xfe] %vm8342_vm10, %v19051_v34  ;;  %v8742_v36 = vrot.slane %v7961_v42, 1  ;;  %v8263_v18 = vrot.slane %v7964_v45, 7  ;;  %v7966_v1 = vsel %vm7838_vm14, %v7774_v44, %v7902_v59  ;;  %8515 = vrot.lane.b32.xlu0 %v7963_v9, %s12706_s21  ;;  %v8412_v55 = vpop.permute.xlu1 %8411 }
 0x9cf   :  { %8391 = vst.msk [vmem:[#allocation5 + $0x360] sm:$0xfe] %vm8342_vm10, %v19052_v57  ;;  %8393 = vst.msk [vmem:[#allocation5 + $0x380] sm:$0xfe] %vm8342_vm10, %v8256_v0  ;;  %v8746_v8 = vrot.slane %v7964_v45, 1  ;;  %vm7837_vm0 = vcmp.ge.f32.partialorder %v7773_v56, 0.0  ;;  %v8261_v53 = vsel %vm3890_vm1, %v8259_v62, %v8260_v48  ;;  %8521 = vrot.lane.b32.xlu1 %v7966_v1, %s12706_s21 }
 0x9d0   :  { %v7901_v31 = vmul.f32 0.2, %v7773_v56  ;;  %v8744_v13 = vsel %vm4180_vm2, %v8742_v36, %v8743_v51  ;;  %v8262_v21 = vrot.slane %v7963_v9, 7  ;;  %v8745_v11 = vrot.slane %v7963_v9, 1  ;;  %8395 = vst.msk [vmem:[#allocation5 + $0x3a0] sm:$0xfe] %vm8342_vm10, %v8259_v62 }
 0x9d1   :  { %8880 = vst.msk [vmem:[#allocation5 + $0x3d8] sm:$0x7f] %vm8825_vm4, %v8746_v8  ;;  %v8266_v17 = vrot.slane %v7966_v1, 7  ;;  %v8749_v7 = vrot.slane %v7966_v1, 1  ;;  %v19053_v49 = vld [vmem:[#allocation90_spill] sm:$0xff]  ;;  %v19056_v38 = vld [vmem:[#allocation87_spill] sm:$0xff] }
 0x9d2   :  { %8877 = vst.msk [vmem:[#allocation5 + $0x3a8] sm:$0xff] %vm7176_vm3, %v8744_v13  ;;  %8396 = vst.msk [vmem:[#allocation5 + $0x3b0] sm:$0xff] %vm7176_vm3, %v8261_v53  ;;  %v7965_v10 = vsel %vm7837_vm0, %v7773_v56, %v7901_v31  ;;  %v7705_v16 = vmul.f32 %v17377_v60, %v19053_v49  ;;  %v8264_v29 = vsel %vm3890_vm1, %v8262_v21, %v8263_v18  ;;  %v19054_v22 = vld [vmem:[#allocation26_spill] sm:$0xff]  ;;  %v19057_v4 = vld [vmem:[#allocation45_spill] sm:$0xff]  ;;  %vm7844_vm7 = vcmp.ge.f32.partialorder %v7780_v35, 0.0  ;;  %v8414_v15 = vpop.permute.xlu1 %8413 }
 0x9d3   :  { %v8747_v43 = vsel %vm4180_vm2, %v8745_v11, %v8746_v8  ;;  %v8265_v20 = vrot.slane %v7965_v10, 7  ;;  %v8748_v23 = vrot.slane %v7965_v10, 1  ;;  %8397 = vst.msk [vmem:[#allocation5 + $0x3c0] sm:$0xfe] %vm8342_vm10, %v8262_v21  ;;  %v7704_v30 = vmul.f32 %v17377_v60, %v19054_v22  ;;  %v19059_v40 = vld [vmem:[#allocation104_spill] sm:$0xff]  ;;  %8519 = vrot.lane.b32.xlu0 %v7965_v10, %s12706_s21  ;;  %v12457_v22 = vld [vmem:[%s18361_s15 + $0xc0] sm:$0xff]  }
 0x9d4   :  { %8879 = vst.msk [vmem:[#allocation5 + $0x3c8] sm:$0xff] %vm7176_vm3, %v8747_v43  ;;  %8398 = vst.msk [vmem:[#allocation5 + $0x3d0] sm:$0xff] %vm7176_vm3, %v8264_v29  ;;  %v7776_v63 = vadd.f32 %v17350_v47, %v7705_v16  ;;  %v7636_v5 = vmul.f32 %v19056_v38, %v19055_v39  ;;  %v7635_v32 = vmul.f32 %v19056_v38, %v19057_v4  ;;  %v7908_v6 = vmul.f32 0.2, %v7780_v35  ;;  %v8898_v16 = vld [vmem:[#allocation5 + $0x48] sm:$0xff]  ;;  %v8900_v29 = vld [vmem:[#allocation5 + $0x58] sm:$0xff] }
 0x9d5   :  { %8882 = vst.msk [vmem:[#allocation5 + $0x3f8] sm:$0x7f] %vm8825_vm4, %v8749_v7  ;;  %v8267_v12 = vsel %vm3890_vm1, %v8265_v20, %v8266_v17  ;;  %v8750_v33 = vsel %vm4180_vm2, %v8748_v23, %v8749_v7  ;;  %v7708_v54 = vmul.f32 %v17377_v60, %v19059_v40  ;;  %v7775_v48 = vadd.f32 %v17350_v47, %v7704_v30 }
 0x9d6   :  { %8399 = vst.msk [vmem:[#allocation5 + $0x3e0] sm:$0xfe] %vm8342_vm10, %v8265_v20  ;;  %vm7840_vm5 = vcmp.ge.f32.partialorder %v7776_v63, 0.0  ;;  %v7904_v0 = vmul.f32 0.2, %v7776_v63  ;;  %v7707_v51 = vmul.f32 %v17377_v60, %v7636_v5  ;;  %v7706_v50 = vmul.f32 %v17377_v60, %v7635_v32  ;;  %v8408_v60 = vpop.permute.xlu0 %8407  ;;  %v12458_v5 = vld [vmem:[%s18361_s15 + $0xc8] sm:$0xff]  }
 0x9d7   :  { %8881 = vst.msk [vmem:[#allocation5 + $0x3e8] sm:$0xff] %vm7176_vm3, %v8750_v33  ;;  %8400 = vst.msk [vmem:[#allocation5 + $0x3f0] sm:$0xff] %vm7176_vm3, %v8267_v12  ;;  %v7779_v44 = vadd.f32 %v17350_v47, %v7708_v54  ;;  %vm7839_vm6 = vcmp.ge.f32.partialorder %v7775_v48, 0.0  ;;  %v7903_v46 = vmul.f32 0.2, %v7775_v48  ;;  %v7972_v34 = vsel %vm7844_vm7, %v7780_v35, %v7908_v6  ;;  %v8418_v13 = vpop.permute.xlu1 %8417  ;;  %v8902_v12 = vld [vmem:[#allocation5 + $0x68] sm:$0xff] }
 0x9d8   :  { %v7968_v41 = vsel %vm7840_vm5, %v7776_v63, %v7904_v0  ;;  %v7778_v52 = vadd.f32 %v17350_v47, %v7707_v51  ;;  %8602 = vst.msk [vmem:[#allocation5 + $0x40] sm:$0xff] %vm8599_vm15, %v8412_v55  ;;  %v7777_v3 = vadd.f32 %v17350_v47, %v7706_v50  ;;  %8600 = vst.msk [vmem:[#allocation5 + $0x20] sm:$0xff] %vm8599_vm15, %v8408_v60  ;;  %v8275_v36 = vrot.slane %v7972_v34, 7  ;;  %v8904_v33 = vld [vmem:[#allocation5 + $0x78] sm:$0xff]  ;;  %v12459_v54 = vld [vmem:[%s18361_s15 + $0xd0] sm:$0xff]  }
 0x9d9   :  { %v8269_v14 = vrot.slane %v7968_v41, 7  ;;  %v8752_v28 = vrot.slane %v7968_v41, 1  ;;  %8525 = vrot.lane.b32.xlu1 %v7968_v41, %s12706_s21  ;;  %v7967_v24 = vsel %vm7839_vm6, %v7775_v48, %v7903_v46  ;;  %vm7843_vm11 = vcmp.ge.f32.partialorder %v7779_v44, 0.0  ;;  %8603 = vst.msk [vmem:[#allocation5 + $0x50] sm:$0xff] %vm8599_vm15, %v8414_v15  ;;  %8605 = vst.msk [vmem:[#allocation5 + $0x70] sm:$0xff] %vm8599_vm15, %v8418_v13  ;;  %v12460_v50 = vld [vmem:[%s18361_s15 + $0xd8] sm:$0xff]  }
 0x9da   :  { %vm7842_vm8 = vcmp.ge.f32.partialorder %v7778_v52, 0.0  ;;  %v7906_v25 = vmul.f32 0.2, %v7778_v52  ;;  %v8268_v61 = vrot.slane %v7967_v24, 7  ;;  %v8751_v2 = vrot.slane %v7967_v24, 1  ;;  %8523 = vrot.lane.b32.xlu0 %v7967_v24, %s12706_s21  ;;  %v8410_v56 = vpop.permute.xlu0 %8409  ;;  %v8906_v41 = vld [vmem:[#allocation5 + $0x88] sm:$0xff] }
 0x9db   :  { %8884 = vst.msk [vmem:[#allocation5 + $0x418] sm:$0x7f] %vm8825_vm4, %v8752_v28  ;;  %vm7841_vm9 = vcmp.ge.f32.partialorder %v7777_v3, 0.0  ;;  %v7905_v37 = vmul.f32 0.2, %v7777_v3  ;;  %v8758_v18 = vrot.slane %v7972_v34, 1  ;;  %v8422_v49 = vpop.permute.xlu1 %8421  ;;  %v17574_v39 = vpack.c.bf16 %v8900_v29, %v8898_v16 }
 0x9dc   :  { %v7970_v47 = vsel %vm7842_vm8, %v7778_v52, %v7906_v25  ;;  %v7907_v57 = vmul.f32 0.2, %v7779_v44  ;;  %v8270_v27 = vsel %vm3890_vm1, %v8268_v61, %v8269_v14  ;;  %v8753_v59 = vsel %vm4180_vm2, %v8751_v2, %v8752_v28  ;;  %8401 = vst.msk [vmem:[#allocation5 + $0x400] sm:$0xfe] %vm8342_vm10, %v8268_v61  ;;  %v8908_v46 = vld [vmem:[#allocation5 + $0x98] sm:$0xff]  ;;  %v12461_v28 = vld [vmem:[%s18361_s15 + $0xe0] sm:$0xff]  }
 0x9dd   :  { %v8272_v42 = vrot.slane %v7970_v47, 7  ;;  %v8755_v45 = vrot.slane %v7970_v47, 1  ;;  %8883 = vst.msk [vmem:[#allocation5 + $0x408] sm:$0xff] %vm7176_vm3, %v8753_v59  ;;  %8402 = vst.msk [vmem:[#allocation5 + $0x410] sm:$0xff] %vm7176_vm3, %v8270_v27  ;;  %8529 = vrot.lane.b32.xlu1 %v7970_v47, %s12706_s21  ;;  %v7969_v62 = vsel %vm7841_vm9, %v7777_v3, %v7905_v37  ;;  %v17593_v48 = vpack.c.bf16 %v8904_v33, %v8902_v12  ;;  %v12462_v25 = vld [vmem:[%s18361_s15 + $0xe8] sm:$0xff]   ;;  %v8912_v15 = vld [vmem:[#allocation5 + $0xb8] sm:$0xff] }
 0x9de   :  { %v7971_v8 = vsel %vm7843_vm11, %v7779_v44, %v7907_v57  ;;  %8601 = vst.msk [vmem:[#allocation5 + $0x30] sm:$0xff] %vm8599_vm15, %v8410_v56  ;;  %v8271_v9 = vrot.slane %v7969_v62, 7  ;;  %v8754_v1 = vrot.slane %v7969_v62, 1  ;;  %8527 = vrot.lane.b32.xlu0 %v7969_v62, %s12706_s21  ;;  %v8416_v10 = vpop.permute.xlu0 %8415  ;;  %8607 = vst.msk [vmem:[#allocation5 + $0x90] sm:$0xff] %vm8599_vm15, %v8422_v49  ;;  %v17615_v60 = vpack.c.bf16 %v8908_v46, %v8906_v41  ;;  %v8910_v37 = vld [vmem:[#allocation5 + $0xa8] sm:$0xff]  ;;  %v12463_v57 = vld [vmem:[%s18361_s15 + $0xf0] sm:$0xff]  }
 0x9df   :  { %8886 = vst.msk [vmem:[#allocation5 + $0x438] sm:$0x7f] %vm8825_vm4, %v8755_v45  ;;  %v8274_v31 = vrot.slane %v7971_v8, 7  ;;  %v8757_v53 = vrot.slane %v7971_v8, 1  ;;  %8888 = vst.msk [vmem:[#allocation5 + $0x458] sm:$0x7f] %vm8825_vm4, %v8758_v18  ;;  %v8426_v30 = vpop.permute.xlu1 %8425  ;;  %v17637_v59 = vpack.c.bf16 %v8912_v15, %v8910_v37 }
 0x9e0   :  { %v8273_v21 = vsel %vm3890_vm1, %v8271_v9, %v8272_v42  ;;  %v8756_v11 = vsel %vm4180_vm2, %v8754_v1, %v8755_v45  ;;  %8403 = vst.msk [vmem:[#allocation5 + $0x420] sm:$0xfe] %vm8342_vm10, %v8271_v9  ;;  %v8893_v43 = vld [vmem:[#allocation5 + $0x20] sm:$0xff]  ;;  %v8899_v32 = vld [vmem:[#allocation5 + $0x50] sm:$0xff]  ;;  %v12464_v45 = vld [vmem:[%s18361_s15 + $0xf8] sm:$0xff]  }
 0x9e1   :  { %v8276_v17 = vsel %vm3890_vm1, %v8274_v31, %v8275_v36  ;;  %v8759_v7 = vsel %vm4180_vm2, %v8757_v53, %v8758_v18  ;;  %8405 = vst.msk [vmem:[#allocation5 + $0x440] sm:$0xfe] %vm8342_vm10, %v8274_v31  ;;  %8533 = vrot.lane.b32.xlu1 %v7972_v34, %s12706_s21  ;;  %v8897_v58 = vld [vmem:[#allocation5 + $0x40] sm:$0xff]  ;;  %v8903_v55 = vld [vmem:[#allocation5 + $0x70] sm:$0xff]  ;;  %v8914_v18 = vld [vmem:[#allocation5 + $0xc8] sm:$0xff] }
 0x9e2   :  { %8885 = vst.msk [vmem:[#allocation5 + $0x428] sm:$0xff] %vm7176_vm3, %v8756_v11  ;;  %8404 = vst.msk [vmem:[#allocation5 + $0x430] sm:$0xff] %vm7176_vm3, %v8273_v21  ;;  %8531 = vrot.lane.b32.xlu0 %v7971_v8, %s12706_s21  ;;  %v8420_v23 = vpop.permute.xlu0 %8419  ;;  %v17588_v40 = vpack.c.bf16 %v8899_v32, %v8897_v58  ;;  %v8916_v8 = vld [vmem:[#allocation5 + $0xd8] sm:$0xff] }
 0x9e3   :  { %8887 = vst.msk [vmem:[#allocation5 + $0x448] sm:$0xff] %vm7176_vm3, %v8759_v7  ;;  %8406 = vst.msk [vmem:[#allocation5 + $0x450] sm:$0xff] %vm7176_vm3, %v8276_v17  ;;  %v8430_v4 = vpop.permute.xlu1 %8429  ;;  %v17656_v53 = vpack.c.bf16 %v8916_v8, %v8914_v18  ;;  %v8918_v7 = vld [vmem:[#allocation5 + $0xe8] sm:$0xff] }
 0x9e4   :  { %8604 = vst.msk [vmem:[#allocation5 + $0x60] sm:$0xff] %vm8599_vm15, %v8416_v10  ;;  %8606 = vst.msk [vmem:[#allocation5 + $0x80] sm:$0xff] %vm8599_vm15, %v8420_v23  ;;  %v8920_v10 = vld [vmem:[#allocation5 + $0xf8] sm:$0xff]  ;;  %v12465_v23 = vld [vmem:[%s18361_s15 + $0x100] sm:$0xff]  }
 0x9e5   :  { %v8895_v20 = vld [vmem:[#allocation5 + $0x30] sm:$0xff]  ;;  %8609 = vst.msk [vmem:[#allocation5 + $0xb0] sm:$0xff] %vm8599_vm15, %v8426_v30  ;;  %8611 = vst.msk [vmem:[#allocation5 + $0xd0] sm:$0xff] %vm8599_vm15, %v8430_v4 }
 0x9e6   :  { %v9035_v63 = vpack.c.bf16 %v8895_v20, %v8893_v43  ;;  %v8424_v38 = vpop.permute.xlu0 %8423  ;;  %v8907_v2 = vld [vmem:[#allocation5 + $0x90] sm:$0xff]  ;;  %v17671_v43 = vpack.c.bf16 %v8920_v10, %v8918_v7  ;;  %v8938_v7 = vld [vmem:[#allocation5 + $0x188] sm:$0xff]  ;;  %v8940_v10 = vld [vmem:[#allocation5 + $0x198] sm:$0xff] }
 0x9e7   :  { %8608 = vst.msk [vmem:[#allocation5 + $0xa0] sm:$0xff] %vm8599_vm15, %v8424_v38  ;;  %v8434_v0 = vpop.permute.xlu1 %8433  ;;  %v8922_v38 = vld [vmem:[#allocation5 + $0x108] sm:$0xff] }
 0x9e8   :  { %9351 = vmatmul.mubr.bf16.vlgmr.msra.gmra.mrb[92].mxu1 %v9035_v63  ;;  %9726 = vmatmul.mubr.bf16.gmra.mrb[200].mxu0 %v9035_v63  ;;  %8613 = vst.msk [vmem:[#allocation5 + $0xf0] sm:$0xff] %vm8599_vm15, %v8434_v0 }
 0x9e9   :  { %11152 = vmatprep.mubr.msk.bf16.mxu1 %vm7176_vm3, %v17574_v39  ;;  %11197 = vmatprep.mubr.msk.bf16.mxu0 %vm7176_vm3, %v17574_v39 }
 0x9ea   :  { %10082 = vmatpush1.bf16.msra.mxu1 %v12457_v22  ;;  %v8428_v26 = vpop.permute.xlu0 %8427 }
 0x9eb   :  { %10083 = vmatprep.subr.bf16.mxu1 %v18976_v19  ;;  %8610 = vst.msk [vmem:[#allocation5 + $0xc0] sm:$0xff] %vm8599_vm15, %v8428_v26  ;;  %v8438_v35 = vpop.permute.xlu1 %8437  ;;  %v8901_v44 = vld [vmem:[#allocation5 + $0x60] sm:$0xff] }
 0x9ec   :  { %8615 = vst.msk [vmem:[#allocation5 + $0x110] sm:$0xff] %vm8599_vm15, %v8438_v35  ;;  %v17610_v14 = vpack.c.bf16 %v8903_v55, %v8901_v44  ;;  %v8905_v61 = vld [vmem:[#allocation5 + $0x80] sm:$0xff]  ;;  %v8911_v36 = vld [vmem:[#allocation5 + $0xb0] sm:$0xff] }
 0x9ed   :  { %v17632_v34 = vpack.c.bf16 %v8907_v2, %v8905_v61  ;;  %v8915_v17 = vld [vmem:[#allocation5 + $0xd0] sm:$0xff] }
 0x9ee   :  { %10084 = vmatpush1.bf16.msra.mxu1 %v12458_v5  ;;  %v8432_v51 = vpop.permute.xlu0 %8431  ;;  %v8909_v62 = vld [vmem:[#allocation5 + $0xa0] sm:$0xff]  ;;  %v8924_v5 = vld [vmem:[#allocation5 + $0x118] sm:$0xff] }
 0x9ef   :  { %10085 = vmatprep.subr.bf16.mxu1 %v18976_v19  ;;  %8612 = vst.msk [vmem:[#allocation5 + $0xe0] sm:$0xff] %vm8599_vm15, %v8432_v51  ;;  %v8442_v3 = vpop.permute.xlu1 %8441  ;;  %v17654_v1 = vpack.c.bf16 %v8911_v36, %v8909_v62  ;;  %v8919_v30 = vld [vmem:[#allocation5 + $0xf0] sm:$0xff]  ;;  %v17689_v33 = vpack.c.bf16 %v8924_v5, %v8922_v38  ;;  %v8926_v51 = vld [vmem:[#allocation5 + $0x128] sm:$0xff] }
 0x9f0   :  { %9359 = vmatmul.mubr.bf16.gmra.mrb[96].mxu1 %v17588_v40  ;;  %9734 = vmatmul.mubr.bf16.gmra.mrb[204].mxu0 %v17588_v40  ;;  %8617 = vst.msk [vmem:[#allocation5 + $0x130] sm:$0xff] %vm8599_vm15, %v8442_v3 }
 0x9f1   :  { %11153 = vmatprep.mubr.msk.bf16.mxu1 %vm7176_vm3, %v17593_v48  ;;  %11198 = vmatprep.mubr.msk.bf16.mxu0 %vm7176_vm3, %v17593_v48 }
 0x9f2   :  { %10086 = vmatpush1.bf16.msra.mxu1 %v12459_v54  ;;  %v8436_v52 = vpop.permute.xlu0 %8435  ;;  %v8913_v11 = vld [vmem:[#allocation5 + $0xc0] sm:$0xff] }
 0x9f3   :  { %10087 = vmatprep.subr.bf16.mxu1 %v18976_v19  ;;  %8614 = vst.msk [vmem:[#allocation5 + $0x100] sm:$0xff] %vm8599_vm15, %v8436_v52  ;;  %v8446_v6 = vpop.permute.xlu1 %8445  ;;  %v17669_v16 = vpack.c.bf16 %v8915_v17, %v8913_v11  ;;  %v8923_v0 = vld [vmem:[#allocation5 + $0x110] sm:$0xff] }
 0x9f4   :  { %8619 = vst.msk [vmem:[#allocation5 + $0x150] sm:$0xff] %vm8599_vm15, %v8446_v6 }
 0x9f6   :  { %10088 = vmatpush1.bf16.msra.mxu1 %v12460_v50  ;;  %v8440_v24 = vpop.permute.xlu0 %8439  ;;  %v8917_v22 = vld [vmem:[#allocation5 + $0xe0] sm:$0xff]  ;;  %v8928_v50 = vld [vmem:[#allocation5 + $0x138] sm:$0xff] }
 0x9f7   :  { %10089 = vmatprep.subr.bf16.mxu1 %v18976_v19  ;;  %8616 = vst.msk [vmem:[#allocation5 + $0x120] sm:$0xff] %vm8599_vm15, %v8440_v24  ;;  %v8450_v27 = vpop.permute.xlu1 %8449  ;;  %v17687_v32 = vpack.c.bf16 %v8919_v30, %v8917_v22  ;;  %v17703_v41 = vpack.c.bf16 %v8928_v50, %v8926_v51  ;;  %v8927_v3 = vld [vmem:[#allocation5 + $0x130] sm:$0xff]  ;;  %v8930_v24 = vld [vmem:[#allocation5 + $0x148] sm:$0xff] }
 0x9f8   :  { %9367 = vmatmul.mubr.bf16.gmra.mrb[100].mxu1 %v17610_v14  ;;  %9742 = vmatmul.mubr.bf16.gmra.mrb[208].mxu0 %v17610_v14  ;;  %8621 = vst.msk [vmem:[#allocation5 + $0x170] sm:$0xff] %vm8599_vm15, %v8450_v27 }
 0x9f9   :  { %11154 = vmatprep.mubr.msk.bf16.mxu1 %vm7176_vm3, %v17615_v60  ;;  %11199 = vmatprep.mubr.msk.bf16.mxu0 %vm7176_vm3, %v17615_v60 }
 0x9fa   :  { %10090 = vmatpush1.bf16.msra.mxu1 %v12461_v28  ;;  %v8444_v47 = vpop.permute.xlu0 %8443  ;;  %v8921_v54 = vld [vmem:[#allocation5 + $0x100] sm:$0xff] }
 0x9fb   :  { %10091 = vmatprep.subr.bf16.mxu1 %v18976_v19  ;;  %8618 = vst.msk [vmem:[#allocation5 + $0x140] sm:$0xff] %vm8599_vm15, %v8444_v47  ;;  %v8454_v56 = vpop.permute.xlu1 %8453  ;;  %v17701_v44 = vpack.c.bf16 %v8923_v0, %v8921_v54  ;;  %v12466_v47 = vld [vmem:[%s18361_s15 + $0x108] sm:$0xff]   ;;  %v12467_v0 = vld [vmem:[%s18361_s15 + $0x110] sm:$0xff]  }
 0x9fc   :  { %8623 = vst.msk [vmem:[#allocation5 + $0x190] sm:$0xff] %vm8599_vm15, %v8454_v56  ;;  %v8936_v56 = vld [vmem:[#allocation5 + $0x178] sm:$0xff] }
 0x9fe   :  { %10092 = vmatpush1.bf16.msra.mxu1 %v12462_v25  ;;  %v8448_v42 = vpop.permute.xlu0 %8447  ;;  %v8925_v28 = vld [vmem:[#allocation5 + $0x120] sm:$0xff]  ;;  %v8932_v25 = vld [vmem:[#allocation5 + $0x158] sm:$0xff] }
 0x9ff   :  { %10093 = vmatprep.subr.bf16.mxu1 %v18976_v19  ;;  %8620 = vst.msk [vmem:[#allocation5 + $0x160] sm:$0xff] %vm8599_vm15, %v8448_v42  ;;  %v8458_v31 = vpop.permute.xlu1 %8457  ;;  %v17715_v61 = vpack.c.bf16 %v8927_v3, %v8925_v28  ;;  %v17717_v37 = vpack.c.bf16 %v8932_v25, %v8930_v24  ;;  %v8931_v42 = vld [vmem:[#allocation5 + $0x150] sm:$0xff]  ;;  %v8946_v28 = vld [vmem:[#allocation5 + $0x1c8] sm:$0xff]  ;;  %v8948_v3 = vld [vmem:[#allocation5 + $0x1d8] sm:$0xff] }
 0xa00   :  { %9375 = vmatmul.mubr.bf16.gmra.mrb[104].mxu1 %v17632_v34  ;;  %9750 = vmatmul.mubr.bf16.gmra.mrb[212].mxu0 %v17632_v34  ;;  %8625 = vst.msk [vmem:[#allocation5 + $0x1b0] sm:$0xff] %vm8599_vm15, %v8458_v31  ;;  %v17744_v31 = vpop.f32.mrb[196].mxu0  ;;  %v8935_v17 = vld [vmem:[#allocation5 + $0x170] sm:$0xff] }
 0xa01   :  { %11155 = vmatprep.mubr.msk.bf16.mxu1 %vm7176_vm3, %v17637_v59  ;;  %11200 = vmatprep.mubr.msk.bf16.mxu0 %vm7176_vm3, %v17637_v59 }
 0xa02   :  { %10094 = vmatpush1.bf16.msra.mxu1 %v12463_v57  ;;  %v8452_v9 = vpop.permute.xlu0 %8451  ;;  %v8929_v27 = vld [vmem:[#allocation5 + $0x140] sm:$0xff] }
 0xa03   :  { %10095 = vmatprep.subr.bf16.mxu1 %v18976_v19  ;;  %8622 = vst.msk [vmem:[#allocation5 + $0x180] sm:$0xff] %vm8599_vm15, %v8452_v9  ;;  %v8462_v21 = vpop.permute.xlu1 %8461  ;;  %v17733_v36 = vpack.c.bf16 %v8931_v42, %v8929_v27  ;;  %v8950_v27 = vld [vmem:[#allocation5 + $0x1e8] sm:$0xff]  ;;  %v8952_v42 = vld [vmem:[#allocation5 + $0x1f8] sm:$0xff] }
 0xa04   :  { %8627 = vst.msk [vmem:[#allocation5 + $0x1d0] sm:$0xff] %vm8599_vm15, %v8462_v21 }
 0xa06   :  { %10096 = vmatpush1.bf16.msra.mxu1 %v12464_v45  ;;  %v8456_v13 = vpop.permute.xlu0 %8455  ;;  %v8934_v45 = vld [vmem:[#allocation5 + $0x168] sm:$0xff]  ;;  %v8933_v11 = vld [vmem:[#allocation5 + $0x160] sm:$0xff] }
 0xa07   :  { %10097 = vmatprep.subr.bf16.mxu1 %v18976_v19  ;;  %8624 = vst.msk [vmem:[#allocation5 + $0x1a0] sm:$0xff] %vm8599_vm15, %v8456_v13  ;;  %v8466_v29 = vpop.permute.xlu1 %8465  ;;  %v17735_v8 = vpack.c.bf16 %v8936_v56, %v8934_v45  ;;  %v9721_v13 = vpop.f32.mrb[197].mxu0 }
 0xa08   :  { %9383 = vmatmul.mubr.bf16.gmra.mrb[108].mxu1 %v17654_v1  ;;  %9758 = vmatmul.mubr.bf16.gmra.mrb[216].mxu0 %v17654_v1  ;;  %8629 = vst.msk [vmem:[#allocation5 + $0x1f0] sm:$0xff] %vm8599_vm15, %v8466_v29  ;;  %v17749_v29 = vpack.c.bf16 %v8935_v17, %v8933_v11  ;;  %v17760_v22 = vpop.f32.mrb[198].mxu0  ;;  %v8962_v13 = vld [vmem:[#allocation5 + $0x248] sm:$0xff] }
 0xa09   :  { %11156 = vmatprep.mubr.msk.bf16.mxu1 %vm7176_vm3, %v17656_v53  ;;  %11201 = vmatprep.mubr.msk.bf16.mxu0 %vm7176_vm3, %v17656_v53  ;;  %v9724_v30 = vpop.f32.mrb[199].mxu0 }
 0xa0a   :  { %v8460_v49 = vpop.permute.xlu0 %8459  ;;  %10098 = vmatpush1.bf16.msra.mxu1 %v12465_v23  ;;  %v17751_v23 = vpack.c.bf16 %v8940_v10, %v8938_v7  ;;  %v8937_v5 = vld [vmem:[#allocation5 + $0x180] sm:$0xff]  ;;  %v8954_v10 = vld [vmem:[#allocation5 + $0x208] sm:$0xff] }
 0xa0b   :  { %8626 = vst.msk [vmem:[#allocation5 + $0x1c0] sm:$0xff] %vm8599_vm15, %v8460_v49  ;;  %v8470_v63 = vpop.permute.xlu1 %8469  ;;  %10099 = vmatprep.subr.bf16.mxu1 %v18976_v19 }
 0xa0c   :  { %8631 = vst.msk [vmem:[#allocation5 + $0x210] sm:$0xff] %vm8599_vm15, %v8470_v63 }
 0xa0e   :  { %v8464_v20 = vpop.permute.xlu0 %8463  ;;  %10100 = vmatpush1.bf16.msra.mxu1 %v12466_v47 }
 0xa0f   :  { %8628 = vst.msk [vmem:[#allocation5 + $0x1e0] sm:$0xff] %vm8599_vm15, %v8464_v20  ;;  %v8474_v12 = vpop.permute.xlu1 %8473  ;;  %10101 = vmatprep.subr.bf16.mxu1 %v18976_v19  ;;  %v8951_v7 = vld [vmem:[#allocation5 + $0x1f0] sm:$0xff] }
 0xa10   :  { %9391 = vmatmul.mubr.bf16.gmra.mrb[112].mxu1 %v17669_v16  ;;  %9766 = vmatmul.mubr.bf16.gmra.mrb[220].mxu0 %v17669_v16  ;;  %8633 = vst.msk [vmem:[#allocation5 + $0x270] sm:$0xff] %vm8599_vm15, %v8474_v12  ;;  %v8942_v12 = vld [vmem:[#allocation5 + $0x1a8] sm:$0xff] }
 0xa11   :  { %11157 = vmatprep.mubr.msk.bf16.mxu1 %vm7176_vm3, %v17671_v43  ;;  %11202 = vmatprep.mubr.msk.bf16.mxu0 %vm7176_vm3, %v17671_v43 }
 0xa12   :  { %v8468_v4 = vpop.permute.xlu0 %8467  ;;  %10102 = vmatpush1.bf16.msra.mxu1 %v12467_v0  ;;  %v8945_v47 = vld [vmem:[#allocation5 + $0x1c0] sm:$0xff]  ;;  %v8966_v0 = vld [vmem:[#allocation5 + $0x268] sm:$0xff] }
 0xa13   :  { %8630 = vst.msk [vmem:[#allocation5 + $0x200] sm:$0xff] %vm8599_vm15, %v8468_v4  ;;  %v8478_v58 = vpop.permute.xlu1 %8477  ;;  %v8939_v4 = vld [vmem:[#allocation5 + $0x190] sm:$0xff]  ;;  %10103 = vmatprep.subr.bf16.mxu1 %v18976_v19 }
 0xa14   :  { %8635 = vst.msk [vmem:[#allocation5 + $0x290] sm:$0xff] %vm8599_vm15, %v8478_v58  ;;  %v17765_v54 = vpack.c.bf16 %v8939_v4, %v8937_v5 }
 0xa16   :  { %v8472_v26 = vpop.permute.xlu0 %8471  ;;  %v8949_v17 = vld [vmem:[#allocation5 + $0x1e0] sm:$0xff] }
 0xa17   :  { %8632 = vst.msk [vmem:[#allocation5 + $0x260] sm:$0xff] %vm8599_vm15, %v8472_v26  ;;  %v8482_v55 = vpop.permute.xlu1 %8481  ;;  %v8944_v26 = vld [vmem:[#allocation5 + $0x1b8] sm:$0xff] }
 0xa18   :  { %9399 = vmatmul.mubr.bf16.gmra.mrb[116].mxu1 %v17687_v32  ;;  %9774 = vmatmul.mubr.bf16.gmra.mrb[224].mxu0 %v17687_v32  ;;  %8637 = vst.msk [vmem:[#allocation5 + $0x2b0] sm:$0xff] %vm8599_vm15, %v8482_v55  ;;  %v17770_v50 = vpack.c.bf16 %v8944_v26, %v8942_v12  ;;  %v8955_v12 = vld [vmem:[#allocation5 + $0x210] sm:$0xff]  ;;  %v12630_v26 = vld [vmem:[#allocation3] sm:$0xff] }
 0xa19   :  { %11158 = vmatprep.mubr.msk.bf16.mxu1 %vm7176_vm3, %v17689_v33  ;;  %11203 = vmatprep.mubr.msk.bf16.mxu0 %vm7176_vm3, %v17689_v33 }
 0xa1a   :  { %v8476_v35 = vpop.permute.xlu0 %8475  ;;  %v8953_v4 = vld [vmem:[#allocation5 + $0x200] sm:$0xff] }
 0xa1b   :  { %8634 = vst.msk [vmem:[#allocation5 + $0x280] sm:$0xff] %vm8599_vm15, %v8476_v35 }
 0xa1c   :  { %v8486_v52 = vpop.permute.xlu1 %8485 }
 0xa1d   :  { %8639 = vst.msk [vmem:[#allocation5 + $0x2d0] sm:$0xff] %vm8599_vm15, %v8486_v52  ;;  %v8943_v52 = vld [vmem:[#allocation5 + $0x1b0] sm:$0xff] }
 0xa1e   :  { %v8480_v46 = vpop.permute.xlu0 %8479 }
 0xa1f   :  { %8636 = vst.msk [vmem:[#allocation5 + $0x2a0] sm:$0xff] %vm8599_vm15, %v8480_v46  ;;  %v8941_v46 = vld [vmem:[#allocation5 + $0x1a0] sm:$0xff] }
 0xa20   :  { %9407 = vmatmul.mubr.bf16.gmra.mrb[120].mxu1 %v17701_v44  ;;  %9782 = vmatmul.mubr.bf16.gmra.mrb[228].mxu0 %v17701_v44  ;;  %v8490_v2 = vpop.permute.xlu1 %8489  ;;  %v17783_v25 = vpack.c.bf16 %v8943_v52, %v8941_v46  ;;  %v8965_v46 = vld [vmem:[#allocation5 + $0x260] sm:$0xff]  ;;  %v8967_v52 = vld [vmem:[#allocation5 + $0x270] sm:$0xff] }
 0xa21   :  { %11159 = vmatprep.mubr.msk.bf16.mxu1 %vm7176_vm3, %v17703_v41  ;;  %11204 = vmatprep.mubr.msk.bf16.mxu0 %vm7176_vm3, %v17703_v41  ;;  %8641 = vst.msk [vmem:[#allocation5 + $0x2f0] sm:$0xff] %vm8599_vm15, %v8490_v2  ;;  %v17785_v2 = vpack.c.bf16 %v8948_v3, %v8946_v28  ;;  %v8970_v28 = vld [vmem:[#allocation5 + $0x288] sm:$0xff]  ;;  %v8972_v3 = vld [vmem:[#allocation5 + $0x298] sm:$0xff] }
 0xa22   :  { %v8484_v6 = vpop.permute.xlu0 %8483 }
 0xa23   :  { %8638 = vst.msk [vmem:[#allocation5 + $0x2c0] sm:$0xff] %vm8599_vm15, %v8484_v6 }
 0xa25   :  { %v8494_v57 = vpop.permute.xlu1 %8493 }
 0xa26   :  { %v8488_v15 = vpop.permute.xlu0 %8487  ;;  %8643 = vst.msk [vmem:[#allocation5 + $0x310] sm:$0xff] %vm8599_vm15, %v8494_v57  ;;  %v8947_v57 = vld [vmem:[#allocation5 + $0x1d0] sm:$0xff] }
 0xa27   :  { %8640 = vst.msk [vmem:[#allocation5 + $0x2e0] sm:$0xff] %vm8599_vm15, %v8488_v15  ;;  %v17797_v56 = vpack.c.bf16 %v8947_v57, %v8945_v47  ;;  %v8974_v47 = vld [vmem:[#allocation5 + $0x2a8] sm:$0xff]  ;;  %v8976_v57 = vld [vmem:[#allocation5 + $0x2b8] sm:$0xff] }
 0xa28   :  { %9415 = vmatmul.mubr.bf16.gmra.mrb[124].mxu1 %v17715_v61  ;;  %9790 = vmatmul.mubr.bf16.gmra.mrb[232].mxu0 %v17715_v61 }
 0xa29   :  { %11160 = vmatprep.mubr.msk.bf16.mxu1 %vm7176_vm3, %v17717_v37  ;;  %11205 = vmatprep.mubr.msk.bf16.mxu0 %vm7176_vm3, %v17717_v37  ;;  %v8498_v18 = vpop.permute.xlu1 %8497 }
 0xa2a   :  { %v8492_v62 = vpop.permute.xlu0 %8491  ;;  %8645 = vst.msk [vmem:[#allocation5 + $0x330] sm:$0xff] %vm8599_vm15, %v8498_v18  ;;  %v17799_v18 = vpack.c.bf16 %v8952_v42, %v8950_v27  ;;  %v17839_v42 = vpack.c.bf16 %v8976_v57, %v8974_v47  ;;  %v8994_v47 = vld [vmem:[#allocation5 + $0x348] sm:$0xff]  ;;  %v8996_v57 = vld [vmem:[#allocation5 + $0x358] sm:$0xff] }
 0xa2b   :  { %8642 = vst.msk [vmem:[#allocation5 + $0x300] sm:$0xff] %vm8599_vm15, %v8492_v62 }
 0xa2d   :  { %v8502_v21 = vpop.permute.xlu1 %8501 }
 0xa2e   :  { %v8496_v9 = vpop.permute.xlu0 %8495  ;;  %8647 = vst.msk [vmem:[#allocation5 + $0x350] sm:$0xff] %vm8599_vm15, %v8502_v21  ;;  %v8964_v21 = vld [vmem:[#allocation5 + $0x258] sm:$0xff] }
 0xa2f   :  { %8644 = vst.msk [vmem:[#allocation5 + $0x320] sm:$0xff] %vm8599_vm15, %v8496_v9  ;;  %v9066_v30 = vpack.c.bf16 %v8964_v21, %v8962_v13  ;;  %v8980_v13 = vld [vmem:[#allocation5 + $0x2d8] sm:$0xff] }
 0xa30   :  { %9423 = vmatmul.mubr.bf16.gmra.mrb[128].mxu1 %v17733_v36  ;;  %9798 = vmatmul.mubr.bf16.gmra.mrb[236].mxu0 %v17733_v36 }
 0xa31   :  { %11161 = vmatprep.mubr.msk.bf16.mxu1 %vm7176_vm3, %v17735_v8  ;;  %11206 = vmatprep.mubr.msk.bf16.mxu0 %vm7176_vm3, %v17735_v8  ;;  %v8506_v20 = vpop.permute.xlu1 %8505 }
 0xa32   :  { %v8500_v49 = vpop.permute.xlu0 %8499  ;;  %8649 = vst.msk [vmem:[#allocation5 + $0x370] sm:$0xff] %vm8599_vm15, %v8506_v20  ;;  %v12468_v20 = vld [vmem:[%s18361_s15 + $0x118] sm:$0xff]  }
 0xa33   :  { %8646 = vst.msk [vmem:[#allocation5 + $0x340] sm:$0xff] %vm8599_vm15, %v8500_v49  ;;  %v8956_v49 = vld [vmem:[#allocation5 + $0x218] sm:$0xff]  ;;  %10104 = vmatpush1.bf16.msra.mxu1 %v12468_v20 }
 0xa34   :  { %v17816_v5 = vpack.c.bf16 %v8956_v49, %v8954_v10  ;;  %v8982_v10 = vld [vmem:[#allocation5 + $0x2e8] sm:$0xff]  ;;  %v8984_v49 = vld [vmem:[#allocation5 + $0x2f8] sm:$0xff] }
 0xa35   :  { %v8510_v38 = vpop.permute.xlu1 %8509 }
 0xa36   :  { %v8504_v63 = vpop.permute.xlu0 %8503  ;;  %8651 = vst.msk [vmem:[#allocation5 + $0x390] sm:$0xff] %vm8599_vm15, %v8510_v38  ;;  %v17814_v38 = vpack.c.bf16 %v8951_v7, %v8949_v17  ;;  %v8977_v17 = vld [vmem:[#allocation5 + $0x2c0] sm:$0xff]  ;;  %v8979_v7 = vld [vmem:[#allocation5 + $0x2d0] sm:$0xff] }
 0xa37   :  { %8648 = vst.msk [vmem:[#allocation5 + $0x360] sm:$0xff] %vm8599_vm15, %v8504_v63  ;;  %v17857_v20 = vpack.c.bf16 %v8979_v7, %v8977_v17  ;;  %v8998_v17 = vld [vmem:[#allocation5 + $0x368] sm:$0xff]  ;;  %v9000_v7 = vld [vmem:[#allocation5 + $0x378] sm:$0xff] }
 0xa38   :  { %9431 = vmatmul.mubr.bf16.gmra.mrb[132].mxu1 %v17749_v29  ;;  %9806 = vmatmul.mubr.bf16.gmra.mrb[240].mxu0 %v17749_v29 }
 0xa39   :  { %11162 = vmatprep.mubr.msk.bf16.mxu1 %vm7176_vm3, %v17751_v23  ;;  %11207 = vmatprep.mubr.msk.bf16.mxu0 %vm7176_vm3, %v17751_v23  ;;  %v8514_v51 = vpop.permute.xlu1 %8513 }
 0xa3a   :  { %v8508_v58 = vpop.permute.xlu0 %8507  ;;  %8653 = vst.msk [vmem:[#allocation5 + $0x3b0] sm:$0xff] %vm8599_vm15, %v8514_v51  ;;  %v8968_v51 = vld [vmem:[#allocation5 + $0x278] sm:$0xff] }
 0xa3b   :  { %8650 = vst.msk [vmem:[#allocation5 + $0x380] sm:$0xff] %vm8599_vm15, %v8508_v58  ;;  %v17823_v58 = vpack.c.bf16 %v12630_v26, %v12630_v26  ;;  %v8988_v26 = vld [vmem:[#allocation5 + $0x318] sm:$0xff] }
 0xa3d   :  { %v8518_v55 = vpop.permute.xlu1 %8517 }
 0xa3e   :  { %v8512_v35 = vpop.permute.xlu0 %8511  ;;  %8655 = vst.msk [vmem:[#allocation5 + $0x3d0] sm:$0xff] %vm8599_vm15, %v8518_v55  ;;  %v9068_v55 = vpack.c.bf16 %v8968_v51, %v8966_v0 }
 0xa3f   :  { %8652 = vst.msk [vmem:[#allocation5 + $0x3a0] sm:$0xff] %vm8599_vm15, %v8512_v35  ;;  %v17825_v35 = vpack.c.bf16 %v8955_v12, %v8953_v4  ;;  %v8983_v4 = vld [vmem:[#allocation5 + $0x2f0] sm:$0xff]  ;;  %v8986_v12 = vld [vmem:[#allocation5 + $0x308] sm:$0xff] }
 0xa40   :  { %9439 = vmatmul.mubr.bf16.gmra.mrb[136].mxu1 %v17765_v54  ;;  %9814 = vmatmul.mubr.bf16.gmra.mrb[244].mxu0 %v17765_v54  ;;  %v17869_v51 = vpack.c.bf16 %v8988_v26, %v8986_v12  ;;  %v9002_v12 = vld [vmem:[#allocation5 + $0x388] sm:$0xff]  ;;  %v9004_v26 = vld [vmem:[#allocation5 + $0x398] sm:$0xff] }
 0xa41   :  { %11163 = vmatprep.mubr.msk.bf16.mxu1 %vm7176_vm3, %v17770_v50  ;;  %11208 = vmatprep.mubr.msk.bf16.mxu0 %vm7176_vm3, %v17770_v50  ;;  %v8522_v6 = vpop.permute.xlu1 %8521 }
 0xa42   :  { %v8516_v24 = vpop.permute.xlu0 %8515  ;;  %8657 = vst.msk [vmem:[#allocation5 + $0x3f0] sm:$0xff] %vm8599_vm15, %v8522_v6  ;;  %v17831_v6 = vpack.c.bf16 %v8972_v3, %v8970_v28  ;;  %v8992_v28 = vld [vmem:[#allocation5 + $0x338] sm:$0xff] }
 0xa43   :  { %8654 = vst.msk [vmem:[#allocation5 + $0x3c0] sm:$0xff] %vm8599_vm15, %v8516_v24  ;;  %v9067_v24 = vpack.c.bf16 %v8967_v52, %v8965_v46  ;;  %v8987_v46 = vld [vmem:[#allocation5 + $0x310] sm:$0xff]  ;;  %v8990_v52 = vld [vmem:[#allocation5 + $0x328] sm:$0xff] }
 0xa46   :  { %v8520_v15 = vpop.permute.xlu0 %8519 }
 0xa47   :  { %8656 = vst.msk [vmem:[#allocation5 + $0x3e0] sm:$0xff] %vm8599_vm15, %v8520_v15  ;;  %v8969_v15 = vld [vmem:[#allocation5 + $0x280] sm:$0xff] }
 0xa48   :  { %9447 = vmatmul.mubr.bf16.gmra.mrb[140].mxu1 %v17783_v25  ;;  %9822 = vmatmul.mubr.bf16.gmra.mrb[248].mxu0 %v17783_v25 }
 0xa49   :  { %11164 = vmatprep.mubr.msk.bf16.mxu1 %vm7176_vm3, %v17785_v2  ;;  %11209 = vmatprep.mubr.msk.bf16.mxu0 %vm7176_vm3, %v17785_v2 }
 0xa4b   :  { %v8526_v19 = vpop.permute.xlu1 %8525 }
 0xa4c   :  { %8659 = vst.msk [vmem:[#allocation5 + $0x410] sm:$0xff] %vm8599_vm15, %v8526_v19  ;;  %v8524_v45 = vpop.permute.xlu0 %8523  ;;  %v8971_v19 = vld [vmem:[#allocation5 + $0x290] sm:$0xff] }
 0xa4d   :  { %8658 = vst.msk [vmem:[#allocation5 + $0x400] sm:$0xff] %vm8599_vm15, %v8524_v45  ;;  %v17837_v27 = vpack.c.bf16 %v8971_v19, %v8969_v15  ;;  %v8973_v45 = vld [vmem:[#allocation5 + $0x2a0] sm:$0xff]  ;;  %v8991_v19 = vld [vmem:[#allocation5 + $0x330] sm:$0xff] }
 0xa4e   :  { %v8989_v15 = vld [vmem:[#allocation5 + $0x320] sm:$0xff] }
 0xa4f   :  { %v8530_v62 = vpop.permute.xlu1 %8529 }
 0xa50   :  { %9455 = vmatmul.mubr.bf16.gmra.mrb[144].mxu1 %v17797_v56  ;;  %9830 = vmatmul.mubr.bf16.gmra.mrb[252].mxu0 %v17797_v56  ;;  %8661 = vst.msk [vmem:[#allocation5 + $0x430] sm:$0xff] %vm8599_vm15, %v8530_v62  ;;  %v8528_v9 = vpop.permute.xlu0 %8527  ;;  %v8975_v62 = vld [vmem:[#allocation5 + $0x2b0] sm:$0xff] }
 0xa51   :  { %11165 = vmatprep.mubr.msk.bf16.mxu1 %vm7176_vm3, %v17799_v18  ;;  %11210 = vmatprep.mubr.msk.bf16.mxu0 %vm7176_vm3, %v17799_v18  ;;  %8660 = vst.msk [vmem:[#allocation5 + $0x420] sm:$0xff] %vm8599_vm15, %v8528_v9  ;;  %v8978_v9 = vld [vmem:[#allocation5 + $0x2c8] sm:$0xff]  ;;  %v17847_v21 = vpack.c.bf16 %v8975_v62, %v8973_v45  ;;  %v17887_v45 = vpack.c.bf16 %v8991_v19, %v8989_v15  ;;  %v9008_v19 = vld [vmem:[#allocation5 + $0x3b8] sm:$0xff] }
 0xa52   :  { %v17889_v62 = vpack.c.bf16 %v8996_v57, %v8994_v47  ;;  %v9006_v15 = vld [vmem:[#allocation5 + $0x3a8] sm:$0xff] }
 0xa53   :  { %v8534_v11 = vpop.permute.xlu1 %8533  ;;  %v17919_v57 = vpack.c.bf16 %v9008_v19, %v9006_v15 }
 0xa54   :  { %8663 = vst.msk [vmem:[#allocation5 + $0x450] sm:$0xff] %vm8599_vm15, %v8534_v11  ;;  %v8532_v63 = vpop.permute.xlu0 %8531  ;;  %v17849_v11 = vpack.c.bf16 %v8980_v13, %v8978_v9  ;;  %v8993_v9 = vld [vmem:[#allocation5 + $0x340] sm:$0xff]  ;;  %v8995_v13 = vld [vmem:[#allocation5 + $0x350] sm:$0xff] }
 0xa55   :  { %8662 = vst.msk [vmem:[#allocation5 + $0x440] sm:$0xff] %vm8599_vm15, %v8532_v63  ;;  %v17859_v63 = vpack.c.bf16 %v8984_v49, %v8982_v10  ;;  %v17897_v10 = vpack.c.bf16 %v8995_v13, %v8993_v9  ;;  %v17899_v49 = vpack.c.bf16 %v9000_v7, %v8998_v17  ;;  %19064 = vst [vmem:[#allocation60_spill] sm:$0xff] %v17919_v57  ;;  %v9005_v9 = vld [vmem:[#allocation5 + $0x3a0] sm:$0xff]  ;;  %v9007_v13 = vld [vmem:[#allocation5 + $0x3b0] sm:$0xff] }
 0xa56   :  { %v9010_v17 = vld [vmem:[#allocation5 + $0x3c8] sm:$0xff]  ;;  %v9012_v7 = vld [vmem:[#allocation5 + $0x3d8] sm:$0xff] }
 0xa57   :  { %19060 = vst [vmem:[#allocation54_spill] sm:$0xff] %v17899_v49 }
 0xa58   :  { %9463 = vmatmul.mubr.bf16.gmra.mrb[148].mxu1 %v17814_v38  ;;  %9838 = vmatmul.mubr.bf16.gmra.mrb[0].mxu0 %v17814_v38 }
 0xa59   :  { %11166 = vmatprep.mubr.msk.bf16.mxu1 %vm7176_vm3, %v17816_v5  ;;  %11211 = vmatprep.mubr.msk.bf16.mxu0 %vm7176_vm3, %v9066_v30  ;;  %v8981_v30 = vld [vmem:[#allocation5 + $0x2e0] sm:$0xff] }
 0xa5a   :  { %v17867_v0 = vpack.c.bf16 %v8983_v4, %v8981_v30  ;;  %v8997_v30 = vld [vmem:[#allocation5 + $0x360] sm:$0xff]  ;;  %v8999_v4 = vld [vmem:[#allocation5 + $0x370] sm:$0xff] }
 0xa60   :  { %9471 = vmatmul.mubr.bf16.gmra.mrb[152].mxu1 %v17825_v35  ;;  %9846 = vmatmul.mubr.bf16.gmra.mrb[4].mxu0 %v17823_v58 }
 0xa61   :  { %11167 = vmatprep.mubr.msk.bf16.mxu1 %vm7176_vm3, %v9068_v55  ;;  %11212 = vmatprep.mubr.msk.bf16.mxu0 %vm7176_vm3, %v9068_v55  ;;  %v8985_v55 = vld [vmem:[#allocation5 + $0x300] sm:$0xff] }
 0xa62   :  { %v17877_v3 = vpack.c.bf16 %v8987_v46, %v8985_v55  ;;  %v17907_v55 = vpack.c.bf16 %v8999_v4, %v8997_v30  ;;  %v17909_v46 = vpack.c.bf16 %v9004_v26, %v9002_v12  ;;  %v17927_v30 = vpack.c.bf16 %v9007_v13, %v9005_v9  ;;  %v9014_v13 = vld [vmem:[#allocation5 + $0x3e8] sm:$0xff] }
 0xa63   :  { %v17929_v4 = vpack.c.bf16 %v9012_v7, %v9010_v17  ;;  %v9016_v17 = vld [vmem:[#allocation5 + $0x3f8] sm:$0xff] }
 0xa64   :  { %19061 = vst [vmem:[#allocation16_spill] sm:$0xff] %v17907_v55  ;;  %19062 = vst [vmem:[#allocation91_spill] sm:$0xff] %v17909_v46 }
 0xa65   :  { %19065 = vst [vmem:[#allocation92_spill] sm:$0xff] %v17927_v30  ;;  %19066 = vst [vmem:[#allocation105_spill] sm:$0xff] %v17929_v4 }
 0xa68   :  { %9479 = vmatmul.mubr.bf16.gmra.mrb[156].mxu1 %v9067_v24  ;;  %9854 = vmatmul.mubr.bf16.gmra.mrb[8].mxu0 %v9067_v24  ;;  %v17879_v24 = vpack.c.bf16 %v8992_v28, %v8990_v52  ;;  %v9001_v52 = vld [vmem:[#allocation5 + $0x380] sm:$0xff]  ;;  %v9003_v28 = vld [vmem:[#allocation5 + $0x390] sm:$0xff] }
 0xa69   :  { %11168 = vmatprep.mubr.msk.bf16.mxu1 %vm7176_vm3, %v17831_v6  ;;  %11213 = vmatprep.mubr.msk.bf16.mxu0 %vm7176_vm3, %v17831_v6  ;;  %v17917_v47 = vpack.c.bf16 %v9003_v28, %v9001_v52  ;;  %v9009_v52 = vld [vmem:[#allocation5 + $0x3c0] sm:$0xff]  ;;  %v9011_v28 = vld [vmem:[#allocation5 + $0x3d0] sm:$0xff] }
 0xa6b   :  { %19063 = vst [vmem:[#allocation29_spill] sm:$0xff] %v17917_v47 }
 0xa70   :  { %9487 = vmatmul.mubr.bf16.gmra.mrb[160].mxu1 %v17837_v27  ;;  %9862 = vmatmul.mubr.bf16.gmra.mrb[12].mxu0 %v17837_v27 }
 0xa71   :  { %11169 = vmatprep.mubr.msk.bf16.mxu1 %vm7176_vm3, %v17839_v42  ;;  %11214 = vmatprep.mubr.msk.bf16.mxu0 %vm7176_vm3, %v17839_v42 }
 0xa78   :  { %9495 = vmatmul.mubr.bf16.gmra.mrb[164].mxu1 %v17847_v21  ;;  %9870 = vmatmul.mubr.bf16.gmra.mrb[16].mxu0 %v17847_v21 }
 0xa79   :  { %11170 = vmatprep.mubr.msk.bf16.mxu1 %vm7176_vm3, %v17849_v11  ;;  %11215 = vmatprep.mubr.msk.bf16.mxu0 %vm7176_vm3, %v17849_v11 }
 0xa80   :  { %9503 = vmatmul.mubr.bf16.gmra.mrb[168].mxu1 %v17857_v20  ;;  %9878 = vmatmul.mubr.bf16.gmra.mrb[20].mxu0 %v17857_v20 }
 0xa81   :  { %11171 = vmatprep.mubr.msk.bf16.mxu1 %vm7176_vm3, %v17859_v63  ;;  %11216 = vmatprep.mubr.msk.bf16.mxu0 %vm7176_vm3, %v17859_v63 }
 0xa88   :  { %9511 = vmatmul.mubr.bf16.gmra.mrb[172].mxu1 %v17867_v0  ;;  %9886 = vmatmul.mubr.bf16.gmra.mrb[24].mxu0 %v17867_v0 }
 0xa89   :  { %11172 = vmatprep.mubr.msk.bf16.mxu1 %vm7176_vm3, %v17869_v51  ;;  %11217 = vmatprep.mubr.msk.bf16.mxu0 %vm7176_vm3, %v17869_v51 }
 0xa90   :  { %9519 = vmatmul.mubr.bf16.gmra.mrb[176].mxu1 %v17877_v3  ;;  %9894 = vmatmul.mubr.bf16.gmra.mrb[28].mxu0 %v17877_v3 }
 0xa91   :  { %11173 = vmatprep.mubr.msk.bf16.mxu1 %vm7176_vm3, %v17879_v24  ;;  %11218 = vmatprep.mubr.msk.bf16.mxu0 %vm7176_vm3, %v17879_v24 }
 0xa98   :  { %9527 = vmatmul.mubr.bf16.gmra.mrb[180].mxu1 %v17887_v45  ;;  %9902 = vmatmul.mubr.bf16.gmra.mrb[32].mxu0 %v17887_v45 }
 0xa99   :  { %11174 = vmatprep.mubr.msk.bf16.mxu1 %vm7176_vm3, %v17889_v62  ;;  %11219 = vmatprep.mubr.msk.bf16.mxu0 %vm7176_vm3, %v17889_v62 }
 0xaa0   :  { %9535 = vmatmul.mubr.bf16.gmra.mrb[184].mxu1 %v17897_v10  ;;  %9910 = vmatmul.mubr.bf16.gmra.mrb[52].mxu0 %v17897_v10 }
 0xaa1   :  { %11175 = vmatprep.mubr.msk.bf16.mxu1 %vm7176_vm3, %v17899_v49  ;;  %11220 = vmatprep.mubr.msk.bf16.mxu0 %vm7176_vm3, %v17899_v49 }
 0xaa8   :  { %9543 = vmatmul.mubr.bf16.gmra.mrb[188].mxu1 %v17907_v55  ;;  %9918 = vmatmul.mubr.bf16.gmra.mrb[56].mxu0 %v17907_v55  ;;  %v17943_v55 = vpack.c.bf16 %v9011_v28, %v9009_v52  ;;  %v9018_v28 = vld [vmem:[#allocation5 + $0x408] sm:$0xff] }
 0xaa9   :  { %11176 = vmatprep.mubr.msk.bf16.mxu1 %vm7176_vm3, %v17909_v46  ;;  %11221 = vmatprep.mubr.msk.bf16.mxu0 %vm7176_vm3, %v17909_v46 }
 0xaaa   :  { %19069 = vst [vmem:[#allocation31_spill] sm:$0xff] %v17943_v55 }
 0xab0   :  { %9551 = vmatmul.mubr.bf16.gmra.mrb[192].mxu1 %v17917_v47  ;;  %9926 = vmatmul.mubr.bf16.gmra.mrb[60].mxu0 %v17917_v47 }
 0xab1   :  { %11177 = vmatprep.mubr.msk.bf16.mxu1 %vm7176_vm3, %v17919_v57  ;;  %11222 = vmatprep.mubr.msk.bf16.mxu0 %vm7176_vm3, %v17919_v57 }
 0xab8   :  { %9559 = vmatmul.mubr.bf16.gmra.mrb[196].mxu1 %v17927_v30  ;;  %9934 = vmatmul.mubr.bf16.gmra.mrb[64].mxu0 %v17927_v30 }
 0xab9   :  { %11178 = vmatprep.mubr.msk.bf16.mxu1 %vm7176_vm3, %v17929_v4  ;;  %11223 = vmatprep.mubr.msk.bf16.mxu0 %vm7176_vm3, %v17929_v4  ;;  %v17945_v4 = vpack.c.bf16 %v9016_v17, %v9014_v13 }
 0xabb   :  { %v9352_v12 = vpop.f32.mrb[92].mxu1  ;;  %v9727_v26 = vpop.f32.mrb[200].mxu0  ;;  %19070 = vst [vmem:[#allocation71_spill] sm:$0xff] %v17945_v4 }
 0xabc   :  { %v17938_v15 = vadd.f32 %v17744_v31, %v9352_v12  ;;  %v9354_v19 = vpop.f32.mrb[93].mxu1  ;;  %v9729_v9 = vpop.f32.mrb[201].mxu0 }
 0xabd   :  { %v9355_v7 = vpop.f32.mrb[94].mxu1  ;;  %v9730_v57 = vpop.f32.mrb[202].mxu0  ;;  %v9015_v19 = vld [vmem:[#allocation5 + $0x3f0] sm:$0xff]  ;;  %v9020_v9 = vld [vmem:[#allocation5 + $0x418] sm:$0xff] }
 0xabe   :  { %19067 = vst [vmem:[#allocation67_spill] sm:$0xff] %v17938_v15  ;;  %v17941_v30 = vadd.f32 %v17760_v22, %v9355_v7  ;;  %v9357_v47 = vpop.f32.mrb[95].mxu1  ;;  %v9732_v46 = vpop.f32.mrb[203].mxu0  ;;  %v9013_v22 = vld [vmem:[#allocation5 + $0x3e0] sm:$0xff]  ;;  %v17959_v49 = vpack.c.bf16 %v9020_v9, %v9018_v28 }
 0xac0   :  { %19068 = vst [vmem:[#allocation93_spill] sm:$0xff] %v17941_v30  ;;  %9567 = vmatmul.mubr.bf16.gmra.mrb[200].mxu1 %v17943_v55  ;;  %9942 = vmatmul.mubr.bf16.gmra.mrb[68].mxu0 %v17943_v55  ;;  %v17957_v55 = vpack.c.bf16 %v9015_v19, %v9013_v22  ;;  %19074 = vst [vmem:[#allocation75_spill] sm:$0xff] %v17959_v49  ;;  %v9022_v19 = vld [vmem:[#allocation5 + $0x428] sm:$0xff] }
 0xac1   :  { %11179 = vmatprep.mubr.msk.bf16.mxu1 %vm7176_vm3, %v17945_v4  ;;  %11224 = vmatprep.mubr.msk.bf16.mxu0 %vm7176_vm3, %v17945_v4 }
 0xac2   :  { %19073 = vst [vmem:[#allocation95_spill] sm:$0xff] %v17957_v55 }
 0xac3   :  { %v9360_v31 = vpop.f32.mrb[96].mxu1  ;;  %v9735_v12 = vpop.f32.mrb[204].mxu0 }
 0xac4   :  { %v17953_v47 = vadd.f32 %v9727_v26, %v9360_v31  ;;  %v9362_v46 = vpop.f32.mrb[97].mxu1  ;;  %v9737_v52 = vpop.f32.mrb[205].mxu0 }
 0xac5   :  { %v9363_v13 = vpop.f32.mrb[98].mxu1  ;;  %v9738_v17 = vpop.f32.mrb[206].mxu0  ;;  %v9019_v46 = vld [vmem:[#allocation5 + $0x410] sm:$0xff]  ;;  %v9024_v52 = vld [vmem:[#allocation5 + $0x438] sm:$0xff] }
 0xac6   :  { %19071 = vst [vmem:[#allocation94_spill] sm:$0xff] %v17953_v47  ;;  %v17955_v7 = vadd.f32 %v9730_v57, %v9363_v13  ;;  %v9365_v30 = vpop.f32.mrb[99].mxu1  ;;  %v9740_v15 = vpop.f32.mrb[207].mxu0  ;;  %v9017_v57 = vld [vmem:[#allocation5 + $0x400] sm:$0xff]  ;;  %v17973_v4 = vpack.c.bf16 %v9024_v52, %v9022_v19 }
 0xac8   :  { %19072 = vst [vmem:[#allocation73_spill] sm:$0xff] %v17955_v7  ;;  %9575 = vmatmul.mubr.bf16.gmra.mrb[204].mxu1 %v17957_v55  ;;  %9950 = vmatmul.mubr.bf16.gmra.mrb[72].mxu0 %v17957_v55  ;;  %v17971_v55 = vpack.c.bf16 %v9019_v46, %v9017_v57  ;;  %v9026_v46 = vld [vmem:[#allocation5 + $0x448] sm:$0xff] }
 0xac9   :  { %11180 = vmatprep.mubr.msk.bf16.mxu1 %vm7176_vm3, %v17959_v49  ;;  %11225 = vmatprep.mubr.msk.bf16.mxu0 %vm7176_vm3, %v17959_v49 }
 0xaca   :  { %19077 = vst [vmem:[#allocation98_spill] sm:$0xff] %v17971_v55 }
 0xacb   :  { %v9368_v26 = vpop.f32.mrb[100].mxu1  ;;  %v9743_v31 = vpop.f32.mrb[208].mxu0 }
 0xacc   :  { %v17967_v30 = vadd.f32 %v9735_v12, %v9368_v26  ;;  %v9370_v15 = vpop.f32.mrb[101].mxu1  ;;  %v9745_v22 = vpop.f32.mrb[209].mxu0 }
 0xacd   :  { %v9371_v28 = vpop.f32.mrb[102].mxu1  ;;  %v9746_v9 = vpop.f32.mrb[210].mxu0  ;;  %v9023_v15 = vld [vmem:[#allocation5 + $0x430] sm:$0xff]  ;;  %v9028_v22 = vld [vmem:[#allocation5 + $0x458] sm:$0xff] }
 0xace   :  { %19075 = vst [vmem:[#allocation96_spill] sm:$0xff] %v17967_v30  ;;  %v17969_v13 = vadd.f32 %v9738_v17, %v9371_v28  ;;  %v9373_v7 = vpop.f32.mrb[103].mxu1  ;;  %v9748_v47 = vpop.f32.mrb[211].mxu0  ;;  %v9021_v17 = vld [vmem:[#allocation5 + $0x420] sm:$0xff]  ;;  %v17987_v49 = vpack.c.bf16 %v9028_v22, %v9026_v46 }
 0xad0   :  { %19076 = vst [vmem:[#allocation78_spill] sm:$0xff] %v17969_v13  ;;  %9583 = vmatmul.mubr.bf16.gmra.mrb[208].mxu1 %v17971_v55  ;;  %9958 = vmatmul.mubr.bf16.gmra.mrb[76].mxu0 %v17971_v55  ;;  %v17985_v55 = vpack.c.bf16 %v9023_v15, %v9021_v17  ;;  %19081 = vst [vmem:[#allocation34_spill] sm:$0xff] %v17987_v49 }
 0xad1   :  { %11181 = vmatprep.mubr.msk.bf16.mxu1 %vm7176_vm3, %v17973_v4  ;;  %11226 = vmatprep.mubr.msk.bf16.mxu0 %vm7176_vm3, %v17973_v4 }
 0xad2   :  { %19080 = vst [vmem:[#allocation106_spill] sm:$0xff] %v17985_v55 }
 0xad3   :  { %v9376_v12 = vpop.f32.mrb[104].mxu1  ;;  %v9751_v26 = vpop.f32.mrb[212].mxu0 }
 0xad4   :  { %v17981_v7 = vadd.f32 %v9743_v31, %v9376_v12  ;;  %v9378_v47 = vpop.f32.mrb[105].mxu1  ;;  %v9753_v57 = vpop.f32.mrb[213].mxu0 }
 0xad5   :  { %v9379_v19 = vpop.f32.mrb[106].mxu1  ;;  %v9754_v52 = vpop.f32.mrb[214].mxu0  ;;  %v9025_v47 = vld [vmem:[#allocation5 + $0x440] sm:$0xff]  ;;  %v9027_v57 = vld [vmem:[#allocation5 + $0x450] sm:$0xff] }
 0xad6   :  { %19078 = vst [vmem:[#allocation82_spill] sm:$0xff] %v17981_v7  ;;  %v17983_v28 = vadd.f32 %v9746_v9, %v9379_v19  ;;  %v9381_v13 = vpop.f32.mrb[107].mxu1  ;;  %v9756_v30 = vpop.f32.mrb[215].mxu0  ;;  %v17997_v19 = vpack.c.bf16 %v9027_v57, %v9025_v47 }
 0xad8   :  { %19079 = vst [vmem:[#allocation101_spill] sm:$0xff] %v17983_v28  ;;  %9591 = vmatmul.mubr.bf16.gmra.mrb[212].mxu1 %v17985_v55  ;;  %9966 = vmatmul.mubr.bf16.gmra.mrb[80].mxu0 %v17985_v55 }
 0xad9   :  { %11182 = vmatprep.mubr.msk.bf16.mxu1 %vm7176_vm3, %v17987_v49 }
 0xadb   :  { %v9384_v31 = vpop.f32.mrb[108].mxu1  ;;  %v9759_v12 = vpop.f32.mrb[216].mxu0 }
 0xadc   :  { %v17993_v7 = vadd.f32 %v9751_v26, %v9384_v31  ;;  %v9386_v9 = vpop.f32.mrb[109].mxu1  ;;  %v9761_v13 = vpop.f32.mrb[217].mxu0 }
 0xadd   :  { %v9387_v30 = vpop.f32.mrb[110].mxu1  ;;  %v9762_v17 = vpop.f32.mrb[218].mxu0 }
 0xade   :  { %19082 = vst [vmem:[#allocation22_spill] sm:$0xff] %v17993_v7  ;;  %v17995_v15 = vadd.f32 %v9754_v52, %v9387_v30  ;;  %v9389_v46 = vpop.f32.mrb[111].mxu1  ;;  %v9764_v22 = vpop.f32.mrb[219].mxu0 }
 0xae0   :  { %9599 = vmatmul.mubr.bf16.gmra.mrb[216].mxu1 %v17997_v19 }
 0xae1   :  { %11263 = vmatprep.mubr.msk.bf16.mxu1 %vm7176_vm3, %v17574_v39 }
 0xae3   :  { %v9392_v28 = vpop.f32.mrb[112].mxu1  ;;  %v9767_v49 = vpop.f32.mrb[220].mxu0 }
 0xae4   :  { %v18002_v55 = vadd.f32 %v9759_v12, %v9392_v28  ;;  %v9394_v26 = vpop.f32.mrb[113].mxu1  ;;  %v9769_v31 = vpop.f32.mrb[221].mxu0 }
 0xae5   :  { %v9395_v9 = vpop.f32.mrb[114].mxu1  ;;  %v9770_v13 = vpop.f32.mrb[222].mxu0 }
 0xae6   :  { %v18004_v7 = vadd.f32 %v9762_v17, %v9395_v9  ;;  %v9397_v52 = vpop.f32.mrb[115].mxu1  ;;  %v9772_v30 = vpop.f32.mrb[223].mxu0 }
 0xae8   :  { %10114 = vmatmul.mubr.bf16.vlgmr.msra.gmra.mrb[220].mxu1 %v17588_v40 }
 0xae9   :  { %11264 = vmatprep.mubr.msk.bf16.mxu1 %vm7176_vm3, %v17593_v48 }
 0xaeb   :  { %v9400_v47 = vpop.f32.mrb[116].mxu1  ;;  %v9775_v57 = vpop.f32.mrb[224].mxu0 }
 0xaec   :  { %v18009_v39 = vadd.f32 %v9767_v49, %v9400_v47  ;;  %v9402_v46 = vpop.f32.mrb[117].mxu1  ;;  %v9777_v28 = vpop.f32.mrb[225].mxu0 }
 0xaed   :  { %v9403_v12 = vpop.f32.mrb[118].mxu1  ;;  %v9778_v22 = vpop.f32.mrb[226].mxu0 }
 0xaee   :  { %v18011_v26 = vadd.f32 %v9770_v13, %v9403_v12  ;;  %v9405_v31 = vpop.f32.mrb[119].mxu1  ;;  %v9780_v17 = vpop.f32.mrb[227].mxu0 }
 0xaf0   :  { %10122 = vmatmul.mubr.bf16.gmra.mrb[224].mxu1 %v17610_v14 }
 0xaf1   :  { %11265 = vmatprep.mubr.msk.bf16.mxu1 %vm7176_vm3, %v17615_v60 }
 0xaf3   :  { %v9408_v40 = vpop.f32.mrb[120].mxu1  ;;  %v9783_v9 = vpop.f32.mrb[228].mxu0 }
 0xaf4   :  { %v18016_v48 = vadd.f32 %v9775_v57, %v9408_v40  ;;  %v9410_v52 = vpop.f32.mrb[121].mxu1  ;;  %v9785_v49 = vpop.f32.mrb[229].mxu0 }
 0xaf5   :  { %v9411_v30 = vpop.f32.mrb[122].mxu1  ;;  %v9786_v47 = vpop.f32.mrb[230].mxu0 }
 0xaf6   :  { %v18018_v46 = vadd.f32 %v9778_v22, %v9411_v30  ;;  %v9413_v28 = vpop.f32.mrb[123].mxu1  ;;  %v9788_v13 = vpop.f32.mrb[231].mxu0 }
 0xaf8   :  { %10130 = vmatmul.mubr.bf16.gmra.mrb[228].mxu1 %v17632_v34 }
 0xaf9   :  { %11266 = vmatprep.mubr.msk.bf16.mxu1 %vm7176_vm3, %v17637_v59 }
 0xafb   :  { %v9416_v14 = vpop.f32.mrb[124].mxu1  ;;  %v9791_v12 = vpop.f32.mrb[232].mxu0 }
 0xafc   :  { %v18023_v60 = vadd.f32 %v9783_v9, %v9416_v14  ;;  %v9418_v31 = vpop.f32.mrb[125].mxu1  ;;  %v9793_v57 = vpop.f32.mrb[233].mxu0 }
 0xafd   :  { %v9419_v17 = vpop.f32.mrb[126].mxu1  ;;  %v9794_v40 = vpop.f32.mrb[234].mxu0 }
 0xafe   :  { %v18025_v52 = vadd.f32 %v9786_v47, %v9419_v17  ;;  %v9421_v49 = vpop.f32.mrb[127].mxu1  ;;  %v9796_v22 = vpop.f32.mrb[235].mxu0 }
 0xb00   :  { %10138 = vmatmul.mubr.bf16.gmra.mrb[232].mxu1 %v17654_v1 }
 0xb01   :  { %11267 = vmatprep.mubr.msk.bf16.mxu1 %vm7176_vm3, %v17656_v53 }
 0xb03   :  { %v9424_v34 = vpop.f32.mrb[128].mxu1  ;;  %v9799_v30 = vpop.f32.mrb[236].mxu0 }
 0xb04   :  { %v18030_v59 = vadd.f32 %v9791_v12, %v9424_v34  ;;  %v9426_v28 = vpop.f32.mrb[129].mxu1  ;;  %v9801_v9 = vpop.f32.mrb[237].mxu0 }
 0xb05   :  { %v9427_v13 = vpop.f32.mrb[130].mxu1  ;;  %v9802_v14 = vpop.f32.mrb[238].mxu0 }
 0xb06   :  { %v18032_v31 = vadd.f32 %v9794_v40, %v9427_v13  ;;  %v9429_v57 = vpop.f32.mrb[131].mxu1  ;;  %v9804_v47 = vpop.f32.mrb[239].mxu0 }
 0xb08   :  { %10146 = vmatmul.mubr.bf16.gmra.mrb[236].mxu1 %v17669_v16 }
 0xb09   :  { %11268 = vmatprep.mubr.msk.bf16.mxu1 %vm7176_vm3, %v17671_v43 }
 0xb0b   :  { %v9432_v1 = vpop.f32.mrb[132].mxu1  ;;  %v9807_v17 = vpop.f32.mrb[240].mxu0 }
 0xb0c   :  { %v18037_v53 = vadd.f32 %v9799_v30, %v9432_v1  ;;  %v9434_v49 = vpop.f32.mrb[133].mxu1  ;;  %v9809_v12 = vpop.f32.mrb[241].mxu0 }
 0xb0d   :  { %v9435_v22 = vpop.f32.mrb[134].mxu1  ;;  %v9810_v34 = vpop.f32.mrb[242].mxu0 }
 0xb0e   :  { %v18039_v28 = vadd.f32 %v9802_v14, %v9435_v22  ;;  %v9437_v9 = vpop.f32.mrb[135].mxu1  ;;  %v9812_v40 = vpop.f32.mrb[243].mxu0 }
 0xb10   :  { %10154 = vmatmul.mubr.bf16.gmra.mrb[240].mxu1 %v17687_v32 }
 0xb11   :  { %11269 = vmatprep.mubr.msk.bf16.mxu1 %vm7176_vm3, %v17689_v33 }
 0xb13   :  { %v9440_v16 = vpop.f32.mrb[136].mxu1  ;;  %v9815_v13 = vpop.f32.mrb[244].mxu0 }
 0xb14   :  { %v18044_v43 = vadd.f32 %v9807_v17, %v9440_v16  ;;  %v9442_v57 = vpop.f32.mrb[137].mxu1  ;;  %v9817_v30 = vpop.f32.mrb[245].mxu0 }
 0xb15   :  { %v9443_v47 = vpop.f32.mrb[138].mxu1  ;;  %v9818_v1 = vpop.f32.mrb[246].mxu0 }
 0xb16   :  { %v18046_v49 = vadd.f32 %v9810_v34, %v9443_v47  ;;  %v9445_v12 = vpop.f32.mrb[139].mxu1  ;;  %v9820_v14 = vpop.f32.mrb[247].mxu0 }
 0xb18   :  { %10162 = vmatmul.mubr.bf16.gmra.mrb[244].mxu1 %v17701_v44 }
 0xb19   :  { %11270 = vmatprep.mubr.msk.bf16.mxu1 %vm7176_vm3, %v17703_v41 }
 0xb1b   :  { %v9448_v32 = vpop.f32.mrb[140].mxu1  ;;  %v9823_v22 = vpop.f32.mrb[248].mxu0 }
 0xb1c   :  { %v18051_v33 = vadd.f32 %v9815_v13, %v9448_v32  ;;  %v9450_v9 = vpop.f32.mrb[141].mxu1  ;;  %v9825_v17 = vpop.f32.mrb[249].mxu0 }
 0xb1d   :  { %v9451_v40 = vpop.f32.mrb[142].mxu1  ;;  %v9826_v16 = vpop.f32.mrb[250].mxu0 }
 0xb1e   :  { %v18053_v57 = vadd.f32 %v9818_v1, %v9451_v40  ;;  %v9453_v30 = vpop.f32.mrb[143].mxu1  ;;  %v9828_v34 = vpop.f32.mrb[251].mxu0 }
 0xb20   :  { %10170 = vmatmul.mubr.bf16.gmra.mrb[248].mxu1 %v17715_v61 }
 0xb21   :  { %11271 = vmatprep.mubr.msk.bf16.mxu1 %vm7176_vm3, %v17717_v37 }
 0xb23   :  { %v9456_v44 = vpop.f32.mrb[144].mxu1  ;;  %v9831_v47 = vpop.f32.mrb[252].mxu0 }
 0xb24   :  { %v18058_v41 = vadd.f32 %v9823_v22, %v9456_v44  ;;  %v9458_v12 = vpop.f32.mrb[145].mxu1  ;;  %v9833_v13 = vpop.f32.mrb[253].mxu0 }
 0xb25   :  { %v9459_v14 = vpop.f32.mrb[146].mxu1  ;;  %v9834_v32 = vpop.f32.mrb[254].mxu0 }
 0xb26   :  { %v18060_v9 = vadd.f32 %v9826_v16, %v9459_v14  ;;  %v9461_v17 = vpop.f32.mrb[147].mxu1  ;;  %v9836_v1 = vpop.f32.mrb[255].mxu0 }
 0xb28   :  { %10178 = vmatmul.mubr.bf16.gmra.mrb[252].mxu1 %v17733_v36 }
 0xb29   :  { %11272 = vmatprep.mubr.msk.bf16.mxu1 %vm7176_vm3, %v17735_v8 }
 0xb2b   :  { %v9464_v61 = vpop.f32.mrb[148].mxu1  ;;  %v9839_v40 = vpop.f32.mrb[0].mxu0 }
 0xb2c   :  { %v18065_v37 = vadd.f32 %v9831_v47, %v9464_v61  ;;  %v9466_v30 = vpop.f32.mrb[149].mxu1  ;;  %v9841_v22 = vpop.f32.mrb[1].mxu0 }
 0xb2d   :  { %v9467_v34 = vpop.f32.mrb[150].mxu1  ;;  %v9842_v44 = vpop.f32.mrb[2].mxu0 }
 0xb2e   :  { %v18067_v12 = vadd.f32 %v9834_v32, %v9467_v34  ;;  %v9469_v13 = vpop.f32.mrb[151].mxu1  ;;  %v9844_v16 = vpop.f32.mrb[3].mxu0 }
 0xb30   :  { %10186 = vmatmul.mubr.bf16.gmra.mrb[0].mxu1 %v17749_v29 }
 0xb31   :  { %11273 = vmatprep.mubr.msk.bf16.mxu1 %vm7176_vm3, %v17751_v23 }
 0xb33   :  { %v9472_v36 = vpop.f32.mrb[152].mxu1  ;;  %v9847_v14 = vpop.f32.mrb[4].mxu0 }
 0xb34   :  { %v18072_v8 = vadd.f32 %v9839_v40, %v9472_v36  ;;  %v9474_v17 = vpop.f32.mrb[153].mxu1  ;;  %v9849_v47 = vpop.f32.mrb[5].mxu0 }
 0xb35   :  { %v9475_v1 = vpop.f32.mrb[154].mxu1  ;;  %v9850_v61 = vpop.f32.mrb[6].mxu0 }
 0xb36   :  { %v18074_v30 = vadd.f32 %v9842_v44, %v9475_v1  ;;  %v9477_v22 = vpop.f32.mrb[155].mxu1  ;;  %v9852_v32 = vpop.f32.mrb[7].mxu0 }
 0xb38   :  { %10194 = vmatmul.mubr.bf16.gmra.mrb[4].mxu1 %v17765_v54 }
 0xb39   :  { %11274 = vmatprep.mubr.msk.bf16.mxu1 %vm7176_vm3, %v17770_v50 }
 0xb3b   :  { %v9480_v29 = vpop.f32.mrb[156].mxu1  ;;  %v9855_v34 = vpop.f32.mrb[8].mxu0 }
 0xb3c   :  { %v18079_v23 = vadd.f32 %v9847_v14, %v9480_v29  ;;  %v9482_v13 = vpop.f32.mrb[157].mxu1  ;;  %v9857_v40 = vpop.f32.mrb[9].mxu0 }
 0xb3d   :  { %v9483_v16 = vpop.f32.mrb[158].mxu1  ;;  %v9858_v36 = vpop.f32.mrb[10].mxu0 }
 0xb3e   :  { %v18081_v17 = vadd.f32 %v9850_v61, %v9483_v16  ;;  %v9485_v47 = vpop.f32.mrb[159].mxu1  ;;  %v9860_v44 = vpop.f32.mrb[11].mxu0 }
 0xb40   :  { %10202 = vmatmul.mubr.bf16.gmra.mrb[8].mxu1 %v17783_v25 }
 0xb41   :  { %11275 = vmatprep.mubr.msk.bf16.mxu1 %vm7176_vm3, %v17785_v2 }
 0xb43   :  { %v9488_v54 = vpop.f32.mrb[160].mxu1  ;;  %v9863_v1 = vpop.f32.mrb[12].mxu0 }
 0xb44   :  { %v18086_v50 = vadd.f32 %v9855_v34, %v9488_v54  ;;  %v9490_v22 = vpop.f32.mrb[161].mxu1  ;;  %v9865_v14 = vpop.f32.mrb[13].mxu0 }
 0xb45   :  { %v9491_v32 = vpop.f32.mrb[162].mxu1  ;;  %v9866_v29 = vpop.f32.mrb[14].mxu0 }
 0xb46   :  { %v18088_v13 = vadd.f32 %v9858_v36, %v9491_v32  ;;  %v9493_v40 = vpop.f32.mrb[163].mxu1  ;;  %v9868_v61 = vpop.f32.mrb[15].mxu0  ;;  %v8960_v32 = vld [vmem:[#allocation5 + $0x238] sm:$0xff] }
 0xb48   :  { %10210 = vmatmul.mubr.bf16.gmra.mrb[12].mxu1 %v17797_v56  ;;  %v8958_v56 = vld [vmem:[#allocation5 + $0x228] sm:$0xff] }
 0xb49   :  { %11276 = vmatprep.mubr.msk.bf16.mxu1 %vm7176_vm3, %v17799_v18 }
 0xb4b   :  { %v9496_v25 = vpop.f32.mrb[164].mxu1  ;;  %v9871_v16 = vpop.f32.mrb[16].mxu0 }
 0xb4c   :  { %v18093_v2 = vadd.f32 %v9863_v1, %v9496_v25  ;;  %v9498_v47 = vpop.f32.mrb[165].mxu1  ;;  %v9873_v34 = vpop.f32.mrb[17].mxu0 }
 0xb4d   :  { %v9499_v44 = vpop.f32.mrb[166].mxu1  ;;  %v9874_v54 = vpop.f32.mrb[18].mxu0 }
 0xb4e   :  { %19083 = vst [vmem:[#allocation107_spill] sm:$0xff] %v18093_v2  ;;  %v18095_v22 = vadd.f32 %v9866_v29, %v9499_v44  ;;  %v9501_v14 = vpop.f32.mrb[167].mxu1  ;;  %v9876_v36 = vpop.f32.mrb[19].mxu0  ;;  %v9975_v2 = vpack.c.bf16 %v8960_v32, %v8958_v56 }
 0xb50   :  { %19084 = vst [vmem:[#allocation33_spill] sm:$0xff] %v18095_v22  ;;  %10218 = vmatmul.mubr.bf16.gmra.mrb[16].mxu1 %v17814_v38 }
 0xb51   :  { %11277 = vmatprep.mubr.msk.bf16.mxu1 %vm7176_vm3, %v17816_v5 }
 0xb53   :  { %v9504_v18 = vpop.f32.mrb[168].mxu1  ;;  %v9879_v40 = vpop.f32.mrb[20].mxu0 }
 0xb54   :  { %v18100_v61 = vadd.f32 %v9871_v16, %v9504_v18  ;;  %v9506_v1 = vpop.f32.mrb[169].mxu1  ;;  %v9881_v25 = vpop.f32.mrb[21].mxu0 }
 0xb55   :  { %v9507_v47 = vpop.f32.mrb[170].mxu1  ;;  %v9882_v34 = vpop.f32.mrb[22].mxu0 }
 0xb56   :  { %19085 = vst [vmem:[#allocation108_spill] sm:$0xff] %v18100_v61  ;;  %v18102_v29 = vadd.f32 %v9874_v54, %v9507_v47  ;;  %v9509_v44 = vpop.f32.mrb[171].mxu1  ;;  %v9884_v14 = vpop.f32.mrb[23].mxu0 }
 0xb58   :  { %10226 = vmatmul.mubr.bf16.gmra.mrb[20].mxu1 %v17825_v35 }
 0xb59   :  { %11278 = vmatprep.mubr.msk.bf16.mxu1 %vm7176_vm3, %v9975_v2 }
 0xb5b   :  { %v9512_v38 = vpop.f32.mrb[172].mxu1  ;;  %v9887_v5 = vpop.f32.mrb[24].mxu0 }
 0xb5c   :  { %v18106_v36 = vadd.f32 %v9879_v40, %v9512_v38  ;;  %v9514_v22 = vpop.f32.mrb[173].mxu1  ;;  %v9889_v16 = vpop.f32.mrb[25].mxu0 }
 0xb5d   :  { %v9515_v18 = vpop.f32.mrb[174].mxu1  ;;  %v9890_v1 = vpop.f32.mrb[26].mxu0 }
 0xb5e   :  { %v18108_v25 = vadd.f32 %v9882_v34, %v9515_v18  ;;  %v9517_v61 = vpop.f32.mrb[175].mxu1  ;;  %v9892_v56 = vpop.f32.mrb[27].mxu0 }
 0xb60   :  { %10234 = vmatmul.mubr.bf16.gmra.mrb[24].mxu1 %v17823_v58 }
 0xb61   :  { %11279 = vmatprep.mubr.msk.bf16.mxu1 %vm7176_vm3, %v17831_v6 }
 0xb63   :  { %v9520_v35 = vpop.f32.mrb[176].mxu1  ;;  %v9895_v54 = vpop.f32.mrb[28].mxu0 }
 0xb64   :  { %v18113_v2 = vadd.f32 %v9887_v5, %v9520_v35  ;;  %v9522_v32 = vpop.f32.mrb[177].mxu1  ;;  %v9897_v40 = vpop.f32.mrb[29].mxu0 }
 0xb65   :  { %v9523_v47 = vpop.f32.mrb[178].mxu1  ;;  %v9898_v22 = vpop.f32.mrb[30].mxu0 }
 0xb66   :  { %v18115_v44 = vadd.f32 %v9890_v1, %v9523_v47  ;;  %v9525_v14 = vpop.f32.mrb[179].mxu1  ;;  %v9900_v34 = vpop.f32.mrb[31].mxu0 }
 0xb68   :  { %10242 = vmatmul.mubr.bf16.gmra.mrb[28].mxu1 %v17837_v27 }
 0xb69   :  { %11280 = vmatprep.mubr.msk.bf16.mxu1 %vm7176_vm3, %v17839_v42 }
 0xb6b   :  { %v9528_v58 = vpop.f32.mrb[180].mxu1  ;;  %v9903_v61 = vpop.f32.mrb[32].mxu0 }
 0xb6c   :  { %v18120_v6 = vadd.f32 %v9895_v54, %v9528_v58  ;;  %v9530_v38 = vpop.f32.mrb[181].mxu1  ;;  %v9905_v5 = vpop.f32.mrb[33].mxu0 }
 0xb6d   :  { %v9531_v16 = vpop.f32.mrb[182].mxu1  ;;  %v9906_v18 = vpop.f32.mrb[34].mxu0 }
 0xb6e   :  { %v18122_v56 = vadd.f32 %v9898_v22, %v9531_v16  ;;  %v9533_v35 = vpop.f32.mrb[183].mxu1  ;;  %v9908_v1 = vpop.f32.mrb[35].mxu0 }
 0xb70   :  { %10250 = vmatmul.mubr.bf16.gmra.mrb[32].mxu1 %v17847_v21 }
 0xb71   :  { %11281 = vmatprep.mubr.msk.bf16.mxu1 %vm7176_vm3, %v17849_v11 }
 0xb73   :  { %v9536_v27 = vpop.f32.mrb[184].mxu1  ;;  %v9911_v32 = vpop.f32.mrb[52].mxu0 }
 0xb74   :  { %v18127_v42 = vadd.f32 %v9903_v61, %v9536_v27  ;;  %v9538_v40 = vpop.f32.mrb[185].mxu1  ;;  %v9913_v54 = vpop.f32.mrb[53].mxu0 }
 0xb75   :  { %v9539_v47 = vpop.f32.mrb[186].mxu1  ;;  %v9914_v14 = vpop.f32.mrb[54].mxu0 }
 0xb76   :  { %v18129_v34 = vadd.f32 %v9906_v18, %v9539_v47  ;;  %v9541_v58 = vpop.f32.mrb[187].mxu1  ;;  %v9916_v22 = vpop.f32.mrb[55].mxu0 }
 0xb78   :  { %10258 = vmatmul.mubr.bf16.gmra.mrb[36].mxu1 %v17857_v20 }
 0xb79   :  { %11282 = vmatprep.mubr.msk.bf16.mxu1 %vm7176_vm3, %v17859_v63 }
 0xb7b   :  { %v9544_v21 = vpop.f32.mrb[188].mxu1  ;;  %v9919_v38 = vpop.f32.mrb[56].mxu0 }
 0xb7c   :  { %v18134_v11 = vadd.f32 %v9911_v32, %v9544_v21  ;;  %v9546_v5 = vpop.f32.mrb[189].mxu1  ;;  %v9921_v61 = vpop.f32.mrb[57].mxu0 }
 0xb7d   :  { %v9547_v16 = vpop.f32.mrb[190].mxu1  ;;  %v9922_v35 = vpop.f32.mrb[58].mxu0 }
 0xb7e   :  { %v18136_v1 = vadd.f32 %v9914_v14, %v9547_v16  ;;  %v9549_v27 = vpop.f32.mrb[191].mxu1  ;;  %v9924_v18 = vpop.f32.mrb[59].mxu0 }
 0xb80   :  { %10266 = vmatmul.mubr.bf16.gmra.mrb[40].mxu1 %v17867_v0 }
 0xb81   :  { %11283 = vmatprep.mubr.msk.bf16.mxu1 %vm7176_vm3, %v17869_v51 }
 0xb83   :  { %v9552_v20 = vpop.f32.mrb[192].mxu1  ;;  %v9927_v40 = vpop.f32.mrb[60].mxu0 }
 0xb84   :  { %v18141_v63 = vadd.f32 %v9919_v38, %v9552_v20  ;;  %v9554_v54 = vpop.f32.mrb[193].mxu1  ;;  %v9929_v32 = vpop.f32.mrb[61].mxu0 }
 0xb85   :  { %v9555_v47 = vpop.f32.mrb[194].mxu1  ;;  %v9930_v58 = vpop.f32.mrb[62].mxu0 }
 0xb86   :  { %v18143_v22 = vadd.f32 %v9922_v35, %v9555_v47  ;;  %v9557_v21 = vpop.f32.mrb[195].mxu1  ;;  %v9932_v14 = vpop.f32.mrb[63].mxu0 }
 0xb88   :  { %10274 = vmatmul.mubr.bf16.gmra.mrb[44].mxu1 %v17877_v3 }
 0xb89   :  { %11284 = vmatprep.mubr.msk.bf16.mxu1 %vm7176_vm3, %v17879_v24 }
 0xb8b   :  { %v9560_v0 = vpop.f32.mrb[196].mxu1  ;;  %v9935_v5 = vpop.f32.mrb[64].mxu0 }
 0xb8c   :  { %v18148_v51 = vadd.f32 %v9927_v40, %v9560_v0  ;;  %v9562_v61 = vpop.f32.mrb[197].mxu1  ;;  %v9937_v38 = vpop.f32.mrb[65].mxu0 }
 0xb8d   :  { %v9563_v16 = vpop.f32.mrb[198].mxu1  ;;  %v9938_v27 = vpop.f32.mrb[66].mxu0  ;;  %v19086_v61 = vld [vmem:[#allocation54_spill] sm:$0xff] }
 0xb8e   :  { %v18150_v18 = vadd.f32 %v9930_v58, %v9563_v16  ;;  %v9565_v20 = vpop.f32.mrb[199].mxu1  ;;  %v9940_v35 = vpop.f32.mrb[67].mxu0 }
 0xb90   :  { %10282 = vmatmul.mubr.bf16.gmra.mrb[48].mxu1 %v17887_v45 }
 0xb91   :  { %11285 = vmatprep.mubr.msk.bf16.mxu1 %vm7176_vm3, %v17889_v62 }
 0xb93   :  { %v9568_v3 = vpop.f32.mrb[200].mxu1  ;;  %v9943_v54 = vpop.f32.mrb[68].mxu0 }
 0xb94   :  { %v18155_v24 = vadd.f32 %v9935_v5, %v9568_v3  ;;  %v9570_v32 = vpop.f32.mrb[201].mxu1  ;;  %v9945_v40 = vpop.f32.mrb[69].mxu0 }
 0xb95   :  { %v9571_v47 = vpop.f32.mrb[202].mxu1  ;;  %v9946_v21 = vpop.f32.mrb[70].mxu0  ;;  %v19089_v40 = vld [vmem:[#allocation16_spill] sm:$0xff] }
 0xb96   :  { %v18157_v14 = vadd.f32 %v9938_v27, %v9571_v47  ;;  %v9573_v0 = vpop.f32.mrb[203].mxu1  ;;  %v9948_v58 = vpop.f32.mrb[71].mxu0  ;;  %v19090_v47 = vld [vmem:[#allocation91_spill] sm:$0xff] }
 0xb98   :  { %10290 = vmatmul.mubr.bf16.gmra.mrb[52].mxu1 %v17897_v10 }
 0xb99   :  { %11286 = vmatprep.mubr.msk.bf16.mxu1 %vm7176_vm3, %v19086_v61 }
 0xb9b   :  { %v9576_v45 = vpop.f32.mrb[204].mxu1  ;;  %v9951_v38 = vpop.f32.mrb[72].mxu0 }
 0xb9c   :  { %v18162_v62 = vadd.f32 %v9943_v54, %v9576_v45  ;;  %v9578_v16 = vpop.f32.mrb[205].mxu1  ;;  %v9953_v5 = vpop.f32.mrb[73].mxu0 }
 0xb9d   :  { %v9579_v20 = vpop.f32.mrb[206].mxu1  ;;  %v9954_v35 = vpop.f32.mrb[74].mxu0 }
 0xb9e   :  { %19087 = vst [vmem:[#allocation36_spill] sm:$0xff] %v18162_v62  ;;  %v18164_v3 = vadd.f32 %v9946_v21, %v9579_v20  ;;  %v9581_v32 = vpop.f32.mrb[207].mxu1  ;;  %v9956_v27 = vpop.f32.mrb[75].mxu0  ;;  %v19093_v20 = vld [vmem:[#allocation29_spill] sm:$0xff] }
 0xb9f   :  { %v19094_v32 = vld [vmem:[#allocation60_spill] sm:$0xff] }
 0xba0   :  { %19088 = vst [vmem:[#allocation39_spill] sm:$0xff] %v18164_v3  ;;  %10298 = vmatmul.mubr.bf16.gmra.mrb[56].mxu1 %v19089_v40 }
 0xba1   :  { %11287 = vmatprep.mubr.msk.bf16.mxu1 %vm7176_vm3, %v19090_v47 }
 0xba3   :  { %v9584_v10 = vpop.f32.mrb[208].mxu1  ;;  %v9959_v0 = vpop.f32.mrb[76].mxu0 }
 0xba4   :  { %v18169_v58 = vadd.f32 %v9951_v38, %v9584_v10  ;;  %v9586_v61 = vpop.f32.mrb[209].mxu1  ;;  %v9961_v54 = vpop.f32.mrb[77].mxu0 }
 0xba5   :  { %v9587_v45 = vpop.f32.mrb[210].mxu1  ;;  %v9962_v16 = vpop.f32.mrb[78].mxu0 }
 0xba6   :  { %19091 = vst [vmem:[#allocation21_spill] sm:$0xff] %v18169_v58  ;;  %v18171_v5 = vadd.f32 %v9954_v35, %v9587_v45  ;;  %v9589_v62 = vpop.f32.mrb[211].mxu1  ;;  %v9964_v21 = vpop.f32.mrb[79].mxu0  ;;  %v19096_v45 = vld [vmem:[#allocation92_spill] sm:$0xff] }
 0xba7   :  { %v19097_v62 = vld [vmem:[#allocation105_spill] sm:$0xff] }
 0xba8   :  { %19092 = vst [vmem:[#allocation38_spill] sm:$0xff] %v18171_v5  ;;  %10306 = vmatmul.mubr.bf16.gmra.mrb[60].mxu1 %v19093_v20 }
 0xba9   :  { %11288 = vmatprep.mubr.msk.bf16.mxu1 %vm7176_vm3, %v19094_v32 }
 0xbab   :  { %v9592_v27 = vpop.f32.mrb[212].mxu1  ;;  %v9967_v40 = vpop.f32.mrb[80].mxu0 }
 0xbac   :  { %v18176_v47 = vadd.f32 %v9959_v0, %v9592_v27  ;;  %v9594_v3 = vpop.f32.mrb[213].mxu1  ;;  %v9969_v38 = vpop.f32.mrb[81].mxu0  ;;  %v19100_v27 = vld [vmem:[#allocation31_spill] sm:$0xff] }
 0xbad   :  { %v9595_v10 = vpop.f32.mrb[214].mxu1  ;;  %v9970_v61 = vpop.f32.mrb[82].mxu0  ;;  %v19101_v38 = vld [vmem:[#allocation71_spill] sm:$0xff] }
 0xbae   :  { %v18178_v54 = vadd.f32 %v9962_v16, %v9595_v10  ;;  %v9597_v58 = vpop.f32.mrb[215].mxu1  ;;  %v9972_v35 = vpop.f32.mrb[83].mxu0  ;;  %v18193_v16 = vld [vmem:[%s18362_s16] ss:$0 sm:$0xff]  ;;  %s12712_s16 = smov [#allocation11]  }
 0xbaf   :  { %v19102_v10 = vld [vmem:[#allocation67_spill] sm:$0xff]  ;;  %s10638_s12 = sshll.u32 %s12712_s16, 4  ;;  %s10639_s12 = int_to_ptr.vmem [resolvable:$true] %s10638_s12 }
 0xbb0   :  { %19095 = vst [vmem:[#allocation110_spill] sm:$0xff] %v18178_v54  ;;  %10314 = vmatmul.mubr.bf16.gmra.mrb[64].mxu1 %v19096_v45  ;;  %s12676_s9 = scalar_lea.vmem %s10639_s12, 8192  ;;  %p12681_p3 = scmp.lt.s32.totalorder %s10639_s12, %s10639_s12 }
 0xbb1   :  { %11289 = vmatprep.mubr.msk.bf16.mxu1 %vm7176_vm3, %v19097_v62  ;;  %p12677_p2 = scmp.ne.s32.totalorder %s10639_s12, %s12676_s9  ;;  %p12682_p4 = scmp.lt.s32.totalorder %s12676_s9, %s12676_s9 }
 0xbb3   :  { %v9600_v21 = vpop.f32.mrb[216].mxu1  ;;  %p12683_p5 = por %p12682_p4, %p12681_p3 }
 0xbb4   :  { %v18183_v20 = vadd.f32 %v9967_v40, %v9600_v21  ;;  %v9602_v32 = vpop.f32.mrb[217].mxu1 }
 0xbb5   :  { %v9603_v5 = vpop.f32.mrb[218].mxu1  ;;  %p12684_p6 = pnand %p12683_p5, %p12677_p2 }
 0xbb6   :  { %19098 = vst [vmem:[#allocation109_spill] sm:$0xff] %v18183_v20  ;;  %v18185_v0 = vadd.f32 %v9970_v61, %v9603_v5  ;;  %v9605_v3 = vpop.f32.mrb[219].mxu1  ;;  %v19103_v5 = vld [vmem:[#allocation93_spill] sm:$0xff] }
 0xbb7   :  { %v19104_v3 = vld [vmem:[#allocation95_spill] sm:$0xff] }
 0xbb8   :  { %19099 = vst [vmem:[#allocation41_spill] sm:$0xff] %v18185_v0  ;;  %10322 = vmatmul.mubr.bf16.gmra.mrb[68].mxu1 %v19100_v27  ;;  %v19105_v27 = vld [vmem:[#allocation75_spill] sm:$0xff]  ;;  %v19106_v0 = vld [vmem:[#allocation94_spill] sm:$0xff] }
 0xbb9   :  { %11290 = vmatprep.mubr.msk.bf16.mxu1 %vm7176_vm3, %v19101_v38 }
 0xbbb   :  { %v10115_v58 = vpop.f32.mrb[220].mxu1 }
 0xbbc   :  { %v10370_v35 = vadd.f32 %v10115_v58, %v19102_v10  ;;  %v10117_v40 = vpop.f32.mrb[221].mxu1 }
 0xbbd   :  { %v10118_v45 = vpop.f32.mrb[222].mxu1 }
 0xbbe   :  { %v10441_v62 = vadd.f32 %v18193_v16, %v10370_v35  ;;  %v10371_v61 = vadd.f32 %v10118_v45, %v19103_v5  ;;  %v10120_v21 = vpop.f32.mrb[223].mxu1  ;;  %v19107_v35 = vld [vmem:[#allocation73_spill] sm:$0xff]  ;;  %v19108_v5 = vld [vmem:[#allocation98_spill] sm:$0xff] }
 0xbc0   :  { %12475 = vtanh.f32 %v10441_v62  ;;  %v10442_v32 = vadd.f32 %v18193_v16, %v10371_v61  ;;  %10330 = vmatmul.mubr.bf16.gmra.mrb[72].mxu1 %v19104_v3 }
 0xbc1   :  { %11291 = vmatprep.mubr.msk.bf16.mxu1 %vm7176_vm3, %v19105_v27 }
 0xbc2   :  { %12477 = vtanh.f32 %v10442_v32  ;;  %v19109_v32 = vld [vmem:[#allocation96_spill] sm:$0xff] }
 0xbc3   :  { %v10123_v38 = vpop.f32.mrb[224].mxu1 }
 0xbc4   :  { %v10372_v20 = vadd.f32 %v10123_v38, %v19106_v0  ;;  %v10125_v58 = vpop.f32.mrb[225].mxu1 }
 0xbc5   :  { %v10126_v10 = vpop.f32.mrb[226].mxu1  ;;  %v19110_v58 = vld [vmem:[#allocation78_spill] sm:$0xff] }
 0xbc6   :  { %v10443_v40 = vadd.f32 %v18193_v16, %v10372_v20  ;;  %v10373_v54 = vadd.f32 %v10126_v10, %v19107_v35  ;;  %v10128_v45 = vpop.f32.mrb[227].mxu1  ;;  %v19111_v35 = vld [vmem:[#allocation106_spill] sm:$0xff] }
 0xbc8   :  { %12479 = vtanh.f32 %v10443_v40  ;;  %v10444_v62 = vadd.f32 %v18193_v16, %v10373_v54  ;;  %10338 = vmatmul.mubr.bf16.gmra.mrb[76].mxu1 %v19108_v5  ;;  %v9032_v5 = vld [vmem:[#allocation5 + $0x478] sm:$0xff] }
 0xbc9   :  { %11292 = vmatprep.mubr.msk.bf16.mxu1 %vm7176_vm3, %v17973_v4  ;;  %v19112_v4 = vld [vmem:[#allocation34_spill] sm:$0xff] }
 0xbca   :  { %v12476_v61 = vpop.eup %12475  ;;  %12481 = vtanh.f32 %v10444_v62  ;;  %v9030_v62 = vld [vmem:[#allocation5 + $0x468] sm:$0xff] }
 0xbcb   :  { %10569 = vst [vmem:[#allocation11] sm:$0xff] %v12476_v61  ;;  %v10131_v21 = vpop.f32.mrb[228].mxu1 }
 0xbcc   :  { %v12478_v0 = vpop.eup %12477  ;;  %v10374_v3 = vadd.f32 %v10131_v21, %v19109_v32  ;;  %v10133_v27 = vpop.f32.mrb[229].mxu1 }
 0xbcd   :  { %10570 = vst [vmem:[#allocation11 + $0x8] sm:$0xff] %v12478_v0  ;;  %v10134_v20 = vpop.f32.mrb[230].mxu1  ;;  %v19113_v0 = vld [vmem:[#allocation82_spill] sm:$0xff] }
 0xbce   :  { %v10445_v38 = vadd.f32 %v18193_v16, %v10374_v3  ;;  %v10375_v10 = vadd.f32 %v10134_v20, %v19110_v58  ;;  %v10136_v54 = vpop.f32.mrb[231].mxu1  ;;  %v9977_v20 = vpack.c.bf16 %v9032_v5, %v9030_v62  ;;  %v19114_v58 = vld [vmem:[#allocation101_spill] sm:$0xff]  ;;  %v12631_v5 = vld [vmem:[#allocation3] sm:$0xff] }
 0xbd0   :  { %12483 = vtanh.f32 %v10445_v38  ;;  %v10446_v40 = vadd.f32 %v18193_v16, %v10375_v10  ;;  %10346 = vmatmul.mubr.bf16.gmra.mrb[80].mxu1 %v19111_v35 }
 0xbd1   :  { %11293 = vmatprep.mubr.msk.bf16.mxu1 %vm7176_vm3, %v19112_v4 }
 0xbd2   :  { %v12480_v45 = vpop.eup %12479  ;;  %12485 = vtanh.f32 %v10446_v40 }
 0xbd3   :  { %10571 = vst [vmem:[#allocation11 + $0x10] sm:$0xff] %v12480_v45  ;;  %v10139_v61 = vpop.f32.mrb[232].mxu1 }
 0xbd4   :  { %v12482_v21 = vpop.eup %12481  ;;  %v10376_v32 = vadd.f32 %v10139_v61, %v19113_v0  ;;  %v10141_v3 = vpop.f32.mrb[233].mxu1  ;;  %v19115_v61 = vld [vmem:[#allocation22_spill] sm:$0xff]  ;;  %v9976_v0 = vpack.c.bf16 %v12631_v5, %v12631_v5 }
 0xbd5   :  { %10572 = vst [vmem:[#allocation11 + $0x18] sm:$0xff] %v12482_v21  ;;  %v10142_v27 = vpop.f32.mrb[234].mxu1 }
 0xbd6   :  { %v10447_v38 = vadd.f32 %v18193_v16, %v10376_v32  ;;  %v10377_v10 = vadd.f32 %v10142_v27, %v19114_v58  ;;  %v10144_v54 = vpop.f32.mrb[235].mxu1 }
 0xbd8   :  { %12487 = vtanh.f32 %v10447_v38  ;;  %v10448_v35 = vadd.f32 %v18193_v16, %v10377_v10  ;;  %10354 = vmatmul.mubr.bf16.gmra.mrb[84].mxu1 %v17997_v19 }
 0xbd9   :  { %11294 = vmatprep.mubr.msk.bf16.mxu1 %vm7176_vm3, %v9977_v20 }
 0xbda   :  { %v12484_v40 = vpop.eup %12483  ;;  %12489 = vtanh.f32 %v10448_v35 }
 0xbdb   :  { %10573 = vst [vmem:[#allocation11 + $0x20] sm:$0xff] %v12484_v40  ;;  %v10147_v4 = vpop.f32.mrb[236].mxu1 }
 0xbdc   :  { %v12486_v45 = vpop.eup %12485  ;;  %v10378_v21 = vadd.f32 %v10147_v4, %v19115_v61  ;;  %v10149_v62 = vpop.f32.mrb[237].mxu1 }
 0xbdd   :  { %10574 = vst [vmem:[#allocation11 + $0x28] sm:$0xff] %v12486_v45  ;;  %v10150_v32 = vpop.f32.mrb[238].mxu1 }
 0xbde   :  { %v10449_v3 = vadd.f32 %v18193_v16, %v10378_v21  ;;  %v10379_v27 = vadd.f32 %v10150_v32, %v17995_v15  ;;  %v10152_v38 = vpop.f32.mrb[239].mxu1 }
 0xbe0   :  { %12491 = vtanh.f32 %v10449_v3  ;;  %v10450_v19 = vadd.f32 %v18193_v16, %v10379_v27  ;;  %10362 = vmatmul.mubr.bf16.gmra.mrb[88].mxu1 %v9976_v0 }
 0xbe2   :  { %v12488_v20 = vpop.eup %12487  ;;  %12493 = vtanh.f32 %v10450_v19 }
 0xbe3   :  { %10575 = vst [vmem:[#allocation11 + $0x30] sm:$0xff] %v12488_v20  ;;  %v10155_v58 = vpop.f32.mrb[240].mxu1 }
 0xbe4   :  { %v12490_v10 = vpop.eup %12489  ;;  %v10380_v54 = vadd.f32 %v10155_v58, %v18002_v55  ;;  %v10157_v35 = vpop.f32.mrb[241].mxu1 }
 0xbe5   :  { %10576 = vst [vmem:[#allocation11 + $0x38] sm:$0xff] %v12490_v10  ;;  %v10158_v40 = vpop.f32.mrb[242].mxu1 }
 0xbe6   :  { %v10451_v4 = vadd.f32 %v18193_v16, %v10380_v54  ;;  %v10381_v45 = vadd.f32 %v10158_v40, %v18004_v7  ;;  %v10160_v15 = vpop.f32.mrb[243].mxu1 }
 0xbe8   :  { %12495 = vtanh.f32 %v10451_v4  ;;  %v10452_v61 = vadd.f32 %v18193_v16, %v10381_v45 }
 0xbea   :  { %v12492_v21 = vpop.eup %12491  ;;  %12497 = vtanh.f32 %v10452_v61 }
 0xbeb   :  { %10577 = vst [vmem:[#allocation11 + $0x40] sm:$0xff] %v12492_v21  ;;  %v10163_v62 = vpop.f32.mrb[244].mxu1 }
 0xbec   :  { %v12494_v5 = vpop.eup %12493  ;;  %v10382_v0 = vadd.f32 %v10163_v62, %v18009_v39  ;;  %v10165_v32 = vpop.f32.mrb[245].mxu1 }
 0xbed   :  { %10578 = vst [vmem:[#allocation11 + $0x48] sm:$0xff] %v12494_v5  ;;  %v10166_v55 = vpop.f32.mrb[246].mxu1 }
 0xbee   :  { %v10453_v3 = vadd.f32 %v18193_v16, %v10382_v0  ;;  %v10383_v27 = vadd.f32 %v10166_v55, %v18011_v26  ;;  %v10168_v38 = vpop.f32.mrb[247].mxu1 }
 0xbf0   :  { %12499 = vtanh.f32 %v10453_v3  ;;  %v10454_v7 = vadd.f32 %v18193_v16, %v10383_v27 }
 0xbf2   :  { %v12496_v19 = vpop.eup %12495  ;;  %12501 = vtanh.f32 %v10454_v7 }
 0xbf3   :  { %10579 = vst [vmem:[#allocation11 + $0x50] sm:$0xff] %v12496_v19  ;;  %v10171_v20 = vpop.f32.mrb[248].mxu1 }
 0xbf4   :  { %v12498_v58 = vpop.eup %12497  ;;  %v10384_v10 = vadd.f32 %v10171_v20, %v18016_v48  ;;  %v10173_v54 = vpop.f32.mrb[249].mxu1 }
 0xbf5   :  { %10580 = vst [vmem:[#allocation11 + $0x58] sm:$0xff] %v12498_v58  ;;  %v10174_v39 = vpop.f32.mrb[250].mxu1 }
 0xbf6   :  { %v10455_v35 = vadd.f32 %v18193_v16, %v10384_v10  ;;  %v10385_v40 = vadd.f32 %v10174_v39, %v18018_v46  ;;  %v10176_v4 = vpop.f32.mrb[251].mxu1 }
 0xbf8   :  { %12503 = vtanh.f32 %v10455_v35  ;;  %v10456_v26 = vadd.f32 %v18193_v16, %v10385_v40 }
 0xbfa   :  { %v12500_v45 = vpop.eup %12499  ;;  %12505 = vtanh.f32 %v10456_v26 }
 0xbfb   :  { %10581 = vst [vmem:[#allocation11 + $0x60] sm:$0xff] %v12500_v45  ;;  %v10179_v15 = vpop.f32.mrb[252].mxu1 }
 0xbfc   :  { %v12502_v61 = vpop.eup %12501  ;;  %v10386_v21 = vadd.f32 %v10179_v15, %v18023_v60  ;;  %v10181_v62 = vpop.f32.mrb[253].mxu1 }
 0xbfd   :  { %10582 = vst [vmem:[#allocation11 + $0x68] sm:$0xff] %v12502_v61  ;;  %v10182_v48 = vpop.f32.mrb[254].mxu1 }
 0xbfe   :  { %v10457_v5 = vadd.f32 %v18193_v16, %v10386_v21  ;;  %v10387_v0 = vadd.f32 %v10182_v48, %v18025_v52  ;;  %v10184_v32 = vpop.f32.mrb[255].mxu1 }
 0xc00   :  { %12507 = vtanh.f32 %v10457_v5  ;;  %v10458_v46 = vadd.f32 %v18193_v16, %v10387_v0 }
 0xc02   :  { %v12504_v55 = vpop.eup %12503  ;;  %12509 = vtanh.f32 %v10458_v46 }
 0xc03   :  { %10583 = vst [vmem:[#allocation11 + $0x70] sm:$0xff] %v12504_v55  ;;  %v10187_v3 = vpop.f32.mrb[0].mxu1 }
 0xc04   :  { %v12506_v27 = vpop.eup %12505  ;;  %v10388_v38 = vadd.f32 %v10187_v3, %v18030_v59  ;;  %v10189_v7 = vpop.f32.mrb[1].mxu1 }
 0xc05   :  { %10584 = vst [vmem:[#allocation11 + $0x78] sm:$0xff] %v12506_v27  ;;  %v10190_v60 = vpop.f32.mrb[2].mxu1 }
 0xc06   :  { %v10459_v19 = vadd.f32 %v18193_v16, %v10388_v38  ;;  %v10389_v20 = vadd.f32 %v10190_v60, %v18032_v31  ;;  %v10192_v58 = vpop.f32.mrb[3].mxu1 }
 0xc08   :  { %12511 = vtanh.f32 %v10459_v19  ;;  %v10460_v52 = vadd.f32 %v18193_v16, %v10389_v20 }
 0xc0a   :  { %v12508_v10 = vpop.eup %12507  ;;  %12513 = vtanh.f32 %v10460_v52 }
 0xc0b   :  { %10585 = vst [vmem:[#allocation11 + $0x80] sm:$0xff] %v12508_v10  ;;  %v10195_v54 = vpop.f32.mrb[4].mxu1 }
 0xc0c   :  { %v12510_v39 = vpop.eup %12509  ;;  %v10390_v35 = vadd.f32 %v10195_v54, %v18037_v53  ;;  %v10197_v40 = vpop.f32.mrb[5].mxu1 }
 0xc0d   :  { %10586 = vst [vmem:[#allocation11 + $0x88] sm:$0xff] %v12510_v39  ;;  %v10198_v59 = vpop.f32.mrb[6].mxu1 }
 0xc0e   :  { %v10461_v4 = vadd.f32 %v18193_v16, %v10390_v35  ;;  %v10391_v26 = vadd.f32 %v10198_v59, %v18039_v28  ;;  %v10200_v45 = vpop.f32.mrb[7].mxu1 }
 0xc10   :  { %12515 = vtanh.f32 %v10461_v4  ;;  %v10462_v31 = vadd.f32 %v18193_v16, %v10391_v26 }
 0xc12   :  { %v12512_v15 = vpop.eup %12511  ;;  %12517 = vtanh.f32 %v10462_v31 }
 0xc13   :  { %10587 = vst [vmem:[#allocation11 + $0x90] sm:$0xff] %v12512_v15  ;;  %v10203_v61 = vpop.f32.mrb[8].mxu1 }
 0xc14   :  { %v12514_v21 = vpop.eup %12513  ;;  %v10392_v62 = vadd.f32 %v10203_v61, %v18044_v43  ;;  %v10205_v48 = vpop.f32.mrb[9].mxu1 }
 0xc15   :  { %10588 = vst [vmem:[#allocation11 + $0x98] sm:$0xff] %v12514_v21  ;;  %v10206_v53 = vpop.f32.mrb[10].mxu1 }
 0xc16   :  { %v10463_v5 = vadd.f32 %v18193_v16, %v10392_v62  ;;  %v10393_v0 = vadd.f32 %v10206_v53, %v18046_v49  ;;  %v10208_v32 = vpop.f32.mrb[11].mxu1 }
 0xc18   :  { %12519 = vtanh.f32 %v10463_v5  ;;  %v10464_v28 = vadd.f32 %v18193_v16, %v10393_v0 }
 0xc1a   :  { %v12516_v46 = vpop.eup %12515  ;;  %12521 = vtanh.f32 %v10464_v28 }
 0xc1b   :  { %10589 = vst [vmem:[#allocation11 + $0xa0] sm:$0xff] %v12516_v46  ;;  %v10211_v55 = vpop.f32.mrb[12].mxu1 }
 0xc1c   :  { %v12518_v3 = vpop.eup %12517  ;;  %v10394_v27 = vadd.f32 %v10211_v55, %v18051_v33  ;;  %v10213_v38 = vpop.f32.mrb[13].mxu1 }
 0xc1d   :  { %10590 = vst [vmem:[#allocation11 + $0xa8] sm:$0xff] %v12518_v3  ;;  %v10214_v43 = vpop.f32.mrb[14].mxu1 }
 0xc1e   :  { %v10465_v7 = vadd.f32 %v18193_v16, %v10394_v27  ;;  %v10395_v60 = vadd.f32 %v10214_v43, %v18053_v57  ;;  %v10216_v19 = vpop.f32.mrb[15].mxu1 }
 0xc20   :  { %12523 = vtanh.f32 %v10465_v7  ;;  %v10466_v49 = vadd.f32 %v18193_v16, %v10395_v60 }
 0xc22   :  { %v12520_v20 = vpop.eup %12519  ;;  %12525 = vtanh.f32 %v10466_v49 }
 0xc23   :  { %10591 = vst [vmem:[#allocation11 + $0xb0] sm:$0xff] %v12520_v20  ;;  %v10219_v58 = vpop.f32.mrb[16].mxu1 }
 0xc24   :  { %v12522_v52 = vpop.eup %12521  ;;  %v10396_v10 = vadd.f32 %v10219_v58, %v18058_v41  ;;  %v10221_v54 = vpop.f32.mrb[17].mxu1 }
 0xc25   :  { %10592 = vst [vmem:[#allocation11 + $0xb8] sm:$0xff] %v12522_v52  ;;  %v10222_v33 = vpop.f32.mrb[18].mxu1 }
 0xc26   :  { %v10467_v39 = vadd.f32 %v18193_v16, %v10396_v10  ;;  %v10397_v35 = vadd.f32 %v10222_v33, %v18060_v9  ;;  %v10224_v40 = vpop.f32.mrb[19].mxu1 }
 0xc28   :  { %12527 = vtanh.f32 %v10467_v39  ;;  %v10468_v57 = vadd.f32 %v18193_v16, %v10397_v35 }
 0xc2a   :  { %v12524_v59 = vpop.eup %12523  ;;  %12529 = vtanh.f32 %v10468_v57 }
 0xc2b   :  { %10593 = vst [vmem:[#allocation11 + $0xc0] sm:$0xff] %v12524_v59  ;;  %v10227_v4 = vpop.f32.mrb[20].mxu1  ;;  %v19116_v59 = vld [vmem:[#allocation107_spill] sm:$0xff] }
 0xc2c   :  { %v12526_v26 = vpop.eup %12525  ;;  %v10398_v45 = vadd.f32 %v10227_v4, %v18065_v37  ;;  %v10229_v31 = vpop.f32.mrb[21].mxu1 }
 0xc2d   :  { %10594 = vst [vmem:[#allocation11 + $0xc8] sm:$0xff] %v12526_v26  ;;  %v10230_v41 = vpop.f32.mrb[22].mxu1  ;;  %v19117_v31 = vld [vmem:[#allocation33_spill] sm:$0xff] }
 0xc2e   :  { %v10469_v15 = vadd.f32 %v18193_v16, %v10398_v45  ;;  %v10399_v61 = vadd.f32 %v10230_v41, %v18067_v12  ;;  %v10232_v21 = vpop.f32.mrb[23].mxu1 }
 0xc30   :  { %12531 = vtanh.f32 %v10469_v15  ;;  %v10470_v9 = vadd.f32 %v18193_v16, %v10399_v61 }
 0xc32   :  { %v12528_v62 = vpop.eup %12527  ;;  %12533 = vtanh.f32 %v10470_v9 }
 0xc33   :  { %10595 = vst [vmem:[#allocation11 + $0xd0] sm:$0xff] %v12528_v62  ;;  %v10235_v48 = vpop.f32.mrb[24].mxu1  ;;  %v19118_v62 = vld [vmem:[#allocation108_spill] sm:$0xff] }
 0xc34   :  { %v12530_v53 = vpop.eup %12529  ;;  %v10400_v5 = vadd.f32 %v10235_v48, %v18072_v8  ;;  %v10237_v0 = vpop.f32.mrb[25].mxu1 }
 0xc35   :  { %10596 = vst [vmem:[#allocation11 + $0xd8] sm:$0xff] %v12530_v53  ;;  %v10238_v37 = vpop.f32.mrb[26].mxu1 }
 0xc36   :  { %v10471_v32 = vadd.f32 %v18193_v16, %v10400_v5  ;;  %v10401_v28 = vadd.f32 %v10238_v37, %v18074_v30  ;;  %v10240_v46 = vpop.f32.mrb[27].mxu1 }
 0xc38   :  { %12535 = vtanh.f32 %v10471_v32  ;;  %v10472_v12 = vadd.f32 %v18193_v16, %v10401_v28 }
 0xc3a   :  { %v12532_v55 = vpop.eup %12531  ;;  %12537 = vtanh.f32 %v10472_v12 }
 0xc3b   :  { %10597 = vst [vmem:[#allocation11 + $0xe0] sm:$0xff] %v12532_v55  ;;  %v10243_v3 = vpop.f32.mrb[28].mxu1 }
 0xc3c   :  { %v12534_v27 = vpop.eup %12533  ;;  %v10402_v38 = vadd.f32 %v10243_v3, %v18079_v23  ;;  %v10245_v43 = vpop.f32.mrb[29].mxu1 }
 0xc3d   :  { %10598 = vst [vmem:[#allocation11 + $0xe8] sm:$0xff] %v12534_v27  ;;  %v10246_v8 = vpop.f32.mrb[30].mxu1 }
 0xc3e   :  { %v10473_v7 = vadd.f32 %v18193_v16, %v10402_v38  ;;  %v10403_v60 = vadd.f32 %v10246_v8, %v18081_v17  ;;  %v10248_v19 = vpop.f32.mrb[31].mxu1 }
 0xc40   :  { %12539 = vtanh.f32 %v10473_v7  ;;  %v10474_v30 = vadd.f32 %v18193_v16, %v10403_v60 }
 0xc42   :  { %v12536_v49 = vpop.eup %12535  ;;  %12541 = vtanh.f32 %v10474_v30 }
 0xc43   :  { %10599 = vst [vmem:[#allocation11 + $0xf0] sm:$0xff] %v12536_v49  ;;  %v10251_v20 = vpop.f32.mrb[32].mxu1 }
 0xc44   :  { %v12538_v58 = vpop.eup %12537  ;;  %v10404_v52 = vadd.f32 %v10251_v20, %v18086_v50  ;;  %v10253_v10 = vpop.f32.mrb[33].mxu1 }
 0xc45   :  { %10600 = vst [vmem:[#allocation11 + $0xf8] sm:$0xff] %v12538_v58  ;;  %v10254_v23 = vpop.f32.mrb[34].mxu1 }
 0xc46   :  { %v10475_v54 = vadd.f32 %v18193_v16, %v10404_v52  ;;  %v10405_v33 = vadd.f32 %v10254_v23, %v18088_v13  ;;  %v10256_v39 = vpop.f32.mrb[35].mxu1 }
 0xc48   :  { %12543 = vtanh.f32 %v10475_v54  ;;  %v10476_v17 = vadd.f32 %v18193_v16, %v10405_v33 }
 0xc4a   :  { %v12540_v35 = vpop.eup %12539  ;;  %12545 = vtanh.f32 %v10476_v17 }
 0xc4b   :  { %10601 = vst [vmem:[#allocation11 + $0x100] sm:$0xff] %v12540_v35  ;;  %v10259_v40 = vpop.f32.mrb[36].mxu1 }
 0xc4c   :  { %v12542_v57 = vpop.eup %12541  ;;  %v10406_v4 = vadd.f32 %v10259_v40, %v19116_v59  ;;  %v10261_v26 = vpop.f32.mrb[37].mxu1 }
 0xc4d   :  { %10602 = vst [vmem:[#allocation11 + $0x108] sm:$0xff] %v12542_v57  ;;  %v10262_v50 = vpop.f32.mrb[38].mxu1 }
 0xc4e   :  { %v10477_v45 = vadd.f32 %v18193_v16, %v10406_v4  ;;  %v10407_v41 = vadd.f32 %v10262_v50, %v19117_v31  ;;  %v10264_v15 = vpop.f32.mrb[39].mxu1 }
 0xc50   :  { %12547 = vtanh.f32 %v10477_v45  ;;  %v10478_v13 = vadd.f32 %v18193_v16, %v10407_v41 }
 0xc52   :  { %v12544_v61 = vpop.eup %12543  ;;  %12549 = vtanh.f32 %v10478_v13 }
 0xc53   :  { %10603 = vst [vmem:[#allocation11 + $0x110] sm:$0xff] %v12544_v61  ;;  %v10267_v21 = vpop.f32.mrb[40].mxu1 }
 0xc54   :  { %v12546_v9 = vpop.eup %12545  ;;  %v10408_v48 = vadd.f32 %v10267_v21, %v19118_v62  ;;  %v10269_v53 = vpop.f32.mrb[41].mxu1 }
 0xc55   :  { %10604 = vst [vmem:[#allocation11 + $0x118] sm:$0xff] %v12546_v9  ;;  %v10270_v5 = vpop.f32.mrb[42].mxu1 }
 0xc56   :  { %v10479_v0 = vadd.f32 %v18193_v16, %v10408_v48  ;;  %v10409_v37 = vadd.f32 %v10270_v5, %v18102_v29  ;;  %v10272_v32 = vpop.f32.mrb[43].mxu1 }
 0xc58   :  { %12551 = vtanh.f32 %v10479_v0  ;;  %v10480_v28 = vadd.f32 %v18193_v16, %v10409_v37 }
 0xc5a   :  { %v12548_v46 = vpop.eup %12547  ;;  %12553 = vtanh.f32 %v10480_v28 }
 0xc5b   :  { %10605 = vst [vmem:[#allocation11 + $0x120] sm:$0xff] %v12548_v46  ;;  %v10275_v12 = vpop.f32.mrb[44].mxu1 }
 0xc5c   :  { %v12550_v55 = vpop.eup %12549  ;;  %v10410_v3 = vadd.f32 %v10275_v12, %v18106_v36  ;;  %v10277_v27 = vpop.f32.mrb[45].mxu1 }
 0xc5d   :  { %10606 = vst [vmem:[#allocation11 + $0x128] sm:$0xff] %v12550_v55  ;;  %v10278_v38 = vpop.f32.mrb[46].mxu1 }
 0xc5e   :  { %v10481_v43 = vadd.f32 %v18193_v16, %v10410_v3  ;;  %v10411_v8 = vadd.f32 %v10278_v38, %v18108_v25  ;;  %v10280_v7 = vpop.f32.mrb[47].mxu1 }
 0xc60   :  { %12555 = vtanh.f32 %v10481_v43  ;;  %v10482_v29 = vadd.f32 %v18193_v16, %v10411_v8 }
 0xc62   :  { %v12552_v60 = vpop.eup %12551  ;;  %12557 = vtanh.f32 %v10482_v29 }
 0xc63   :  { %10607 = vst [vmem:[#allocation11 + $0x130] sm:$0xff] %v12552_v60  ;;  %v10283_v19 = vpop.f32.mrb[48].mxu1 }
 0xc64   :  { %v12554_v30 = vpop.eup %12553  ;;  %v10412_v49 = vadd.f32 %v10283_v19, %v18113_v2  ;;  %v10285_v20 = vpop.f32.mrb[49].mxu1 }
 0xc65   :  { %10608 = vst [vmem:[#allocation11 + $0x138] sm:$0xff] %v12554_v30  ;;  %v10286_v36 = vpop.f32.mrb[50].mxu1 }
 0xc66   :  { %v10483_v58 = vadd.f32 %v18193_v16, %v10412_v49  ;;  %v10413_v52 = vadd.f32 %v10286_v36, %v18115_v44  ;;  %v10288_v10 = vpop.f32.mrb[51].mxu1 }
 0xc68   :  { %12559 = vtanh.f32 %v10483_v58  ;;  %v10484_v25 = vadd.f32 %v18193_v16, %v10413_v52 }
 0xc6a   :  { %v12556_v23 = vpop.eup %12555  ;;  %12561 = vtanh.f32 %v10484_v25 }
 0xc6b   :  { %10609 = vst [vmem:[#allocation11 + $0x140] sm:$0xff] %v12556_v23  ;;  %v10291_v54 = vpop.f32.mrb[52].mxu1 }
 0xc6c   :  { %v12558_v33 = vpop.eup %12557  ;;  %v10414_v39 = vadd.f32 %v10291_v54, %v18120_v6  ;;  %v10293_v17 = vpop.f32.mrb[53].mxu1 }
 0xc6d   :  { %10610 = vst [vmem:[#allocation11 + $0x148] sm:$0xff] %v12558_v33  ;;  %v10294_v2 = vpop.f32.mrb[54].mxu1 }
 0xc6e   :  { %v10485_v35 = vadd.f32 %v18193_v16, %v10414_v39  ;;  %v10415_v40 = vadd.f32 %v10294_v2, %v18122_v56  ;;  %v10296_v57 = vpop.f32.mrb[55].mxu1  ;;  %v19119_v39 = vld [vmem:[#allocation36_spill] sm:$0xff] }
 0xc70   :  { %12563 = vtanh.f32 %v10485_v35  ;;  %v10486_v44 = vadd.f32 %v18193_v16, %v10415_v40  ;;  %v19120_v40 = vld [vmem:[#allocation39_spill] sm:$0xff] }
 0xc72   :  { %v12560_v59 = vpop.eup %12559  ;;  %12565 = vtanh.f32 %v10486_v44 }
 0xc73   :  { %10611 = vst [vmem:[#allocation11 + $0x150] sm:$0xff] %v12560_v59  ;;  %v10299_v4 = vpop.f32.mrb[56].mxu1 }
 0xc74   :  { %v12562_v26 = vpop.eup %12561  ;;  %v10416_v50 = vadd.f32 %v10299_v4, %v18127_v42  ;;  %v10301_v45 = vpop.f32.mrb[57].mxu1 }
 0xc75   :  { %10612 = vst [vmem:[#allocation11 + $0x158] sm:$0xff] %v12562_v26  ;;  %v10302_v6 = vpop.f32.mrb[58].mxu1 }
 0xc76   :  { %v10487_v31 = vadd.f32 %v18193_v16, %v10416_v50  ;;  %v10417_v41 = vadd.f32 %v10302_v6, %v18129_v34  ;;  %v10304_v15 = vpop.f32.mrb[59].mxu1  ;;  %v19121_v50 = vld [vmem:[#allocation21_spill] sm:$0xff] }
 0xc77   :  { %v19122_v15 = vld [vmem:[#allocation38_spill] sm:$0xff] }
 0xc78   :  { %12567 = vtanh.f32 %v10487_v31  ;;  %v10488_v56 = vadd.f32 %v18193_v16, %v10417_v41 }
 0xc7a   :  { %v12564_v13 = vpop.eup %12563  ;;  %12569 = vtanh.f32 %v10488_v56 }
 0xc7b   :  { %10613 = vst [vmem:[#allocation11 + $0x160] sm:$0xff] %v12564_v13  ;;  %v10307_v61 = vpop.f32.mrb[60].mxu1 }
 0xc7c   :  { %v12566_v21 = vpop.eup %12565  ;;  %v10418_v9 = vadd.f32 %v10307_v61, %v18134_v11  ;;  %v10309_v62 = vpop.f32.mrb[61].mxu1 }
 0xc7d   :  { %10614 = vst [vmem:[#allocation11 + $0x168] sm:$0xff] %v12566_v21  ;;  %v10310_v42 = vpop.f32.mrb[62].mxu1 }
 0xc7e   :  { %v10489_v48 = vadd.f32 %v18193_v16, %v10418_v9  ;;  %v10419_v53 = vadd.f32 %v10310_v42, %v18136_v1  ;;  %v10312_v5 = vpop.f32.mrb[63].mxu1 }
 0xc80   :  { %12571 = vtanh.f32 %v10489_v48  ;;  %v10490_v34 = vadd.f32 %v18193_v16, %v10419_v53 }
 0xc82   :  { %v12568_v0 = vpop.eup %12567  ;;  %12573 = vtanh.f32 %v10490_v34  ;;  %v19123_v34 = vld [vmem:[#allocation110_spill] sm:$0xff] }
 0xc83   :  { %10615 = vst [vmem:[#allocation11 + $0x170] sm:$0xff] %v12568_v0  ;;  %v10315_v37 = vpop.f32.mrb[64].mxu1 }
 0xc84   :  { %v12570_v32 = vpop.eup %12569  ;;  %v10420_v28 = vadd.f32 %v10315_v37, %v18141_v63  ;;  %v10317_v46 = vpop.f32.mrb[65].mxu1 }
 0xc85   :  { %10616 = vst [vmem:[#allocation11 + $0x178] sm:$0xff] %v12570_v32  ;;  %v10318_v11 = vpop.f32.mrb[66].mxu1 }
 0xc86   :  { %v10491_v12 = vadd.f32 %v18193_v16, %v10420_v28  ;;  %v10421_v55 = vadd.f32 %v10318_v11, %v18143_v22  ;;  %v10320_v3 = vpop.f32.mrb[67].mxu1 }
 0xc88   :  { %12575 = vtanh.f32 %v10491_v12  ;;  %v10492_v1 = vadd.f32 %v18193_v16, %v10421_v55  ;;  %v19124_v12 = vld [vmem:[#allocation109_spill] sm:$0xff] }
 0xc8a   :  { %v12572_v27 = vpop.eup %12571  ;;  %12577 = vtanh.f32 %v10492_v1 }
 0xc8b   :  { %10617 = vst [vmem:[#allocation11 + $0x180] sm:$0xff] %v12572_v27  ;;  %v10323_v38 = vpop.f32.mrb[68].mxu1  ;;  %v19125_v27 = vld [vmem:[#allocation41_spill] sm:$0xff] }
 0xc8c   :  { %v12574_v43 = vpop.eup %12573  ;;  %v10422_v8 = vadd.f32 %v10323_v38, %v18148_v51  ;;  %v10325_v7 = vpop.f32.mrb[69].mxu1 }
 0xc8d   :  { %10618 = vst [vmem:[#allocation11 + $0x188] sm:$0xff] %v12574_v43  ;;  %v10326_v63 = vpop.f32.mrb[70].mxu1 }
 0xc8e   :  { %v10493_v29 = vadd.f32 %v18193_v16, %v10422_v8  ;;  %v10423_v60 = vadd.f32 %v10326_v63, %v18150_v18  ;;  %v10328_v19 = vpop.f32.mrb[71].mxu1 }
 0xc90   :  { %12579 = vtanh.f32 %v10493_v29  ;;  %v10494_v22 = vadd.f32 %v18193_v16, %v10423_v60 }
 0xc92   :  { %v12576_v30 = vpop.eup %12575  ;;  %12581 = vtanh.f32 %v10494_v22 }
 0xc93   :  { %10619 = vst [vmem:[#allocation11 + $0x190] sm:$0xff] %v12576_v30  ;;  %v10331_v49 = vpop.f32.mrb[72].mxu1 }
 0xc94   :  { %v12578_v20 = vpop.eup %12577  ;;  %v10424_v36 = vadd.f32 %v10331_v49, %v18155_v24  ;;  %v10333_v58 = vpop.f32.mrb[73].mxu1 }
 0xc95   :  { %10620 = vst [vmem:[#allocation11 + $0x198] sm:$0xff] %v12578_v20  ;;  %v10334_v51 = vpop.f32.mrb[74].mxu1 }
 0xc96   :  { %v10495_v52 = vadd.f32 %v18193_v16, %v10424_v36  ;;  %v10425_v10 = vadd.f32 %v10334_v51, %v18157_v14  ;;  %v10336_v25 = vpop.f32.mrb[75].mxu1 }
 0xc98   :  { %12583 = vtanh.f32 %v10495_v52  ;;  %v10496_v18 = vadd.f32 %v18193_v16, %v10425_v10 }
 0xc9a   :  { %v12580_v23 = vpop.eup %12579  ;;  %12585 = vtanh.f32 %v10496_v18 }
 0xc9b   :  { %10621 = vst [vmem:[#allocation11 + $0x1a0] sm:$0xff] %v12580_v23  ;;  %v10339_v54 = vpop.f32.mrb[76].mxu1 }
 0xc9c   :  { %v12582_v33 = vpop.eup %12581  ;;  %v10426_v17 = vadd.f32 %v10339_v54, %v19119_v39  ;;  %v10341_v2 = vpop.f32.mrb[77].mxu1 }
 0xc9d   :  { %10622 = vst [vmem:[#allocation11 + $0x1a8] sm:$0xff] %v12582_v33  ;;  %v10342_v24 = vpop.f32.mrb[78].mxu1 }
 0xc9e   :  { %v10497_v35 = vadd.f32 %v18193_v16, %v10426_v17  ;;  %v10427_v57 = vadd.f32 %v10342_v24, %v19120_v40  ;;  %v10344_v44 = vpop.f32.mrb[79].mxu1 }
 0xca0   :  { %12587 = vtanh.f32 %v10497_v35  ;;  %v10498_v14 = vadd.f32 %v18193_v16, %v10427_v57 }
 0xca2   :  { %v12584_v59 = vpop.eup %12583  ;;  %12589 = vtanh.f32 %v10498_v14 }
 0xca3   :  { %10623 = vst [vmem:[#allocation11 + $0x1b0] sm:$0xff] %v12584_v59  ;;  %v10347_v4 = vpop.f32.mrb[80].mxu1 }
 0xca4   :  { %v12586_v26 = vpop.eup %12585  ;;  %v10428_v45 = vadd.f32 %v10347_v4, %v19121_v50  ;;  %v10349_v6 = vpop.f32.mrb[81].mxu1 }
 0xca5   :  { %10624 = vst [vmem:[#allocation11 + $0x1b8] sm:$0xff] %v12586_v26  ;;  %v10350_v31 = vpop.f32.mrb[82].mxu1 }
 0xca6   :  { %v10499_v41 = vadd.f32 %v18193_v16, %v10428_v45  ;;  %v10429_v56 = vadd.f32 %v10350_v31, %v19122_v15  ;;  %v10352_v13 = vpop.f32.mrb[83].mxu1 }
 0xca8   :  { %12591 = vtanh.f32 %v10499_v41  ;;  %v10500_v61 = vadd.f32 %v18193_v16, %v10429_v56 }
 0xcaa   :  { %v12588_v21 = vpop.eup %12587  ;;  %12593 = vtanh.f32 %v10500_v61 }
 0xcab   :  { %10625 = vst [vmem:[#allocation11 + $0x1c0] sm:$0xff] %v12588_v21  ;;  %v10355_v9 = vpop.f32.mrb[84].mxu1 }
 0xcac   :  { %v12590_v62 = vpop.eup %12589  ;;  %v10430_v42 = vadd.f32 %v10355_v9, %v18176_v47  ;;  %v10357_v48 = vpop.f32.mrb[85].mxu1 }
 0xcad   :  { %10626 = vst [vmem:[#allocation11 + $0x1c8] sm:$0xff] %v12590_v62  ;;  %v10358_v53 = vpop.f32.mrb[86].mxu1 }
 0xcae   :  { %v10501_v5 = vadd.f32 %v18193_v16, %v10430_v42  ;;  %v10431_v0 = vadd.f32 %v10358_v53, %v19123_v34  ;;  %v10360_v37 = vpop.f32.mrb[87].mxu1 }
 0xcb0   :  { %12595 = vtanh.f32 %v10501_v5  ;;  %v10502_v32 = vadd.f32 %v18193_v16, %v10431_v0 }
 0xcb2   :  { %v12592_v28 = vpop.eup %12591  ;;  %12597 = vtanh.f32 %v10502_v32 }
 0xcb3   :  { %10627 = vst [vmem:[#allocation11 + $0x1d0] sm:$0xff] %v12592_v28  ;;  %v10363_v46 = vpop.f32.mrb[88].mxu1 }
 0xcb4   :  { %v12594_v11 = vpop.eup %12593  ;;  %v10432_v55 = vadd.f32 %v10363_v46, %v19124_v12  ;;  %v10365_v3 = vpop.f32.mrb[89].mxu1 }
 0xcb5   :  { %10628 = vst [vmem:[#allocation11 + $0x1d8] sm:$0xff] %v12594_v11  ;;  %v10366_v47 = vpop.f32.mrb[90].mxu1 }
 0xcb6   :  { %v10503_v1 = vadd.f32 %v18193_v16, %v10432_v55  ;;  %v10433_v38 = vadd.f32 %v10366_v47, %v19125_v27  ;;  %v10368_v43 = vpop.f32.mrb[91].mxu1 }
 0xcb8   :  { %12599 = vtanh.f32 %v10503_v1  ;;  %v10504_v8 = vadd.f32 %v18193_v16, %v10433_v38 }
 0xcba   :  { %v12596_v7 = vpop.eup %12595  ;;  %12601 = vtanh.f32 %v10504_v8 }
 0xcbb   :  { %10629 = vst [vmem:[#allocation11 + $0x1e0] sm:$0xff] %v12596_v7 }
 0xcbc   :  { %v12598_v63 = vpop.eup %12597 }
 0xcbd   :  { %10630 = vst [vmem:[#allocation11 + $0x1e8] sm:$0xff] %v12598_v63 }
 0xcc2   :  { %v12600_v29 = vpop.eup %12599 }
 0xcc3   :  { %10631 = vst [vmem:[#allocation11 + $0x1f0] sm:$0xff] %v12600_v29 }
 0xcc4   :  { %v12602_v60 = vpop.eup %12601 }
 0xcc5   :  { %10632 = vst [vmem:[#allocation11 + $0x1f8] sm:$0xff] %v12602_v60 }
 0xcc6   :  { %12687 = shalt.err (!%p12684_p6)
}
 0xcc7   :  { %s19126_s13 = sld [smem:[#allocation125_spill]] }
 0xccd   :  { %s12688_s17 = scalar_lea.hbm %s19126_s13, 8192 }
 0xcce   :  { %p12689_p7 = scmp.ne.s32.totalorder %s19126_s13, %s12688_s17  ;;  %p12692_p8 = scmp.lt.u32.totalorder %s12688_s17, %s19126_s13 }
 0xcd0   :  { %p12694_p9 = pnand %p12692_p8, %p12689_p7 }
 0xcd2   :  { %12697 = shalt.err (!%p12694_p9)
}
 0xcd3   :  { %s12713_s24 = smov 128   ;;  %s12714_s26 = smov 8  }
 0xcd4   :  { %10644 = dma.vmem_to_hbm [thread:$0]  %s10639_s12, 8192, %s19126_s13, [#allocation8], %s12713_s24, %s12713_s24, %s12714_s26  }
 0xcd5   :  { %12702 = dma.done.wait [#allocation8], 8192  }
 0xcd6   :  { %12703 = vsyncadd [#allocation8], 4294959104 }
 0xcd7   :  { %10648 = vsyncpa [#allocation7], 1 }
 0xcd8   :  { %10649 = vsyncpa [#allocation10], 1 }
 0xcd9   :  { %10650 = vsyncpa [#allocation8], 1 }

</bundles_post_ra>
